<compile_context>
chip_gen: v5e
topology: v5e:2x2
jax: 0.10.0
libtpu: 0.0.40
codegen_flags: <defaults>
</compile_context>

<pallas_src>
import functools

import jax
import jax.numpy as jnp
import numpy as np
from jax.experimental import pallas as pl
from jax.experimental.pallas import tpu as pltpu


# ------------------------------ fused kernel -------------------------------- #

def _cnn_fused_kernel(p1_ref, w1_ref, b1_ref, w2_ref, b2_ref, w1e_ref,
                      fc1b_ref, fc2w_ref, fc2b_ref, fc3w_ref, fc3b_ref,
                      out_ref, p2s_ref, *, tb):
    w1 = w1_ref[...]          # (8, 75)   bf16  (rows 6,7 zero)
    b1 = b1_ref[...]          # (8, 1)    f32   (rows 6,7 zero)
    w2 = w2_ref[...]          # (16, 200) f32
    b2 = b2_ref[...]          # (16, 1)   f32

    # --- conv1 -> pool1 -> conv2 -> pool2, one sample at a time (unrolled) ---
    for b in range(tb):
        # conv1 + bias + ReLU: (8,75)@(75,1024) -> (8,1024), lane-dense.
        c1 = jnp.dot(w1, p1_ref[b], preferred_element_type=jnp.float32)
        c1 = jnp.maximum(c1 + b1, 0.0)
        # pool1: the four 256-lane blocks are the four 2x2-window positions.
        pooled1 = jnp.maximum(jnp.maximum(c1[:, 0:256], c1[:, 256:512]),
                              jnp.maximum(c1[:, 512:768], c1[:, 768:1024]))
        # conv2 as ONE GEMM: stack the 25 shifted-lane taps (tap (kh,kw) =
        # pooled1[:, 14*kh+kw : 14*kh+kw+192]) along the contraction axis.
        taps = jnp.concatenate(
            [pooled1[:, 14 * kh + kw:14 * kh + kw + 192]
             for kh in range(5) for kw in range(5)], axis=0)          # (200,192)
        c2 = jnp.dot(w2, taps, preferred_element_type=jnp.float32)    # (16,192)
        c2 = jnp.maximum(c2 + b2, 0.0)
        # pool2: max over lane offsets {0,1,14,15}; valid lanes are 28*h3+2*w3.
        p2s_ref[b] = jnp.maximum(jnp.maximum(c2[:, 0:128], c2[:, 1:129]),
                                 jnp.maximum(c2[:, 14:142], c2[:, 15:143]))

    # --- FC head, batched over the TB samples of this grid step -------------
    # (tb,16,128) scratch acts as a transpose buffer: contiguous per-sample
    # stores above, per-channel strided reads here, lane-concat to (tb,2048).
    acts = jnp.concatenate([p2s_ref[:, c, :] for c in range(16)], axis=1)
    h = jnp.maximum(
        jnp.dot(acts, w1e_ref[...], preferred_element_type=jnp.float32)
        + fc1b_ref[...], 0.0)                                         # (tb,128)
    h = jnp.maximum(
        jnp.dot(h, fc2w_ref[...], preferred_element_type=jnp.float32)
        + fc2b_ref[...], 0.0)                                         # (tb,128)
    out_ref[...] = (jnp.dot(h, fc3w_ref[...], preferred_element_type=jnp.float32)
                    + fc3b_ref[...])                                  # (tb,128)


# ------------------------------ host-side glue ------------------------------ #

def _conv1_patches(x):
    """im2col for conv1, lane-dense and pool1-friendly, from strided slices.

    Returns (N, 75, 1024) bf16 with
      row    = ci*25 + kh*5 + kw
      column = (2*dh + dw)*256 + (ho*14 + wo)      (columns 196..255 zero-pad)
      value  = x[n, ci, 2*ho + dh + kh, 2*wo + dw + kw]
    so pool1 inside the kernel is an elementwise max of four 256-lane blocks.
    """
    n = x.shape[0]
    blocks = []
    for dh in range(2):
        for dw in range(2):
            pieces = []
            for kh in range(5):
                for kw in range(5):
                    sl = jax.lax.slice(
                        x,
                        (0, 0, dh + kh, dw + kw),
                        (n, 3, dh + kh + 27, dw + kw + 27),
                        (1, 1, 2, 2))                        # (N,3,14,14)
                    pieces.append(sl.reshape(n, 3, 1, 196))
            blk = jnp.concatenate(pieces, axis=2).reshape(n, 75, 196)
            blk = jnp.pad(blk, ((0, 0), (0, 0), (0, 60)))    # (N,75,256)
            blocks.append(blk)
    return jnp.concatenate(blocks, axis=2).astype(jnp.bfloat16)   # (N,75,1024)


def _pad2(a, rows, cols):
    return jnp.pad(a, ((0, rows - a.shape[0]), (0, cols - a.shape[1])))


def _prepare_weights(params):
    f32 = jnp.float32
    # conv1: (6,3,5,5) -> (8,75) row-padded; bf16 to match the patch stream.
    w1 = jnp.pad(params["conv1_w"].astype(f32).reshape(6, 75),
                 ((0, 2), (0, 0))).astype(jnp.bfloat16)
    b1 = jnp.pad(params["conv1_b"].astype(f32), (0, 2)).reshape(8, 1)
    # conv2: (16,6,5,5) -> (16,200), column 8*(kh*5+kw)+ci (ci=6,7 zero),
    # matching the (200,192) stacked-tap layout built in the kernel.
    w2 = jnp.transpose(params["conv2_w"].astype(f32), (0, 2, 3, 1))
    w2 = jnp.pad(w2, ((0, 0), (0, 0), (0, 0), (0, 2))).reshape(16, 200)
    b2 = params["conv2_b"].astype(f32).reshape(16, 1)
    # fc1 with the pool2 lane selection and the (C,5,5) flatten folded in:
    # w1e[c*128 + (28*h3+2*w3), f] = fc1_w[c*25 + 5*h3 + w3, f]; zero elsewhere.
    sel = np.zeros((128, 25), np.float32)
    for h3 in range(5):
        for w3 in range(5):
            sel[28 * h3 + 2 * w3, 5 * h3 + w3] = 1.0
    fc1w3 = params["fc1_w"].astype(f32).reshape(16, 25, 120)
    w1e = jnp.einsum("lp,cpf->clf", jnp.asarray(sel), fc1w3)      # (16,128,120)
    w1e = jnp.pad(w1e, ((0, 0), (0, 0), (0, 8))).reshape(2048, 128)
    fc1b = jnp.pad(params["fc1_b"].astype(f32), (0, 8)).reshape(1, 128)
    fc2w = _pad2(params["fc2_w"].astype(f32), 128, 128)
    fc2b = jnp.pad(params["fc2_b"].astype(f32), (0, 44)).reshape(1, 128)
    fc3w = _pad2(params["fc3_w"].astype(f32), 128, 128)
    fc3b = jnp.pad(params["fc3_b"].astype(f32), (0, 118)).reshape(1, 128)
    return w1, b1, w2, b2, w1e, fc1b, fc2w, fc2b, fc3w, fc3b


def cnn_forward(params, x_nchw, block_batch=8):
    n = x_nchw.shape[0]
    tb = min(block_batch, n)                # TB=8 fits v5e's 16MiB scoped VMEM
    n_pad = pl.cdiv(n, tb) * tb

    p1 = _conv1_patches(x_nchw.astype(jnp.float32))       # (N,75,1024) bf16
    if n_pad != n:
        p1 = jnp.pad(p1, ((0, n_pad - n), (0, 0), (0, 0)))
    (w1, b1, w2, b2, w1e, fc1b, fc2w, fc2b, fc3w, fc3b) = _prepare_weights(params)

    rep2 = lambda i: (0, 0)
    out = pl.pallas_call(
        functools.partial(_cnn_fused_kernel, tb=tb),
        out_shape=jax.ShapeDtypeStruct((n_pad, 128), jnp.float32),
        grid=(n_pad // tb,),
        in_specs=[
            pl.BlockSpec((tb, 75, 1024), lambda i: (i, 0, 0)),  # patches (tile)
            pl.BlockSpec((8, 75), rep2),        # conv1 weights (bf16)
            pl.BlockSpec((8, 1), rep2),         # conv1 bias
            pl.BlockSpec((16, 200), rep2),      # conv2 weights (tap-stacked)
            pl.BlockSpec((16, 1), rep2),        # conv2 bias
            pl.BlockSpec((2048, 128), rep2),    # fc1 weights (selection folded)
            pl.BlockSpec((1, 128), rep2),       # fc1 bias
            pl.BlockSpec((128, 128), rep2),     # fc2 weights
            pl.BlockSpec((1, 128), rep2),       # fc2 bias
            pl.BlockSpec((128, 128), rep2),     # fc3 weights
            pl.BlockSpec((1, 128), rep2),       # fc3 bias
        ],
        out_specs=pl.BlockSpec((tb, 128), lambda i: (i, 0)),
        scratch_shapes=[pltpu.VMEM((tb, 16, 128), jnp.float32)],
        compiler_params=pltpu.CompilerParams(
            dimension_semantics=("parallel",)),
    )(p1, w1, b1, w2, b2, w1e, fc1b, fc2w, fc2b, fc3w, fc3b)
    return out[:n, :10]


# ------------------------------ params / reference -------------------------- #

def init_params(key):
    ks = jax.random.split(key, 10)

    def u(k, shape, fan_in):
        bound = 1.0 / jnp.sqrt(jnp.float32(fan_in))
        return jax.random.uniform(k, shape, jnp.float32, -bound, bound)

    return {
        "conv1_w": u(ks[0], (6, 3, 5, 5), 3 * 25),
        "conv1_b": u(ks[1], (6,), 3 * 25),
        "conv2_w": u(ks[2], (16, 6, 5, 5), 6 * 25),
        "conv2_b": u(ks[3], (16,), 6 * 25),
        "fc1_w": u(ks[4], (400, 120), 400),
        "fc1_b": u(ks[5], (120,), 400),
        "fc2_w": u(ks[6], (120, 84), 120),
        "fc2_b": u(ks[7], (84,), 120),
        "fc3_w": u(ks[8], (84, 10), 84),
        "fc3_b": u(ks[9], (10,), 84),
    }


def cnn_reference(params, x):
    """Plain-JAX reference mirroring the PyTorch forward exactly (all f32)."""
    def conv(x, w, b):
        y = jax.lax.conv_general_dilated(
            x, w, window_strides=(1, 1), padding="VALID",
            dimension_numbers=("NCHW", "OIHW", "NCHW"))
        return jax.nn.relu(y + b[None, :, None, None])

    def pool(x):
        return jax.lax.reduce_window(x, -jnp.inf, jax.lax.max,
                                     (1, 1, 2, 2), (1, 1, 2, 2), "VALID")

    x = pool(conv(x, params["conv1_w"], params["conv1_b"]))
    x = pool(conv(x, params["conv2_w"], params["conv2_b"]))
    x = x.reshape(x.shape[0], -1)
    x = jax.nn.relu(x @ params["fc1_w"] + params["fc1_b"])
    x = jax.nn.relu(x @ params["fc2_w"] + params["fc2_b"])
    return x @ params["fc3_w"] + params["fc3_b"]


if __name__ == "__main__":
    key = jax.random.PRNGKey(0)
    k_params, k_x = jax.random.split(key)
    params = init_params(k_params)
    # CIFAR-shaped input (32x32 is required by the 16*5*5 flatten); batch=10
    # exercises both the TB=8 batch tile and the padded remainder tile.
    x = jax.random.normal(k_x, (10, 3, 32, 32), dtype=jnp.float32)

    out = jax.block_until_ready(jax.jit(cnn_forward)(params, x))
    assert out.shape == (10, 10), out.shape

    ref = jax.block_until_ready(cnn_reference(params, x))
    # Accuracy is bounded by the bf16 conv1-input stream (~1e-3 observed);
    # indexing/layout regressions produce O(1) errors, so this still catches them.
    assert jnp.allclose(out, ref, rtol=1e-2, atol=1e-2), (
        float(jnp.max(jnp.abs(out - ref))))

    print("KERNEL_OK")
</pallas_src>

<mosaic_0001>
module attributes {stable_mosaic.version = 11 : i64} {
  func.func @_cnn_fused_kernel(%arg0: i32, %arg1: memref<8x75x1024xbf16, #tpu.memory_space<vmem>>, %arg2: memref<8x75xbf16, #tpu.memory_space<vmem>>, %arg3: memref<8x1xf32, #tpu.memory_space<vmem>>, %arg4: memref<16x200xf32, #tpu.memory_space<vmem>>, %arg5: memref<16x1xf32, #tpu.memory_space<vmem>>, %arg6: memref<2048x128xf32, #tpu.memory_space<vmem>>, %arg7: memref<1x128xf32, #tpu.memory_space<vmem>>, %arg8: memref<128x128xf32, #tpu.memory_space<vmem>>, %arg9: memref<1x128xf32, #tpu.memory_space<vmem>>, %arg10: memref<128x128xf32, #tpu.memory_space<vmem>>, %arg11: memref<1x128xf32, #tpu.memory_space<vmem>>, %arg12: memref<8x128xf32, #tpu.memory_space<vmem>>, %arg13: memref<8x16x128xf32, #tpu.memory_space<vmem>>) attributes {dimension_semantics = [#tpu.dimension_semantics<parallel>], iteration_bounds = array<i64: 2>, scalar_prefetch = 0 : i64, scratch_operands = 1 : i64, tpu.core_type = #tpu.core_type<tc>, window_params = [{transform_indices = @transform_0, window_bounds = array<i64: 8, 75, 1024>}, {pipeline_mode = #tpu.pipeline_mode<synchronous>, transform_indices = @transform_1, window_bounds = array<i64: 8, 75>}, {pipeline_mode = #tpu.pipeline_mode<synchronous>, transform_indices = @transform_2, window_bounds = array<i64: 8, 1>}, {pipeline_mode = #tpu.pipeline_mode<synchronous>, transform_indices = @transform_3, window_bounds = array<i64: 16, 200>}, {pipeline_mode = #tpu.pipeline_mode<synchronous>, transform_indices = @transform_4, window_bounds = array<i64: 16, 1>}, {pipeline_mode = #tpu.pipeline_mode<synchronous>, transform_indices = @transform_5, window_bounds = array<i64: 2048, 128>}, {pipeline_mode = #tpu.pipeline_mode<synchronous>, transform_indices = @transform_6, window_bounds = array<i64: 1, 128>}, {pipeline_mode = #tpu.pipeline_mode<synchronous>, transform_indices = @transform_7, window_bounds = array<i64: 128, 128>}, {pipeline_mode = #tpu.pipeline_mode<synchronous>, transform_indices = @transform_8, window_bounds = array<i64: 1, 128>}, {pipeline_mode = #tpu.pipeline_mode<synchronous>, transform_indices = @transform_9, window_bounds = array<i64: 128, 128>}, {pipeline_mode = #tpu.pipeline_mode<synchronous>, transform_indices = @transform_10, window_bounds = array<i64: 1, 128>}, {transform_indices = @transform_11, window_bounds = array<i64: 8, 128>}]} {
    %c0 = arith.constant 0 : index
    %c0_0 = arith.constant 0 : index
    %0 = vector.load %arg2[%c0, %c0_0] : memref<8x75xbf16, #tpu.memory_space<vmem>>, vector<8x75xbf16>
    %c0_1 = arith.constant 0 : index
    %c0_2 = arith.constant 0 : index
    %1 = vector.load %arg3[%c0_1, %c0_2] : memref<8x1xf32, #tpu.memory_space<vmem>>, vector<8x1xf32>
    %c0_3 = arith.constant 0 : index
    %c0_4 = arith.constant 0 : index
    %2 = vector.load %arg4[%c0_3, %c0_4] : memref<16x200xf32, #tpu.memory_space<vmem>>, vector<16x200xf32>
    %c0_5 = arith.constant 0 : index
    %c0_6 = arith.constant 0 : index
    %3 = vector.load %arg5[%c0_5, %c0_6] : memref<16x1xf32, #tpu.memory_space<vmem>>, vector<16x1xf32>
    %c0_7 = arith.constant 0 : index
    %c0_8 = arith.constant 0 : index
    %c0_9 = arith.constant 0 : index
    %4 = vector.load %arg1[%c0_7, %c0_8, %c0_9] : memref<8x75x1024xbf16, #tpu.memory_space<vmem>>, vector<1x75x1024xbf16>
    %5 = vector.shape_cast %4 : vector<1x75x1024xbf16> to vector<75x1024xbf16>
    %cst = arith.constant dense<0.000000e+00> : vector<8x1024xf32>
    %6 = tpu.matmul %0, %5, %cst {dimension_numbers = #tpu.dot_dimension_numbers<[1], [0], [0], [1], [0, 0, 1, 1], [], []>} : vector<8x75xbf16>, vector<75x1024xbf16>, vector<8x1024xf32> -> vector<8x1024xf32>
    %7 = vector.broadcast %1 : vector<8x1xf32> to vector<8x1024xf32>
    %8 = arith.addf %6, %7 : vector<8x1024xf32>
    %cst_10 = arith.constant 0.000000e+00 : f32
    %9 = vector.broadcast %cst_10 : f32 to vector<8x1024xf32>
    %10 = arith.maximumf %8, %9 : vector<8x1024xf32>
    %11 = vector.extract_strided_slice %10 {offsets = [0, 0], sizes = [8, 256], strides = [1, 1]} : vector<8x1024xf32> to vector<8x256xf32>
    %12 = vector.extract_strided_slice %10 {offsets = [0, 256], sizes = [8, 256], strides = [1, 1]} : vector<8x1024xf32> to vector<8x256xf32>
    %13 = arith.maximumf %11, %12 : vector<8x256xf32>
    %14 = vector.extract_strided_slice %10 {offsets = [0, 512], sizes = [8, 256], strides = [1, 1]} : vector<8x1024xf32> to vector<8x256xf32>
    %15 = vector.extract_strided_slice %10 {offsets = [0, 768], sizes = [8, 256], strides = [1, 1]} : vector<8x1024xf32> to vector<8x256xf32>
    %16 = arith.maximumf %14, %15 : vector<8x256xf32>
    %17 = arith.maximumf %13, %16 : vector<8x256xf32>
    %18 = vector.extract_strided_slice %17 {offsets = [0, 0], sizes = [8, 192], strides = [1, 1]} : vector<8x256xf32> to vector<8x192xf32>
    %19 = vector.extract_strided_slice %17 {offsets = [0, 1], sizes = [8, 192], strides = [1, 1]} : vector<8x256xf32> to vector<8x192xf32>
    %20 = vector.extract_strided_slice %17 {offsets = [0, 2], sizes = [8, 192], strides = [1, 1]} : vector<8x256xf32> to vector<8x192xf32>
    %21 = vector.extract_strided_slice %17 {offsets = [0, 3], sizes = [8, 192], strides = [1, 1]} : vector<8x256xf32> to vector<8x192xf32>
    %22 = vector.extract_strided_slice %17 {offsets = [0, 4], sizes = [8, 192], strides = [1, 1]} : vector<8x256xf32> to vector<8x192xf32>
    %23 = vector.extract_strided_slice %17 {offsets = [0, 14], sizes = [8, 192], strides = [1, 1]} : vector<8x256xf32> to vector<8x192xf32>
    %24 = vector.extract_strided_slice %17 {offsets = [0, 15], sizes = [8, 192], strides = [1, 1]} : vector<8x256xf32> to vector<8x192xf32>
    %25 = vector.extract_strided_slice %17 {offsets = [0, 16], sizes = [8, 192], strides = [1, 1]} : vector<8x256xf32> to vector<8x192xf32>
    %26 = vector.extract_strided_slice %17 {offsets = [0, 17], sizes = [8, 192], strides = [1, 1]} : vector<8x256xf32> to vector<8x192xf32>
    %27 = vector.extract_strided_slice %17 {offsets = [0, 18], sizes = [8, 192], strides = [1, 1]} : vector<8x256xf32> to vector<8x192xf32>
    %28 = vector.extract_strided_slice %17 {offsets = [0, 28], sizes = [8, 192], strides = [1, 1]} : vector<8x256xf32> to vector<8x192xf32>
    %29 = vector.extract_strided_slice %17 {offsets = [0, 29], sizes = [8, 192], strides = [1, 1]} : vector<8x256xf32> to vector<8x192xf32>
    %30 = vector.extract_strided_slice %17 {offsets = [0, 30], sizes = [8, 192], strides = [1, 1]} : vector<8x256xf32> to vector<8x192xf32>
    %31 = vector.extract_strided_slice %17 {offsets = [0, 31], sizes = [8, 192], strides = [1, 1]} : vector<8x256xf32> to vector<8x192xf32>
    %32 = vector.extract_strided_slice %17 {offsets = [0, 32], sizes = [8, 192], strides = [1, 1]} : vector<8x256xf32> to vector<8x192xf32>
    %33 = vector.extract_strided_slice %17 {offsets = [0, 42], sizes = [8, 192], strides = [1, 1]} : vector<8x256xf32> to vector<8x192xf32>
    %34 = vector.extract_strided_slice %17 {offsets = [0, 43], sizes = [8, 192], strides = [1, 1]} : vector<8x256xf32> to vector<8x192xf32>
    %35 = vector.extract_strided_slice %17 {offsets = [0, 44], sizes = [8, 192], strides = [1, 1]} : vector<8x256xf32> to vector<8x192xf32>
    %36 = vector.extract_strided_slice %17 {offsets = [0, 45], sizes = [8, 192], strides = [1, 1]} : vector<8x256xf32> to vector<8x192xf32>
    %37 = vector.extract_strided_slice %17 {offsets = [0, 46], sizes = [8, 192], strides = [1, 1]} : vector<8x256xf32> to vector<8x192xf32>
    %38 = vector.extract_strided_slice %17 {offsets = [0, 56], sizes = [8, 192], strides = [1, 1]} : vector<8x256xf32> to vector<8x192xf32>
    %39 = vector.extract_strided_slice %17 {offsets = [0, 57], sizes = [8, 192], strides = [1, 1]} : vector<8x256xf32> to vector<8x192xf32>
    %40 = vector.extract_strided_slice %17 {offsets = [0, 58], sizes = [8, 192], strides = [1, 1]} : vector<8x256xf32> to vector<8x192xf32>
    %41 = vector.extract_strided_slice %17 {offsets = [0, 59], sizes = [8, 192], strides = [1, 1]} : vector<8x256xf32> to vector<8x192xf32>
    %42 = vector.extract_strided_slice %17 {offsets = [0, 60], sizes = [8, 192], strides = [1, 1]} : vector<8x256xf32> to vector<8x192xf32>
    %43 = tpu.concatenate %18, %19, %20, %21, %22, %23, %24, %25, %26, %27, %28, %29, %30, %31, %32, %33 in 0 : vector<8x192xf32>, vector<8x192xf32>, vector<8x192xf32>, vector<8x192xf32>, vector<8x192xf32>, vector<8x192xf32>, vector<8x192xf32>, vector<8x192xf32>, vector<8x192xf32>, vector<8x192xf32>, vector<8x192xf32>, vector<8x192xf32>, vector<8x192xf32>, vector<8x192xf32>, vector<8x192xf32>, vector<8x192xf32> -> vector<128x192xf32>
    %44 = tpu.concatenate %34, %35, %36, %37, %38, %39, %40, %41, %42 in 0 : vector<8x192xf32>, vector<8x192xf32>, vector<8x192xf32>, vector<8x192xf32>, vector<8x192xf32>, vector<8x192xf32>, vector<8x192xf32>, vector<8x192xf32>, vector<8x192xf32> -> vector<72x192xf32>
    %45 = tpu.concatenate %43, %44 in 0 : vector<128x192xf32>, vector<72x192xf32> -> vector<200x192xf32>
    %cst_11 = arith.constant dense<0.000000e+00> : vector<16x192xf32>
    %46 = tpu.matmul %2, %45, %cst_11 {dimension_numbers = #tpu.dot_dimension_numbers<[1], [0], [0], [1], [0, 0, 1, 1], [], []>} : vector<16x200xf32>, vector<200x192xf32>, vector<16x192xf32> -> vector<16x192xf32>
    %47 = vector.broadcast %3 : vector<16x1xf32> to vector<16x192xf32>
    %48 = arith.addf %46, %47 : vector<16x192xf32>
    %cst_12 = arith.constant 0.000000e+00 : f32
    %49 = vector.broadcast %cst_12 : f32 to vector<16x192xf32>
    %50 = arith.maximumf %48, %49 : vector<16x192xf32>
    %51 = vector.extract_strided_slice %50 {offsets = [0, 0], sizes = [16, 128], strides = [1, 1]} : vector<16x192xf32> to vector<16x128xf32>
    %52 = vector.extract_strided_slice %50 {offsets = [0, 1], sizes = [16, 128], strides = [1, 1]} : vector<16x192xf32> to vector<16x128xf32>
    %53 = arith.maximumf %51, %52 : vector<16x128xf32>
    %54 = vector.extract_strided_slice %50 {offsets = [0, 14], sizes = [16, 128], strides = [1, 1]} : vector<16x192xf32> to vector<16x128xf32>
    %55 = vector.extract_strided_slice %50 {offsets = [0, 15], sizes = [16, 128], strides = [1, 1]} : vector<16x192xf32> to vector<16x128xf32>
    %56 = arith.maximumf %54, %55 : vector<16x128xf32>
    %57 = arith.maximumf %53, %56 : vector<16x128xf32>
    %c0_13 = arith.constant 0 : index
    %c0_14 = arith.constant 0 : index
    %c0_15 = arith.constant 0 : index
    %58 = vector.load %arg13[%c0_13, %c0_14, %c0_15] : memref<8x16x128xf32, #tpu.memory_space<vmem>>, vector<1x16x128xf32>
    %59 = vector.shape_cast %58 : vector<1x16x128xf32> to vector<16x128xf32>
    %60 = vector.shape_cast %57 : vector<16x128xf32> to vector<1x16x128xf32>
    tpu.vector_store %arg13[%c0_13, %c0_14, %c0_15], %60 {strides = array<i32>} : memref<8x16x128xf32, #tpu.memory_space<vmem>>, vector<1x16x128xf32>,
    %c1 = arith.constant 1 : index
    %c0_16 = arith.constant 0 : index
    %c0_17 = arith.constant 0 : index
    %61 = vector.load %arg1[%c1, %c0_16, %c0_17] : memref<8x75x1024xbf16, #tpu.memory_space<vmem>>, vector<1x75x1024xbf16>
    %62 = vector.shape_cast %61 : vector<1x75x1024xbf16> to vector<75x1024xbf16>
    %cst_18 = arith.constant dense<0.000000e+00> : vector<8x1024xf32>
    %63 = tpu.matmul %0, %62, %cst_18 {dimension_numbers = #tpu.dot_dimension_numbers<[1], [0], [0], [1], [0, 0, 1, 1], [], []>} : vector<8x75xbf16>, vector<75x1024xbf16>, vector<8x1024xf32> -> vector<8x1024xf32>
    %64 = vector.broadcast %1 : vector<8x1xf32> to vector<8x1024xf32>
    %65 = arith.addf %63, %64 : vector<8x1024xf32>
    %cst_19 = arith.constant 0.000000e+00 : f32
    %66 = vector.broadcast %cst_19 : f32 to vector<8x1024xf32>
    %67 = arith.maximumf %65, %66 : vector<8x1024xf32>
    %68 = vector.extract_strided_slice %67 {offsets = [0, 0], sizes = [8, 256], strides = [1, 1]} : vector<8x1024xf32> to vector<8x256xf32>
    %69 = vector.extract_strided_slice %67 {offsets = [0, 256], sizes = [8, 256], strides = [1, 1]} : vector<8x1024xf32> to vector<8x256xf32>
    %70 = arith.maximumf %68, %69 : vector<8x256xf32>
    %71 = vector.extract_strided_slice %67 {offsets = [0, 512], sizes = [8, 256], strides = [1, 1]} : vector<8x1024xf32> to vector<8x256xf32>
    %72 = vector.extract_strided_slice %67 {offsets = [0, 768], sizes = [8, 256], strides = [1, 1]} : vector<8x1024xf32> to vector<8x256xf32>
    %73 = arith.maximumf %71, %72 : vector<8x256xf32>
    %74 = arith.maximumf %70, %73 : vector<8x256xf32>
    %75 = vector.extract_strided_slice %74 {offsets = [0, 0], sizes = [8, 192], strides = [1, 1]} : vector<8x256xf32> to vector<8x192xf32>
    %76 = vector.extract_strided_slice %74 {offsets = [0, 1], sizes = [8, 192], strides = [1, 1]} : vector<8x256xf32> to vector<8x192xf32>
    %77 = vector.extract_strided_slice %74 {offsets = [0, 2], sizes = [8, 192], strides = [1, 1]} : vector<8x256xf32> to vector<8x192xf32>
    %78 = vector.extract_strided_slice %74 {offsets = [0, 3], sizes = [8, 192], strides = [1, 1]} : vector<8x256xf32> to vector<8x192xf32>
    %79 = vector.extract_strided_slice %74 {offsets = [0, 4], sizes = [8, 192], strides = [1, 1]} : vector<8x256xf32> to vector<8x192xf32>
    %80 = vector.extract_strided_slice %74 {offsets = [0, 14], sizes = [8, 192], strides = [1, 1]} : vector<8x256xf32> to vector<8x192xf32>
    %81 = vector.extract_strided_slice %74 {offsets = [0, 15], sizes = [8, 192], strides = [1, 1]} : vector<8x256xf32> to vector<8x192xf32>
    %82 = vector.extract_strided_slice %74 {offsets = [0, 16], sizes = [8, 192], strides = [1, 1]} : vector<8x256xf32> to vector<8x192xf32>
    %83 = vector.extract_strided_slice %74 {offsets = [0, 17], sizes = [8, 192], strides = [1, 1]} : vector<8x256xf32> to vector<8x192xf32>
    %84 = vector.extract_strided_slice %74 {offsets = [0, 18], sizes = [8, 192], strides = [1, 1]} : vector<8x256xf32> to vector<8x192xf32>
    %85 = vector.extract_strided_slice %74 {offsets = [0, 28], sizes = [8, 192], strides = [1, 1]} : vector<8x256xf32> to vector<8x192xf32>
    %86 = vector.extract_strided_slice %74 {offsets = [0, 29], sizes = [8, 192], strides = [1, 1]} : vector<8x256xf32> to vector<8x192xf32>
    %87 = vector.extract_strided_slice %74 {offsets = [0, 30], sizes = [8, 192], strides = [1, 1]} : vector<8x256xf32> to vector<8x192xf32>
    %88 = vector.extract_strided_slice %74 {offsets = [0, 31], sizes = [8, 192], strides = [1, 1]} : vector<8x256xf32> to vector<8x192xf32>
    %89 = vector.extract_strided_slice %74 {offsets = [0, 32], sizes = [8, 192], strides = [1, 1]} : vector<8x256xf32> to vector<8x192xf32>
    %90 = vector.extract_strided_slice %74 {offsets = [0, 42], sizes = [8, 192], strides = [1, 1]} : vector<8x256xf32> to vector<8x192xf32>
    %91 = vector.extract_strided_slice %74 {offsets = [0, 43], sizes = [8, 192], strides = [1, 1]} : vector<8x256xf32> to vector<8x192xf32>
    %92 = vector.extract_strided_slice %74 {offsets = [0, 44], sizes = [8, 192], strides = [1, 1]} : vector<8x256xf32> to vector<8x192xf32>
    %93 = vector.extract_strided_slice %74 {offsets = [0, 45], sizes = [8, 192], strides = [1, 1]} : vector<8x256xf32> to vector<8x192xf32>
    %94 = vector.extract_strided_slice %74 {offsets = [0, 46], sizes = [8, 192], strides = [1, 1]} : vector<8x256xf32> to vector<8x192xf32>
    %95 = vector.extract_strided_slice %74 {offsets = [0, 56], sizes = [8, 192], strides = [1, 1]} : vector<8x256xf32> to vector<8x192xf32>
    %96 = vector.extract_strided_slice %74 {offsets = [0, 57], sizes = [8, 192], strides = [1, 1]} : vector<8x256xf32> to vector<8x192xf32>
    %97 = vector.extract_strided_slice %74 {offsets = [0, 58], sizes = [8, 192], strides = [1, 1]} : vector<8x256xf32> to vector<8x192xf32>
    %98 = vector.extract_strided_slice %74 {offsets = [0, 59], sizes = [8, 192], strides = [1, 1]} : vector<8x256xf32> to vector<8x192xf32>
    %99 = vector.extract_strided_slice %74 {offsets = [0, 60], sizes = [8, 192], strides = [1, 1]} : vector<8x256xf32> to vector<8x192xf32>
    %100 = tpu.concatenate %75, %76, %77, %78, %79, %80, %81, %82, %83, %84, %85, %86, %87, %88, %89, %90 in 0 : vector<8x192xf32>, vector<8x192xf32>, vector<8x192xf32>, vector<8x192xf32>, vector<8x192xf32>, vector<8x192xf32>, vector<8x192xf32>, vector<8x192xf32>, vector<8x192xf32>, vector<8x192xf32>, vector<8x192xf32>, vector<8x192xf32>, vector<8x192xf32>, vector<8x192xf32>, vector<8x192xf32>, vector<8x192xf32> -> vector<128x192xf32>
    %101 = tpu.concatenate %91, %92, %93, %94, %95, %96, %97, %98, %99 in 0 : vector<8x192xf32>, vector<8x192xf32>, vector<8x192xf32>, vector<8x192xf32>, vector<8x192xf32>, vector<8x192xf32>, vector<8x192xf32>, vector<8x192xf32>, vector<8x192xf32> -> vector<72x192xf32>
    %102 = tpu.concatenate %100, %101 in 0 : vector<128x192xf32>, vector<72x192xf32> -> vector<200x192xf32>
    %cst_20 = arith.constant dense<0.000000e+00> : vector<16x192xf32>
    %103 = tpu.matmul %2, %102, %cst_20 {dimension_numbers = #tpu.dot_dimension_numbers<[1], [0], [0], [1], [0, 0, 1, 1], [], []>} : vector<16x200xf32>, vector<200x192xf32>, vector<16x192xf32> -> vector<16x192xf32>
    %104 = vector.broadcast %3 : vector<16x1xf32> to vector<16x192xf32>
    %105 = arith.addf %103, %104 : vector<16x192xf32>
    %cst_21 = arith.constant 0.000000e+00 : f32
    %106 = vector.broadcast %cst_21 : f32 to vector<16x192xf32>
    %107 = arith.maximumf %105, %106 : vector<16x192xf32>
    %108 = vector.extract_strided_slice %107 {offsets = [0, 0], sizes = [16, 128], strides = [1, 1]} : vector<16x192xf32> to vector<16x128xf32>
    %109 = vector.extract_strided_slice %107 {offsets = [0, 1], sizes = [16, 128], strides = [1, 1]} : vector<16x192xf32> to vector<16x128xf32>
    %110 = arith.maximumf %108, %109 : vector<16x128xf32>
    %111 = vector.extract_strided_slice %107 {offsets = [0, 14], sizes = [16, 128], strides = [1, 1]} : vector<16x192xf32> to vector<16x128xf32>
    %112 = vector.extract_strided_slice %107 {offsets = [0, 15], sizes = [16, 128], strides = [1, 1]} : vector<16x192xf32> to vector<16x128xf32>
    %113 = arith.maximumf %111, %112 : vector<16x128xf32>
    %114 = arith.maximumf %110, %113 : vector<16x128xf32>
    %c1_22 = arith.constant 1 : index
    %c0_23 = arith.constant 0 : index
    %c0_24 = arith.constant 0 : index
    %115 = vector.load %arg13[%c1_22, %c0_23, %c0_24] : memref<8x16x128xf32, #tpu.memory_space<vmem>>, vector<1x16x128xf32>
    %116 = vector.shape_cast %115 : vector<1x16x128xf32> to vector<16x128xf32>
    %117 = vector.shape_cast %114 : vector<16x128xf32> to vector<1x16x128xf32>
    tpu.vector_store %arg13[%c1_22, %c0_23, %c0_24], %117 {strides = array<i32>} : memref<8x16x128xf32, #tpu.memory_space<vmem>>, vector<1x16x128xf32>,
    %c2 = arith.constant 2 : index
    %c0_25 = arith.constant 0 : index
    %c0_26 = arith.constant 0 : index
    %118 = vector.load %arg1[%c2, %c0_25, %c0_26] : memref<8x75x1024xbf16, #tpu.memory_space<vmem>>, vector<1x75x1024xbf16>
    %119 = vector.shape_cast %118 : vector<1x75x1024xbf16> to vector<75x1024xbf16>
    %cst_27 = arith.constant dense<0.000000e+00> : vector<8x1024xf32>
    %120 = tpu.matmul %0, %119, %cst_27 {dimension_numbers = #tpu.dot_dimension_numbers<[1], [0], [0], [1], [0, 0, 1, 1], [], []>} : vector<8x75xbf16>, vector<75x1024xbf16>, vector<8x1024xf32> -> vector<8x1024xf32>
    %121 = vector.broadcast %1 : vector<8x1xf32> to vector<8x1024xf32>
    %122 = arith.addf %120, %121 : vector<8x1024xf32>
    %cst_28 = arith.constant 0.000000e+00 : f32
    %123 = vector.broadcast %cst_28 : f32 to vector<8x1024xf32>
    %124 = arith.maximumf %122, %123 : vector<8x1024xf32>
    %125 = vector.extract_strided_slice %124 {offsets = [0, 0], sizes = [8, 256], strides = [1, 1]} : vector<8x1024xf32> to vector<8x256xf32>
    %126 = vector.extract_strided_slice %124 {offsets = [0, 256], sizes = [8, 256], strides = [1, 1]} : vector<8x1024xf32> to vector<8x256xf32>
    %127 = arith.maximumf %125, %126 : vector<8x256xf32>
    %128 = vector.extract_strided_slice %124 {offsets = [0, 512], sizes = [8, 256], strides = [1, 1]} : vector<8x1024xf32> to vector<8x256xf32>
    %129 = vector.extract_strided_slice %124 {offsets = [0, 768], sizes = [8, 256], strides = [1, 1]} : vector<8x1024xf32> to vector<8x256xf32>
    %130 = arith.maximumf %128, %129 : vector<8x256xf32>
    %131 = arith.maximumf %127, %130 : vector<8x256xf32>
    %132 = vector.extract_strided_slice %131 {offsets = [0, 0], sizes = [8, 192], strides = [1, 1]} : vector<8x256xf32> to vector<8x192xf32>
    %133 = vector.extract_strided_slice %131 {offsets = [0, 1], sizes = [8, 192], strides = [1, 1]} : vector<8x256xf32> to vector<8x192xf32>
    %134 = vector.extract_strided_slice %131 {offsets = [0, 2], sizes = [8, 192], strides = [1, 1]} : vector<8x256xf32> to vector<8x192xf32>
    %135 = vector.extract_strided_slice %131 {offsets = [0, 3], sizes = [8, 192], strides = [1, 1]} : vector<8x256xf32> to vector<8x192xf32>
    %136 = vector.extract_strided_slice %131 {offsets = [0, 4], sizes = [8, 192], strides = [1, 1]} : vector<8x256xf32> to vector<8x192xf32>
    %137 = vector.extract_strided_slice %131 {offsets = [0, 14], sizes = [8, 192], strides = [1, 1]} : vector<8x256xf32> to vector<8x192xf32>
    %138 = vector.extract_strided_slice %131 {offsets = [0, 15], sizes = [8, 192], strides = [1, 1]} : vector<8x256xf32> to vector<8x192xf32>
    %139 = vector.extract_strided_slice %131 {offsets = [0, 16], sizes = [8, 192], strides = [1, 1]} : vector<8x256xf32> to vector<8x192xf32>
    %140 = vector.extract_strided_slice %131 {offsets = [0, 17], sizes = [8, 192], strides = [1, 1]} : vector<8x256xf32> to vector<8x192xf32>
    %141 = vector.extract_strided_slice %131 {offsets = [0, 18], sizes = [8, 192], strides = [1, 1]} : vector<8x256xf32> to vector<8x192xf32>
    %142 = vector.extract_strided_slice %131 {offsets = [0, 28], sizes = [8, 192], strides = [1, 1]} : vector<8x256xf32> to vector<8x192xf32>
    %143 = vector.extract_strided_slice %131 {offsets = [0, 29], sizes = [8, 192], strides = [1, 1]} : vector<8x256xf32> to vector<8x192xf32>
    %144 = vector.extract_strided_slice %131 {offsets = [0, 30], sizes = [8, 192], strides = [1, 1]} : vector<8x256xf32> to vector<8x192xf32>
    %145 = vector.extract_strided_slice %131 {offsets = [0, 31], sizes = [8, 192], strides = [1, 1]} : vector<8x256xf32> to vector<8x192xf32>
    %146 = vector.extract_strided_slice %131 {offsets = [0, 32], sizes = [8, 192], strides = [1, 1]} : vector<8x256xf32> to vector<8x192xf32>
    %147 = vector.extract_strided_slice %131 {offsets = [0, 42], sizes = [8, 192], strides = [1, 1]} : vector<8x256xf32> to vector<8x192xf32>
    %148 = vector.extract_strided_slice %131 {offsets = [0, 43], sizes = [8, 192], strides = [1, 1]} : vector<8x256xf32> to vector<8x192xf32>
    %149 = vector.extract_strided_slice %131 {offsets = [0, 44], sizes = [8, 192], strides = [1, 1]} : vector<8x256xf32> to vector<8x192xf32>
    %150 = vector.extract_strided_slice %131 {offsets = [0, 45], sizes = [8, 192], strides = [1, 1]} : vector<8x256xf32> to vector<8x192xf32>
    %151 = vector.extract_strided_slice %131 {offsets = [0, 46], sizes = [8, 192], strides = [1, 1]} : vector<8x256xf32> to vector<8x192xf32>
    %152 = vector.extract_strided_slice %131 {offsets = [0, 56], sizes = [8, 192], strides = [1, 1]} : vector<8x256xf32> to vector<8x192xf32>
    %153 = vector.extract_strided_slice %131 {offsets = [0, 57], sizes = [8, 192], strides = [1, 1]} : vector<8x256xf32> to vector<8x192xf32>
    %154 = vector.extract_strided_slice %131 {offsets = [0, 58], sizes = [8, 192], strides = [1, 1]} : vector<8x256xf32> to vector<8x192xf32>
    %155 = vector.extract_strided_slice %131 {offsets = [0, 59], sizes = [8, 192], strides = [1, 1]} : vector<8x256xf32> to vector<8x192xf32>
    %156 = vector.extract_strided_slice %131 {offsets = [0, 60], sizes = [8, 192], strides = [1, 1]} : vector<8x256xf32> to vector<8x192xf32>
    %157 = tpu.concatenate %132, %133, %134, %135, %136, %137, %138, %139, %140, %141, %142, %143, %144, %145, %146, %147 in 0 : vector<8x192xf32>, vector<8x192xf32>, vector<8x192xf32>, vector<8x192xf32>, vector<8x192xf32>, vector<8x192xf32>, vector<8x192xf32>, vector<8x192xf32>, vector<8x192xf32>, vector<8x192xf32>, vector<8x192xf32>, vector<8x192xf32>, vector<8x192xf32>, vector<8x192xf32>, vector<8x192xf32>, vector<8x192xf32> -> vector<128x192xf32>
    %158 = tpu.concatenate %148, %149, %150, %151, %152, %153, %154, %155, %156 in 0 : vector<8x192xf32>, vector<8x192xf32>, vector<8x192xf32>, vector<8x192xf32>, vector<8x192xf32>, vector<8x192xf32>, vector<8x192xf32>, vector<8x192xf32>, vector<8x192xf32> -> vector<72x192xf32>
    %159 = tpu.concatenate %157, %158 in 0 : vector<128x192xf32>, vector<72x192xf32> -> vector<200x192xf32>
    %cst_29 = arith.constant dense<0.000000e+00> : vector<16x192xf32>
    %160 = tpu.matmul %2, %159, %cst_29 {dimension_numbers = #tpu.dot_dimension_numbers<[1], [0], [0], [1], [0, 0, 1, 1], [], []>} : vector<16x200xf32>, vector<200x192xf32>, vector<16x192xf32> -> vector<16x192xf32>
    %161 = vector.broadcast %3 : vector<16x1xf32> to vector<16x192xf32>
    %162 = arith.addf %160, %161 : vector<16x192xf32>
    %cst_30 = arith.constant 0.000000e+00 : f32
    %163 = vector.broadcast %cst_30 : f32 to vector<16x192xf32>
    %164 = arith.maximumf %162, %163 : vector<16x192xf32>
    %165 = vector.extract_strided_slice %164 {offsets = [0, 0], sizes = [16, 128], strides = [1, 1]} : vector<16x192xf32> to vector<16x128xf32>
    %166 = vector.extract_strided_slice %164 {offsets = [0, 1], sizes = [16, 128], strides = [1, 1]} : vector<16x192xf32> to vector<16x128xf32>
    %167 = arith.maximumf %165, %166 : vector<16x128xf32>
    %168 = vector.extract_strided_slice %164 {offsets = [0, 14], sizes = [16, 128], strides = [1, 1]} : vector<16x192xf32> to vector<16x128xf32>
    %169 = vector.extract_strided_slice %164 {offsets = [0, 15], sizes = [16, 128], strides = [1, 1]} : vector<16x192xf32> to vector<16x128xf32>
    %170 = arith.maximumf %168, %169 : vector<16x128xf32>
    %171 = arith.maximumf %167, %170 : vector<16x128xf32>
    %c2_31 = arith.constant 2 : index
    %c0_32 = arith.constant 0 : index
    %c0_33 = arith.constant 0 : index
    %172 = vector.load %arg13[%c2_31, %c0_32, %c0_33] : memref<8x16x128xf32, #tpu.memory_space<vmem>>, vector<1x16x128xf32>
    %173 = vector.shape_cast %172 : vector<1x16x128xf32> to vector<16x128xf32>
    %174 = vector.shape_cast %171 : vector<16x128xf32> to vector<1x16x128xf32>
    tpu.vector_store %arg13[%c2_31, %c0_32, %c0_33], %174 {strides = array<i32>} : memref<8x16x128xf32, #tpu.memory_space<vmem>>, vector<1x16x128xf32>,
    %c3 = arith.constant 3 : index
    %c0_34 = arith.constant 0 : index
    %c0_35 = arith.constant 0 : index
    %175 = vector.load %arg1[%c3, %c0_34, %c0_35] : memref<8x75x1024xbf16, #tpu.memory_space<vmem>>, vector<1x75x1024xbf16>
    %176 = vector.shape_cast %175 : vector<1x75x1024xbf16> to vector<75x1024xbf16>
    %cst_36 = arith.constant dense<0.000000e+00> : vector<8x1024xf32>
    %177 = tpu.matmul %0, %176, %cst_36 {dimension_numbers = #tpu.dot_dimension_numbers<[1], [0], [0], [1], [0, 0, 1, 1], [], []>} : vector<8x75xbf16>, vector<75x1024xbf16>, vector<8x1024xf32> -> vector<8x1024xf32>
    %178 = vector.broadcast %1 : vector<8x1xf32> to vector<8x1024xf32>
    %179 = arith.addf %177, %178 : vector<8x1024xf32>
    %cst_37 = arith.constant 0.000000e+00 : f32
    %180 = vector.broadcast %cst_37 : f32 to vector<8x1024xf32>
    %181 = arith.maximumf %179, %180 : vector<8x1024xf32>
    %182 = vector.extract_strided_slice %181 {offsets = [0, 0], sizes = [8, 256], strides = [1, 1]} : vector<8x1024xf32> to vector<8x256xf32>
    %183 = vector.extract_strided_slice %181 {offsets = [0, 256], sizes = [8, 256], strides = [1, 1]} : vector<8x1024xf32> to vector<8x256xf32>
    %184 = arith.maximumf %182, %183 : vector<8x256xf32>
    %185 = vector.extract_strided_slice %181 {offsets = [0, 512], sizes = [8, 256], strides = [1, 1]} : vector<8x1024xf32> to vector<8x256xf32>
    %186 = vector.extract_strided_slice %181 {offsets = [0, 768], sizes = [8, 256], strides = [1, 1]} : vector<8x1024xf32> to vector<8x256xf32>
    %187 = arith.maximumf %185, %186 : vector<8x256xf32>
    %188 = arith.maximumf %184, %187 : vector<8x256xf32>
    %189 = vector.extract_strided_slice %188 {offsets = [0, 0], sizes = [8, 192], strides = [1, 1]} : vector<8x256xf32> to vector<8x192xf32>
    %190 = vector.extract_strided_slice %188 {offsets = [0, 1], sizes = [8, 192], strides = [1, 1]} : vector<8x256xf32> to vector<8x192xf32>
    %191 = vector.extract_strided_slice %188 {offsets = [0, 2], sizes = [8, 192], strides = [1, 1]} : vector<8x256xf32> to vector<8x192xf32>
    %192 = vector.extract_strided_slice %188 {offsets = [0, 3], sizes = [8, 192], strides = [1, 1]} : vector<8x256xf32> to vector<8x192xf32>
    %193 = vector.extract_strided_slice %188 {offsets = [0, 4], sizes = [8, 192], strides = [1, 1]} : vector<8x256xf32> to vector<8x192xf32>
    %194 = vector.extract_strided_slice %188 {offsets = [0, 14], sizes = [8, 192], strides = [1, 1]} : vector<8x256xf32> to vector<8x192xf32>
    %195 = vector.extract_strided_slice %188 {offsets = [0, 15], sizes = [8, 192], strides = [1, 1]} : vector<8x256xf32> to vector<8x192xf32>
    %196 = vector.extract_strided_slice %188 {offsets = [0, 16], sizes = [8, 192], strides = [1, 1]} : vector<8x256xf32> to vector<8x192xf32>
    %197 = vector.extract_strided_slice %188 {offsets = [0, 17], sizes = [8, 192], strides = [1, 1]} : vector<8x256xf32> to vector<8x192xf32>
    %198 = vector.extract_strided_slice %188 {offsets = [0, 18], sizes = [8, 192], strides = [1, 1]} : vector<8x256xf32> to vector<8x192xf32>
    %199 = vector.extract_strided_slice %188 {offsets = [0, 28], sizes = [8, 192], strides = [1, 1]} : vector<8x256xf32> to vector<8x192xf32>
    %200 = vector.extract_strided_slice %188 {offsets = [0, 29], sizes = [8, 192], strides = [1, 1]} : vector<8x256xf32> to vector<8x192xf32>
    %201 = vector.extract_strided_slice %188 {offsets = [0, 30], sizes = [8, 192], strides = [1, 1]} : vector<8x256xf32> to vector<8x192xf32>
    %202 = vector.extract_strided_slice %188 {offsets = [0, 31], sizes = [8, 192], strides = [1, 1]} : vector<8x256xf32> to vector<8x192xf32>
    %203 = vector.extract_strided_slice %188 {offsets = [0, 32], sizes = [8, 192], strides = [1, 1]} : vector<8x256xf32> to vector<8x192xf32>
    %204 = vector.extract_strided_slice %188 {offsets = [0, 42], sizes = [8, 192], strides = [1, 1]} : vector<8x256xf32> to vector<8x192xf32>
    %205 = vector.extract_strided_slice %188 {offsets = [0, 43], sizes = [8, 192], strides = [1, 1]} : vector<8x256xf32> to vector<8x192xf32>
    %206 = vector.extract_strided_slice %188 {offsets = [0, 44], sizes = [8, 192], strides = [1, 1]} : vector<8x256xf32> to vector<8x192xf32>
    %207 = vector.extract_strided_slice %188 {offsets = [0, 45], sizes = [8, 192], strides = [1, 1]} : vector<8x256xf32> to vector<8x192xf32>
    %208 = vector.extract_strided_slice %188 {offsets = [0, 46], sizes = [8, 192], strides = [1, 1]} : vector<8x256xf32> to vector<8x192xf32>
    %209 = vector.extract_strided_slice %188 {offsets = [0, 56], sizes = [8, 192], strides = [1, 1]} : vector<8x256xf32> to vector<8x192xf32>
    %210 = vector.extract_strided_slice %188 {offsets = [0, 57], sizes = [8, 192], strides = [1, 1]} : vector<8x256xf32> to vector<8x192xf32>
    %211 = vector.extract_strided_slice %188 {offsets = [0, 58], sizes = [8, 192], strides = [1, 1]} : vector<8x256xf32> to vector<8x192xf32>
    %212 = vector.extract_strided_slice %188 {offsets = [0, 59], sizes = [8, 192], strides = [1, 1]} : vector<8x256xf32> to vector<8x192xf32>
    %213 = vector.extract_strided_slice %188 {offsets = [0, 60], sizes = [8, 192], strides = [1, 1]} : vector<8x256xf32> to vector<8x192xf32>
    %214 = tpu.concatenate %189, %190, %191, %192, %193, %194, %195, %196, %197, %198, %199, %200, %201, %202, %203, %204 in 0 : vector<8x192xf32>, vector<8x192xf32>, vector<8x192xf32>, vector<8x192xf32>, vector<8x192xf32>, vector<8x192xf32>, vector<8x192xf32>, vector<8x192xf32>, vector<8x192xf32>, vector<8x192xf32>, vector<8x192xf32>, vector<8x192xf32>, vector<8x192xf32>, vector<8x192xf32>, vector<8x192xf32>, vector<8x192xf32> -> vector<128x192xf32>
    %215 = tpu.concatenate %205, %206, %207, %208, %209, %210, %211, %212, %213 in 0 : vector<8x192xf32>, vector<8x192xf32>, vector<8x192xf32>, vector<8x192xf32>, vector<8x192xf32>, vector<8x192xf32>, vector<8x192xf32>, vector<8x192xf32>, vector<8x192xf32> -> vector<72x192xf32>
    %216 = tpu.concatenate %214, %215 in 0 : vector<128x192xf32>, vector<72x192xf32> -> vector<200x192xf32>
    %cst_38 = arith.constant dense<0.000000e+00> : vector<16x192xf32>
    %217 = tpu.matmul %2, %216, %cst_38 {dimension_numbers = #tpu.dot_dimension_numbers<[1], [0], [0], [1], [0, 0, 1, 1], [], []>} : vector<16x200xf32>, vector<200x192xf32>, vector<16x192xf32> -> vector<16x192xf32>
    %218 = vector.broadcast %3 : vector<16x1xf32> to vector<16x192xf32>
    %219 = arith.addf %217, %218 : vector<16x192xf32>
    %cst_39 = arith.constant 0.000000e+00 : f32
    %220 = vector.broadcast %cst_39 : f32 to vector<16x192xf32>
    %221 = arith.maximumf %219, %220 : vector<16x192xf32>
    %222 = vector.extract_strided_slice %221 {offsets = [0, 0], sizes = [16, 128], strides = [1, 1]} : vector<16x192xf32> to vector<16x128xf32>
    %223 = vector.extract_strided_slice %221 {offsets = [0, 1], sizes = [16, 128], strides = [1, 1]} : vector<16x192xf32> to vector<16x128xf32>
    %224 = arith.maximumf %222, %223 : vector<16x128xf32>
    %225 = vector.extract_strided_slice %221 {offsets = [0, 14], sizes = [16, 128], strides = [1, 1]} : vector<16x192xf32> to vector<16x128xf32>
    %226 = vector.extract_strided_slice %221 {offsets = [0, 15], sizes = [16, 128], strides = [1, 1]} : vector<16x192xf32> to vector<16x128xf32>
    %227 = arith.maximumf %225, %226 : vector<16x128xf32>
    %228 = arith.maximumf %224, %227 : vector<16x128xf32>
    %c3_40 = arith.constant 3 : index
    %c0_41 = arith.constant 0 : index
    %c0_42 = arith.constant 0 : index
    %229 = vector.load %arg13[%c3_40, %c0_41, %c0_42] : memref<8x16x128xf32, #tpu.memory_space<vmem>>, vector<1x16x128xf32>
    %230 = vector.shape_cast %229 : vector<1x16x128xf32> to vector<16x128xf32>
    %231 = vector.shape_cast %228 : vector<16x128xf32> to vector<1x16x128xf32>
    tpu.vector_store %arg13[%c3_40, %c0_41, %c0_42], %231 {strides = array<i32>} : memref<8x16x128xf32, #tpu.memory_space<vmem>>, vector<1x16x128xf32>,
    %c4 = arith.constant 4 : index
    %c0_43 = arith.constant 0 : index
    %c0_44 = arith.constant 0 : index
    %232 = vector.load %arg1[%c4, %c0_43, %c0_44] : memref<8x75x1024xbf16, #tpu.memory_space<vmem>>, vector<1x75x1024xbf16>
    %233 = vector.shape_cast %232 : vector<1x75x1024xbf16> to vector<75x1024xbf16>
    %cst_45 = arith.constant dense<0.000000e+00> : vector<8x1024xf32>
    %234 = tpu.matmul %0, %233, %cst_45 {dimension_numbers = #tpu.dot_dimension_numbers<[1], [0], [0], [1], [0, 0, 1, 1], [], []>} : vector<8x75xbf16>, vector<75x1024xbf16>, vector<8x1024xf32> -> vector<8x1024xf32>
    %235 = vector.broadcast %1 : vector<8x1xf32> to vector<8x1024xf32>
    %236 = arith.addf %234, %235 : vector<8x1024xf32>
    %cst_46 = arith.constant 0.000000e+00 : f32
    %237 = vector.broadcast %cst_46 : f32 to vector<8x1024xf32>
    %238 = arith.maximumf %236, %237 : vector<8x1024xf32>
    %239 = vector.extract_strided_slice %238 {offsets = [0, 0], sizes = [8, 256], strides = [1, 1]} : vector<8x1024xf32> to vector<8x256xf32>
    %240 = vector.extract_strided_slice %238 {offsets = [0, 256], sizes = [8, 256], strides = [1, 1]} : vector<8x1024xf32> to vector<8x256xf32>
    %241 = arith.maximumf %239, %240 : vector<8x256xf32>
    %242 = vector.extract_strided_slice %238 {offsets = [0, 512], sizes = [8, 256], strides = [1, 1]} : vector<8x1024xf32> to vector<8x256xf32>
    %243 = vector.extract_strided_slice %238 {offsets = [0, 768], sizes = [8, 256], strides = [1, 1]} : vector<8x1024xf32> to vector<8x256xf32>
    %244 = arith.maximumf %242, %243 : vector<8x256xf32>
    %245 = arith.maximumf %241, %244 : vector<8x256xf32>
    %246 = vector.extract_strided_slice %245 {offsets = [0, 0], sizes = [8, 192], strides = [1, 1]} : vector<8x256xf32> to vector<8x192xf32>
    %247 = vector.extract_strided_slice %245 {offsets = [0, 1], sizes = [8, 192], strides = [1, 1]} : vector<8x256xf32> to vector<8x192xf32>
    %248 = vector.extract_strided_slice %245 {offsets = [0, 2], sizes = [8, 192], strides = [1, 1]} : vector<8x256xf32> to vector<8x192xf32>
    %249 = vector.extract_strided_slice %245 {offsets = [0, 3], sizes = [8, 192], strides = [1, 1]} : vector<8x256xf32> to vector<8x192xf32>
    %250 = vector.extract_strided_slice %245 {offsets = [0, 4], sizes = [8, 192], strides = [1, 1]} : vector<8x256xf32> to vector<8x192xf32>
    %251 = vector.extract_strided_slice %245 {offsets = [0, 14], sizes = [8, 192], strides = [1, 1]} : vector<8x256xf32> to vector<8x192xf32>
    %252 = vector.extract_strided_slice %245 {offsets = [0, 15], sizes = [8, 192], strides = [1, 1]} : vector<8x256xf32> to vector<8x192xf32>
    %253 = vector.extract_strided_slice %245 {offsets = [0, 16], sizes = [8, 192], strides = [1, 1]} : vector<8x256xf32> to vector<8x192xf32>
    %254 = vector.extract_strided_slice %245 {offsets = [0, 17], sizes = [8, 192], strides = [1, 1]} : vector<8x256xf32> to vector<8x192xf32>
    %255 = vector.extract_strided_slice %245 {offsets = [0, 18], sizes = [8, 192], strides = [1, 1]} : vector<8x256xf32> to vector<8x192xf32>
    %256 = vector.extract_strided_slice %245 {offsets = [0, 28], sizes = [8, 192], strides = [1, 1]} : vector<8x256xf32> to vector<8x192xf32>
    %257 = vector.extract_strided_slice %245 {offsets = [0, 29], sizes = [8, 192], strides = [1, 1]} : vector<8x256xf32> to vector<8x192xf32>
    %258 = vector.extract_strided_slice %245 {offsets = [0, 30], sizes = [8, 192], strides = [1, 1]} : vector<8x256xf32> to vector<8x192xf32>
    %259 = vector.extract_strided_slice %245 {offsets = [0, 31], sizes = [8, 192], strides = [1, 1]} : vector<8x256xf32> to vector<8x192xf32>
    %260 = vector.extract_strided_slice %245 {offsets = [0, 32], sizes = [8, 192], strides = [1, 1]} : vector<8x256xf32> to vector<8x192xf32>
    %261 = vector.extract_strided_slice %245 {offsets = [0, 42], sizes = [8, 192], strides = [1, 1]} : vector<8x256xf32> to vector<8x192xf32>
    %262 = vector.extract_strided_slice %245 {offsets = [0, 43], sizes = [8, 192], strides = [1, 1]} : vector<8x256xf32> to vector<8x192xf32>
    %263 = vector.extract_strided_slice %245 {offsets = [0, 44], sizes = [8, 192], strides = [1, 1]} : vector<8x256xf32> to vector<8x192xf32>
    %264 = vector.extract_strided_slice %245 {offsets = [0, 45], sizes = [8, 192], strides = [1, 1]} : vector<8x256xf32> to vector<8x192xf32>
    %265 = vector.extract_strided_slice %245 {offsets = [0, 46], sizes = [8, 192], strides = [1, 1]} : vector<8x256xf32> to vector<8x192xf32>
    %266 = vector.extract_strided_slice %245 {offsets = [0, 56], sizes = [8, 192], strides = [1, 1]} : vector<8x256xf32> to vector<8x192xf32>
    %267 = vector.extract_strided_slice %245 {offsets = [0, 57], sizes = [8, 192], strides = [1, 1]} : vector<8x256xf32> to vector<8x192xf32>
    %268 = vector.extract_strided_slice %245 {offsets = [0, 58], sizes = [8, 192], strides = [1, 1]} : vector<8x256xf32> to vector<8x192xf32>
    %269 = vector.extract_strided_slice %245 {offsets = [0, 59], sizes = [8, 192], strides = [1, 1]} : vector<8x256xf32> to vector<8x192xf32>
    %270 = vector.extract_strided_slice %245 {offsets = [0, 60], sizes = [8, 192], strides = [1, 1]} : vector<8x256xf32> to vector<8x192xf32>
    %271 = tpu.concatenate %246, %247, %248, %249, %250, %251, %252, %253, %254, %255, %256, %257, %258, %259, %260, %261 in 0 : vector<8x192xf32>, vector<8x192xf32>, vector<8x192xf32>, vector<8x192xf32>, vector<8x192xf32>, vector<8x192xf32>, vector<8x192xf32>, vector<8x192xf32>, vector<8x192xf32>, vector<8x192xf32>, vector<8x192xf32>, vector<8x192xf32>, vector<8x192xf32>, vector<8x192xf32>, vector<8x192xf32>, vector<8x192xf32> -> vector<128x192xf32>
    %272 = tpu.concatenate %262, %263, %264, %265, %266, %267, %268, %269, %270 in 0 : vector<8x192xf32>, vector<8x192xf32>, vector<8x192xf32>, vector<8x192xf32>, vector<8x192xf32>, vector<8x192xf32>, vector<8x192xf32>, vector<8x192xf32>, vector<8x192xf32> -> vector<72x192xf32>
    %273 = tpu.concatenate %271, %272 in 0 : vector<128x192xf32>, vector<72x192xf32> -> vector<200x192xf32>
    %cst_47 = arith.constant dense<0.000000e+00> : vector<16x192xf32>
    %274 = tpu.matmul %2, %273, %cst_47 {dimension_numbers = #tpu.dot_dimension_numbers<[1], [0], [0], [1], [0, 0, 1, 1], [], []>} : vector<16x200xf32>, vector<200x192xf32>, vector<16x192xf32> -> vector<16x192xf32>
    %275 = vector.broadcast %3 : vector<16x1xf32> to vector<16x192xf32>
    %276 = arith.addf %274, %275 : vector<16x192xf32>
    %cst_48 = arith.constant 0.000000e+00 : f32
    %277 = vector.broadcast %cst_48 : f32 to vector<16x192xf32>
    %278 = arith.maximumf %276, %277 : vector<16x192xf32>
    %279 = vector.extract_strided_slice %278 {offsets = [0, 0], sizes = [16, 128], strides = [1, 1]} : vector<16x192xf32> to vector<16x128xf32>
    %280 = vector.extract_strided_slice %278 {offsets = [0, 1], sizes = [16, 128], strides = [1, 1]} : vector<16x192xf32> to vector<16x128xf32>
    %281 = arith.maximumf %279, %280 : vector<16x128xf32>
    %282 = vector.extract_strided_slice %278 {offsets = [0, 14], sizes = [16, 128], strides = [1, 1]} : vector<16x192xf32> to vector<16x128xf32>
    %283 = vector.extract_strided_slice %278 {offsets = [0, 15], sizes = [16, 128], strides = [1, 1]} : vector<16x192xf32> to vector<16x128xf32>
    %284 = arith.maximumf %282, %283 : vector<16x128xf32>
    %285 = arith.maximumf %281, %284 : vector<16x128xf32>
    %c4_49 = arith.constant 4 : index
    %c0_50 = arith.constant 0 : index
    %c0_51 = arith.constant 0 : index
    %286 = vector.load %arg13[%c4_49, %c0_50, %c0_51] : memref<8x16x128xf32, #tpu.memory_space<vmem>>, vector<1x16x128xf32>
    %287 = vector.shape_cast %286 : vector<1x16x128xf32> to vector<16x128xf32>
    %288 = vector.shape_cast %285 : vector<16x128xf32> to vector<1x16x128xf32>
    tpu.vector_store %arg13[%c4_49, %c0_50, %c0_51], %288 {strides = array<i32>} : memref<8x16x128xf32, #tpu.memory_space<vmem>>, vector<1x16x128xf32>,
    %c5 = arith.constant 5 : index
    %c0_52 = arith.constant 0 : index
    %c0_53 = arith.constant 0 : index
    %289 = vector.load %arg1[%c5, %c0_52, %c0_53] : memref<8x75x1024xbf16, #tpu.memory_space<vmem>>, vector<1x75x1024xbf16>
    %290 = vector.shape_cast %289 : vector<1x75x1024xbf16> to vector<75x1024xbf16>
    %cst_54 = arith.constant dense<0.000000e+00> : vector<8x1024xf32>
    %291 = tpu.matmul %0, %290, %cst_54 {dimension_numbers = #tpu.dot_dimension_numbers<[1], [0], [0], [1], [0, 0, 1, 1], [], []>} : vector<8x75xbf16>, vector<75x1024xbf16>, vector<8x1024xf32> -> vector<8x1024xf32>
    %292 = vector.broadcast %1 : vector<8x1xf32> to vector<8x1024xf32>
    %293 = arith.addf %291, %292 : vector<8x1024xf32>
    %cst_55 = arith.constant 0.000000e+00 : f32
    %294 = vector.broadcast %cst_55 : f32 to vector<8x1024xf32>
    %295 = arith.maximumf %293, %294 : vector<8x1024xf32>
    %296 = vector.extract_strided_slice %295 {offsets = [0, 0], sizes = [8, 256], strides = [1, 1]} : vector<8x1024xf32> to vector<8x256xf32>
    %297 = vector.extract_strided_slice %295 {offsets = [0, 256], sizes = [8, 256], strides = [1, 1]} : vector<8x1024xf32> to vector<8x256xf32>
    %298 = arith.maximumf %296, %297 : vector<8x256xf32>
    %299 = vector.extract_strided_slice %295 {offsets = [0, 512], sizes = [8, 256], strides = [1, 1]} : vector<8x1024xf32> to vector<8x256xf32>
    %300 = vector.extract_strided_slice %295 {offsets = [0, 768], sizes = [8, 256], strides = [1, 1]} : vector<8x1024xf32> to vector<8x256xf32>
    %301 = arith.maximumf %299, %300 : vector<8x256xf32>
    %302 = arith.maximumf %298, %301 : vector<8x256xf32>
    %303 = vector.extract_strided_slice %302 {offsets = [0, 0], sizes = [8, 192], strides = [1, 1]} : vector<8x256xf32> to vector<8x192xf32>
    %304 = vector.extract_strided_slice %302 {offsets = [0, 1], sizes = [8, 192], strides = [1, 1]} : vector<8x256xf32> to vector<8x192xf32>
    %305 = vector.extract_strided_slice %302 {offsets = [0, 2], sizes = [8, 192], strides = [1, 1]} : vector<8x256xf32> to vector<8x192xf32>
    %306 = vector.extract_strided_slice %302 {offsets = [0, 3], sizes = [8, 192], strides = [1, 1]} : vector<8x256xf32> to vector<8x192xf32>
    %307 = vector.extract_strided_slice %302 {offsets = [0, 4], sizes = [8, 192], strides = [1, 1]} : vector<8x256xf32> to vector<8x192xf32>
    %308 = vector.extract_strided_slice %302 {offsets = [0, 14], sizes = [8, 192], strides = [1, 1]} : vector<8x256xf32> to vector<8x192xf32>
    %309 = vector.extract_strided_slice %302 {offsets = [0, 15], sizes = [8, 192], strides = [1, 1]} : vector<8x256xf32> to vector<8x192xf32>
    %310 = vector.extract_strided_slice %302 {offsets = [0, 16], sizes = [8, 192], strides = [1, 1]} : vector<8x256xf32> to vector<8x192xf32>
    %311 = vector.extract_strided_slice %302 {offsets = [0, 17], sizes = [8, 192], strides = [1, 1]} : vector<8x256xf32> to vector<8x192xf32>
    %312 = vector.extract_strided_slice %302 {offsets = [0, 18], sizes = [8, 192], strides = [1, 1]} : vector<8x256xf32> to vector<8x192xf32>
    %313 = vector.extract_strided_slice %302 {offsets = [0, 28], sizes = [8, 192], strides = [1, 1]} : vector<8x256xf32> to vector<8x192xf32>
    %314 = vector.extract_strided_slice %302 {offsets = [0, 29], sizes = [8, 192], strides = [1, 1]} : vector<8x256xf32> to vector<8x192xf32>
    %315 = vector.extract_strided_slice %302 {offsets = [0, 30], sizes = [8, 192], strides = [1, 1]} : vector<8x256xf32> to vector<8x192xf32>
    %316 = vector.extract_strided_slice %302 {offsets = [0, 31], sizes = [8, 192], strides = [1, 1]} : vector<8x256xf32> to vector<8x192xf32>
    %317 = vector.extract_strided_slice %302 {offsets = [0, 32], sizes = [8, 192], strides = [1, 1]} : vector<8x256xf32> to vector<8x192xf32>
    %318 = vector.extract_strided_slice %302 {offsets = [0, 42], sizes = [8, 192], strides = [1, 1]} : vector<8x256xf32> to vector<8x192xf32>
    %319 = vector.extract_strided_slice %302 {offsets = [0, 43], sizes = [8, 192], strides = [1, 1]} : vector<8x256xf32> to vector<8x192xf32>
    %320 = vector.extract_strided_slice %302 {offsets = [0, 44], sizes = [8, 192], strides = [1, 1]} : vector<8x256xf32> to vector<8x192xf32>
    %321 = vector.extract_strided_slice %302 {offsets = [0, 45], sizes = [8, 192], strides = [1, 1]} : vector<8x256xf32> to vector<8x192xf32>
    %322 = vector.extract_strided_slice %302 {offsets = [0, 46], sizes = [8, 192], strides = [1, 1]} : vector<8x256xf32> to vector<8x192xf32>
    %323 = vector.extract_strided_slice %302 {offsets = [0, 56], sizes = [8, 192], strides = [1, 1]} : vector<8x256xf32> to vector<8x192xf32>
    %324 = vector.extract_strided_slice %302 {offsets = [0, 57], sizes = [8, 192], strides = [1, 1]} : vector<8x256xf32> to vector<8x192xf32>
    %325 = vector.extract_strided_slice %302 {offsets = [0, 58], sizes = [8, 192], strides = [1, 1]} : vector<8x256xf32> to vector<8x192xf32>
    %326 = vector.extract_strided_slice %302 {offsets = [0, 59], sizes = [8, 192], strides = [1, 1]} : vector<8x256xf32> to vector<8x192xf32>
    %327 = vector.extract_strided_slice %302 {offsets = [0, 60], sizes = [8, 192], strides = [1, 1]} : vector<8x256xf32> to vector<8x192xf32>
    %328 = tpu.concatenate %303, %304, %305, %306, %307, %308, %309, %310, %311, %312, %313, %314, %315, %316, %317, %318 in 0 : vector<8x192xf32>, vector<8x192xf32>, vector<8x192xf32>, vector<8x192xf32>, vector<8x192xf32>, vector<8x192xf32>, vector<8x192xf32>, vector<8x192xf32>, vector<8x192xf32>, vector<8x192xf32>, vector<8x192xf32>, vector<8x192xf32>, vector<8x192xf32>, vector<8x192xf32>, vector<8x192xf32>, vector<8x192xf32> -> vector<128x192xf32>
    %329 = tpu.concatenate %319, %320, %321, %322, %323, %324, %325, %326, %327 in 0 : vector<8x192xf32>, vector<8x192xf32>, vector<8x192xf32>, vector<8x192xf32>, vector<8x192xf32>, vector<8x192xf32>, vector<8x192xf32>, vector<8x192xf32>, vector<8x192xf32> -> vector<72x192xf32>
    %330 = tpu.concatenate %328, %329 in 0 : vector<128x192xf32>, vector<72x192xf32> -> vector<200x192xf32>
    %cst_56 = arith.constant dense<0.000000e+00> : vector<16x192xf32>
    %331 = tpu.matmul %2, %330, %cst_56 {dimension_numbers = #tpu.dot_dimension_numbers<[1], [0], [0], [1], [0, 0, 1, 1], [], []>} : vector<16x200xf32>, vector<200x192xf32>, vector<16x192xf32> -> vector<16x192xf32>
    %332 = vector.broadcast %3 : vector<16x1xf32> to vector<16x192xf32>
    %333 = arith.addf %331, %332 : vector<16x192xf32>
    %cst_57 = arith.constant 0.000000e+00 : f32
    %334 = vector.broadcast %cst_57 : f32 to vector<16x192xf32>
    %335 = arith.maximumf %333, %334 : vector<16x192xf32>
    %336 = vector.extract_strided_slice %335 {offsets = [0, 0], sizes = [16, 128], strides = [1, 1]} : vector<16x192xf32> to vector<16x128xf32>
    %337 = vector.extract_strided_slice %335 {offsets = [0, 1], sizes = [16, 128], strides = [1, 1]} : vector<16x192xf32> to vector<16x128xf32>
    %338 = arith.maximumf %336, %337 : vector<16x128xf32>
    %339 = vector.extract_strided_slice %335 {offsets = [0, 14], sizes = [16, 128], strides = [1, 1]} : vector<16x192xf32> to vector<16x128xf32>
    %340 = vector.extract_strided_slice %335 {offsets = [0, 15], sizes = [16, 128], strides = [1, 1]} : vector<16x192xf32> to vector<16x128xf32>
    %341 = arith.maximumf %339, %340 : vector<16x128xf32>
    %342 = arith.maximumf %338, %341 : vector<16x128xf32>
    %c5_58 = arith.constant 5 : index
    %c0_59 = arith.constant 0 : index
    %c0_60 = arith.constant 0 : index
    %343 = vector.load %arg13[%c5_58, %c0_59, %c0_60] : memref<8x16x128xf32, #tpu.memory_space<vmem>>, vector<1x16x128xf32>
    %344 = vector.shape_cast %343 : vector<1x16x128xf32> to vector<16x128xf32>
    %345 = vector.shape_cast %342 : vector<16x128xf32> to vector<1x16x128xf32>
    tpu.vector_store %arg13[%c5_58, %c0_59, %c0_60], %345 {strides = array<i32>} : memref<8x16x128xf32, #tpu.memory_space<vmem>>, vector<1x16x128xf32>,
    %c6 = arith.constant 6 : index
    %c0_61 = arith.constant 0 : index
    %c0_62 = arith.constant 0 : index
    %346 = vector.load %arg1[%c6, %c0_61, %c0_62] : memref<8x75x1024xbf16, #tpu.memory_space<vmem>>, vector<1x75x1024xbf16>
    %347 = vector.shape_cast %346 : vector<1x75x1024xbf16> to vector<75x1024xbf16>
    %cst_63 = arith.constant dense<0.000000e+00> : vector<8x1024xf32>
    %348 = tpu.matmul %0, %347, %cst_63 {dimension_numbers = #tpu.dot_dimension_numbers<[1], [0], [0], [1], [0, 0, 1, 1], [], []>} : vector<8x75xbf16>, vector<75x1024xbf16>, vector<8x1024xf32> -> vector<8x1024xf32>
    %349 = vector.broadcast %1 : vector<8x1xf32> to vector<8x1024xf32>
    %350 = arith.addf %348, %349 : vector<8x1024xf32>
    %cst_64 = arith.constant 0.000000e+00 : f32
    %351 = vector.broadcast %cst_64 : f32 to vector<8x1024xf32>
    %352 = arith.maximumf %350, %351 : vector<8x1024xf32>
    %353 = vector.extract_strided_slice %352 {offsets = [0, 0], sizes = [8, 256], strides = [1, 1]} : vector<8x1024xf32> to vector<8x256xf32>
    %354 = vector.extract_strided_slice %352 {offsets = [0, 256], sizes = [8, 256], strides = [1, 1]} : vector<8x1024xf32> to vector<8x256xf32>
    %355 = arith.maximumf %353, %354 : vector<8x256xf32>
    %356 = vector.extract_strided_slice %352 {offsets = [0, 512], sizes = [8, 256], strides = [1, 1]} : vector<8x1024xf32> to vector<8x256xf32>
    %357 = vector.extract_strided_slice %352 {offsets = [0, 768], sizes = [8, 256], strides = [1, 1]} : vector<8x1024xf32> to vector<8x256xf32>
    %358 = arith.maximumf %356, %357 : vector<8x256xf32>
    %359 = arith.maximumf %355, %358 : vector<8x256xf32>
    %360 = vector.extract_strided_slice %359 {offsets = [0, 0], sizes = [8, 192], strides = [1, 1]} : vector<8x256xf32> to vector<8x192xf32>
    %361 = vector.extract_strided_slice %359 {offsets = [0, 1], sizes = [8, 192], strides = [1, 1]} : vector<8x256xf32> to vector<8x192xf32>
    %362 = vector.extract_strided_slice %359 {offsets = [0, 2], sizes = [8, 192], strides = [1, 1]} : vector<8x256xf32> to vector<8x192xf32>
    %363 = vector.extract_strided_slice %359 {offsets = [0, 3], sizes = [8, 192], strides = [1, 1]} : vector<8x256xf32> to vector<8x192xf32>
    %364 = vector.extract_strided_slice %359 {offsets = [0, 4], sizes = [8, 192], strides = [1, 1]} : vector<8x256xf32> to vector<8x192xf32>
    %365 = vector.extract_strided_slice %359 {offsets = [0, 14], sizes = [8, 192], strides = [1, 1]} : vector<8x256xf32> to vector<8x192xf32>
    %366 = vector.extract_strided_slice %359 {offsets = [0, 15], sizes = [8, 192], strides = [1, 1]} : vector<8x256xf32> to vector<8x192xf32>
    %367 = vector.extract_strided_slice %359 {offsets = [0, 16], sizes = [8, 192], strides = [1, 1]} : vector<8x256xf32> to vector<8x192xf32>
    %368 = vector.extract_strided_slice %359 {offsets = [0, 17], sizes = [8, 192], strides = [1, 1]} : vector<8x256xf32> to vector<8x192xf32>
    %369 = vector.extract_strided_slice %359 {offsets = [0, 18], sizes = [8, 192], strides = [1, 1]} : vector<8x256xf32> to vector<8x192xf32>
    %370 = vector.extract_strided_slice %359 {offsets = [0, 28], sizes = [8, 192], strides = [1, 1]} : vector<8x256xf32> to vector<8x192xf32>
    %371 = vector.extract_strided_slice %359 {offsets = [0, 29], sizes = [8, 192], strides = [1, 1]} : vector<8x256xf32> to vector<8x192xf32>
    %372 = vector.extract_strided_slice %359 {offsets = [0, 30], sizes = [8, 192], strides = [1, 1]} : vector<8x256xf32> to vector<8x192xf32>
    %373 = vector.extract_strided_slice %359 {offsets = [0, 31], sizes = [8, 192], strides = [1, 1]} : vector<8x256xf32> to vector<8x192xf32>
    %374 = vector.extract_strided_slice %359 {offsets = [0, 32], sizes = [8, 192], strides = [1, 1]} : vector<8x256xf32> to vector<8x192xf32>
    %375 = vector.extract_strided_slice %359 {offsets = [0, 42], sizes = [8, 192], strides = [1, 1]} : vector<8x256xf32> to vector<8x192xf32>
    %376 = vector.extract_strided_slice %359 {offsets = [0, 43], sizes = [8, 192], strides = [1, 1]} : vector<8x256xf32> to vector<8x192xf32>
    %377 = vector.extract_strided_slice %359 {offsets = [0, 44], sizes = [8, 192], strides = [1, 1]} : vector<8x256xf32> to vector<8x192xf32>
    %378 = vector.extract_strided_slice %359 {offsets = [0, 45], sizes = [8, 192], strides = [1, 1]} : vector<8x256xf32> to vector<8x192xf32>
    %379 = vector.extract_strided_slice %359 {offsets = [0, 46], sizes = [8, 192], strides = [1, 1]} : vector<8x256xf32> to vector<8x192xf32>
    %380 = vector.extract_strided_slice %359 {offsets = [0, 56], sizes = [8, 192], strides = [1, 1]} : vector<8x256xf32> to vector<8x192xf32>
    %381 = vector.extract_strided_slice %359 {offsets = [0, 57], sizes = [8, 192], strides = [1, 1]} : vector<8x256xf32> to vector<8x192xf32>
    %382 = vector.extract_strided_slice %359 {offsets = [0, 58], sizes = [8, 192], strides = [1, 1]} : vector<8x256xf32> to vector<8x192xf32>
    %383 = vector.extract_strided_slice %359 {offsets = [0, 59], sizes = [8, 192], strides = [1, 1]} : vector<8x256xf32> to vector<8x192xf32>
    %384 = vector.extract_strided_slice %359 {offsets = [0, 60], sizes = [8, 192], strides = [1, 1]} : vector<8x256xf32> to vector<8x192xf32>
    %385 = tpu.concatenate %360, %361, %362, %363, %364, %365, %366, %367, %368, %369, %370, %371, %372, %373, %374, %375 in 0 : vector<8x192xf32>, vector<8x192xf32>, vector<8x192xf32>, vector<8x192xf32>, vector<8x192xf32>, vector<8x192xf32>, vector<8x192xf32>, vector<8x192xf32>, vector<8x192xf32>, vector<8x192xf32>, vector<8x192xf32>, vector<8x192xf32>, vector<8x192xf32>, vector<8x192xf32>, vector<8x192xf32>, vector<8x192xf32> -> vector<128x192xf32>
    %386 = tpu.concatenate %376, %377, %378, %379, %380, %381, %382, %383, %384 in 0 : vector<8x192xf32>, vector<8x192xf32>, vector<8x192xf32>, vector<8x192xf32>, vector<8x192xf32>, vector<8x192xf32>, vector<8x192xf32>, vector<8x192xf32>, vector<8x192xf32> -> vector<72x192xf32>
    %387 = tpu.concatenate %385, %386 in 0 : vector<128x192xf32>, vector<72x192xf32> -> vector<200x192xf32>
    %cst_65 = arith.constant dense<0.000000e+00> : vector<16x192xf32>
    %388 = tpu.matmul %2, %387, %cst_65 {dimension_numbers = #tpu.dot_dimension_numbers<[1], [0], [0], [1], [0, 0, 1, 1], [], []>} : vector<16x200xf32>, vector<200x192xf32>, vector<16x192xf32> -> vector<16x192xf32>
    %389 = vector.broadcast %3 : vector<16x1xf32> to vector<16x192xf32>
    %390 = arith.addf %388, %389 : vector<16x192xf32>
    %cst_66 = arith.constant 0.000000e+00 : f32
    %391 = vector.broadcast %cst_66 : f32 to vector<16x192xf32>
    %392 = arith.maximumf %390, %391 : vector<16x192xf32>
    %393 = vector.extract_strided_slice %392 {offsets = [0, 0], sizes = [16, 128], strides = [1, 1]} : vector<16x192xf32> to vector<16x128xf32>
    %394 = vector.extract_strided_slice %392 {offsets = [0, 1], sizes = [16, 128], strides = [1, 1]} : vector<16x192xf32> to vector<16x128xf32>
    %395 = arith.maximumf %393, %394 : vector<16x128xf32>
    %396 = vector.extract_strided_slice %392 {offsets = [0, 14], sizes = [16, 128], strides = [1, 1]} : vector<16x192xf32> to vector<16x128xf32>
    %397 = vector.extract_strided_slice %392 {offsets = [0, 15], sizes = [16, 128], strides = [1, 1]} : vector<16x192xf32> to vector<16x128xf32>
    %398 = arith.maximumf %396, %397 : vector<16x128xf32>
    %399 = arith.maximumf %395, %398 : vector<16x128xf32>
    %c6_67 = arith.constant 6 : index
    %c0_68 = arith.constant 0 : index
    %c0_69 = arith.constant 0 : index
    %400 = vector.load %arg13[%c6_67, %c0_68, %c0_69] : memref<8x16x128xf32, #tpu.memory_space<vmem>>, vector<1x16x128xf32>
    %401 = vector.shape_cast %400 : vector<1x16x128xf32> to vector<16x128xf32>
    %402 = vector.shape_cast %399 : vector<16x128xf32> to vector<1x16x128xf32>
    tpu.vector_store %arg13[%c6_67, %c0_68, %c0_69], %402 {strides = array<i32>} : memref<8x16x128xf32, #tpu.memory_space<vmem>>, vector<1x16x128xf32>,
    %c7 = arith.constant 7 : index
    %c0_70 = arith.constant 0 : index
    %c0_71 = arith.constant 0 : index
    %403 = vector.load %arg1[%c7, %c0_70, %c0_71] : memref<8x75x1024xbf16, #tpu.memory_space<vmem>>, vector<1x75x1024xbf16>
    %404 = vector.shape_cast %403 : vector<1x75x1024xbf16> to vector<75x1024xbf16>
    %cst_72 = arith.constant dense<0.000000e+00> : vector<8x1024xf32>
    %405 = tpu.matmul %0, %404, %cst_72 {dimension_numbers = #tpu.dot_dimension_numbers<[1], [0], [0], [1], [0, 0, 1, 1], [], []>} : vector<8x75xbf16>, vector<75x1024xbf16>, vector<8x1024xf32> -> vector<8x1024xf32>
    %406 = vector.broadcast %1 : vector<8x1xf32> to vector<8x1024xf32>
    %407 = arith.addf %405, %406 : vector<8x1024xf32>
    %cst_73 = arith.constant 0.000000e+00 : f32
    %408 = vector.broadcast %cst_73 : f32 to vector<8x1024xf32>
    %409 = arith.maximumf %407, %408 : vector<8x1024xf32>
    %410 = vector.extract_strided_slice %409 {offsets = [0, 0], sizes = [8, 256], strides = [1, 1]} : vector<8x1024xf32> to vector<8x256xf32>
    %411 = vector.extract_strided_slice %409 {offsets = [0, 256], sizes = [8, 256], strides = [1, 1]} : vector<8x1024xf32> to vector<8x256xf32>
    %412 = arith.maximumf %410, %411 : vector<8x256xf32>
    %413 = vector.extract_strided_slice %409 {offsets = [0, 512], sizes = [8, 256], strides = [1, 1]} : vector<8x1024xf32> to vector<8x256xf32>
    %414 = vector.extract_strided_slice %409 {offsets = [0, 768], sizes = [8, 256], strides = [1, 1]} : vector<8x1024xf32> to vector<8x256xf32>
    %415 = arith.maximumf %413, %414 : vector<8x256xf32>
    %416 = arith.maximumf %412, %415 : vector<8x256xf32>
    %417 = vector.extract_strided_slice %416 {offsets = [0, 0], sizes = [8, 192], strides = [1, 1]} : vector<8x256xf32> to vector<8x192xf32>
    %418 = vector.extract_strided_slice %416 {offsets = [0, 1], sizes = [8, 192], strides = [1, 1]} : vector<8x256xf32> to vector<8x192xf32>
    %419 = vector.extract_strided_slice %416 {offsets = [0, 2], sizes = [8, 192], strides = [1, 1]} : vector<8x256xf32> to vector<8x192xf32>
    %420 = vector.extract_strided_slice %416 {offsets = [0, 3], sizes = [8, 192], strides = [1, 1]} : vector<8x256xf32> to vector<8x192xf32>
    %421 = vector.extract_strided_slice %416 {offsets = [0, 4], sizes = [8, 192], strides = [1, 1]} : vector<8x256xf32> to vector<8x192xf32>
    %422 = vector.extract_strided_slice %416 {offsets = [0, 14], sizes = [8, 192], strides = [1, 1]} : vector<8x256xf32> to vector<8x192xf32>
    %423 = vector.extract_strided_slice %416 {offsets = [0, 15], sizes = [8, 192], strides = [1, 1]} : vector<8x256xf32> to vector<8x192xf32>
    %424 = vector.extract_strided_slice %416 {offsets = [0, 16], sizes = [8, 192], strides = [1, 1]} : vector<8x256xf32> to vector<8x192xf32>
    %425 = vector.extract_strided_slice %416 {offsets = [0, 17], sizes = [8, 192], strides = [1, 1]} : vector<8x256xf32> to vector<8x192xf32>
    %426 = vector.extract_strided_slice %416 {offsets = [0, 18], sizes = [8, 192], strides = [1, 1]} : vector<8x256xf32> to vector<8x192xf32>
    %427 = vector.extract_strided_slice %416 {offsets = [0, 28], sizes = [8, 192], strides = [1, 1]} : vector<8x256xf32> to vector<8x192xf32>
    %428 = vector.extract_strided_slice %416 {offsets = [0, 29], sizes = [8, 192], strides = [1, 1]} : vector<8x256xf32> to vector<8x192xf32>
    %429 = vector.extract_strided_slice %416 {offsets = [0, 30], sizes = [8, 192], strides = [1, 1]} : vector<8x256xf32> to vector<8x192xf32>
    %430 = vector.extract_strided_slice %416 {offsets = [0, 31], sizes = [8, 192], strides = [1, 1]} : vector<8x256xf32> to vector<8x192xf32>
    %431 = vector.extract_strided_slice %416 {offsets = [0, 32], sizes = [8, 192], strides = [1, 1]} : vector<8x256xf32> to vector<8x192xf32>
    %432 = vector.extract_strided_slice %416 {offsets = [0, 42], sizes = [8, 192], strides = [1, 1]} : vector<8x256xf32> to vector<8x192xf32>
    %433 = vector.extract_strided_slice %416 {offsets = [0, 43], sizes = [8, 192], strides = [1, 1]} : vector<8x256xf32> to vector<8x192xf32>
    %434 = vector.extract_strided_slice %416 {offsets = [0, 44], sizes = [8, 192], strides = [1, 1]} : vector<8x256xf32> to vector<8x192xf32>
    %435 = vector.extract_strided_slice %416 {offsets = [0, 45], sizes = [8, 192], strides = [1, 1]} : vector<8x256xf32> to vector<8x192xf32>
    %436 = vector.extract_strided_slice %416 {offsets = [0, 46], sizes = [8, 192], strides = [1, 1]} : vector<8x256xf32> to vector<8x192xf32>
    %437 = vector.extract_strided_slice %416 {offsets = [0, 56], sizes = [8, 192], strides = [1, 1]} : vector<8x256xf32> to vector<8x192xf32>
    %438 = vector.extract_strided_slice %416 {offsets = [0, 57], sizes = [8, 192], strides = [1, 1]} : vector<8x256xf32> to vector<8x192xf32>
    %439 = vector.extract_strided_slice %416 {offsets = [0, 58], sizes = [8, 192], strides = [1, 1]} : vector<8x256xf32> to vector<8x192xf32>
    %440 = vector.extract_strided_slice %416 {offsets = [0, 59], sizes = [8, 192], strides = [1, 1]} : vector<8x256xf32> to vector<8x192xf32>
    %441 = vector.extract_strided_slice %416 {offsets = [0, 60], sizes = [8, 192], strides = [1, 1]} : vector<8x256xf32> to vector<8x192xf32>
    %442 = tpu.concatenate %417, %418, %419, %420, %421, %422, %423, %424, %425, %426, %427, %428, %429, %430, %431, %432 in 0 : vector<8x192xf32>, vector<8x192xf32>, vector<8x192xf32>, vector<8x192xf32>, vector<8x192xf32>, vector<8x192xf32>, vector<8x192xf32>, vector<8x192xf32>, vector<8x192xf32>, vector<8x192xf32>, vector<8x192xf32>, vector<8x192xf32>, vector<8x192xf32>, vector<8x192xf32>, vector<8x192xf32>, vector<8x192xf32> -> vector<128x192xf32>
    %443 = tpu.concatenate %433, %434, %435, %436, %437, %438, %439, %440, %441 in 0 : vector<8x192xf32>, vector<8x192xf32>, vector<8x192xf32>, vector<8x192xf32>, vector<8x192xf32>, vector<8x192xf32>, vector<8x192xf32>, vector<8x192xf32>, vector<8x192xf32> -> vector<72x192xf32>
    %444 = tpu.concatenate %442, %443 in 0 : vector<128x192xf32>, vector<72x192xf32> -> vector<200x192xf32>
    %cst_74 = arith.constant dense<0.000000e+00> : vector<16x192xf32>
    %445 = tpu.matmul %2, %444, %cst_74 {dimension_numbers = #tpu.dot_dimension_numbers<[1], [0], [0], [1], [0, 0, 1, 1], [], []>} : vector<16x200xf32>, vector<200x192xf32>, vector<16x192xf32> -> vector<16x192xf32>
    %446 = vector.broadcast %3 : vector<16x1xf32> to vector<16x192xf32>
    %447 = arith.addf %445, %446 : vector<16x192xf32>
    %cst_75 = arith.constant 0.000000e+00 : f32
    %448 = vector.broadcast %cst_75 : f32 to vector<16x192xf32>
    %449 = arith.maximumf %447, %448 : vector<16x192xf32>
    %450 = vector.extract_strided_slice %449 {offsets = [0, 0], sizes = [16, 128], strides = [1, 1]} : vector<16x192xf32> to vector<16x128xf32>
    %451 = vector.extract_strided_slice %449 {offsets = [0, 1], sizes = [16, 128], strides = [1, 1]} : vector<16x192xf32> to vector<16x128xf32>
    %452 = arith.maximumf %450, %451 : vector<16x128xf32>
    %453 = vector.extract_strided_slice %449 {offsets = [0, 14], sizes = [16, 128], strides = [1, 1]} : vector<16x192xf32> to vector<16x128xf32>
    %454 = vector.extract_strided_slice %449 {offsets = [0, 15], sizes = [16, 128], strides = [1, 1]} : vector<16x192xf32> to vector<16x128xf32>
    %455 = arith.maximumf %453, %454 : vector<16x128xf32>
    %456 = arith.maximumf %452, %455 : vector<16x128xf32>
    %c7_76 = arith.constant 7 : index
    %c0_77 = arith.constant 0 : index
    %c0_78 = arith.constant 0 : index
    %457 = vector.load %arg13[%c7_76, %c0_77, %c0_78] : memref<8x16x128xf32, #tpu.memory_space<vmem>>, vector<1x16x128xf32>
    %458 = vector.shape_cast %457 : vector<1x16x128xf32> to vector<16x128xf32>
    %459 = vector.shape_cast %456 : vector<16x128xf32> to vector<1x16x128xf32>
    tpu.vector_store %arg13[%c7_76, %c0_77, %c0_78], %459 {strides = array<i32>} : memref<8x16x128xf32, #tpu.memory_space<vmem>>, vector<1x16x128xf32>,
    %c0_79 = arith.constant 0 : index
    %c0_80 = arith.constant 0 : index
    %c0_81 = arith.constant 0 : index
    %460 = vector.load %arg13[%c0_79, %c0_80, %c0_81] : memref<8x16x128xf32, #tpu.memory_space<vmem>>, vector<8x1x128xf32>
    %461 = vector.shape_cast %460 : vector<8x1x128xf32> to vector<8x128xf32>
    %c0_82 = arith.constant 0 : index
    %c1_83 = arith.constant 1 : index
    %c0_84 = arith.constant 0 : index
    %462 = vector.load %arg13[%c0_82, %c1_83, %c0_84] : memref<8x16x128xf32, #tpu.memory_space<vmem>>, vector<8x1x128xf32>
    %463 = vector.shape_cast %462 : vector<8x1x128xf32> to vector<8x128xf32>
    %c0_85 = arith.constant 0 : index
    %c2_86 = arith.constant 2 : index
    %c0_87 = arith.constant 0 : index
    %464 = vector.load %arg13[%c0_85, %c2_86, %c0_87] : memref<8x16x128xf32, #tpu.memory_space<vmem>>, vector<8x1x128xf32>
    %465 = vector.shape_cast %464 : vector<8x1x128xf32> to vector<8x128xf32>
    %c0_88 = arith.constant 0 : index
    %c3_89 = arith.constant 3 : index
    %c0_90 = arith.constant 0 : index
    %466 = vector.load %arg13[%c0_88, %c3_89, %c0_90] : memref<8x16x128xf32, #tpu.memory_space<vmem>>, vector<8x1x128xf32>
    %467 = vector.shape_cast %466 : vector<8x1x128xf32> to vector<8x128xf32>
    %c0_91 = arith.constant 0 : index
    %c4_92 = arith.constant 4 : index
    %c0_93 = arith.constant 0 : index
    %468 = vector.load %arg13[%c0_91, %c4_92, %c0_93] : memref<8x16x128xf32, #tpu.memory_space<vmem>>, vector<8x1x128xf32>
    %469 = vector.shape_cast %468 : vector<8x1x128xf32> to vector<8x128xf32>
    %c0_94 = arith.constant 0 : index
    %c5_95 = arith.constant 5 : index
    %c0_96 = arith.constant 0 : index
    %470 = vector.load %arg13[%c0_94, %c5_95, %c0_96] : memref<8x16x128xf32, #tpu.memory_space<vmem>>, vector<8x1x128xf32>
    %471 = vector.shape_cast %470 : vector<8x1x128xf32> to vector<8x128xf32>
    %c0_97 = arith.constant 0 : index
    %c6_98 = arith.constant 6 : index
    %c0_99 = arith.constant 0 : index
    %472 = vector.load %arg13[%c0_97, %c6_98, %c0_99] : memref<8x16x128xf32, #tpu.memory_space<vmem>>, vector<8x1x128xf32>
    %473 = vector.shape_cast %472 : vector<8x1x128xf32> to vector<8x128xf32>
    %c0_100 = arith.constant 0 : index
    %c7_101 = arith.constant 7 : index
    %c0_102 = arith.constant 0 : index
    %474 = vector.load %arg13[%c0_100, %c7_101, %c0_102] : memref<8x16x128xf32, #tpu.memory_space<vmem>>, vector<8x1x128xf32>
    %475 = vector.shape_cast %474 : vector<8x1x128xf32> to vector<8x128xf32>
    %c0_103 = arith.constant 0 : index
    %c8 = arith.constant 8 : index
    %c0_104 = arith.constant 0 : index
    %476 = vector.load %arg13[%c0_103, %c8, %c0_104] : memref<8x16x128xf32, #tpu.memory_space<vmem>>, vector<8x1x128xf32>
    %477 = vector.shape_cast %476 : vector<8x1x128xf32> to vector<8x128xf32>
    %c0_105 = arith.constant 0 : index
    %c9 = arith.constant 9 : index
    %c0_106 = arith.constant 0 : index
    %478 = vector.load %arg13[%c0_105, %c9, %c0_106] : memref<8x16x128xf32, #tpu.memory_space<vmem>>, vector<8x1x128xf32>
    %479 = vector.shape_cast %478 : vector<8x1x128xf32> to vector<8x128xf32>
    %c0_107 = arith.constant 0 : index
    %c10 = arith.constant 10 : index
    %c0_108 = arith.constant 0 : index
    %480 = vector.load %arg13[%c0_107, %c10, %c0_108] : memref<8x16x128xf32, #tpu.memory_space<vmem>>, vector<8x1x128xf32>
    %481 = vector.shape_cast %480 : vector<8x1x128xf32> to vector<8x128xf32>
    %c0_109 = arith.constant 0 : index
    %c11 = arith.constant 11 : index
    %c0_110 = arith.constant 0 : index
    %482 = vector.load %arg13[%c0_109, %c11, %c0_110] : memref<8x16x128xf32, #tpu.memory_space<vmem>>, vector<8x1x128xf32>
    %483 = vector.shape_cast %482 : vector<8x1x128xf32> to vector<8x128xf32>
    %c0_111 = arith.constant 0 : index
    %c12 = arith.constant 12 : index
    %c0_112 = arith.constant 0 : index
    %484 = vector.load %arg13[%c0_111, %c12, %c0_112] : memref<8x16x128xf32, #tpu.memory_space<vmem>>, vector<8x1x128xf32>
    %485 = vector.shape_cast %484 : vector<8x1x128xf32> to vector<8x128xf32>
    %c0_113 = arith.constant 0 : index
    %c13 = arith.constant 13 : index
    %c0_114 = arith.constant 0 : index
    %486 = vector.load %arg13[%c0_113, %c13, %c0_114] : memref<8x16x128xf32, #tpu.memory_space<vmem>>, vector<8x1x128xf32>
    %487 = vector.shape_cast %486 : vector<8x1x128xf32> to vector<8x128xf32>
    %c0_115 = arith.constant 0 : index
    %c14 = arith.constant 14 : index
    %c0_116 = arith.constant 0 : index
    %488 = vector.load %arg13[%c0_115, %c14, %c0_116] : memref<8x16x128xf32, #tpu.memory_space<vmem>>, vector<8x1x128xf32>
    %489 = vector.shape_cast %488 : vector<8x1x128xf32> to vector<8x128xf32>
    %c0_117 = arith.constant 0 : index
    %c15 = arith.constant 15 : index
    %c0_118 = arith.constant 0 : index
    %490 = vector.load %arg13[%c0_117, %c15, %c0_118] : memref<8x16x128xf32, #tpu.memory_space<vmem>>, vector<8x1x128xf32>
    %491 = vector.shape_cast %490 : vector<8x1x128xf32> to vector<8x128xf32>
    %492 = tpu.concatenate %461, %463, %465, %467, %469, %471, %473, %475, %477, %479, %481, %483, %485, %487, %489, %491 in 1 : vector<8x128xf32>, vector<8x128xf32>, vector<8x128xf32>, vector<8x128xf32>, vector<8x128xf32>, vector<8x128xf32>, vector<8x128xf32>, vector<8x128xf32>, vector<8x128xf32>, vector<8x128xf32>, vector<8x128xf32>, vector<8x128xf32>, vector<8x128xf32>, vector<8x128xf32>, vector<8x128xf32>, vector<8x128xf32> -> vector<8x2048xf32>
    %c0_119 = arith.constant 0 : index
    %c0_120 = arith.constant 0 : index
    %493 = vector.load %arg6[%c0_119, %c0_120] : memref<2048x128xf32, #tpu.memory_space<vmem>>, vector<2048x128xf32>
    %cst_121 = arith.constant dense<0.000000e+00> : vector<8x128xf32>
    %494 = tpu.matmul %492, %493, %cst_121 {dimension_numbers = #tpu.dot_dimension_numbers<[1], [0], [0], [1], [0, 0, 1, 1], [], []>} : vector<8x2048xf32>, vector<2048x128xf32>, vector<8x128xf32> -> vector<8x128xf32>
    %c0_122 = arith.constant 0 : index
    %c0_123 = arith.constant 0 : index
    %495 = vector.load %arg7[%c0_122, %c0_123] : memref<1x128xf32, #tpu.memory_space<vmem>>, vector<1x128xf32>
    %496 = vector.broadcast %495 : vector<1x128xf32> to vector<8x128xf32>
    %497 = arith.addf %494, %496 : vector<8x128xf32>
    %cst_124 = arith.constant 0.000000e+00 : f32
    %498 = vector.broadcast %cst_124 : f32 to vector<8x128xf32>
    %499 = arith.maximumf %497, %498 : vector<8x128xf32>
    %c0_125 = arith.constant 0 : index
    %c0_126 = arith.constant 0 : index
    %500 = vector.load %arg8[%c0_125, %c0_126] : memref<128x128xf32, #tpu.memory_space<vmem>>, vector<128x128xf32>
    %cst_127 = arith.constant dense<0.000000e+00> : vector<8x128xf32>
    %501 = tpu.matmul %499, %500, %cst_127 {dimension_numbers = #tpu.dot_dimension_numbers<[1], [0], [0], [1], [0, 0, 1, 1], [], []>} : vector<8x128xf32>, vector<128x128xf32>, vector<8x128xf32> -> vector<8x128xf32>
    %c0_128 = arith.constant 0 : index
    %c0_129 = arith.constant 0 : index
    %502 = vector.load %arg9[%c0_128, %c0_129] : memref<1x128xf32, #tpu.memory_space<vmem>>, vector<1x128xf32>
    %503 = vector.broadcast %502 : vector<1x128xf32> to vector<8x128xf32>
    %504 = arith.addf %501, %503 : vector<8x128xf32>
    %cst_130 = arith.constant 0.000000e+00 : f32
    %505 = vector.broadcast %cst_130 : f32 to vector<8x128xf32>
    %506 = arith.maximumf %504, %505 : vector<8x128xf32>
    %c0_131 = arith.constant 0 : index
    %c0_132 = arith.constant 0 : index
    %507 = vector.load %arg10[%c0_131, %c0_132] : memref<128x128xf32, #tpu.memory_space<vmem>>, vector<128x128xf32>
    %cst_133 = arith.constant dense<0.000000e+00> : vector<8x128xf32>
    %508 = tpu.matmul %506, %507, %cst_133 {dimension_numbers = #tpu.dot_dimension_numbers<[1], [0], [0], [1], [0, 0, 1, 1], [], []>} : vector<8x128xf32>, vector<128x128xf32>, vector<8x128xf32> -> vector<8x128xf32>
    %c0_134 = arith.constant 0 : index
    %c0_135 = arith.constant 0 : index
    %509 = vector.load %arg11[%c0_134, %c0_135] : memref<1x128xf32, #tpu.memory_space<vmem>>, vector<1x128xf32>
    %510 = vector.broadcast %509 : vector<1x128xf32> to vector<8x128xf32>
    %511 = arith.addf %508, %510 : vector<8x128xf32>
    %c0_136 = arith.constant 0 : index
    %c0_137 = arith.constant 0 : index
    %512 = vector.load %arg12[%c0_136, %c0_137] : memref<8x128xf32, #tpu.memory_space<vmem>>, vector<8x128xf32>
    tpu.vector_store %arg12[%c0_136, %c0_137], %511 {strides = array<i32>} : memref<8x128xf32, #tpu.memory_space<vmem>>, vector<8x128xf32>,
    return
  }
  func.func @transform_0(%arg0: i32) -> (i32, i32, i32) {
    %c0_i32 = arith.constant 0 : i32
    %c0_i32_0 = arith.constant 0 : i32
    %c0_i32_1 = arith.constant 0 : i32
    return %arg0, %c0_i32, %c0_i32_0 : i32, i32, i32
  }
  func.func @transform_1(%arg0: i32) -> (i32, i32) {
    %c0_i32 = arith.constant 0 : i32
    %c0_i32_0 = arith.constant 0 : i32
    %c0_i32_1 = arith.constant 0 : i32
    return %c0_i32, %c0_i32_0 : i32, i32
  }
  func.func @transform_2(%arg0: i32) -> (i32, i32) {
    %c0_i32 = arith.constant 0 : i32
    %c0_i32_0 = arith.constant 0 : i32
    %c0_i32_1 = arith.constant 0 : i32
    return %c0_i32, %c0_i32_0 : i32, i32
  }
  func.func @transform_3(%arg0: i32) -> (i32, i32) {
    %c0_i32 = arith.constant 0 : i32
    %c0_i32_0 = arith.constant 0 : i32
    %c0_i32_1 = arith.constant 0 : i32
    return %c0_i32, %c0_i32_0 : i32, i32
  }
  func.func @transform_4(%arg0: i32) -> (i32, i32) {
    %c0_i32 = arith.constant 0 : i32
    %c0_i32_0 = arith.constant 0 : i32
    %c0_i32_1 = arith.constant 0 : i32
    return %c0_i32, %c0_i32_0 : i32, i32
  }
  func.func @transform_5(%arg0: i32) -> (i32, i32) {
    %c0_i32 = arith.constant 0 : i32
    %c0_i32_0 = arith.constant 0 : i32
    %c0_i32_1 = arith.constant 0 : i32
    return %c0_i32, %c0_i32_0 : i32, i32
  }
  func.func @transform_6(%arg0: i32) -> (i32, i32) {
    %c0_i32 = arith.constant 0 : i32
    %c0_i32_0 = arith.constant 0 : i32
    %c0_i32_1 = arith.constant 0 : i32
    return %c0_i32, %c0_i32_0 : i32, i32
  }
  func.func @transform_7(%arg0: i32) -> (i32, i32) {
    %c0_i32 = arith.constant 0 : i32
    %c0_i32_0 = arith.constant 0 : i32
    %c0_i32_1 = arith.constant 0 : i32
    return %c0_i32, %c0_i32_0 : i32, i32
  }
  func.func @transform_8(%arg0: i32) -> (i32, i32) {
    %c0_i32 = arith.constant 0 : i32
    %c0_i32_0 = arith.constant 0 : i32
    %c0_i32_1 = arith.constant 0 : i32
    return %c0_i32, %c0_i32_0 : i32, i32
  }
  func.func @transform_9(%arg0: i32) -> (i32, i32) {
    %c0_i32 = arith.constant 0 : i32
    %c0_i32_0 = arith.constant 0 : i32
    %c0_i32_1 = arith.constant 0 : i32
    return %c0_i32, %c0_i32_0 : i32, i32
  }
  func.func @transform_10(%arg0: i32) -> (i32, i32) {
    %c0_i32 = arith.constant 0 : i32
    %c0_i32_0 = arith.constant 0 : i32
    %c0_i32_1 = arith.constant 0 : i32
    return %c0_i32, %c0_i32_0 : i32, i32
  }
  func.func @transform_11(%arg0: i32) -> (i32, i32) {
    %c0_i32 = arith.constant 0 : i32
    %c0_i32_0 = arith.constant 0 : i32
    return %arg0, %c0_i32 : i32, i32
  }
}

</mosaic_0001>

<bundles_post_ra>
// kernel: cnn_forward.1
= control target key start
LH: loop header
LB: loop body
LE: loop exit
PB: predicated region body
PF: predicated region fallthrough
CT: control target
= control target key end

     0   :  { %s14527_s0 = inlined_call_operand.vmem [shape: bf16[16,75,1024], index: 0, kind: input, shape index: {}]   ;;  %s14528_s1 = inlined_call_operand.vmem [shape: bf16[8,75], index: 1, kind: input, shape index: {}]   ;;  %s14529_s2 = inlined_call_operand.vmem [shape: f32[8,1], index: 2, kind: input, shape index: {}]   ;;  %s14530_s3 = inlined_call_operand.vmem [shape: f32[16,200], index: 3, kind: input, shape index: {}]   ;;  %s14531_s4 = inlined_call_operand.vmem [shape: f32[16,1], index: 4, kind: input, shape index: {}]   ;;  %s14532_s5 = inlined_call_operand.vmem [shape: f32[2048,128], index: 5, kind: input, shape index: {}]   ;;  %s14533_s6 = inlined_call_operand.vmem [shape: f32[1,128], index: 6, kind: input, shape index: {}]   ;;  %s14534_s7 = inlined_call_operand.vmem [shape: f32[128,128], index: 7, kind: input, shape index: {}]   ;;  %s14535_s8 = inlined_call_operand.vmem [shape: f32[1,128], index: 8, kind: input, shape index: {}]   ;;  %s14536_s9 = inlined_call_operand.vmem [shape: f32[128,128], index: 9, kind: input, shape index: {}]   ;;  %s14537_s10 = inlined_call_operand.vmem [shape: f32[1,128], index: 10, kind: input, shape index: {}]   ;;  %s14538_s11 = inlined_call_operand.hbm [shape: f32[16,128], index: 11, kind: output, shape index: {}]  }
   0x1   :  { %14596 = sst [smem:[#allocation40_spill]] %s14527_s0 }
   0x2   :  { %14597 = sst [smem:[#allocation41_spill]] %s14529_s2 }
   0x3   :  { %14598 = sst [smem:[#allocation42_spill]] %s14537_s10 }
   0x4   :  { %16 = vsyncpa [#allocation4], 0 }
   0x5   :  { %18 = vsyncpa [#allocation4 + $0x1], 0  ;;  %s10393_s17 = smov 0   ;;  %s10395_s18 = smov 0  }
   0x6   :  { %s10397_s19 = smov 0   ;;  %s10399_s20 = smov 0  }
   0x7 LB: > { %14599 = sst [smem:[#allocation6_spill]] %s10300_s17  ;;  %s7196_s21 = sadd.s32 4294967295, %s10312_s20   ;;  %s10312_s20 = sphi %s10399_s20, %s14770_s20   ;;  %s10308_s19 = sphi %s10397_s19, %s14772_s19   ;;  %s10304_s18 = sphi %s10395_s18, %s14774_s18   ;;  %s10300_s17 = sphi %s10393_s17, %s14773_s17  }
   0x8   : > { %14600 = sst [smem:[#allocation7_spill]] %s10308_s19  ;;  %s7197_s22 = sadd.s32 4294967294, %s10312_s20  }
   0x9   : > { %14601 = sst [smem:[#allocation8_spill]] %s10312_s20  ;;  %s10416_s23 = sadd.s32 1, %s10312_s20  }
   0xa   : > { %14602 = sst [smem:[#allocation9_spill]] %s10416_s23  ;;  %s267_s24 = sadd.s32 1, %s10308_s19 }
   0xb   : > { %s264_s25 = ssub.s32 %s10312_s20, %s10416_s23  ;;  %p277_p0 = scmp.ne.s32.totalorder %s10308_s19, %s10304_s18 }
   0xc   : > { %p265_p1 = scmp.eq.s32.totalorder %s264_s25, 0  ;;  %p278_p2 = scmp.eq.s32.totalorder %s7196_s21, 1 }
   0xd   : > { %p283_p3 = scmp.ne.s32.totalorder %s10304_s18, %s10300_s17  ;;  %p284_p4 = scmp.eq.s32.totalorder %s7197_s22, 1 }
   0xe   : > { %s10426_s26 = scalar_select %p265_p1, %s10308_s19, %s267_s24  }
   0xf   : > { %p10428_p5 = por %p278_p2, %p277_p0  ;;  %p10432_p6 = por %p284_p4, %p283_p3 }
  0x10   : > { %14603 = sst [smem:[#allocation10_spill]] %s10426_s26  ;;  %p7200_p7 = scmp.ge.s32.totalorder %s10312_s20, 1 }
  0x11   : > { %s14604_s27 = scalar_select %p10428_p5, 1, 0 }
  0x12   : > { %s14606_s28 = scalar_select %p10432_p6, 1, 0 }
  0x13   : > { %14605 = sst [smem:[#allocation11_spill]] %s14604_s27  ;;  %p342_p8 = scmp.lt.s32.totalorder %s10312_s20, 3 }
  0x14   : > { %14607 = sst [smem:[#allocation12_spill]] %s14606_s28 }
  0x15   : > { %p343_p9 = pnand %p7200_p7, %p342_p8 }
  0x17   : > { %346 = sbr.rel (%p343_p9) target bundleno = 4491 (0x118b), region = 64 }
  0x1c   : > { %s10438_s29 = sshll.u32 %s7196_s21, 3  ;;  %vm640_vm0 = vcmask 1044480   ;;  %vm641_vm1 = vcmask 1045504   ;;  %v10314_v0 = vmov 65535   ;;  %s14608_s0 = sld [smem:[#allocation40_spill]]  ;;  %vm636_vm2 = vcmask 613376  }
  0x1d   : > { %p384_p10 = scmp.lt.s32.totalorder %s10438_s29, 15  ;;  %v642_v1 = vsel %vm640_vm0, 4294967295, %v10314_v0  ;;  %s14609_s2 = sld [smem:[#allocation41_spill]]  ;;  %vm824_vm3 = vcmask 932864   ;;  %vm904_vm4 = vcmask 703488   ;;  %vm840_vm5 = vcmask 916480  }
  0x1e   : > { %v10447_v2 = vsel %vm641_vm1, %v642_v1, 0  ;;  %s14539_s25 = smov 114   ;;  %s14541_s13 = smov 115   ;;  %vm848_vm6 = vcmask 908288   ;;  %vm912_vm7 = vcmask 941056   ;;  %vm832_vm8 = vcmask 924672  }
  0x1f   : > { %s385_s30 = scalar_select %p384_p10, %s10438_s29, 15  ;;  %vm792_vm9 = vcmask 1039360   ;;  %vm808_vm10 = vcmask 1022976   ;;  %vm800_vm11 = vcmask 1031168   ;;  %vm14577_vm12 = vcmask 785408  }
  0x20   : > { %s14568_s14 = smov 113   ;;  %s14543_s16 = smov 125   ;;  %vm14584_vm13 = vcmask 793600   ;;  %vm880_vm14 = vcmask 801792   ;;  %vm14555_vm15 = vcmask 809984   ;;  %vm14578_vm0 = vcmask 695296  }
  0x21   : > { %s9184_s12 = smul.u32 320, %s385_s30  ;;  %s14570_s30 = smov 112   ;;  %vm14560_vm1 = vcmask 818176  }
  0x22   : > { %s14545_s21 = smov 127   ;;  %s14547_s22 = smov 126  }
  0x23   : > { %s10445_s15 = scalar_lea.vmem %s14608_s0, %s9184_s12  ;;  %s14549_s12 = smov 111  }
  0x24   : > { %v7334_v3 = vld [vmem:[%s10445_s15 + $0x100] sm:$0xf]  ;;  %v8896_v5 = vld [vmem:[%s10445_s15 + $0x104] sm:$0xf]  ;;  %v7342_v8 = vld [vmem:[%s10445_s15 + $0x108] sm:$0xf] }
  0x25   : > { %v8900_v4 = vld [vmem:[%s10445_s15 + $0x11c] sm:$0x30]  ;;  %v7336_v7 = vld [vmem:[%s10445_s15 + $0x120] sm:$0x30]  ;;  %v8901_v9 = vld [vmem:[%s10445_s15 + $0x124] sm:$0x30] }
  0x26   : > { %v7335_v6 = vor.u32 %v8900_v4, %v7334_v3  ;;  %v7339_v10 = vor.u32 %v8896_v5, %v7336_v7  ;;  %v7343_v11 = vor.u32 %v8901_v9, %v7342_v8  ;;  %v8897_v12 = vld [vmem:[%s10445_s15 + $0x10c] sm:$0xf]  ;;  %v7302_v14 = vld [vmem:[%s10445_s15 + $0xc0] sm:$0xf]  ;;  %v8888_v18 = vld [vmem:[%s10445_s15 + $0xc4] sm:$0xf] }
  0x27   : > { %v7344_v13 = vld [vmem:[%s10445_s15 + $0x128] sm:$0x30]  ;;  %v8892_v17 = vld [vmem:[%s10445_s15 + $0xdc] sm:$0xf0]  ;;  %v7304_v19 = vld [vmem:[%s10445_s15 + $0xe0] sm:$0xf0] }
  0x28   : > { %v645_v15 = vand.u32 %v7335_v6, %v10447_v2  ;;  %v7347_v16 = vor.u32 %v8897_v12, %v7344_v13  ;;  %v648_v20 = vand.u32 %v7339_v10, %v10447_v2  ;;  %v651_v21 = vand.u32 %v7343_v11, %v10447_v2  ;;  %v7310_v22 = vld [vmem:[%s10445_s15 + $0xc8] sm:$0xf]  ;;  %v8889_v24 = vld [vmem:[%s10445_s15 + $0xcc] sm:$0xf]  ;;  %v7270_v30 = vld [vmem:[%s10445_s15 + $0x80] sm:$0xf] }
  0x29   : > { %v8893_v23 = vld [vmem:[%s10445_s15 + $0xe4] sm:$0xf0]  ;;  %v7303_v26 = vor.u32 %v8892_v17, %v7302_v14  ;;  %v7312_v27 = vld [vmem:[%s10445_s15 + $0xe8] sm:$0xf0]  ;;  %v7307_v28 = vor.u32 %v8888_v18, %v7304_v19  ;;  %v8884_v31 = vld [vmem:[%s10445_s15 + $0x9c] sm:$0xf0] }
  0x2a   : > { %671 = vmatpush.bf16.msra.mxu0 %v645_v15  ;;  %v654_v25 = vand.u32 %v7347_v16, %v10447_v2  ;;  %684 = vmatpush.bf16.msra.mxu1 %v648_v20  ;;  %v7311_v29 = vor.u32 %v8893_v23, %v7310_v22  ;;  %v8880_v32 = vld [vmem:[%s10445_s15 + $0x84] sm:$0xf]  ;;  %v7315_v33 = vor.u32 %v8889_v24, %v7312_v27  ;;  %v7278_v35 = vld [vmem:[%s10445_s15 + $0x88] sm:$0xf]  ;;  %v8881_v37 = vld [vmem:[%s10445_s15 + $0x8c] sm:$0xf] }
  0x2b   : > { %697 = vmatpush.bf16.msra.mxu2 %v651_v21  ;;  %v7272_v34 = vld [vmem:[%s10445_s15 + $0xa0] sm:$0xf0]  ;;  %v8885_v36 = vld [vmem:[%s10445_s15 + $0xa4] sm:$0xf0]  ;;  %v7280_v38 = vld [vmem:[%s10445_s15 + $0xa8] sm:$0xf0]  ;;  %v7271_v39 = vor.u32 %v8884_v31, %v7270_v30 }
  0x2c   : > { %710 = vmatpush.bf16.msra.mxu3 %v654_v25  ;;  %v7238_v40 = vld [vmem:[%s10445_s15 + $0x40] sm:$0xf]  ;;  %v7275_v41 = vor.u32 %v8880_v32, %v7272_v34  ;;  %v7279_v42 = vor.u32 %v8885_v36, %v7278_v35  ;;  %v8872_v44 = vld [vmem:[%s10445_s15 + $0x44] sm:$0xf]  ;;  %v7283_v46 = vor.u32 %v8881_v37, %v7280_v38  ;;  %v7246_v47 = vld [vmem:[%s10445_s15 + $0x48] sm:$0xf] }
  0x2d   : > { %v8876_v43 = vld [vmem:[%s10445_s15 + $0x5c] sm:$0xf0]  ;;  %v7240_v45 = vld [vmem:[%s10445_s15 + $0x60] sm:$0xf0]  ;;  %v8877_v48 = vld [vmem:[%s10445_s15 + $0x64] sm:$0xf0] }
  0x2e   : > { %672 = vmatpush.bf16.msra.mxu0 %v7303_v26  ;;  %685 = vmatpush.bf16.msra.mxu1 %v7307_v28  ;;  %v8873_v49 = vld [vmem:[%s10445_s15 + $0x4c] sm:$0xf]  ;;  %v7206_v51 = vld [vmem:[%s10445_s15] sm:$0xf]  ;;  %v7239_v53 = vor.u32 %v8876_v43, %v7238_v40  ;;  %v8864_v54 = vld [vmem:[%s10445_s15 + $0x4] sm:$0xf]  ;;  %v7243_v60 = vor.u32 %v8872_v44, %v7240_v45  ;;  %v7247_v61 = vor.u32 %v8877_v48, %v7246_v47 }
  0x2f   : > { %698 = vmatpush.bf16.msra.mxu2 %v7311_v29  ;;  %v7248_v50 = vld [vmem:[%s10445_s15 + $0x68] sm:$0xf0]  ;;  %v8868_v52 = vld [vmem:[%s10445_s15 + $0x1c] sm:$0xf0]  ;;  %v7208_v55 = vld [vmem:[%s10445_s15 + $0x20] sm:$0xf0] }
  0x30   : > { %711 = vmatpush.bf16.msra.mxu3 %v7315_v33  ;;  %v7214_v56 = vld [vmem:[%s10445_s15 + $0x8] sm:$0xf]  ;;  %v7350_v58 = vld [vmem:[%s10445_s15 + $0x110] sm:$0xf]  ;;  %v8898_v62 = vld [vmem:[%s10445_s15 + $0x114] sm:$0xf]  ;;  %v7251_v1 = vor.u32 %v8873_v49, %v7248_v50  ;;  %v7207_v11 = vor.u32 %v8868_v52, %v7206_v51  ;;  %v7211_v13 = vor.u32 %v8864_v54, %v7208_v55 }
  0x31   : > { %v8869_v57 = vld [vmem:[%s10445_s15 + $0x24] sm:$0xf0]  ;;  %v8902_v59 = vld [vmem:[%s10445_s15 + $0x12c] sm:$0x30]  ;;  %v7352_v63 = vld [vmem:[%s10445_s15 + $0x130] sm:$0x30] }
  0x32   : > { %673 = vmatpush.bf16.msra.mxu0 %v7271_v39  ;;  %686 = vmatpush.bf16.msra.mxu1 %v7275_v41  ;;  %v7358_v0 = vld [vmem:[%s10445_s15 + $0x118] sm:$0xf]  ;;  %v7351_v3 = vor.u32 %v8902_v59, %v7350_v58  ;;  %v8899_v5 = vld [vmem:[%s10445_s15 + $0x11c] sm:$0xf]  ;;  %v8865_v7 = vld [vmem:[%s10445_s15 + $0xc] sm:$0xf]  ;;  %v7355_v9 = vor.u32 %v8898_v62, %v7352_v63  ;;  %v7215_v14 = vor.u32 %v8869_v57, %v7214_v56 }
  0x33   : > { %699 = vmatpush.bf16.msra.mxu2 %v7279_v42  ;;  %v8903_v4 = vld [vmem:[%s10445_s15 + $0x134] sm:$0x30]  ;;  %v7360_v6 = vld [vmem:[%s10445_s15 + $0x138] sm:$0x30]  ;;  %v7216_v8 = vld [vmem:[%s10445_s15 + $0x28] sm:$0xf0] }
  0x34   : > { %712 = vmatpush.bf16.msra.mxu3 %v7283_v46  ;;  %v7359_v10 = vor.u32 %v8903_v4, %v7358_v0  ;;  %v7363_v12 = vor.u32 %v8899_v5, %v7360_v6  ;;  %v7219_v15 = vor.u32 %v8865_v7, %v7216_v8  ;;  %v657_v16 = vand.u32 %v7351_v3, %v10447_v2  ;;  %v10507_v19 = vld [vmem:[%s14528_s1] sm:$0xf]  ;;  %v7318_v20 = vld [vmem:[%s10445_s15 + $0xd0] sm:$0xf]  ;;  %v8890_v22 = vld [vmem:[%s10445_s15 + $0xd4] sm:$0xf] }
  0x35   : > { %v660_v17 = vand.u32 %v7355_v9, %v10447_v2  ;;  %v8894_v21 = vld [vmem:[%s10445_s15 + $0xec] sm:$0xf0]  ;;  %v7320_v24 = vld [vmem:[%s10445_s15 + $0xf0] sm:$0xf0]  ;;  %v7326_v25 = vld [vmem:[%s10445_s15 + $0xd8] sm:$0xf] }
  0x36   : > { %674 = vmatpush.bf16.msra.mxu0 %v7239_v53  ;;  %687 = vmatpush.bf16.msra.mxu1 %v7243_v60  ;;  %v663_v18 = vand.u32 %v7359_v10, %v10447_v2  ;;  %v666_v23 = vand.u32 %v7363_v12, %v10447_v2  ;;  %v8895_v26 = vld [vmem:[%s10445_s15 + $0xf4] sm:$0xf0]  ;;  %v8891_v27 = vld [vmem:[%s10445_s15 + $0xdc] sm:$0xf]  ;;  %v7319_v29 = vor.u32 %v8894_v21, %v7318_v20  ;;  %v7286_v32 = vld [vmem:[%s10445_s15 + $0x90] sm:$0xf] }
  0x37   : > { %700 = vmatpush.bf16.msra.mxu2 %v7247_v61  ;;  %v7328_v28 = vld [vmem:[%s10445_s15 + $0xf8] sm:$0xf0]  ;;  %v7323_v30 = vor.u32 %v8890_v22, %v7320_v24  ;;  %v7327_v31 = vor.u32 %v8895_v26, %v7326_v25  ;;  %v8886_v33 = vld [vmem:[%s10445_s15 + $0xac] sm:$0xf0]  ;;  %v8882_v34 = vld [vmem:[%s10445_s15 + $0x94] sm:$0xf] }
  0x38   : > { %713 = vmatpush.bf16.msra.mxu3 %v7251_v1  ;;  %v7331_v35 = vor.u32 %v8891_v27, %v7328_v28  ;;  %v7288_v36 = vld [vmem:[%s10445_s15 + $0xb0] sm:$0xf0]  ;;  %v7294_v37 = vld [vmem:[%s10445_s15 + $0x98] sm:$0xf]  ;;  %v8883_v39 = vld [vmem:[%s10445_s15 + $0x9c] sm:$0xf]  ;;  %v7287_v41 = vor.u32 %v8886_v33, %v7286_v32 }
  0x39   : > { %v8887_v38 = vld [vmem:[%s10445_s15 + $0xb4] sm:$0xf0]  ;;  %v7296_v40 = vld [vmem:[%s10445_s15 + $0xb8] sm:$0xf0]  ;;  %v7254_v42 = vld [vmem:[%s10445_s15 + $0x50] sm:$0xf]  ;;  %v7291_v44 = vor.u32 %v8882_v34, %v7288_v36 }
  0x3a   : > { %675 = vmatpush.bf16.msra.mxu0 %v7207_v11  ;;  %688 = vmatpush.bf16.msra.mxu1 %v7211_v13  ;;  %v392_v43 = vld [vmem:[%s14609_s2] sm:$0xff]  ;;  %v7295_v45 = vor.u32 %v8887_v38, %v7294_v37  ;;  %v8878_v46 = vld [vmem:[%s10445_s15 + $0x6c] sm:$0xf0]  ;;  %v8874_v47 = vld [vmem:[%s10445_s15 + $0x54] sm:$0xf]  ;;  %v7299_v49 = vor.u32 %v8883_v39, %v7296_v40  ;;  %v10315_v53 = vmov 0  }
  0x3b   : > { %701 = vmatpush.bf16.msra.mxu2 %v7215_v14  ;;  %v7256_v48 = vld [vmem:[%s10445_s15 + $0x70] sm:$0xf0]  ;;  %v7262_v50 = vld [vmem:[%s10445_s15 + $0x58] sm:$0xf]  ;;  %v8875_v52 = vld [vmem:[%s10445_s15 + $0x5c] sm:$0xf]  ;;  %9243 = vset.pattern.permute.xlu0 %v10315_v53  ;;  %v7255_v57 = vor.u32 %v8878_v46, %v7254_v42 }
  0x3c   : > { %714 = vmatpush.bf16.msra.mxu3 %v7219_v15  ;;  %v8879_v51 = vld [vmem:[%s10445_s15 + $0x74] sm:$0xf0]  ;;  %v7264_v54 = vld [vmem:[%s10445_s15 + $0x78] sm:$0xf0]  ;;  %v7546_v55 = vld [vmem:[%s10445_s15 + $0x240] sm:$0xf]  ;;  %441 = vperm.xlu0 %9243, %v392_v43   ;;  %v7259_v58 = vor.u32 %v8874_v47, %v7256_v48 }
  0x3d   : > { %7364 = vmatmul.msk.bf16.vlgmr.msra.gmra.mxu0 %vm636_vm2, %v10507_v19  ;;  %7365 = vmatmul.msk.bf16.vlgmr.msra.gmra.mxu1 %vm636_vm2, %v10507_v19  ;;  %v8940_v56 = vld [vmem:[%s10445_s15 + $0x25c] sm:$0x30]  ;;  %v7263_v59 = vor.u32 %v8879_v51, %v7262_v50  ;;  %v7222_v60 = vld [vmem:[%s10445_s15 + $0x10] sm:$0xf]  ;;  %v8866_v62 = vld [vmem:[%s10445_s15 + $0x14] sm:$0xf]  ;;  %v7267_v63 = vor.u32 %v8875_v52, %v7264_v54 }
  0x3e   : > { %723 = vmatpush.bf16.msrb.mxu0 %v657_v16  ;;  %736 = vmatpush.bf16.msrb.mxu1 %v660_v17  ;;  %v8870_v61 = vld [vmem:[%s10445_s15 + $0x2c] sm:$0xf0]  ;;  %v7224_v0 = vld [vmem:[%s10445_s15 + $0x30] sm:$0xf0]  ;;  %v7230_v1 = vld [vmem:[%s10445_s15 + $0x18] sm:$0xf]  ;;  %v7547_v4 = vor.u32 %v8940_v56, %v7546_v55 }
  0x3f   : > { %749 = vmatpush.bf16.msrb.mxu2 %v663_v18  ;;  %7367 = vmatmul.msk.bf16.vlgmr.msra.gmra.mxu3 %vm636_vm2, %v10507_v19  ;;  %v8871_v3 = vld [vmem:[%s10445_s15 + $0x34] sm:$0xf0]  ;;  %v8867_v5 = vld [vmem:[%s10445_s15 + $0x1c] sm:$0xf]  ;;  %v7223_v7 = vor.u32 %v8870_v61, %v7222_v60  ;;  %v7227_v8 = vor.u32 %v8866_v62, %v7224_v0  ;;  %v7514_v12 = vld [vmem:[%s10445_s15 + $0x200] sm:$0xf] }
  0x40   : > { %762 = vmatpush.bf16.msrb.mxu3 %v666_v23  ;;  %7366 = vmatmul.msk.bf16.vlgmr.msra.gmra.mxu2 %vm636_vm2, %v10507_v19  ;;  %v7232_v6 = vld [vmem:[%s10445_s15 + $0x38] sm:$0xf0]  ;;  %v7231_v9 = vor.u32 %v8871_v3, %v7230_v1  ;;  %v1367_v11 = vand.u32 %v7547_v4, %v10447_v2  ;;  %v8932_v13 = vld [vmem:[%s10445_s15 + $0x21c] sm:$0xf0]  ;;  %v7562_v21 = vld [vmem:[%s10445_s15 + $0x250] sm:$0xf] }
  0x41   : > { %10229 = vset.pattern.permute.xlu1 %v10315_v53  ;;  %v7235_v10 = vor.u32 %v8867_v5, %v7232_v6  ;;  %v7515_v14 = vor.u32 %v8932_v13, %v7514_v12  ;;  %v7482_v15 = vld [vmem:[%s10445_s15 + $0x1c0] sm:$0xf]  ;;  %v8942_v22 = vld [vmem:[%s10445_s15 + $0x26c] sm:$0x30]  ;;  %s14566_s24 = smov 97   ;;  %s14621_s0 = smov 86  }
  0x42   : > { %724 = vmatpush.bf16.msrb.mxu0 %v7319_v29  ;;  %737 = vmatpush.bf16.msrb.mxu1 %v7323_v30  ;;  %v8924_v16 = vld [vmem:[%s10445_s15 + $0x1dc] sm:$0xf0]  ;;  %v7563_v26 = vor.u32 %v8942_v22, %v7562_v21  ;;  %v7530_v29 = vld [vmem:[%s10445_s15 + $0x210] sm:$0xf]  ;;  %s14622_s2 = smov 98   ;;  %s14625_s26 = smov 100  }
  0x43   : > { %750 = vmatpush.bf16.msrb.mxu2 %v7327_v31  ;;  %v7483_v17 = vor.u32 %v8924_v16, %v7482_v15  ;;  %v7450_v18 = vld [vmem:[%s10445_s15 + $0x180] sm:$0xf]  ;;  %v8934_v30 = vld [vmem:[%s10445_s15 + $0x22c] sm:$0xf0]  ;;  %s14626_s19 = smov 124   ;;  %s14633_s23 = smov 113  }
  0x44   : > { %763 = vmatpush.bf16.msrb.mxu3 %v7331_v35  ;;  %v8916_v20 = vld [vmem:[%s10445_s15 + $0x19c] sm:$0xf0]  ;;  %v1379_v28 = vand.u32 %v7563_v26, %v10447_v2  ;;  %v7531_v31 = vor.u32 %v8934_v30, %v7530_v29  ;;  %v7498_v32 = vld [vmem:[%s10445_s15 + $0x1d0] sm:$0xf]  ;;  %s14634_s28 = smov 112   ;;  %s14635_s17 = smov 96  }
  0x45   : > { %v7451_v23 = vor.u32 %v8916_v20, %v7450_v18  ;;  %v7418_v24 = vld [vmem:[%s10445_s15 + $0x140] sm:$0xf]  ;;  %v8926_v33 = vld [vmem:[%s10445_s15 + $0x1ec] sm:$0xf0]  ;;  %s14636_s20 = smov 99  }
  0x46   : > { %725 = vmatpush.bf16.msrb.mxu0 %v7287_v41  ;;  %738 = vmatpush.bf16.msrb.mxu1 %v7291_v44  ;;  %v8908_v25 = vld [vmem:[%s10445_s15 + $0x15c] sm:$0xf0]  ;;  %v7499_v34 = vor.u32 %v8926_v33, %v7498_v32  ;;  %v7466_v35 = vld [vmem:[%s10445_s15 + $0x190] sm:$0xf] }
  0x47   : > { %751 = vmatpush.bf16.msrb.mxu2 %v7295_v45  ;;  %v7419_v27 = vor.u32 %v8908_v25, %v7418_v24  ;;  %v8918_v36 = vld [vmem:[%s10445_s15 + $0x1ac] sm:$0xf0] }
  0x48   : > { %764 = vmatpush.bf16.msrb.mxu3 %v7299_v49  ;;  %v7467_v37 = vor.u32 %v8918_v36, %v7466_v35  ;;  %v7434_v38 = vld [vmem:[%s10445_s15 + $0x150] sm:$0xf] }
  0x49   : > { %v8910_v39 = vld [vmem:[%s10445_s15 + $0x16c] sm:$0xf0] }
  0x4a   : > { %726 = vmatpush.bf16.msrb.mxu0 %v7255_v57  ;;  %739 = vmatpush.bf16.msrb.mxu1 %v7259_v58  ;;  %v7435_v40 = vor.u32 %v8910_v39, %v7434_v38 }
  0x4b   : > { %752 = vmatpush.bf16.msrb.mxu2 %v7263_v59 }
  0x4c   : > { %765 = vmatpush.bf16.msrb.mxu3 %v7267_v63 }
  0x4e   : > { %727 = vmatpush.bf16.msrb.mxu0 %v7223_v7  ;;  %740 = vmatpush.bf16.msrb.mxu1 %v7227_v8 }
  0x4f   : > { %753 = vmatpush.bf16.msrb.mxu2 %v7231_v9 }
  0x50   : > { %766 = vmatpush.bf16.msrb.mxu3 %v7235_v10 }
  0x51   : > { %7368 = vmatmul.msk.bf16.vlgmr.msrb.gmra.mxu0 %vm636_vm2, %v10507_v19  ;;  %7369 = vmatmul.msk.bf16.vlgmr.msrb.gmra.mxu1 %vm636_vm2, %v10507_v19 }
  0x52   : > { %1393 = vmatpush.bf16.msra.mxu1 %v1367_v11  ;;  %7370 = vmatmul.msk.bf16.vlgmr.msrb.gmra.mxu2 %vm636_vm2, %v10507_v19 }
  0x53   : > { %7371 = vmatmul.msk.bf16.vlgmr.msrb.gmra.mxu3 %vm636_vm2, %v10507_v19 }
  0x56   : > { %1394 = vmatpush.bf16.msra.mxu1 %v7515_v14 }
  0x5a   : > { %1395 = vmatpush.bf16.msra.mxu1 %v7483_v17 }
  0x5e   : > { %1396 = vmatpush.bf16.msra.mxu1 %v7451_v23 }
  0x62   : > { %1397 = vmatpush.bf16.msra.mxu1 %v7419_v27 }
  0x65   : > { %7576 = vmatmul.msk.bf16.vlgmr.msra.gmra.mxu1 %vm636_vm2, %v10507_v19 }
  0x66   : > { %1445 = vmatpush.bf16.msrb.mxu1 %v1379_v28 }
  0x6a   : > { %1446 = vmatpush.bf16.msrb.mxu1 %v7531_v31 }
  0x6e   : > { %1447 = vmatpush.bf16.msrb.mxu1 %v7499_v34 }
  0x72   : > { %1448 = vmatpush.bf16.msrb.mxu1 %v7467_v37 }
  0x76   : > { %1449 = vmatpush.bf16.msrb.mxu1 %v7435_v40 }
  0x79   : > { %7580 = vmatmul.msk.bf16.vlgmr.msrb.gmra.mxu1 %vm636_vm2, %v10507_v19 }
  0xae   : > { %v10587_v50 = vpop.permute.xlu0 %441 }
  0xba   : > { %v677_v41 = vpop.f32.mrf.mxu0  ;;  %v690_v42 = vpop.f32.mrf.mxu1 }
  0xbb   : > { %v678_v53 = vadd.f32 %v677_v41, %v10587_v50  ;;  %v691_v56 = vadd.f32 %v690_v42, %v10587_v50 }
  0xbd   : > { %v772_v61 = vmax.f32 %v678_v53, 0.0  ;;  %v773_v4 = vmax.f32 %v691_v56, 0.0 }
  0xc2   : > { %v716_v44 = vpop.f32.mrf.mxu3  ;;  %v679_v45 = vpop.f32.mrf.mxu0 }
  0xc3   : > { %v703_v43 = vpop.f32.mrf.mxu2  ;;  %v692_v46 = vpop.f32.mrf.mxu1  ;;  %v717_v57 = vadd.f32 %v716_v44, %v10587_v50 }
  0xc4   : > { %v704_v54 = vadd.f32 %v703_v43, %v10587_v50 }
  0xc5   : > { %v775_v5 = vmax.f32 %v717_v57, 0.0 }
  0xc6   : > { %v774_v62 = vmax.f32 %v704_v54, 0.0 }
  0xc7   : > { %v781_v11 = vmax.f32 %v773_v4, %v775_v5 }
  0xc8   : > { %v780_v9 = vmax.f32 %v772_v61, %v774_v62 }
  0xca   : > { %v718_v48 = vpop.f32.mrf.mxu3 }
  0xcb   : > { %v705_v47 = vpop.f32.mrf.mxu2 }
  0xce   : > { %v729_v49 = vpop.f32.mrf.mxu0  ;;  %v742_v51 = vpop.f32.mrf.mxu1 }
  0xcf   : > { %v730_v52 = vadd.f32 %v729_v49, %v10587_v50  ;;  %v743_v55 = vadd.f32 %v742_v51, %v10587_v50 }
  0xd1   : > { %v776_v59 = vmax.f32 %v730_v52, 0.0  ;;  %v777_v1 = vmax.f32 %v743_v55, 0.0 }
  0xd5   : > { %v755_v58 = vpop.f32.mrf.mxu2 }
  0xd6   : > { %v756_v60 = vadd.f32 %v755_v58, %v10587_v50  ;;  %v768_v63 = vpop.f32.mrf.mxu3  ;;  %v731_v0 = vpop.f32.mrf.mxu0 }
  0xd7   : > { %v769_v3 = vadd.f32 %v768_v63, %v10587_v50  ;;  %v744_v6 = vpop.f32.mrf.mxu1 }
  0xd8   : > { %v778_v7 = vmax.f32 %v756_v60, 0.0 }
  0xd9   : > { %v779_v8 = vmax.f32 %v769_v3, 0.0 }
  0xda   : > { %v782_v10 = vmax.f32 %v776_v59, %v778_v7 }
  0xdb   : > { %v783_v12 = vmax.f32 %v777_v1, %v779_v8 }
  0xdc   : > { %v10597_v13 = vmax.f32 %v780_v9, %v782_v10 }
  0xdd   : > { %v10599_v14 = vmax.f32 %v781_v11, %v783_v12  ;;  %v757_v15 = vpop.f32.mrf.mxu2 }
  0xde   : > { %v770_v16 = vpop.f32.mrf.mxu3 }
  0xdf   : > { %v10603_v17 = vpack.i.bf16 %v10599_v14, %v10597_v13  ;;  %v9294_v21 = vpack.i.bf16 %v10597_v13, %v10599_v14 }
  0xe1   : > { %9260 = vrot.lane.b32.xlu2 %v10603_v17, %s14539_s25  ;;  %9250 = vrot.lane.b32.xlu1 %v10603_v17, %s14570_s30  ;;  %s14564_s25 = smov 86  }
  0xe2   : > { %v10605_v18 = vpop.f32.mrf.mxu1  ;;  %9245 = vrot.lane.b32.xlu0 %v10603_v17, %s14549_s12  ;;  %s14558_s12 = smov 110  }
  0xe9   : > { %9265 = vrot.lane.b32.xlu2 %v10603_v17, %s14541_s13  ;;  %9255 = vrot.lane.b32.xlu1 %v10603_v17, %s14568_s14  ;;  %s14574_s13 = smov 96  }
  0xea   : > { %v1401_v20 = vpop.f32.mrf.mxu1  ;;  %9270 = vrot.lane.b32.xlu0 %v10603_v17, %s14543_s16  ;;  %s14553_s16 = smov 100  }
  0xf1   : > { %9280 = vrot.lane.b32.xlu2 %v10603_v17, %s14545_s21  ;;  %9275 = vrot.lane.b32.xlu1 %v10603_v17, %s14547_s22  ;;  %s14551_s21 = smov 98   ;;  %s14572_s22 = smov 99  }
  0xf2   : > { %9295 = vrot.lane.b32.xlu0 %v9294_v21, %s14566_s24  ;;  %s14618_s24 = smov 127  }
  0xf6   : > { %v10625_v22 = vpop.f32.mrf.mxu1 }
  0xf9   : > { %9285 = vrot.lane.b32.xlu2 %v9294_v21, %s14564_s25  ;;  %9290 = vrot.lane.b32.xlu1 %v9294_v21, %s14574_s13  ;;  %s14617_s25 = smov 114  }
  0xfa   : > { %862 = vrot.lane.b32.xlu0 %v10599_v14, %s14553_s16 }
  0xfe   : > { %v1453_v23 = vpop.f32.mrf.mxu1 }
 0x101   : > { %9300 = vrot.lane.b32.xlu2 %v9294_v21, %s14551_s21  ;;  %9305 = vrot.lane.b32.xlu1 %v9294_v21, %s14572_s22  ;;  %s14562_s21 = smov 85  }
 0x109   : > { %854 = vrot.lane.b32.xlu2 %v10599_v14, %s14558_s12 }
 0x13b   : > { %v9261_v24 = vpop.permute.xlu2 %9260 }
 0x13c   : > { %v10636_v25 = vunpack.i.h.bf16 %v9261_v24  ;;  %v9262_v26 = vunpack.i.l.bf16 %v9261_v24 }
 0x13e   : > { %v10640_v27 = vsel %vm824_vm3, %v9262_v26, %v10636_v25 }
 0x13f   : > { %v9324_v28 = vpack.i.bf16 %v10636_v25, %v10640_v27 }
 0x141   : > { %9325 = vrot.lane.b32.xlu2 %v9324_v28, %s14562_s21 }
 0x143   : > { %v9266_v29 = vpop.permute.xlu2 %9265 }
 0x144   : > { %v9268_v44 = vunpack.i.h.bf16 %v9266_v29  ;;  %v9267_v45 = vunpack.i.l.bf16 %v9266_v29 }
 0x146   : > { %v913_v51 = vsel %vm912_vm7, %v9267_v45, %v9268_v44 }
 0x147   : > { %v9329_v54 = vpack.i.bf16 %v9268_v44, %v913_v51 }
 0x14b   : > { %v9281_v30 = vpop.permute.xlu2 %9280 }
 0x14c   : > { %v10679_v56 = vunpack.i.h.bf16 %v9281_v30  ;;  %v9282_v57 = vunpack.i.l.bf16 %v9281_v30 }
 0x14e   : > { %v10689_v63 = vsel %vm792_vm9, %v9282_v57, %v10679_v56 }
 0x14f   : > { %v9349_v4 = vpack.i.bf16 %v10679_v56, %v10689_v63 }
 0x153   : > { %v10645_v31 = vpop.permute.xlu2 %9285  ;;  %v9251_v32 = vpop.permute.xlu1 %9250 }
 0x154   : > { %v9288_v33 = vunpack.i.h.bf16 %v10645_v31  ;;  %v9287_v34 = vunpack.i.l.bf16 %v10645_v31  ;;  %v10649_v35 = vunpack.i.h.bf16 %v9251_v32  ;;  %v9252_v36 = vunpack.i.l.bf16 %v9251_v32  ;;  %v9246_v37 = vpop.permute.xlu0 %9245 }
 0x155   : > { %v10651_v38 = vunpack.i.h.bf16 %v9246_v37  ;;  %v9247_v39 = vunpack.i.l.bf16 %v9246_v37 }
 0x156   : > { %v905_v40 = vsel %vm904_vm4, %v9288_v33, %v9287_v34  ;;  %v10658_v41 = vsel %vm840_vm5, %v9252_v36, %v10649_v35 }
 0x157   : > { %995 = vmatpush.msra.mxu0 %v905_v40  ;;  %v9314_v42 = vpack.i.bf16 %v10649_v35, %v10658_v41  ;;  %v10664_v43 = vsel %vm848_vm6, %v9247_v39, %v10651_v38 }
 0x158   : > { %v9309_v46 = vpack.i.bf16 %v10651_v38, %v10664_v43 }
 0x159   : > { %9315 = vrot.lane.b32.xlu1 %v9314_v42, %s14562_s21 }
 0x15a   : > { %9310 = vrot.lane.b32.xlu0 %v9309_v46, %s14562_s21 }
 0x15b   : > { %v9256_v47 = vpop.permute.xlu1 %9255  ;;  %v10712_v8 = vpop.permute.xlu2 %9300 }
 0x15c   : > { %v10670_v48 = vunpack.i.h.bf16 %v9256_v47  ;;  %v9257_v49 = vunpack.i.l.bf16 %v9256_v47  ;;  %v9271_v52 = vpop.permute.xlu0 %9270  ;;  %v9303_v16 = vunpack.i.h.bf16 %v10712_v8  ;;  %v9302_v20 = vunpack.i.l.bf16 %v10712_v8  ;;  %v7420_v8 = vld [vmem:[%s10445_s15 + $0x160] sm:$0xf0] }
 0x15d   : > { %v10681_v58 = vunpack.i.h.bf16 %v9271_v52  ;;  %v9272_v59 = vunpack.i.l.bf16 %v9271_v52 }
 0x15e   : > { %v10675_v53 = vsel %vm832_vm8, %v9257_v49, %v10670_v48  ;;  %v881_v24 = vsel %vm880_vm14, %v9303_v16, %v9302_v20 }
 0x15f   : > { %v9319_v55 = vpack.i.bf16 %v10670_v48, %v10675_v53  ;;  %v10693_v0 = vsel %vm808_vm10, %v9272_v59, %v10681_v58 }
 0x160   : > { %v9334_v5 = vpack.i.bf16 %v10681_v58, %v10693_v0 }
 0x161   : > { %9330 = vrot.lane.b32.xlu1 %v9329_v54, %s14562_s21 }
 0x162   : > { %9320 = vrot.lane.b32.xlu0 %v9319_v55, %s14562_s21 }
 0x163   : > { %v9276_v60 = vpop.permute.xlu1 %9275  ;;  %v10748_v30 = vpop.permute.xlu2 %854 }
 0x164   : > { %v10685_v61 = vunpack.i.h.bf16 %v9276_v60  ;;  %v9277_v62 = vunpack.i.l.bf16 %v9276_v60  ;;  %v10707_v6 = vpop.permute.xlu0 %9295 }
 0x165   : > { %v9298_v11 = vunpack.i.h.bf16 %v10707_v6  ;;  %v9297_v12 = vunpack.i.l.bf16 %v10707_v6 }
 0x166   : > { %v10697_v1 = vsel %vm800_vm11, %v9277_v62, %v10685_v61 }
 0x167   : > { %v9344_v3 = vpack.i.bf16 %v10685_v61, %v10697_v1  ;;  %v889_v21 = vsel %vm14584_vm13, %v9298_v11, %v9297_v12 }
 0x169   : > { %9345 = vrot.lane.b32.xlu2 %v9344_v3, %s14562_s21  ;;  %9350 = vrot.lane.b32.xlu1 %v9349_v4, %s14562_s21 }
 0x16a   : > { %9335 = vrot.lane.b32.xlu0 %v9334_v5, %s14562_s21 }
 0x16b   : > { %v10710_v7 = vpop.permute.xlu1 %9290 }
 0x16c   : > { %v9293_v9 = vunpack.i.h.bf16 %v10710_v7  ;;  %v9292_v10 = vunpack.i.l.bf16 %v10710_v7  ;;  %v8938_v7 = vld [vmem:[%s10445_s15 + $0x254] sm:$0xf] }
 0x16e   : > { %v897_v15 = vsel %vm14577_vm12, %v9293_v9, %v9292_v10 }
 0x16f   : > { %996 = vmatpush.msra.mxu0 %v897_v15 }
 0x171   : > { %852 = vrot.lane.b32.xlu2 %v10597_v13, %s14558_s12  ;;  %860 = vrot.lane.b32.xlu1 %v10597_v13, %s14553_s16  ;;  %s14556_s16 = smov 124   ;;  %s14614_s12 = smov 111  }
 0x172   : > { %997 = vmatpush.msra.mxu0 %v889_v21  ;;  %9340 = vrot.lane.b32.xlu0 %v10603_v17, %s14562_s21  ;;  %v10746_v17 = vpop.permute.xlu0 %862  ;;  %v8936_v21 = vld [vmem:[%s10445_s15 + $0x244] sm:$0xf]  ;;  %s14616_s21 = smov 115  }
 0x173   : > { %v10732_v23 = vpop.permute.xlu1 %9305 }
 0x174   : > { %v9308_v26 = vunpack.i.h.bf16 %v10732_v23  ;;  %v9307_v28 = vunpack.i.l.bf16 %v10732_v23  ;;  %998 = vmatpush.msra.mxu0 %v881_v24  ;;  %v7548_v24 = vld [vmem:[%s10445_s15 + $0x260] sm:$0x30] }
 0x176   : > { %v873_v29 = vsel %vm14555_vm15, %v9308_v26, %v9307_v28  ;;  %vm14561_vm15 = vcmask 900096  }
 0x177   : > { %999 = vmatpush.msra.mxu0 %v873_v29 }
 0x179   : > { %812 = vrot.lane.b32.xlu1 %v10597_v13, %s14556_s16 }
 0x17a   : > { %814 = vrot.lane.b32.xlu0 %v10599_v14, %s14556_s16  ;;  %s14615_s16 = smov 125  }
 0x19b   : > { %v9326_v44 = vpop.permute.xlu2 %9325 }
 0x19c   : > { %v9328_v49 = vunpack.i.h.bf16 %v9326_v44  ;;  %v9327_v51 = vunpack.i.l.bf16 %v9326_v44 }
 0x19e   : > { %v956_v62 = vsel %vm14578_vm0, %v9327_v51, %v9328_v49  ;;  %v7516_v51 = vld [vmem:[%s10445_s15 + $0x220] sm:$0xf0] }
 0x1c3   : > { %v9346_v60 = vpop.permute.xlu2 %9345 }
 0x1c4   : > { %v9348_v9 = vunpack.i.h.bf16 %v9346_v60  ;;  %v9347_v11 = vunpack.i.l.bf16 %v9346_v60  ;;  %v7484_v60 = vld [vmem:[%s10445_s15 + $0x1e0] sm:$0xf0] }
 0x1cb   : > { %v9316_v32 = vpop.permute.xlu1 %9315 }
 0x1cc   : > { %v9311_v33 = vpop.permute.xlu0 %9310  ;;  %v9318_v36 = vunpack.i.h.bf16 %v9316_v32  ;;  %v9317_v37 = vunpack.i.l.bf16 %v9316_v32 }
 0x1cd   : > { %v9313_v39 = vunpack.i.h.bf16 %v9311_v33  ;;  %v9312_v40 = vunpack.i.l.bf16 %v9311_v33  ;;  %v7551_v33 = vor.u32 %v8936_v21, %v7548_v24  ;;  %v8925_v21 = vld [vmem:[%s10445_s15 + $0x1e4] sm:$0xf0]  ;;  %v7556_v24 = vld [vmem:[%s10445_s15 + $0x268] sm:$0x30] }
 0x1ce   : > { %v958_v45 = vsel %vm14578_vm0, %v9317_v37, %v9318_v36  ;;  %v853_v37 = vpop.permute.xlu2 %852 }
 0x1cf   : > { %1071 = vmatpush.msra.mxu3 %v9313_v39  ;;  %v959_v42 = vsel %vm14578_vm0, %v9312_v40, %v9313_v39 }
 0x1d0   : > { %1025 = vmatpush.msra.mxu2 %v959_v42 }
 0x1d1   : > { %1072 = vmatpush.msra.mxu3 %v9318_v36  ;;  %v953_v36 = vsel %vm14578_vm0, %v9347_v11, %v9348_v9  ;;  %v7532_v11 = vld [vmem:[%s10445_s15 + $0x230] sm:$0xf0] }
 0x1d2   : > { %1026 = vmatpush.msra.mxu2 %v958_v45  ;;  %v1370_v45 = vand.u32 %v7551_v33, %v10447_v2 }
 0x1d3   : > { %v9331_v46 = vpop.permute.xlu1 %9330 }
 0x1d4   : > { %v9321_v47 = vpop.permute.xlu0 %9320  ;;  %v9333_v55 = vunpack.i.h.bf16 %v9331_v46  ;;  %v9332_v57 = vunpack.i.l.bf16 %v9331_v46 }
 0x1d5   : > { %v9323_v52 = vunpack.i.h.bf16 %v9321_v47  ;;  %v9322_v54 = vunpack.i.l.bf16 %v9321_v47 }
 0x1d6   : > { %v955_v4 = vsel %vm14578_vm0, %v9332_v57, %v9333_v55 }
 0x1d7   : > { %1073 = vmatpush.msra.mxu3 %v9323_v52  ;;  %v957_v59 = vsel %vm14578_vm0, %v9322_v54, %v9323_v52  ;;  %v857_v52 = vsel %vm14561_vm15, %v853_v37, %v10748_v30  ;;  %vm816_vm15 = vcmask 1014784   ;;  %v8917_v37 = vld [vmem:[%s10445_s15 + $0x1a4] sm:$0xf0] }
 0x1d8   : > { %1027 = vmatpush.msra.mxu2 %v957_v59  ;;  %v8920_v59 = vld [vmem:[%s10445_s15 + $0x1c4] sm:$0xf] }
 0x1d9   : > { %1074 = vmatpush.msra.mxu3 %v9328_v49  ;;  %v8928_v49 = vld [vmem:[%s10445_s15 + $0x204] sm:$0xf]  ;;  %v7487_v31 = vor.u32 %v8920_v59, %v7484_v60  ;;  %v8921_v60 = vld [vmem:[%s10445_s15 + $0x1cc] sm:$0xf] }
 0x1da   : > { %1028 = vmatpush.msra.mxu2 %v956_v62  ;;  %v7519_v57 = vor.u32 %v8928_v49, %v7516_v51  ;;  %v8912_v62 = vld [vmem:[%s10445_s15 + $0x184] sm:$0xf]  ;;  %v8909_v51 = vld [vmem:[%s10445_s15 + $0x164] sm:$0xf0] }
 0x1db   : > { %1075 = vmatpush.msra.mxu3 %v9333_v55  ;;  %v9351_v3 = vpop.permute.xlu1 %9350  ;;  %v10771_v55 = vld [vmem:[%s14530_s3 + $0x8] sm:$0xff] }
 0x1dc   : > { %v9336_v5 = vpop.permute.xlu0 %9335  ;;  %1029 = vmatpush.msra.mxu2 %v955_v4  ;;  %v9353_v26 = vunpack.i.h.bf16 %v9351_v3  ;;  %v9352_v29 = vunpack.i.l.bf16 %v9351_v3  ;;  %v7452_v3 = vld [vmem:[%s10445_s15 + $0x1a0] sm:$0xf0]  ;;  %v7554_v4 = vld [vmem:[%s10445_s15 + $0x248] sm:$0xf] }
 0x1dd   : > { %v9338_v15 = vunpack.i.h.bf16 %v9336_v5  ;;  %v9337_v16 = vunpack.i.l.bf16 %v9336_v5  ;;  %v7455_v6 = vor.u32 %v8912_v62, %v7452_v3  ;;  %v8913_v3 = vld [vmem:[%s10445_s15 + $0x18c] sm:$0xf] }
 0x1de   : > { %v952_v40 = vsel %vm14578_vm0, %v9352_v29, %v9353_v26  ;;  %v7468_v29 = vld [vmem:[%s10445_s15 + $0x1b0] sm:$0xf0] }
 0x1df   : > { %1076 = vmatpush.msra.mxu3 %v9338_v15  ;;  %v954_v32 = vsel %vm14578_vm0, %v9337_v16, %v9338_v15  ;;  %v8922_v15 = vld [vmem:[%s10445_s15 + $0x1d4] sm:$0xf]  ;;  %v7490_v16 = vld [vmem:[%s10445_s15 + $0x1c8] sm:$0xf] }
 0x1e0   : > { %1030 = vmatpush.msra.mxu2 %v954_v32  ;;  %v7491_v32 = vor.u32 %v8925_v21, %v7490_v16  ;;  %v7508_v16 = vld [vmem:[%s10445_s15 + $0x1f8] sm:$0xf0] }
 0x1e1   : > { %1077 = vmatpush.msra.mxu3 %v9348_v9  ;;  %v8930_v9 = vld [vmem:[%s10445_s15 + $0x214] sm:$0xf] }
 0x1e2   : > { %1031 = vmatpush.msra.mxu2 %v953_v36  ;;  %v7458_v36 = vld [vmem:[%s10445_s15 + $0x188] sm:$0xf] }
 0x1e3   : > { %1078 = vmatpush.msra.mxu3 %v9353_v26  ;;  %v861_v39 = vpop.permute.xlu1 %860  ;;  %v8914_v26 = vld [vmem:[%s10445_s15 + $0x194] sm:$0xf] }
 0x1e4   : > { %v9341_v42 = vpop.permute.xlu0 %9340  ;;  %1032 = vmatpush.msra.mxu2 %v952_v40  ;;  %v865_v44 = vsel %vm14560_vm1, %v861_v39, %v10746_v17  ;;  %vm988_vm1 = vcmask 588800   ;;  %v7471_v33 = vor.u32 %v8914_v26, %v7468_v29  ;;  %v8906_v39 = vld [vmem:[%s10445_s15 + $0x154] sm:$0xf]  ;;  %v8907_v29 = vld [vmem:[%s10445_s15 + $0x15c] sm:$0xf] }
 0x1e5   : > { %v9343_v46 = vunpack.i.h.bf16 %v9341_v42  ;;  %v9342_v47 = vunpack.i.l.bf16 %v9341_v42  ;;  %1000 = vmatpush.msra.mxu0 %v865_v44  ;;  %v7436_v40 = vld [vmem:[%s10445_s15 + $0x170] sm:$0xf0]  ;;  %v7570_v42 = vld [vmem:[%s10445_s15 + $0x258] sm:$0xf] }
 0x1e6   : > { %v8943_v44 = vld [vmem:[%s10445_s15 + $0x274] sm:$0x30]  ;;  %v7439_v49 = vor.u32 %v8906_v39, %v7436_v40 }
 0x1e7   : > { %1079 = vmatpush.msra.mxu3 %v9343_v46  ;;  %1001 = vmatpush.msra.mxu0 %v857_v52  ;;  %v951_v54 = vsel %vm14578_vm0, %v9342_v47, %v9343_v46  ;;  %v7426_v47 = vld [vmem:[%s10445_s15 + $0x148] sm:$0xf]  ;;  %v7524_v52 = vld [vmem:[%s10445_s15 + $0x228] sm:$0xf0] }
 0x1e8   : > { %1033 = vmatpush.msra.mxu2 %v951_v54  ;;  %7374 = vmatmul.msk.f32.vlgmr.msra.gmra.mxu3 %vm988_vm1, %v10771_v55  ;;  %v7571_v54 = vor.u32 %v8943_v44, %v7570_v42 }
 0x1e9   : > { %1406 = vmatpush.bf16.msrb.mxu3 %v1370_v45  ;;  %1002 = vmatpush.msra.mxu0 %v10664_v43  ;;  %v10854_v45 = vld [vmem:[%s14530_s3 + $0x10] sm:$0xff] }
 0x1ea   : > { %1041 = vmatpush.msrb.mxu2 %v9287_v34  ;;  %v1385_v59 = vand.u32 %v7571_v54, %v10447_v2 }
 0x1eb   : > { %7372 = vmatmul.msk.f32.vlgmr.msra.gmra.mxu2 %vm988_vm1, %v10771_v55  ;;  %1003 = vmatpush.msra.mxu0 %v10658_v41  ;;  %v813_v34 = vpop.permute.xlu1 %812  ;;  %v10798_v41 = vld [vmem:[%s14530_s3 + $0x18] sm:$0xff] }
 0x1ec   : > { %1042 = vmatpush.msrb.mxu2 %v9292_v10  ;;  %v815_v43 = vpop.permute.xlu0 %814  ;;  %v7564_v10 = vld [vmem:[%s10445_s15 + $0x270] sm:$0x30] }
 0x1ed   : > { %1407 = vmatpush.bf16.msrb.mxu3 %v7519_v57  ;;  %1004 = vmatpush.msra.mxu0 %v10675_v53  ;;  %v817_v53 = vsel %vm816_vm15, %v813_v34, %v815_v43  ;;  %v7427_v57 = vor.u32 %v8909_v51, %v7426_v47  ;;  %v7538_v34 = vld [vmem:[%s10445_s15 + $0x218] sm:$0xf] }
 0x1ee   : > { %1043 = vmatpush.msrb.mxu2 %v9297_v12  ;;  %v8904_v12 = vld [vmem:[%s10445_s15 + $0x144] sm:$0xf] }
 0x1ef   : > { %1005 = vmatpush.msra.mxu0 %v10640_v27  ;;  %v8941_v27 = vld [vmem:[%s10445_s15 + $0x264] sm:$0x30]  ;;  %v7423_v23 = vor.u32 %v8904_v12, %v7420_v8  ;;  %v7572_v12 = vld [vmem:[%s10445_s15 + $0x278] sm:$0x30] }
 0x1f0   : > { %1044 = vmatpush.msrb.mxu2 %v9302_v20  ;;  %v7567_v20 = vor.u32 %v8938_v7, %v7564_v10  ;;  %7375 = vmatmul.msk.f32.gmra.mxu3 %vm988_vm1, %v10798_v41  ;;  %v7460_v7 = vld [vmem:[%s10445_s15 + $0x1a8] sm:$0xf0]  ;;  %v7506_v10 = vld [vmem:[%s10445_s15 + $0x1d8] sm:$0xf] }
 0x1f1   : > { %1408 = vmatpush.bf16.msrb.mxu3 %v7487_v31  ;;  %1006 = vmatpush.msra.mxu0 %v817_v53  ;;  %v7492_v31 = vld [vmem:[%s10445_s15 + $0x1e8] sm:$0xf0]  ;;  %v8927_v53 = vld [vmem:[%s10445_s15 + $0x1f4] sm:$0xf0]  ;;  %v7463_v8 = vor.u32 %v8913_v3, %v7460_v7 }
 0x1f2   : > { %1045 = vmatpush.msrb.mxu2 %v9307_v28  ;;  %v7555_v28 = vor.u32 %v8941_v27, %v7554_v4  ;;  %v1382_v5 = vand.u32 %v7567_v20, %v10447_v2  ;;  %v7507_v20 = vor.u32 %v8927_v53, %v7506_v10  ;;  %v8905_v4 = vld [vmem:[%s10445_s15 + $0x14c] sm:$0xf] }
 0x1f3   : > { %7373 = vmatmul.msk.f32.gmra.mxu2 %vm988_vm1, %v10798_v41  ;;  %1007 = vmatpush.msra.mxu0 %v10693_v0  ;;  %v7428_v27 = vld [vmem:[%s10445_s15 + $0x168] sm:$0xf0] }
 0x1f4   : > { %1046 = vmatpush.msrb.mxu2 %v10746_v17  ;;  %v1373_v0 = vand.u32 %v7555_v28, %v10447_v2  ;;  %v7535_v17 = vor.u32 %v8930_v9, %v7532_v11  ;;  %v7474_v28 = vld [vmem:[%s10445_s15 + $0x198] sm:$0xf]  ;;  %v7431_v9 = vor.u32 %v8905_v4, %v7428_v27 }
 0x1f5   : > { %1409 = vmatpush.bf16.msrb.mxu3 %v7455_v6  ;;  %1008 = vmatpush.msra.mxu0 %v10697_v1  ;;  %v8933_v1 = vld [vmem:[%s10445_s15 + $0x224] sm:$0xf0]  ;;  %v8939_v6 = vld [vmem:[%s10445_s15 + $0x25c] sm:$0xf] }
 0x1f6   : > { %1047 = vmatpush.msrb.mxu2 %v10748_v30  ;;  %v7522_v30 = vld [vmem:[%s10445_s15 + $0x208] sm:$0xf] }
 0x1f7   : > { %1009 = vmatpush.msra.mxu0 %v10689_v63  ;;  %v7523_v63 = vor.u32 %v8933_v1, %v7522_v30  ;;  %v8931_v30 = vld [vmem:[%s10445_s15 + $0x21c] sm:$0xf] }
 0x1f8   : > { %1048 = vmatpush.msrb.mxu2 %v10651_v38  ;;  %v7500_v38 = vld [vmem:[%s10445_s15 + $0x1f0] sm:$0xf0]  ;;  %v7540_v1 = vld [vmem:[%s10445_s15 + $0x238] sm:$0xf0] }
 0x1f9   : > { %1410 = vmatpush.bf16.msrb.mxu3 %v7423_v23  ;;  %1010 = vmatpush.msra.mxu0 %v10597_v13  ;;  %v7503_v13 = vor.u32 %v8922_v15, %v7500_v38  ;;  %v7575_v23 = vor.u32 %v8939_v6, %v7572_v12  ;;  %v7543_v38 = vor.u32 %v8931_v30, %v7540_v1 }
 0x1fa   : > { %1049 = vmatpush.msrb.mxu2 %v10649_v35  ;;  %v10833_v35 = vld [vmem:[%s14530_s3] sm:$0xff] }
 0x1fb   : > { %1419 = vmatpush.bf16.msrb.mxu0 %v1373_v0  ;;  %v1388_v11 = vand.u32 %v7575_v23, %v10447_v2  ;;  %v7442_v0 = vld [vmem:[%s10445_s15 + $0x158] sm:$0xf] }
 0x1fc   : > { %1050 = vmatpush.msrb.mxu2 %v10670_v48  ;;  %7577 = vmatmul.msk.bf16.vlgmr.msrb.gmra.mxu3 %vm636_vm2, %v10507_v19  ;;  %v8937_v48 = vld [vmem:[%s10445_s15 + $0x24c] sm:$0xf] }
 0x1fd   : > { %1458 = vmatpush.bf16.msra.mxu3 %v1382_v5  ;;  %1011 = vmatmul.f32.vlgmr.msra.gmra.mxu0 %v10833_v35  ;;  %v8919_v5 = vld [vmem:[%s10445_s15 + $0x1b4] sm:$0xf0] }
 0x1fe   : > { %1051 = vmatpush.msrb.mxu2 %v10636_v25  ;;  %v7559_v25 = vor.u32 %v8937_v48, %v7556_v24  ;;  %v8915_v48 = vld [vmem:[%s10445_s15 + $0x19c] sm:$0xf] }
 0x1ff   : > { %1420 = vmatpush.bf16.msrb.mxu0 %v7523_v63  ;;  %v8923_v63 = vld [vmem:[%s10445_s15 + $0x1dc] sm:$0xf] }
 0x200   : > { %1052 = vmatpush.msrb.mxu2 %v815_v43  ;;  %v1376_v46 = vand.u32 %v7559_v25, %v10447_v2  ;;  %v8935_v43 = vld [vmem:[%s10445_s15 + $0x234] sm:$0xf0]  ;;  %v7511_v21 = vor.u32 %v8923_v63, %v7508_v16  ;;  %v7476_v24 = vld [vmem:[%s10445_s15 + $0x1b8] sm:$0xf0] }
 0x201   : > { %1459 = vmatpush.bf16.msra.mxu3 %v7535_v17  ;;  %v7539_v62 = vor.u32 %v8935_v43, %v7538_v34  ;;  %v8911_v17 = vld [vmem:[%s10445_s15 + $0x174] sm:$0xf0]  ;;  %v7479_v26 = vor.u32 %v8915_v48, %v7476_v24 }
 0x202   : > { %1053 = vmatpush.msrb.mxu2 %v10681_v58  ;;  %v7459_v58 = vor.u32 %v8917_v37, %v7458_v36  ;;  %v7443_v15 = vor.u32 %v8911_v17, %v7442_v0 }
 0x203   : > { %1421 = vmatpush.bf16.msrb.mxu0 %v7491_v32  ;;  %v7444_v32 = vld [vmem:[%s10445_s15 + $0x178] sm:$0xf0] }
 0x204   : > { %1054 = vmatpush.msrb.mxu2 %v10685_v61  ;;  %v8929_v61 = vld [vmem:[%s10445_s15 + $0x20c] sm:$0xf]  ;;  %v7447_v25 = vor.u32 %v8907_v29, %v7444_v32 }
 0x205   : > { %1460 = vmatpush.bf16.msra.mxu3 %v7503_v13  ;;  %1014 = vmatmul.f32.gmra.mxu0 %v10854_v45  ;;  %v10895_v13 = vld [vmem:[%s14528_s1] sm:$0xf] }
 0x206   : > { %1055 = vmatpush.msrb.mxu2 %v10679_v56  ;;  %v7527_v56 = vor.u32 %v8929_v61, %v7524_v52 }
 0x207   : > { %1422 = vmatpush.bf16.msrb.mxu0 %v7459_v58 }
 0x208   : > { %1056 = vmatpush.msrb.mxu2 %v10599_v14  ;;  %v7495_v14 = vor.u32 %v8921_v60, %v7492_v31 }
 0x209   : > { %1461 = vmatpush.bf16.msra.mxu3 %v7471_v33  ;;  %1057 = vmatmul.f32.vlgmr.msrb.gmra.mxu2 %v10833_v35 }
 0x20a   : > { %1432 = vmatpush.bf16.msra.mxu2 %v1376_v46 }
 0x20b   : > { %1423 = vmatpush.bf16.msrb.mxu0 %v7427_v57  ;;  %v1400_v57 = vadd.f32 %v10605_v18, %v10587_v50 }
 0x20d   : > { %1462 = vmatpush.bf16.msra.mxu3 %v7439_v49  ;;  %v1494_v43 = vmax.f32 %v1400_v57, 0.0 }
 0x20e   : > { %1433 = vmatpush.bf16.msra.mxu2 %v7527_v56  ;;  %7578 = vmatmul.msk.bf16.vlgmr.msrb.gmra.mxu0 %vm636_vm2, %v10507_v19  ;;  %v1452_v56 = vadd.f32 %v10625_v22, %v10587_v50 }
 0x20f   : > { %1471 = vmatpush.bf16.msra.mxu0 %v1385_v59 }
 0x210   : > { %7581 = vmatmul.msk.bf16.vlgmr.msra.gmra.mxu3 %vm636_vm2, %v10507_v19  ;;  %v7475_v19 = vor.u32 %v8919_v5, %v7474_v28 }
 0x211   : > { %1060 = vmatmul.f32.gmra.mxu2 %v10854_v45 }
 0x212   : > { %1434 = vmatpush.bf16.msra.mxu2 %v7495_v14  ;;  %v1498_v14 = vmax.f32 %v1452_v56, 0.0 }
 0x213   : > { %1472 = vmatpush.bf16.msra.mxu0 %v7539_v62 }
 0x216   : > { %1435 = vmatpush.bf16.msra.mxu2 %v7463_v8 }
 0x217   : > { %1473 = vmatpush.bf16.msra.mxu0 %v7507_v20 }
 0x21a   : > { %1436 = vmatpush.bf16.msra.mxu2 %v7431_v9 }
 0x21b   : > { %1474 = vmatpush.bf16.msra.mxu0 %v7475_v19 }
 0x21d   : > { %7579 = vmatmul.msk.bf16.vlgmr.msra.gmra.mxu2 %vm636_vm2, %v10895_v13 }
 0x21e   : > { %1484 = vmatpush.bf16.msrb.mxu2 %v1388_v11 }
 0x21f   : > { %1475 = vmatpush.bf16.msra.mxu0 %v7443_v15 }
 0x222   : > { %1485 = vmatpush.bf16.msrb.mxu2 %v7543_v38  ;;  %7582 = vmatmul.msk.bf16.vlgmr.msra.gmra.mxu0 %vm636_vm2, %v10895_v13 }
 0x226   : > { %1486 = vmatpush.bf16.msrb.mxu2 %v7511_v21 }
 0x22a   : > { %1487 = vmatpush.bf16.msrb.mxu2 %v7479_v26 }
 0x22e   : > { %1488 = vmatpush.bf16.msrb.mxu2 %v7447_v25 }
 0x231   : > { %7583 = vmatmul.msk.bf16.vlgmr.msrb.gmra.mxu2 %vm636_vm2, %v10895_v13 }
 0x26b   : > { %v10907_v33 = vpop.f32.mrf.mxu3 }
 0x26e   : > { %v10911_v37 = vpop.f32.mrf.mxu2 }
 0x273   : > { %v10909_v36 = vpop.f32.mrf.mxu3 }
 0x274   : > { %14610 = vst [vmem:[#allocation13_spill] sm:$0xff] %v10909_v36 }
 0x276   : > { %v10915_v42 = vpop.f32.mrf.mxu2 }
 0x277   : > { %14611 = vst [vmem:[#allocation14_spill] sm:$0xff] %v10915_v42 }
 0x27a   : > { %v10913_v39 = vpop.f32.mrf.mxu0 }
 0x27f   : > { %v1412_v40 = vpop.f32.mrf.mxu3 }
 0x280   : > { %v1413_v18 = vadd.f32 %v1412_v40, %v10587_v50 }
 0x282   : > { %v10917_v44 = vpop.f32.mrf.mxu0  ;;  %v1495_v27 = vmax.f32 %v1413_v18, 0.0 }
 0x283   : > { %14612 = vst [vmem:[#allocation15_spill] sm:$0xff] %v10917_v44 }
 0x287   : > { %v1414_v58 = vpop.f32.mrf.mxu3 }
 0x28b   : > { %v1425_v46 = vpop.f32.mrf.mxu0 }
 0x28c   : > { %v10919_v47 = vpop.f32.mrf.mxu2  ;;  %v1426_v54 = vadd.f32 %v1425_v46, %v10587_v50 }
 0x28e   : > { %v1496_v60 = vmax.f32 %v1426_v54, 0.0 }
 0x290   : > { %v1502_v3 = vmax.f32 %v1494_v43, %v1496_v60 }
 0x293   : > { %v1464_v49 = vpop.f32.mrf.mxu3  ;;  %v1427_v51 = vpop.f32.mrf.mxu0 }
 0x294   : > { %v10921_v61 = vpop.f32.mrf.mxu2  ;;  %v1465_v22 = vadd.f32 %v1464_v49, %v10587_v50 }
 0x295   : > { %14613 = vst [vmem:[#allocation16_spill] sm:$0xff] %v10921_v61 }
 0x296   : > { %v1499_v23 = vmax.f32 %v1465_v22, 0.0 }
 0x29b   : > { %v1466_v52 = vpop.f32.mrf.mxu3 }
 0x29f   : > { %v1477_v59 = vpop.f32.mrf.mxu0 }
 0x2a0   : > { %v1478_v31 = vadd.f32 %v1477_v59, %v10587_v50  ;;  %v1438_v34 = vpop.f32.mrf.mxu2 }
 0x2a1   : > { %v1439_v12 = vadd.f32 %v1438_v34, %v10587_v50 }
 0x2a2   : > { %v1500_v62 = vmax.f32 %v1478_v31, 0.0 }
 0x2a3   : > { %v1497_v20 = vmax.f32 %v1439_v12, 0.0 }
 0x2a4   : > { %v1504_v7 = vmax.f32 %v1498_v14, %v1500_v62 }
 0x2a5   : > { %v1503_v5 = vmax.f32 %v1495_v27, %v1497_v20 }
 0x2a6   : > { %v10929_v10 = vmax.f32 %v1502_v3, %v1504_v7 }
 0x2a7   : > { %v1479_v53 = vpop.f32.mrf.mxu0 }
 0x2a8   : > { %v1440_v6 = vpop.f32.mrf.mxu2 }
 0x2b4   : > { %v1490_v8 = vpop.f32.mrf.mxu2 }
 0x2b5   : > { %v1491_v4 = vadd.f32 %v1490_v8, %v10587_v50 }
 0x2b7   : > { %v1501_v28 = vmax.f32 %v1491_v4, 0.0 }
 0x2b9   : > { %v1505_v9 = vmax.f32 %v1499_v23, %v1501_v28 }
 0x2bb   : > { %v10935_v19 = vmax.f32 %v1503_v5, %v1505_v9 }
 0x2bc   : > { %v1492_v11 = vpop.f32.mrf.mxu2 }
 0x2bd   : > { %v10939_v0 = vpack.i.bf16 %v10935_v19, %v10929_v10 }
 0x2bf   : > { %9365 = vrot.lane.b32.xlu1 %v10939_v0, %s14568_s14  ;;  %9360 = vrot.lane.b32.xlu0 %v10939_v0, %s14570_s30  ;;  %s14619_s14 = smov 126   ;;  %s14620_s30 = smov 97  }
 0x2c0   : > { %9355 = vrot.lane.b32.xlu2 %v10939_v0, %s14614_s12 }
 0x2c7   : > { %9380 = vrot.lane.b32.xlu1 %v10939_v0, %s14615_s16  ;;  %9375 = vrot.lane.b32.xlu0 %v10939_v0, %s14616_s21 }
 0x2c8   : > { %9370 = vrot.lane.b32.xlu2 %v10939_v0, %s14617_s25 }
 0x2cf   : > { %9400 = vrot.lane.b32.xlu1 %v10939_v0, %s14574_s13  ;;  %9390 = vrot.lane.b32.xlu0 %v10939_v0, %s14618_s24  ;;  %s14624_s13 = smov 110  }
 0x2d0   : > { %9385 = vrot.lane.b32.xlu2 %v10939_v0, %s14619_s14 }
 0x2d7   : > { %9415 = vrot.lane.b32.xlu1 %v10939_v0, %s14572_s22  ;;  %9405 = vrot.lane.b32.xlu0 %v10939_v0, %s14620_s30  ;;  %s14623_s22 = smov 85  }
 0x2d8   : > { %9395 = vrot.lane.b32.xlu2 %v10939_v0, %s14621_s0 }
 0x2e0   : > { %9410 = vrot.lane.b32.xlu2 %v10939_v0, %s14622_s2 }
 0x31a   : > { %v9356_v17 = vpop.permute.xlu2 %9355 }
 0x31b   : > { %v10967_v30 = vunpack.i.h.bf16 %v9356_v17  ;;  %v9357_v1 = vunpack.i.l.bf16 %v9356_v17 }
 0x31d   : > { %v10971_v15 = vsel %vm848_vm6, %v9357_v1, %v10967_v30 }
 0x31e   : > { %v9419_v38 = vpack.i.bf16 %v10967_v30, %v10971_v15 }
 0x320   : > { %9420 = vrot.lane.b32.xlu1 %v9419_v38, %s14623_s22 }
 0x322   : > { %v9371_v63 = vpop.permute.xlu2 %9370 }
 0x323   : > { %v10976_v16 = vunpack.i.h.bf16 %v9371_v63  ;;  %v9372_v21 = vunpack.i.l.bf16 %v9371_v63 }
 0x325   : > { %v10980_v48 = vsel %vm824_vm3, %v9372_v21, %v10976_v16 }
 0x326   : > { %v9434_v24 = vpack.i.bf16 %v10976_v16, %v10980_v48 }
 0x328   : > { %9435 = vrot.lane.b32.xlu1 %v9434_v24, %s14623_s22 }
 0x32a   : > { %v9386_v26 = vpop.permute.xlu2 %9385 }
 0x32b   : > { %v10985_v29 = vunpack.i.h.bf16 %v9386_v26  ;;  %v9387_v32 = vunpack.i.l.bf16 %v9386_v26 }
 0x32d   : > { %v10989_v25 = vsel %vm800_vm11, %v9387_v32, %v10985_v29 }
 0x32e   : > { %v9454_v40 = vpack.i.bf16 %v10985_v29, %v10989_v25 }
 0x330   : > { %9455 = vrot.lane.b32.xlu1 %v9454_v40, %s14623_s22 }
 0x331   : > { %v9366_v58 = vpop.permute.xlu1 %9365  ;;  %v9361_v46 = vpop.permute.xlu0 %9360 }
 0x332   : > { %v10994_v49 = vunpack.i.h.bf16 %v9366_v58  ;;  %v9367_v51 = vunpack.i.l.bf16 %v9366_v58  ;;  %v10996_v52 = vunpack.i.h.bf16 %v9361_v46  ;;  %v9362_v54 = vunpack.i.l.bf16 %v9361_v46  ;;  %v9396_v57 = vpop.permute.xlu2 %9395 }
 0x333   : > { %v9398_v56 = vunpack.i.h.bf16 %v9396_v57  ;;  %v9397_v59 = vunpack.i.l.bf16 %v9396_v57 }
 0x334   : > { %v11000_v60 = vsel %vm832_vm8, %v9367_v51, %v10994_v49  ;;  %v11004_v31 = vsel %vm840_vm5, %v9362_v54, %v10996_v52 }
 0x335   : > { %1729 = vmatpush.msrb.mxu0 %v9398_v56  ;;  %v1612_v34 = vsel %vm904_vm4, %v9397_v59, %v9398_v56  ;;  %v9429_v43 = vpack.i.bf16 %v10994_v49, %v11000_v60  ;;  %v9424_v14 = vpack.i.bf16 %v10996_v52, %v11004_v31 }
 0x336   : > { %1683 = vmatpush.msra.mxu1 %v1612_v34 }
 0x337   : > { %9430 = vrot.lane.b32.xlu0 %v9429_v43, %s14623_s22  ;;  %9425 = vrot.lane.b32.xlu2 %v9424_v14, %s14623_s22 }
 0x338   : > { %9470 = vrot.lane.b32.xlu1 %v10939_v0, %s14624_s13 }
 0x339   : > { %v9381_v62 = vpop.permute.xlu1 %9380  ;;  %v9376_v3 = vpop.permute.xlu0 %9375 }
 0x33a   : > { %v11015_v7 = vunpack.i.h.bf16 %v9381_v62  ;;  %v9382_v53 = vunpack.i.l.bf16 %v9381_v62  ;;  %v9378_v6 = vunpack.i.h.bf16 %v9376_v3  ;;  %v9377_v12 = vunpack.i.l.bf16 %v9376_v3  ;;  %v9411_v38 = vpop.permute.xlu2 %9410 }
 0x33b   : > { %v9413_v32 = vunpack.i.h.bf16 %v9411_v38  ;;  %v9412_v40 = vunpack.i.l.bf16 %v9411_v38 }
 0x33c   : > { %v1619_v18 = vsel %vm912_vm7, %v9377_v12, %v9378_v6  ;;  %v11020_v22 = vsel %vm808_vm10, %v9382_v53, %v11015_v7 }
 0x33d   : > { %v9439_v8 = vpack.i.bf16 %v9378_v6, %v1619_v18  ;;  %v9444_v20 = vpack.i.bf16 %v11015_v7, %v11020_v22  ;;  %v1591_v54 = vsel %vm880_vm14, %v9412_v40, %v9413_v32  ;;  %v8981_v40 = vld [vmem:[%s10445_s15 + $0x3a4] sm:$0x30] }
 0x33f   : > { %9440 = vrot.lane.b32.xlu0 %v9439_v8, %s14623_s22  ;;  %9445 = vrot.lane.b32.xlu2 %v9444_v20, %s14623_s22 }
 0x341   : > { %v9401_v4 = vpop.permute.xlu1 %9400  ;;  %v9391_v27 = vpop.permute.xlu0 %9390 }
 0x342   : > { %v9403_v23 = vunpack.i.h.bf16 %v9401_v4  ;;  %v9402_v28 = vunpack.i.l.bf16 %v9401_v4  ;;  %v11026_v5 = vunpack.i.h.bf16 %v9391_v27  ;;  %v9392_v9 = vunpack.i.l.bf16 %v9391_v27 }
 0x344   : > { %1730 = vmatpush.msrb.mxu0 %v9403_v23  ;;  %v1605_v11 = vsel %vm14577_vm12, %v9402_v28, %v9403_v23  ;;  %v11031_v17 = vsel %vm792_vm9, %v9392_v9, %v11026_v5  ;;  %vm14627_vm12 = vcmask 809984  }
 0x345   : > { %1684 = vmatpush.msra.mxu1 %v1605_v11  ;;  %v9459_v1 = vpack.i.bf16 %v11026_v5, %v11031_v17 }
 0x347   : > { %9460 = vrot.lane.b32.xlu0 %v9459_v1, %s14623_s22  ;;  %9450 = vrot.lane.b32.xlu2 %v10939_v0, %s14623_s22 }
 0x349   : > { %v9406_v63 = vpop.permute.xlu0 %9405  ;;  %v9416_v21 = vpop.permute.xlu1 %9415 }
 0x34a   : > { %v9408_v24 = vunpack.i.h.bf16 %v9406_v63  ;;  %v9407_v26 = vunpack.i.l.bf16 %v9406_v63  ;;  %v9418_v46 = vunpack.i.h.bf16 %v9416_v21  ;;  %v9417_v51 = vunpack.i.l.bf16 %v9416_v21 }
 0x34c   : > { %1731 = vmatpush.msrb.mxu0 %v9408_v24  ;;  %v1598_v58 = vsel %vm14584_vm13, %v9407_v26, %v9408_v24  ;;  %v1584_v57 = vsel %vm14627_vm12, %v9417_v51, %v9418_v46  ;;  %vm14628_vm12 = vcmask 818176  }
 0x34d   : > { %1685 = vmatpush.msra.mxu1 %v1598_v58  ;;  %v7758_v58 = vld [vmem:[%s10445_s15 + $0x380] sm:$0xf] }
 0x34e   : > { %1732 = vmatpush.msrb.mxu0 %v9413_v32  ;;  %v7766_v32 = vld [vmem:[%s10445_s15 + $0x388] sm:$0xf] }
 0x34f   : > { %9465 = vrot.lane.b32.xlu0 %v10939_v0, %s14625_s26  ;;  %9475 = vrot.lane.b32.xlu2 %v10939_v0, %s14626_s19 }
 0x350   : > { %1686 = vmatpush.msra.mxu1 %v1591_v54  ;;  %1733 = vmatpush.msrb.mxu0 %v9418_v46  ;;  %v8980_v46 = vld [vmem:[%s10445_s15 + $0x39c] sm:$0x30] }
 0x352   : > { %1687 = vmatpush.msra.mxu1 %v1584_v57  ;;  %v7767_v57 = vor.u32 %v8981_v40, %v7766_v32 }
 0x391   : > { %v9426_v56 = vpop.permute.xlu2 %9425 }
 0x392   : > { %v9421_v59 = vpop.permute.xlu1 %9420  ;;  %v9428_v34 = vunpack.i.h.bf16 %v9426_v56  ;;  %v9427_v43 = vunpack.i.l.bf16 %v9426_v56 }
 0x393   : > { %v9423_v14 = vunpack.i.h.bf16 %v9421_v59  ;;  %v9422_v62 = vunpack.i.l.bf16 %v9421_v59  ;;  %v7759_v59 = vor.u32 %v8980_v46, %v7758_v58 }
 0x394   : > { %v1663_v0 = vsel %vm14578_vm0, %v9427_v43, %v9428_v34 }
 0x395   : > { %1759 = vmatpush.msra.mxu2 %v9423_v14  ;;  %v1664_v3 = vsel %vm14578_vm0, %v9422_v62, %v9423_v14 }
 0x396   : > { %1713 = vmatpush.msrb.mxu3 %v1664_v3 }
 0x397   : > { %1760 = vmatpush.msra.mxu2 %v9428_v34 }
 0x398   : > { %1714 = vmatpush.msrb.mxu3 %v1663_v0  ;;  %v2062_v0 = vand.u32 %v7767_v57, %v10447_v2  ;;  %v8956_v57 = vld [vmem:[%s10445_s15 + $0x2dc] sm:$0xf0] }
 0x399   : > { %v9446_v27 = vpop.permute.xlu2 %9445 }
 0x39a   : > { %v9436_v53 = vpop.permute.xlu1 %9435  ;;  %v9448_v11 = vunpack.i.h.bf16 %v9446_v27  ;;  %v9447_v1 = vunpack.i.l.bf16 %v9446_v27 }
 0x39b   : > { %v9438_v12 = vunpack.i.h.bf16 %v9436_v53  ;;  %v9437_v18 = vunpack.i.l.bf16 %v9436_v53 }
 0x39c   : > { %v1659_v51 = vsel %vm14578_vm0, %v9447_v1, %v9448_v11 }
 0x39d   : > { %v1661_v23 = vsel %vm14578_vm0, %v9437_v18, %v9438_v12  ;;  %v8973_v18 = vld [vmem:[%s10445_s15 + $0x364] sm:$0xf0] }
 0x3a1   : > { %v9451_v54 = vpop.permute.xlu2 %9450 }
 0x3a2   : > { %v9456_v28 = vpop.permute.xlu1 %9455  ;;  %v9453_v43 = vunpack.i.h.bf16 %v9451_v54  ;;  %v9452_v14 = vunpack.i.l.bf16 %v9451_v54  ;;  %v7662_v54 = vld [vmem:[%s10445_s15 + $0x2c0] sm:$0xf] }
 0x3a3   : > { %v9458_v21 = vunpack.i.h.bf16 %v9456_v28  ;;  %v9457_v24 = vunpack.i.l.bf16 %v9456_v28 }
 0x3a5   : > { %v1658_v56 = vsel %vm14578_vm0, %v9457_v24, %v9458_v21 }
 0x3a9   : > { %v9431_v6 = vpop.permute.xlu0 %9430 }
 0x3aa   : > { %v9433_v8 = vunpack.i.h.bf16 %v9431_v6  ;;  %v9432_v20 = vunpack.i.l.bf16 %v9431_v6  ;;  %v2056_v6 = vand.u32 %v7759_v59, %v10447_v2  ;;  %v9471_v27 = vpop.permute.xlu1 %9470  ;;  %v7782_v59 = vld [vmem:[%s10445_s15 + $0x398] sm:$0xf] }
 0x3ab   : > { %v9472_v24 = vunpack.i.l.bf16 %v9471_v27 }
 0x3ac   : > { %1761 = vmatpush.msra.mxu2 %v9433_v8  ;;  %v1662_v4 = vsel %vm14578_vm0, %v9432_v20, %v9433_v8  ;;  %v7726_v8 = vld [vmem:[%s10445_s15 + $0x340] sm:$0xf] }
 0x3ad   : > { %1715 = vmatpush.msrb.mxu3 %v1662_v4  ;;  %v8972_v20 = vld [vmem:[%s10445_s15 + $0x35c] sm:$0xf0]  ;;  %v1656_v4 = vsel %vm14578_vm0, %v9452_v14, %v9453_v43  ;;  %v8977_v14 = vld [vmem:[%s10445_s15 + $0x38c] sm:$0xf] }
 0x3ae   : > { %1762 = vmatpush.msra.mxu2 %v9438_v12  ;;  %v7734_v12 = vld [vmem:[%s10445_s15 + $0x348] sm:$0xf]  ;;  %v7727_v28 = vor.u32 %v8972_v20, %v7726_v8 }
 0x3af   : > { %1716 = vmatpush.msrb.mxu3 %v1661_v23  ;;  %v7735_v23 = vor.u32 %v8973_v18, %v7734_v12  ;;  %v7630_v12 = vld [vmem:[%s10445_s15 + $0x280] sm:$0xf] }
 0x3b0   : > { %v8948_v18 = vld [vmem:[%s10445_s15 + $0x29c] sm:$0xf0] }
 0x3b1   : > { %v9441_v9 = vpop.permute.xlu0 %9440 }
 0x3b2   : > { %v9443_v38 = vunpack.i.h.bf16 %v9441_v9  ;;  %v9442_v63 = vunpack.i.l.bf16 %v9441_v9  ;;  %v7702_v9 = vld [vmem:[%s10445_s15 + $0x308] sm:$0xf] }
 0x3b4   : > { %1763 = vmatpush.msra.mxu2 %v9443_v38  ;;  %v1660_v26 = vsel %vm14578_vm0, %v9442_v63, %v9443_v38  ;;  %v7694_v38 = vld [vmem:[%s10445_s15 + $0x300] sm:$0xf] }
 0x3b5   : > { %1717 = vmatpush.msrb.mxu3 %v1660_v26  ;;  %v8964_v63 = vld [vmem:[%s10445_s15 + $0x31c] sm:$0xf0] }
 0x3b6   : > { %1764 = vmatpush.msra.mxu2 %v9448_v11  ;;  %v8965_v11 = vld [vmem:[%s10445_s15 + $0x324] sm:$0xf0]  ;;  %v7695_v46 = vor.u32 %v8964_v63, %v7694_v38  ;;  %v7718_v63 = vld [vmem:[%s10445_s15 + $0x318] sm:$0xf] }
 0x3b7   : > { %1718 = vmatpush.msrb.mxu3 %v1659_v51  ;;  %v7703_v40 = vor.u32 %v8965_v11, %v7702_v9  ;;  %v8957_v51 = vld [vmem:[%s10445_s15 + $0x2e4] sm:$0xf0]  ;;  %v7774_v9 = vld [vmem:[%s10445_s15 + $0x390] sm:$0xf] }
 0x3b8   : > { %1765 = vmatpush.msra.mxu2 %v9458_v21  ;;  %v9473_v21 = vunpack.i.h.bf16 %v9471_v27  ;;  %v7631_v27 = vor.u32 %v8948_v18, %v7630_v12  ;;  %v8982_v11 = vld [vmem:[%s10445_s15 + $0x3ac] sm:$0x30]  ;;  %v8960_v18 = vld [vmem:[%s10445_s15 + $0x304] sm:$0xf] }
 0x3b9   : > { %v9461_v34 = vpop.permute.xlu0 %9460  ;;  %1719 = vmatpush.msrb.mxu3 %v1658_v56  ;;  %v8966_v12 = vld [vmem:[%s10445_s15 + $0x32c] sm:$0xf0] }
 0x3ba   : > { %v9463_v62 = vunpack.i.h.bf16 %v9461_v34  ;;  %v9462_v3 = vunpack.i.l.bf16 %v9461_v34  ;;  %v8983_v34 = vld [vmem:[%s10445_s15 + $0x3b4] sm:$0x30] }
 0x3bb   : > { %v7783_v8 = vor.u32 %v8983_v34, %v7782_v59  ;;  %v7728_v59 = vld [vmem:[%s10445_s15 + $0x360] sm:$0xf0]  ;;  %v7784_v34 = vld [vmem:[%s10445_s15 + $0x3b8] sm:$0x30] }
 0x3bc   : > { %1766 = vmatpush.msra.mxu2 %v9463_v62  ;;  %v1657_v53 = vsel %vm14578_vm0, %v9462_v3, %v9463_v62  ;;  %vm14629_vm0 = vcmask 900096   ;;  %v7768_v62 = vld [vmem:[%s10445_s15 + $0x3a8] sm:$0x30]  ;;  %v7663_v3 = vor.u32 %v8956_v57, %v7662_v54  ;;  %v8974_v57 = vld [vmem:[%s10445_s15 + $0x36c] sm:$0xf0] }
 0x3bd   : > { %1720 = vmatpush.msrb.mxu3 %v1657_v53  ;;  %v1570_v56 = vsel %vm14629_vm0, %v9472_v24, %v9473_v21  ;;  %v8949_v53 = vld [vmem:[%s10445_s15 + $0x2a4] sm:$0xf0]  ;;  %v7775_v24 = vor.u32 %v8982_v11, %v7774_v9  ;;  %v7672_v54 = vld [vmem:[%s10445_s15 + $0x2e8] sm:$0xf0]  ;;  %v7776_v9 = vld [vmem:[%s10445_s15 + $0x3b0] sm:$0x30] }
 0x3be   : > { %1767 = vmatpush.msra.mxu2 %v9453_v43  ;;  %vm14637_vm0 = vcmask 785408  }
 0x3bf   : > { %1721 = vmatpush.msrb.mxu3 %v1656_v4  ;;  %7586 = vmatmul.msk.f32.vlgmr.msra.gmra.mxu2 %vm988_vm1, %v10771_v55 }
 0x3c0   : > { %2108 = vmatpush.bf16.msrb.mxu2 %v2062_v0  ;;  %7584 = vmatmul.msk.f32.vlgmr.msrb.gmra.mxu3 %vm988_vm1, %v10771_v55  ;;  %v7670_v55 = vld [vmem:[%s10445_s15 + $0x2c8] sm:$0xf] }
 0x3c1   : > { %2082 = vmatpush.bf16.msra.mxu3 %v2056_v6  ;;  %v9466_v1 = vpop.permute.xlu0 %9465  ;;  %v7671_v43 = vor.u32 %v8957_v51, %v7670_v55  ;;  %v7638_v0 = vld [vmem:[%s10445_s15 + $0x288] sm:$0xf]  ;;  %v9476_v6 = vpop.permute.xlu2 %9475  ;;  %v8959_v55 = vld [vmem:[%s10445_s15 + $0x2f4] sm:$0xf0]  ;;  %v8953_v51 = vld [vmem:[%s10445_s15 + $0x2cc] sm:$0xf] }
 0x3c2   : > { %v9468_v26 = vunpack.i.h.bf16 %v9466_v1  ;;  %v9467_v32 = vunpack.i.l.bf16 %v9466_v1  ;;  %v9478_v20 = vunpack.i.h.bf16 %v9476_v6  ;;  %v9477_v4 = vunpack.i.l.bf16 %v9476_v6  ;;  %v7760_v1 = vld [vmem:[%s10445_s15 + $0x3a0] sm:$0x30]  ;;  %v7710_v6 = vld [vmem:[%s10445_s15 + $0x310] sm:$0xf] }
 0x3c4   : > { %2109 = vmatpush.bf16.msrb.mxu2 %v7735_v23  ;;  %1734 = vmatpush.msrb.mxu0 %v9468_v26  ;;  %v1577_v58 = vsel %vm14628_vm12, %v9467_v32, %v9468_v26  ;;  %v8975_v23 = vld [vmem:[%s10445_s15 + $0x374] sm:$0xf0]  ;;  %v8961_v26 = vld [vmem:[%s10445_s15 + $0x30c] sm:$0xf]  ;;  %vm14638_vm12 = vcmask 809984  }
 0x3c5   : > { %2083 = vmatpush.bf16.msra.mxu3 %v7727_v28  ;;  %1688 = vmatpush.msra.mxu1 %v1577_v58  ;;  %v8969_v28 = vld [vmem:[%s10445_s15 + $0x34c] sm:$0xf]  ;;  %v7686_v58 = vld [vmem:[%s10445_s15 + $0x2d8] sm:$0xf] }
 0x3c6   : > { %1735 = vmatpush.msrb.mxu0 %v9473_v21  ;;  %v8967_v21 = vld [vmem:[%s10445_s15 + $0x334] sm:$0xf0]  ;;  %v7704_v32 = vld [vmem:[%s10445_s15 + $0x328] sm:$0xf0] }
 0x3c7   : > { %1689 = vmatpush.msra.mxu1 %v1570_v56  ;;  %7587 = vmatmul.msk.f32.gmra.mxu2 %vm988_vm1, %v10798_v41  ;;  %v8968_v56 = vld [vmem:[%s10445_s15 + $0x344] sm:$0xf] }
 0x3c8   : > { %2110 = vmatpush.bf16.msrb.mxu2 %v7703_v40  ;;  %1736 = vmatpush.msrb.mxu0 %v10967_v30  ;;  %v7771_v30 = vor.u32 %v8977_v14, %v7768_v62  ;;  %v7654_v62 = vld [vmem:[%s10445_s15 + $0x298] sm:$0xf] }
 0x3c9   : > { %2084 = vmatpush.bf16.msra.mxu3 %v7695_v46  ;;  %1690 = vmatpush.msra.mxu1 %v10971_v15  ;;  %v7639_v15 = vor.u32 %v8949_v53, %v7638_v0  ;;  %v2068_v46 = vand.u32 %v7775_v24, %v10447_v2  ;;  %v8945_v0 = vld [vmem:[%s10445_s15 + $0x28c] sm:$0xf]  ;;  %v7720_v24 = vld [vmem:[%s10445_s15 + $0x338] sm:$0xf0] }
 0x3ca   : > { %1737 = vmatpush.msrb.mxu0 %v10996_v52  ;;  %7585 = vmatmul.msk.f32.gmra.mxu3 %vm988_vm1, %v10798_v41  ;;  %v2074_v41 = vand.u32 %v7783_v8, %v10447_v2  ;;  %v2065_v52 = vand.u32 %v7771_v30, %v10447_v2  ;;  %v7640_v53 = vld [vmem:[%s10445_s15 + $0x2a8] sm:$0xf0]  ;;  %v7696_v8 = vld [vmem:[%s10445_s15 + $0x320] sm:$0xf0] }
 0x3cb   : > { %1691 = vmatpush.msra.mxu1 %v11004_v31  ;;  %v7750_v31 = vld [vmem:[%s10445_s15 + $0x358] sm:$0xf] }
 0x3cc   : > { %2111 = vmatpush.bf16.msrb.mxu2 %v7671_v43  ;;  %1738 = vmatpush.msrb.mxu0 %v10994_v49  ;;  %v7736_v49 = vld [vmem:[%s10445_s15 + $0x368] sm:$0xf0]  ;;  %v7751_v38 = vor.u32 %v8975_v23, %v7750_v31  ;;  %v7675_v43 = vor.u32 %v8953_v51, %v7672_v54  ;;  %v7664_v31 = vld [vmem:[%s10445_s15 + $0x2e0] sm:$0xf0]  ;;  %v8971_v23 = vld [vmem:[%s10445_s15 + $0x35c] sm:$0xf] }
 0x3cd   : > { %2085 = vmatpush.bf16.msra.mxu3 %v7663_v3  ;;  %1692 = vmatpush.msra.mxu1 %v11000_v60  ;;  %v1535_v60 = vsel %vm816_vm15, %v9477_v4, %v9478_v20  ;;  %v8951_v3 = vld [vmem:[%s10445_s15 + $0x2b4] sm:$0xf0]  ;;  %v7699_v4 = vor.u32 %v8960_v18, %v7696_v8  ;;  %v7744_v51 = vld [vmem:[%s10445_s15 + $0x370] sm:$0xf0] }
 0x3ce   : > { %1739 = vmatpush.msrb.mxu0 %v10976_v16  ;;  %v8976_v16 = vld [vmem:[%s10445_s15 + $0x384] sm:$0xf]  ;;  %v7655_v30 = vor.u32 %v8951_v3, %v7654_v62  ;;  %v7648_v62 = vld [vmem:[%s10445_s15 + $0x2b0] sm:$0xf0] }
 0x3cf   : > { %1693 = vmatpush.msra.mxu1 %v10980_v48  ;;  %v7739_v48 = vor.u32 %v8969_v28, %v7736_v49  ;;  %v7763_v40 = vor.u32 %v8976_v16, %v7760_v1  ;;  %v7752_v28 = vld [vmem:[%s10445_s15 + $0x378] sm:$0xf0]  ;;  %v8978_v49 = vld [vmem:[%s10445_s15 + $0x394] sm:$0xf]  ;;  %v7646_v1 = vld [vmem:[%s10445_s15 + $0x290] sm:$0xf] }
 0x3d0   : > { %2112 = vmatpush.bf16.msrb.mxu2 %v7639_v15  ;;  %1740 = vmatpush.msrb.mxu0 %v9478_v20  ;;  %v7643_v15 = vor.u32 %v8945_v0, %v7640_v53  ;;  %v7711_v20 = vor.u32 %v8966_v12, %v7710_v6  ;;  %v7755_v16 = vor.u32 %v8971_v23, %v7752_v28 }
 0x3d1   : > { %2086 = vmatpush.bf16.msra.mxu3 %v7631_v27  ;;  %1694 = vmatpush.msra.mxu1 %v1535_v60 }
 0x3d2   : > { %1741 = vmatpush.msrb.mxu0 %v11015_v7  ;;  %v7719_v7 = vor.u32 %v8967_v21, %v7718_v63  ;;  %v7632_v63 = vld [vmem:[%s10445_s15 + $0x2a0] sm:$0xf0]  ;;  %v8963_v21 = vld [vmem:[%s10445_s15 + $0x31c] sm:$0xf] }
 0x3d3   : > { %7790 = vmatmul.msk.bf16.vlgmr.msrb.gmra.mxu2 %vm636_vm2, %v10895_v13  ;;  %1695 = vmatpush.msra.mxu1 %v11020_v22  ;;  %v7707_v22 = vor.u32 %v8961_v26, %v7704_v32  ;;  %v7779_v26 = vor.u32 %v8978_v49, %v7776_v9 }
 0x3d4   : > { %2160 = vmatpush.bf16.msra.mxu2 %v2074_v41  ;;  %7788 = vmatmul.msk.bf16.vlgmr.msra.gmra.mxu3 %vm636_vm2, %v10895_v13  ;;  %v7678_v41 = vld [vmem:[%s10445_s15 + $0x2d0] sm:$0xf] }
 0x3d5   : > { %2121 = vmatpush.bf16.msrb.mxu3 %v2065_v52  ;;  %1742 = vmatpush.msrb.mxu0 %v10985_v29  ;;  %v2059_v29 = vand.u32 %v7763_v40, %v10447_v2  ;;  %v8958_v52 = vld [vmem:[%s10445_s15 + $0x2ec] sm:$0xf0] }
 0x3d6   : > { %1696 = vmatpush.msra.mxu1 %v10989_v25  ;;  %v7742_v25 = vld [vmem:[%s10445_s15 + $0x350] sm:$0xf]  ;;  %v7679_v11 = vor.u32 %v8958_v52, %v7678_v41 }
 0x3d7   : > { %1743 = vmatpush.msrb.mxu0 %v11026_v5  ;;  %v8979_v5 = vld [vmem:[%s10445_s15 + $0x39c] sm:$0xf]  ;;  %v7743_v14 = vor.u32 %v8974_v57, %v7742_v25  ;;  %v8962_v57 = vld [vmem:[%s10445_s15 + $0x314] sm:$0xf] }
 0x3d8   : > { %2161 = vmatpush.bf16.msra.mxu2 %v7751_v38  ;;  %1697 = vmatpush.msra.mxu1 %v11031_v17  ;;  %v7687_v17 = vor.u32 %v8959_v55, %v7686_v58  ;;  %v8950_v38 = vld [vmem:[%s10445_s15 + $0x2ac] sm:$0xf0]  ;;  %v2071_v58 = vand.u32 %v7779_v26, %v10447_v2  ;;  %v8970_v55 = vld [vmem:[%s10445_s15 + $0x354] sm:$0xf]  ;;  %v7656_v25 = vld [vmem:[%s10445_s15 + $0x2b8] sm:$0xf0] }
 0x3d9   : > { %2122 = vmatpush.bf16.msrb.mxu3 %v7739_v48  ;;  %1744 = vmatpush.msrb.mxu0 %v10935_v19  ;;  %v7731_v19 = vor.u32 %v8968_v56, %v7728_v59  ;;  %v8944_v48 = vld [vmem:[%s10445_s15 + $0x284] sm:$0xf]  ;;  %v7647_v32 = vor.u32 %v8950_v38, %v7646_v1  ;;  %v7747_v54 = vor.u32 %v8970_v55, %v7744_v51  ;;  %v7712_v56 = vld [vmem:[%s10445_s15 + $0x330] sm:$0xf0] }
 0x3da   : > { %1698 = vmatpush.msra.mxu1 %v10929_v10  ;;  %1745 = vmatmul.f32.vlgmr.msrb.gmra.mxu0 %v10833_v35  ;;  %v7787_v10 = vor.u32 %v8979_v5, %v7784_v34  ;;  %v7635_v40 = vor.u32 %v8944_v48, %v7632_v63  ;;  %v7715_v5 = vor.u32 %v8962_v57, %v7712_v56  ;;  %v8954_v34 = vld [vmem:[%s10445_s15 + $0x2d4] sm:$0xf] }
 0x3db   : > { %2134 = vmatpush.bf16.msra.mxu0 %v2068_v46  ;;  %1699 = vmatmul.f32.vlgmr.msra.gmra.mxu1 %v10833_v35  ;;  %v8952_v35 = vld [vmem:[%s10445_s15 + $0x2c4] sm:$0xf]  ;;  %v7688_v46 = vld [vmem:[%s10445_s15 + $0x2f8] sm:$0xf0] }
 0x3dc   : > { %2162 = vmatpush.bf16.msra.mxu2 %v7719_v7  ;;  %2095 = vmatpush.bf16.msrb.mxu1 %v2059_v29  ;;  %v2077_v27 = vand.u32 %v7787_v10, %v10447_v2  ;;  %v7667_v60 = vor.u32 %v8952_v35, %v7664_v31  ;;  %v7723_v7 = vor.u32 %v8963_v21, %v7720_v24  ;;  %v8947_v29 = vld [vmem:[%s10445_s15 + $0x29c] sm:$0xf] }
 0x3dd   : > { %2123 = vmatpush.bf16.msrb.mxu3 %v7707_v22  ;;  %v8955_v22 = vld [vmem:[%s10445_s15 + $0x2dc] sm:$0xf]  ;;  %v7659_v59 = vor.u32 %v8947_v29, %v7656_v25 }
 0x3df   : > { %2135 = vmatpush.bf16.msra.mxu0 %v7743_v14  ;;  %v8946_v14 = vld [vmem:[%s10445_s15 + $0x294] sm:$0xf] }
 0x3e0   : > { %2163 = vmatpush.bf16.msra.mxu2 %v7687_v17  ;;  %2096 = vmatpush.bf16.msrb.mxu1 %v7731_v19  ;;  %v7680_v17 = vld [vmem:[%s10445_s15 + $0x2f0] sm:$0xf0]  ;;  %v7651_v3 = vor.u32 %v8946_v14, %v7648_v62 }
 0x3e1   : > { %2124 = vmatpush.bf16.msrb.mxu3 %v7675_v43  ;;  %v7683_v43 = vor.u32 %v8954_v34, %v7680_v17 }
 0x3e2   : > { %1748 = vmatmul.f32.gmra.mxu0 %v10854_v45 }
 0x3e3   : > { %2136 = vmatpush.bf16.msra.mxu0 %v7711_v20  ;;  %1702 = vmatmul.f32.gmra.mxu1 %v10854_v45  ;;  %v7691_v45 = vor.u32 %v8955_v22, %v7688_v46 }
 0x3e4   : > { %2164 = vmatpush.bf16.msra.mxu2 %v7655_v30  ;;  %2097 = vmatpush.bf16.msrb.mxu1 %v7699_v4 }
 0x3e5   : > { %2125 = vmatpush.bf16.msrb.mxu3 %v7643_v15 }
 0x3e7   : > { %7794 = vmatmul.msk.bf16.vlgmr.msra.gmra.mxu2 %vm636_vm2, %v10895_v13  ;;  %2137 = vmatpush.bf16.msra.mxu0 %v7679_v11 }
 0x3e8   : > { %7791 = vmatmul.msk.bf16.vlgmr.msrb.gmra.mxu3 %vm636_vm2, %v10895_v13  ;;  %2098 = vmatpush.bf16.msrb.mxu1 %v7667_v60 }
 0x3e9   : > { %2173 = vmatpush.bf16.msra.mxu3 %v2077_v27 }
 0x3eb   : > { %2138 = vmatpush.bf16.msra.mxu0 %v7647_v32 }
 0x3ec   : > { %2099 = vmatpush.bf16.msrb.mxu1 %v7635_v40 }
 0x3ed   : > { %2174 = vmatpush.bf16.msra.mxu3 %v7755_v16 }
 0x3ee   : > { %7792 = vmatmul.msk.bf16.vlgmr.msra.gmra.mxu0 %vm636_vm2, %v10895_v13 }
 0x3ef   : > { %7789 = vmatmul.msk.bf16.vlgmr.msrb.gmra.mxu1 %vm636_vm2, %v10895_v13 }
 0x3f0   : > { %2147 = vmatpush.bf16.msra.mxu1 %v2071_v58 }
 0x3f1   : > { %2175 = vmatpush.bf16.msra.mxu3 %v7723_v7 }
 0x3f4   : > { %2148 = vmatpush.bf16.msra.mxu1 %v7747_v54 }
 0x3f5   : > { %2176 = vmatpush.bf16.msra.mxu3 %v7691_v45 }
 0x3f8   : > { %2149 = vmatpush.bf16.msra.mxu1 %v7715_v5 }
 0x3f9   : > { %2177 = vmatpush.bf16.msra.mxu3 %v7659_v59 }
 0x3fc   : > { %7795 = vmatmul.msk.bf16.vlgmr.msra.gmra.mxu3 %vm636_vm2, %v10895_v13  ;;  %2150 = vmatpush.bf16.msra.mxu1 %v7683_v43 }
 0x400   : > { %2151 = vmatpush.bf16.msra.mxu1 %v7651_v3 }
 0x403   : > { %7793 = vmatmul.msk.bf16.vlgmr.msra.gmra.mxu1 %vm636_vm2, %v10895_v13 }
 0x442   : > { %v11189_v0 = vpop.f32.mrf.mxu2 }
 0x443   : > { %v11191_v19 = vpop.f32.mrf.mxu3 }
 0x44a   : > { %v11193_v53 = vpop.f32.mrf.mxu2 }
 0x44b   : > { %14630 = vst [vmem:[#allocation17_spill] sm:$0xff] %v11193_v53 }
 0x44d   : > { %v11195_v6 = vpop.f32.mrf.mxu3 }
 0x44e   : > { %14631 = vst [vmem:[#allocation18_spill] sm:$0xff] %v11195_v6 }
 0x456   : > { %v2114_v12 = vpop.f32.mrf.mxu2 }
 0x457   : > { %v2088_v10 = vpop.f32.mrf.mxu3  ;;  %v11197_v18 = vpop.f32.mrf.mxu0  ;;  %v2115_v9 = vadd.f32 %v2114_v12, %v10587_v50 }
 0x458   : > { %v11199_v8 = vpop.f32.mrf.mxu1  ;;  %v2089_v11 = vadd.f32 %v2088_v10, %v10587_v50 }
 0x459   : > { %v2185_v21 = vmax.f32 %v2115_v9, 0.0 }
 0x45a   : > { %v2183_v26 = vmax.f32 %v2089_v11, 0.0 }
 0x45c   : > { %v2191_v51 = vmax.f32 %v2183_v26, %v2185_v21 }
 0x45e   : > { %v2116_v30 = vpop.f32.mrf.mxu2 }
 0x45f   : > { %v2090_v15 = vpop.f32.mrf.mxu3  ;;  %v11201_v20 = vpop.f32.mrf.mxu0 }
 0x460   : > { %v11203_v4 = vpop.f32.mrf.mxu1 }
 0x461   : > { %14632 = vst [vmem:[#allocation19_spill] sm:$0xff] %v11203_v4 }
 0x46a   : > { %v2166_v13 = vpop.f32.mrf.mxu2 }
 0x46b   : > { %v2127_v27 = vpop.f32.mrf.mxu3  ;;  %v2140_v41 = vpop.f32.mrf.mxu0  ;;  %v2167_v60 = vadd.f32 %v2166_v13, %v10587_v50 }
 0x46c   : > { %v2101_v52 = vpop.f32.mrf.mxu1  ;;  %v2141_v49 = vadd.f32 %v2140_v41, %v10587_v50  ;;  %v2128_v38 = vadd.f32 %v2127_v27, %v10587_v50 }
 0x46d   : > { %v2102_v16 = vadd.f32 %v2101_v52, %v10587_v50  ;;  %v2189_v32 = vmax.f32 %v2167_v60, 0.0 }
 0x46e   : > { %v2187_v48 = vmax.f32 %v2141_v49, 0.0  ;;  %v2186_v58 = vmax.f32 %v2128_v38, 0.0 }
 0x46f   : > { %v2184_v40 = vmax.f32 %v2102_v16, 0.0 }
 0x470   : > { %v2193_v22 = vmax.f32 %v2187_v48, %v2189_v32 }
 0x471   : > { %v2192_v45 = vmax.f32 %v2184_v40, %v2186_v58 }
 0x472   : > { %v2168_v35 = vpop.f32.mrf.mxu2  ;;  %v11213_v25 = vmax.f32 %v2191_v51, %v2193_v22 }
 0x473   : > { %v2129_v31 = vpop.f32.mrf.mxu3  ;;  %v2142_v23 = vpop.f32.mrf.mxu0 }
 0x474   : > { %v2103_v28 = vpop.f32.mrf.mxu1 }
 0x47f   : > { %v2179_v1 = vpop.f32.mrf.mxu3 }
 0x480   : > { %v2180_v63 = vadd.f32 %v2179_v1, %v10587_v50  ;;  %v2153_v24 = vpop.f32.mrf.mxu1 }
 0x481   : > { %v2154_v7 = vadd.f32 %v2153_v24, %v10587_v50 }
 0x482   : > { %v2190_v46 = vmax.f32 %v2180_v63, 0.0 }
 0x483   : > { %v2188_v55 = vmax.f32 %v2154_v7, 0.0 }
 0x485   : > { %v2194_v54 = vmax.f32 %v2188_v55, %v2190_v46 }
 0x487   : > { %v2181_v29 = vpop.f32.mrf.mxu3  ;;  %v11215_v57 = vmax.f32 %v2192_v45, %v2194_v54 }
 0x488   : > { %v2155_v56 = vpop.f32.mrf.mxu1 }
 0x489   : > { %v9489_v59 = vpack.i.bf16 %v11213_v25, %v11215_v57 }
 0x48b   : > { %9490 = vrot.lane.b32.xlu2 %v9489_v59, %s14633_s23  ;;  %9485 = vrot.lane.b32.xlu1 %v9489_v59, %s14634_s28 }
 0x48c   : > { %9480 = vrot.lane.b32.xlu0 %v9489_v59, %s14614_s12 }
 0x493   : > { %9505 = vrot.lane.b32.xlu2 %v9489_v59, %s14615_s16  ;;  %9500 = vrot.lane.b32.xlu1 %v9489_v59, %s14616_s21 }
 0x494   : > { %9495 = vrot.lane.b32.xlu0 %v9489_v59, %s14617_s25 }
 0x49b   : > { %9520 = vrot.lane.b32.xlu2 %v9489_v59, %s14621_s0  ;;  %9515 = vrot.lane.b32.xlu1 %v9489_v59, %s14618_s24 }
 0x49c   : > { %9510 = vrot.lane.b32.xlu0 %v9489_v59, %s14619_s14 }
 0x4a3   : > { %9535 = vrot.lane.b32.xlu2 %v9489_v59, %s14622_s2  ;;  %9530 = vrot.lane.b32.xlu1 %v9489_v59, %s14620_s30 }
 0x4a4   : > { %9525 = vrot.lane.b32.xlu0 %v9489_v59, %s14635_s17 }
 0x4ab   : > { %9550 = vrot.lane.b32.xlu2 %v9489_v59, %s14624_s13  ;;  %9545 = vrot.lane.b32.xlu1 %v9489_v59, %s14625_s26 }
 0x4ac   : > { %9540 = vrot.lane.b32.xlu0 %v9489_v59, %s14636_s20 }
 0x4e5   : > { %v9491_v5 = vpop.permute.xlu2 %9490 }
 0x4e6   : > { %v11239_v13 = vunpack.i.l.bf16 %v9491_v5  ;;  %v9493_v35 = vunpack.i.h.bf16 %v9491_v5 }
 0x4e8   : > { %v11255_v11 = vsel %vm832_vm8, %v9493_v35, %v11239_v13 }
 0x4ed   : > { %v9506_v34 = vpop.permute.xlu2 %9505 }
 0x4ee   : > { %v9508_v48 = vunpack.i.h.bf16 %v9506_v34  ;;  %v11264_v63 = vunpack.i.l.bf16 %v9506_v34 }
 0x4f0   : > { %v11277_v58 = vsel %vm808_vm10, %v9508_v48, %v11264_v63 }
 0x4f5   : > { %v9521_v17 = vpop.permute.xlu2 %9520 }
 0x4f6   : > { %v9523_v43 = vunpack.i.h.bf16 %v9521_v17  ;;  %v9522_v14 = vunpack.i.l.bf16 %v9521_v17 }
 0x4f8   : > { %2418 = vmatpush.msrb.mxu2 %v9522_v14  ;;  %v2301_v62 = vsel %vm904_vm4, %v9523_v43, %v9522_v14 }
 0x4f9   : > { %2372 = vmatpush.msrb.mxu0 %v2301_v62 }
 0x4fd   : > { %v9486_v3 = vpop.permute.xlu1 %9485  ;;  %v9536_v29 = vpop.permute.xlu2 %9535 }
 0x4fe   : > { %v11235_v12 = vunpack.i.l.bf16 %v9486_v3  ;;  %v9481_v10 = vpop.permute.xlu0 %9480  ;;  %v9488_v31 = vunpack.i.h.bf16 %v9486_v3  ;;  %v9538_v3 = vunpack.i.h.bf16 %v9536_v29 }
 0x4ff   : > { %v9483_v30 = vunpack.i.h.bf16 %v9481_v10  ;;  %v11237_v15 = vunpack.i.l.bf16 %v9481_v10  ;;  %v9537_v10 = vunpack.i.l.bf16 %v9536_v29 }
 0x500   : > { %v11259_v60 = vsel %vm840_vm5, %v9488_v31, %v11235_v12 }
 0x501   : > { %v9554_v27 = vpack.i.bf16 %v11235_v12, %v11237_v15  ;;  %v11245_v41 = vsel %vm848_vm6, %v9483_v30, %v11237_v15 }
 0x502   : > { %v9564_v52 = vpack.i.bf16 %v11245_v41, %v11239_v13 }
 0x503   : > { %9555 = vrot.lane.b32.xlu0 %v9554_v27, %s14623_s22 }
 0x504   : > { %9565 = vrot.lane.b32.xlu1 %v9564_v52, %s14623_s22 }
 0x505   : > { %v9501_v23 = vpop.permute.xlu1 %9500 }
 0x506   : > { %v9502_v28 = vunpack.i.l.bf16 %v9501_v23  ;;  %v9496_v49 = vpop.permute.xlu0 %9495  ;;  %v9503_v21 = vunpack.i.h.bf16 %v9501_v23  ;;  %v2280_v23 = vsel %vm880_vm14, %v9538_v3, %v9537_v10  ;;  %v9017_v3 = vld [vmem:[%s10445_s15 + $0x4cc] sm:$0xf] }
 0x507   : > { %v11251_v9 = vunpack.i.l.bf16 %v9496_v49  ;;  %v9498_v38 = vunpack.i.h.bf16 %v9496_v49 }
 0x508   : > { %v9574_v16 = vpack.i.bf16 %v11255_v11, %v9502_v28  ;;  %v2308_v22 = vsel %vm912_vm7, %v9503_v21, %v9502_v28  ;;  %v9551_v28 = vpop.permute.xlu2 %9550 }
 0x509   : > { %v9569_v1 = vpack.i.bf16 %v11259_v60, %v11251_v9  ;;  %v2231_v40 = vsel %vm824_vm3, %v9498_v38, %v11251_v9  ;;  %v9553_v21 = vunpack.i.h.bf16 %v9551_v28 }
 0x50a   : > { %v9579_v55 = vpack.i.bf16 %v2231_v40, %v11264_v63 }
 0x50b   : > { %9570 = vrot.lane.b32.xlu2 %v9569_v1, %s14623_s22  ;;  %9560 = vrot.lane.b32.xlu0 %v9489_v59, %s14626_s19 }
 0x50c   : > { %9575 = vrot.lane.b32.xlu1 %v9574_v16, %s14623_s22 }
 0x50d   : > { %v9516_v24 = vpop.permute.xlu1 %9515 }
 0x50e   : > { %v11269_v26 = vunpack.i.l.bf16 %v9516_v24  ;;  %v9511_v32 = vpop.permute.xlu0 %9510  ;;  %v9518_v45 = vunpack.i.h.bf16 %v9516_v24  ;;  %v9552_v24 = vunpack.i.l.bf16 %v9551_v28 }
 0x50f   : > { %v11273_v7 = vunpack.i.l.bf16 %v9511_v32  ;;  %v9513_v54 = vunpack.i.h.bf16 %v9511_v32 }
 0x510   : > { %v9589_v46 = vpack.i.bf16 %v11277_v58, %v11269_v26  ;;  %v11293_v34 = vsel %vm792_vm9, %v9518_v45, %v11269_v26 }
 0x511   : > { %v9584_v51 = vpack.i.bf16 %v2308_v22, %v11273_v7  ;;  %v11289_v5 = vsel %vm800_vm11, %v9513_v54, %v11273_v7  ;;  %v9599_v52 = vpack.i.bf16 %v11213_v25, %v11293_v34 }
 0x512   : > { %v9594_v27 = vpack.i.bf16 %v11289_v5, %v11215_v57 }
 0x513   : > { %9580 = vrot.lane.b32.xlu2 %v9579_v55, %s14623_s22  ;;  %9585 = vrot.lane.b32.xlu0 %v9584_v51, %s14623_s22 }
 0x514   : > { %9590 = vrot.lane.b32.xlu1 %v9589_v46, %s14623_s22 }
 0x515   : > { %v9531_v56 = vpop.permute.xlu1 %9530 }
 0x516   : > { %v9526_v59 = vpop.permute.xlu0 %9525  ;;  %v9533_v17 = vunpack.i.h.bf16 %v9531_v56  ;;  %v9532_v43 = vunpack.i.l.bf16 %v9531_v56 }
 0x517   : > { %v9528_v14 = vunpack.i.h.bf16 %v9526_v59  ;;  %v9527_v62 = vunpack.i.l.bf16 %v9526_v59 }
 0x518   : > { %v2287_v35 = vsel %vm14584_vm13, %v9533_v17, %v9532_v43  ;;  %vm14640_vm13 = vcmask 900096  }
 0x519   : > { %2419 = vmatpush.msrb.mxu2 %v9527_v62  ;;  %v2294_v30 = vsel %vm14637_vm0, %v9528_v14, %v9527_v62  ;;  %vm14639_vm0 = vcmask 818176   ;;  %v2259_v46 = vsel %vm14640_vm13, %v9553_v21, %v9552_v24  ;;  %vm14641_vm13 = vcmask 695296  }
 0x51a   : > { %2373 = vmatpush.msrb.mxu0 %v2294_v30 }
 0x51b   : > { %2420 = vmatpush.msrb.mxu2 %v9532_v43  ;;  %9595 = vrot.lane.b32.xlu2 %v9594_v27, %s14623_s22  ;;  %v7978_v27 = vld [vmem:[%s10445_s15 + $0x4c8] sm:$0xf] }
 0x51c   : > { %9600 = vrot.lane.b32.xlu0 %v9599_v52, %s14623_s22  ;;  %2374 = vmatpush.msrb.mxu0 %v2287_v35  ;;  %v9021_v52 = vld [vmem:[%s10445_s15 + $0x4e4] sm:$0x30] }
 0x51d   : > { %2421 = vmatpush.msrb.mxu2 %v9537_v10  ;;  %v9546_v31 = vpop.permute.xlu1 %9545  ;;  %v7980_v10 = vld [vmem:[%s10445_s15 + $0x4e8] sm:$0x30] }
 0x51e   : > { %v9541_v49 = vpop.permute.xlu0 %9540  ;;  %2375 = vmatpush.msrb.mxu0 %v2280_v23  ;;  %v9548_v16 = vunpack.i.h.bf16 %v9546_v31  ;;  %v9547_v1 = vunpack.i.l.bf16 %v9546_v31  ;;  %v7983_v23 = vor.u32 %v9017_v3, %v7980_v10  ;;  %v9000_v3 = vld [vmem:[%s10445_s15 + $0x444] sm:$0xf] }
 0x51f   : > { %v9543_v38 = vunpack.i.h.bf16 %v9541_v49  ;;  %v9542_v48 = vunpack.i.l.bf16 %v9541_v49  ;;  %v7979_v49 = vor.u32 %v9021_v52, %v7978_v27  ;;  %v7908_v10 = vld [vmem:[%s10445_s15 + $0x460] sm:$0xf0]  ;;  %v11371_v52 = vld [vmem:[%s14530_s3 + $0x8] sm:$0xff] }
 0x520   : > { %v2266_v22 = vsel %vm14639_vm0, %v9548_v16, %v9547_v1  ;;  %v9016_v16 = vld [vmem:[%s10445_s15 + $0x4c4] sm:$0xf] }
 0x521   : > { %2422 = vmatpush.msrb.mxu2 %v9542_v48  ;;  %v2273_v32 = vsel %vm14638_vm12, %v9543_v38, %v9542_v48  ;;  %vm14642_vm12 = vmmov %vm14641_vm13 }
 0x522   : > { %2376 = vmatpush.msrb.mxu0 %v2273_v32  ;;  %vm14643_vm0 = vmmov %vm14642_vm12 }
 0x523   : > { %2423 = vmatpush.msrb.mxu2 %v9547_v1  ;;  %v7972_v1 = vld [vmem:[%s10445_s15 + $0x4e0] sm:$0x30] }
 0x524   : > { %2377 = vmatpush.msrb.mxu0 %v2266_v22 }
 0x525   : > { %2424 = vmatpush.msrb.mxu2 %v9552_v24  ;;  %v7975_v24 = vor.u32 %v9016_v16, %v7972_v1  ;;  %v8997_v16 = vld [vmem:[%s10445_s15 + $0x424] sm:$0xf0]  ;;  %v7938_v1 = vld [vmem:[%s10445_s15 + $0x480] sm:$0xf] }
 0x526   : > { %2378 = vmatpush.msrb.mxu0 %v2259_v46  ;;  %v9009_v46 = vld [vmem:[%s10445_s15 + $0x48c] sm:$0xf] }
 0x527   : > { %2425 = vmatpush.msrb.mxu2 %v11237_v15 }
 0x528   : > { %2379 = vmatpush.msrb.mxu0 %v11245_v41 }
 0x529   : > { %2426 = vmatpush.msrb.mxu2 %v11235_v12 }
 0x52a   : > { %2380 = vmatpush.msrb.mxu0 %v11259_v60 }
 0x52b   : > { %2427 = vmatpush.msrb.mxu2 %v11239_v13 }
 0x52c   : > { %2381 = vmatpush.msrb.mxu0 %v11255_v11 }
 0x52d   : > { %2428 = vmatpush.msrb.mxu2 %v11251_v9 }
 0x52e   : > { %2382 = vmatpush.msrb.mxu0 %v2231_v40 }
 0x565   : > { %v9571_v55 = vpop.permute.xlu2 %9570 }
 0x566   : > { %v9573_v15 = vunpack.i.h.bf16 %v9571_v55  ;;  %v9572_v11 = vunpack.i.l.bf16 %v9571_v55  ;;  %v7948_v55 = vld [vmem:[%s10445_s15 + $0x4a8] sm:$0xf0] }
 0x56d   : > { %v9581_v9 = vpop.permute.xlu2 %9580 }
 0x56e   : > { %v9583_v43 = vunpack.i.h.bf16 %v9581_v9  ;;  %v9582_v35 = vunpack.i.l.bf16 %v9581_v9  ;;  %v11358_v9 = vld [vmem:[%s14530_s3] sm:$0xff] }
 0x575   : > { %v9556_v51 = vpop.permute.xlu0 %9555  ;;  %v11333_v32 = vpop.permute.xlu2 %9595 }
 0x576   : > { %v9557_v45 = vunpack.i.l.bf16 %v9556_v51  ;;  %v9566_v54 = vpop.permute.xlu1 %9565  ;;  %v9558_v29 = vunpack.i.h.bf16 %v9556_v51  ;;  %v7946_v51 = vld [vmem:[%s10445_s15 + $0x488] sm:$0xf] }
 0x577   : > { %v9568_v56 = vunpack.i.h.bf16 %v9566_v54  ;;  %v9567_v12 = vunpack.i.l.bf16 %v9566_v54  ;;  %v9598_v54 = vunpack.i.h.bf16 %v11333_v32 }
 0x578   : > { %2448 = vmatpush.msrb.mxu3 %v9557_v45  ;;  %v2352_v13 = vsel %vm14642_vm12, %v9573_v15, %v9558_v29  ;;  %vm14645_vm12 = vmmov %vm14643_vm0  ;;  %v7970_v15 = vld [vmem:[%s10445_s15 + $0x4c0] sm:$0xf] }
 0x579   : > { %v2353_v41 = vsel %vm14641_vm13, %v9568_v56, %v9557_v45  ;;  %vm14644_vm13 = vmmov %vm14643_vm0  ;;  %v9013_v45 = vld [vmem:[%s10445_s15 + $0x4a4] sm:$0xf0]  ;;  %v7951_v56 = vor.u32 %v9009_v46, %v7948_v55  ;;  %v7876_v46 = vld [vmem:[%s10445_s15 + $0x420] sm:$0xf0] }
 0x57a   : > { %2402 = vmatpush.msrb.mxu1 %v2353_v41  ;;  %2449 = vmatpush.msrb.mxu3 %v9558_v29  ;;  %v2350_v28 = vsel %vm14644_vm13, %v9583_v43, %v9572_v11  ;;  %v9597_v29 = vunpack.i.l.bf16 %v11333_v32  ;;  %v9020_v41 = vld [vmem:[%s10445_s15 + $0x4dc] sm:$0x30]  ;;  %vm14646_vm13 = vmmov %vm14643_vm0  ;;  %v7911_v32 = vor.u32 %v9000_v3, %v7908_v10 }
 0x57b   : > { %v7971_v43 = vor.u32 %v9020_v41, %v7970_v15  ;;  %v7988_v41 = vld [vmem:[%s10445_s15 + $0x4f0] sm:$0x30] }
 0x57c   : > { %2403 = vmatpush.msrb.mxu1 %v2352_v13  ;;  %2450 = vmatpush.msrb.mxu3 %v9567_v12  ;;  %v7940_v13 = vld [vmem:[%s10445_s15 + $0x4a0] sm:$0xf0] }
 0x57d   : > { %v9561_v60 = vpop.permute.xlu0 %9560 }
 0x57e   : > { %v9563_v40 = vunpack.i.h.bf16 %v9561_v60  ;;  %v9562_v59 = vunpack.i.l.bf16 %v9561_v60  ;;  %v9576_v17 = vpop.permute.xlu1 %9575  ;;  %2451 = vmatpush.msrb.mxu3 %v9572_v11  ;;  %v9001_v11 = vld [vmem:[%s10445_s15 + $0x44c] sm:$0xf] }
 0x57f   : > { %v9578_v14 = vunpack.i.h.bf16 %v9576_v17  ;;  %v9577_v62 = vunpack.i.l.bf16 %v9576_v17  ;;  %v9005_v17 = vld [vmem:[%s10445_s15 + $0x464] sm:$0xf0] }
 0x580   : > { %2429 = vmatpush.msrb.mxu2 %v9562_v59  ;;  %v2224_v30 = vsel %vm816_vm15, %v9563_v40, %v9562_v59  ;;  %v7916_v40 = vld [vmem:[%s10445_s15 + $0x468] sm:$0xf0]  ;;  %v7914_v59 = vld [vmem:[%s10445_s15 + $0x448] sm:$0xf] }
 0x581   : > { %2383 = vmatpush.msrb.mxu0 %v2224_v30  ;;  %2452 = vmatpush.msrb.mxu3 %v9577_v62  ;;  %v2351_v31 = vsel %vm14643_vm0, %v9578_v14, %v9567_v12  ;;  %v9008_v12 = vld [vmem:[%s10445_s15 + $0x484] sm:$0xf] }
 0x582   : > { %2404 = vmatpush.msrb.mxu1 %v2351_v31  ;;  %2430 = vmatpush.msrb.mxu2 %v11264_v63  ;;  %v7915_v31 = vor.u32 %v9005_v17, %v7914_v59  ;;  %v8984_v59 = vld [vmem:[%s10445_s15 + $0x3c4] sm:$0xf] }
 0x583   : > { %2384 = vmatpush.msrb.mxu0 %v11277_v58  ;;  %2453 = vmatpush.msrb.mxu3 %v9582_v35  ;;  %v2754_v58 = vand.u32 %v7983_v23, %v10447_v2  ;;  %v8993_v23 = vld [vmem:[%s10445_s15 + $0x40c] sm:$0xf]  ;;  %v7844_v17 = vld [vmem:[%s10445_s15 + $0x3e0] sm:$0xf0] }
 0x584   : > { %2405 = vmatpush.msrb.mxu1 %v2350_v28  ;;  %2431 = vmatpush.msrb.mxu2 %v11273_v7  ;;  %v7884_v28 = vld [vmem:[%s10445_s15 + $0x428] sm:$0xf0] }
 0x585   : > { %v9586_v38 = vpop.permute.xlu0 %9585  ;;  %2385 = vmatpush.msrb.mxu0 %v11289_v5  ;;  %v2751_v5 = vand.u32 %v7979_v49, %v10447_v2  ;;  %v7882_v49 = vld [vmem:[%s10445_s15 + $0x408] sm:$0xf]  ;;  %v7887_v55 = vor.u32 %v8993_v23, %v7884_v28  ;;  %v9015_v23 = vld [vmem:[%s10445_s15 + $0x4b4] sm:$0xf0]  ;;  %v7874_v28 = vld [vmem:[%s10445_s15 + $0x400] sm:$0xf] }
 0x586   : > { %v9588_v48 = vunpack.i.h.bf16 %v9586_v38  ;;  %v9587_v63 = vunpack.i.l.bf16 %v9586_v38  ;;  %v11329_v21 = vpop.permute.xlu1 %9590  ;;  %2432 = vmatpush.msrb.mxu2 %v11269_v26  ;;  %v9019_v38 = vld [vmem:[%s10445_s15 + $0x4dc] sm:$0xf] }
 0x587   : > { %v9593_v22 = vunpack.i.h.bf16 %v11329_v21  ;;  %v9592_v7 = vunpack.i.l.bf16 %v11329_v21  ;;  %2386 = vmatpush.msrb.mxu0 %v11293_v34  ;;  %v7996_v21 = vld [vmem:[%s10445_s15 + $0x4f8] sm:$0x30] }
 0x588   : > { %2433 = vmatpush.msrb.mxu2 %v11215_v57  ;;  %2454 = vmatpush.msrb.mxu3 %v9587_v63  ;;  %v2349_v26 = vsel %vm14645_vm12, %v9588_v48, %v9577_v62  ;;  %v2748_v57 = vand.u32 %v7975_v24, %v10447_v2  ;;  %v2347_v60 = vsel %vm14646_vm13, %v9598_v54, %v9587_v63  ;;  %vm14647_vm12 = vmmov %vm14643_vm0  ;;  %v9023_v24 = vld [vmem:[%s10445_s15 + $0x4f4] sm:$0x30]  ;;  %v11396_v54 = vld [vmem:[%s14530_s3 + $0x10] sm:$0xff]  ;;  %vm14652_vm13 = vcmask 785408  }
 0x589   : > { %2387 = vmatpush.msrb.mxu0 %v11213_v25  ;;  %2406 = vmatpush.msrb.mxu1 %v2349_v26  ;;  %v2348_v34 = vsel %vm14643_vm0, %v9593_v22, %v9582_v35  ;;  %v7947_v25 = vor.u32 %v9013_v45, %v7946_v51  ;;  %v7943_v62 = vor.u32 %v9008_v12, %v7940_v13  ;;  %v9012_v22 = vld [vmem:[%s10445_s15 + $0x49c] sm:$0xf0]  ;;  %v8985_v51 = vld [vmem:[%s10445_s15 + $0x3cc] sm:$0xf] }
 0x58a   : > { %2810 = vmatpush.bf16.msra.mxu2 %v2754_v58  ;;  %2455 = vmatpush.msrb.mxu3 %v9592_v7  ;;  %v7919_v35 = vor.u32 %v9001_v11, %v7916_v40  ;;  %v2745_v63 = vand.u32 %v7971_v43, %v10447_v2  ;;  %v7994_v58 = vld [vmem:[%s10445_s15 + $0x4d8] sm:$0xf]  ;;  %v7883_v26 = vor.u32 %v8997_v16, %v7882_v49  ;;  %v7852_v45 = vld [vmem:[%s10445_s15 + $0x3e8] sm:$0xf0]  ;;  %v7906_v13 = vld [vmem:[%s10445_s15 + $0x440] sm:$0xf] }
 0x58b   : > { %2797 = vmatpush.bf16.msra.mxu0 %v2751_v5  ;;  %2407 = vmatpush.msrb.mxu1 %v2348_v34  ;;  %v8992_v5 = vld [vmem:[%s10445_s15 + $0x404] sm:$0xf]  ;;  %v7850_v34 = vld [vmem:[%s10445_s15 + $0x3c8] sm:$0xf]  ;;  %v7995_v15 = vor.u32 %v9023_v24, %v7994_v58  ;;  %v9004_v11 = vld [vmem:[%s10445_s15 + $0x45c] sm:$0xf0] }
 0x58c   : > { %2434 = vmatmul.f32.vlgmr.msrb.gmra.mxu2 %v11358_v9  ;;  %2456 = vmatpush.msrb.mxu3 %v9597_v29  ;;  %v7879_v12 = vor.u32 %v8992_v5, %v7876_v46  ;;  %v7907_v10 = vor.u32 %v9004_v11, %v7906_v13  ;;  %v8996_v49 = vld [vmem:[%s10445_s15 + $0x41c] sm:$0xf0]  ;;  %v7930_v5 = vld [vmem:[%s10445_s15 + $0x458] sm:$0xf] }
 0x58d   : > { %2388 = vmatmul.f32.vlgmr.msrb.gmra.mxu0 %v11358_v9  ;;  %2408 = vmatpush.msrb.mxu1 %v2347_v60  ;;  %v7855_v60 = vor.u32 %v8985_v51, %v7852_v45  ;;  %v2763_v3 = vand.u32 %v7995_v15, %v10447_v2  ;;  %v7875_v24 = vor.u32 %v8996_v49, %v7874_v28  ;;  %v11435_v46 = vld [vmem:[%s14528_s1] sm:$0xf]  ;;  %v7898_v13 = vld [vmem:[%s10445_s15 + $0x418] sm:$0xf]  ;;  %v7922_v28 = vld [vmem:[%s10445_s15 + $0x450] sm:$0xf] }
 0x58e   : > { %v9601_v14 = vpop.permute.xlu0 %9600  ;;  %2784 = vmatpush.bf16.msra.mxu3 %v2748_v57  ;;  %2811 = vmatpush.bf16.msra.mxu2 %v7951_v56  ;;  %v8989_v57 = vld [vmem:[%s10445_s15 + $0x3e4] sm:$0xf0]  ;;  %v7999_v56 = vor.u32 %v9019_v38, %v7996_v21  ;;  %v9022_v38 = vld [vmem:[%s10445_s15 + $0x4ec] sm:$0x30]  ;;  %v7956_v21 = vld [vmem:[%s10445_s15 + $0x4b0] sm:$0xf0] }
 0x58f   : > { %v9603_v30 = vunpack.i.h.bf16 %v9601_v14  ;;  %v9602_v27 = vunpack.i.l.bf16 %v9601_v14  ;;  %2798 = vmatpush.bf16.msra.mxu0 %v7947_v25  ;;  %7798 = vmatmul.msk.f32.vlgmr.msrb.gmra.mxu3 %vm988_vm1, %v11371_v52  ;;  %v7939_v25 = vor.u32 %v9012_v22, %v7938_v1  ;;  %v7851_v40 = vor.u32 %v8989_v57, %v7850_v34  ;;  %v11412_v14 = vld [vmem:[%s14530_s3 + $0x18] sm:$0xff]  ;;  %v7986_v1 = vld [vmem:[%s10445_s15 + $0x4d0] sm:$0xf]  ;;  %v9002_v57 = vld [vmem:[%s10445_s15 + $0x454] sm:$0xf] }
 0x590   : > { %v7932_v22 = vld [vmem:[%s10445_s15 + $0x478] sm:$0xf0]  ;;  %v7987_v51 = vor.u32 %v9022_v38, %v7986_v1  ;;  %v8999_v11 = vld [vmem:[%s10445_s15 + $0x434] sm:$0xf0]  ;;  %v9006_v49 = vld [vmem:[%s10445_s15 + $0x46c] sm:$0xf0] }
 0x591   : > { %v2346_v48 = vsel %vm14647_vm12, %v9602_v27, %v9592_v7  ;;  %v2345_v7 = vsel %vm14643_vm0, %v9603_v30, %v9597_v29  ;;  %v9018_v29 = vld [vmem:[%s10445_s15 + $0x4d4] sm:$0xf]  ;;  %v9011_v30 = vld [vmem:[%s10445_s15 + $0x49c] sm:$0xf]  ;;  %vm14653_vm12 = vcmask 793600   ;;  %vm14654_vm0 = vcmask 809984  }
 0x592   : > { %2409 = vmatpush.msrb.mxu1 %v2346_v48  ;;  %2785 = vmatpush.bf16.msra.mxu3 %v7943_v62  ;;  %v7991_v43 = vor.u32 %v9018_v29, %v7988_v41  ;;  %v2766_v62 = vand.u32 %v7999_v56, %v10447_v2  ;;  %v7964_v27 = vld [vmem:[%s10445_s15 + $0x4b8] sm:$0xf0]  ;;  %v7924_v56 = vld [vmem:[%s10445_s15 + $0x470] sm:$0xf0] }
 0x593   : > { %2812 = vmatpush.bf16.msra.mxu2 %v7919_v35  ;;  %2799 = vmatpush.bf16.msra.mxu0 %v7915_v31  ;;  %v7962_v35 = vld [vmem:[%s10445_s15 + $0x498] sm:$0xf]  ;;  %v7847_v31 = vor.u32 %v8984_v59, %v7844_v17  ;;  %v7967_v48 = vor.u32 %v9011_v30, %v7964_v27  ;;  %v8995_v41 = vld [vmem:[%s10445_s15 + $0x41c] sm:$0xf]  ;;  %v9014_v59 = vld [vmem:[%s10445_s15 + $0x4ac] sm:$0xf0] }
 0x594   : > { %2410 = vmatpush.msrb.mxu1 %v2345_v7  ;;  %2437 = vmatmul.f32.gmra.mxu2 %v11396_v54  ;;  %v2760_v16 = vand.u32 %v7991_v43, %v10447_v2  ;;  %v7963_v58 = vor.u32 %v9015_v23, %v7962_v35  ;;  %v9007_v7 = vld [vmem:[%s10445_s15 + $0x474] sm:$0xf0]  ;;  %v8994_v43 = vld [vmem:[%s10445_s15 + $0x414] sm:$0xf]  ;;  %v7868_v30 = vld [vmem:[%s10445_s15 + $0x3f8] sm:$0xf0] }
 0x595   : > { %2391 = vmatmul.f32.gmra.mxu0 %v11396_v54  ;;  %7796 = vmatmul.msk.f32.vlgmr.msrb.gmra.mxu1 %vm988_vm1, %v11371_v52  ;;  %v7931_v15 = vor.u32 %v9007_v7, %v7930_v5  ;;  %v7866_v35 = vld [vmem:[%s10445_s15 + $0x3d8] sm:$0xf]  ;;  %v8986_v1 = vld [vmem:[%s10445_s15 + $0x3d4] sm:$0xf]  ;;  %v8990_v5 = vld [vmem:[%s10445_s15 + $0x3ec] sm:$0xf0] }
 0x596   : > { %2771 = vmatpush.bf16.msra.mxu1 %v2745_v63  ;;  %2786 = vmatpush.bf16.msra.mxu3 %v7911_v32  ;;  %v9010_v63 = vld [vmem:[%s10445_s15 + $0x494] sm:$0xf]  ;;  %v9003_v32 = vld [vmem:[%s10445_s15 + $0x45c] sm:$0xf] }
 0x597   : > { %2813 = vmatpush.bf16.msra.mxu2 %v7887_v55  ;;  %2800 = vmatpush.bf16.msra.mxu0 %v7883_v26  ;;  %v7842_v55 = vld [vmem:[%s10445_s15 + $0x3c0] sm:$0xf]  ;;  %v7959_v45 = vor.u32 %v9010_v63, %v7956_v21  ;;  %v7935_v34 = vor.u32 %v9003_v32, %v7932_v22  ;;  %v7860_v38 = vld [vmem:[%s10445_s15 + $0x3f0] sm:$0xf0]  ;;  %v7923_v63 = vor.u32 %v9006_v49, %v7922_v28  ;;  %v7858_v22 = vld [vmem:[%s10445_s15 + $0x3d0] sm:$0xf] }
 0x598   : > { %7799 = vmatmul.msk.f32.gmra.mxu3 %vm988_vm1, %v11412_v14  ;;  %v8988_v26 = vld [vmem:[%s10445_s15 + $0x3dc] sm:$0xf0]  ;;  %v7863_v21 = vor.u32 %v8986_v1, %v7860_v38  ;;  %v7859_v7 = vor.u32 %v8990_v5, %v7858_v22 }
 0x599   : > { %v7843_v29 = vor.u32 %v8988_v26, %v7842_v55 }
 0x59a   : > { %2772 = vmatpush.bf16.msra.mxu1 %v7939_v25  ;;  %2787 = vmatpush.bf16.msra.mxu3 %v7879_v12  ;;  %v7900_v25 = vld [vmem:[%s10445_s15 + $0x438] sm:$0xf0]  ;;  %v2757_v12 = vand.u32 %v7987_v51, %v10447_v2 }
 0x59b   : > { %2814 = vmatpush.bf16.msra.mxu2 %v7855_v60  ;;  %2801 = vmatpush.bf16.msra.mxu0 %v7851_v40  ;;  %v7927_v60 = vor.u32 %v9002_v57, %v7924_v56  ;;  %v7954_v40 = vld [vmem:[%s10445_s15 + $0x490] sm:$0xf]  ;;  %v7903_v17 = vor.u32 %v8995_v41, %v7900_v25 }
 0x59c   : > { %v7955_v27 = vor.u32 %v9014_v59, %v7954_v40 }
 0x59d   : > { %7797 = vmatmul.msk.f32.gmra.mxu1 %vm988_vm1, %v11412_v14 }
 0x59e   : > { %2773 = vmatpush.bf16.msra.mxu1 %v7907_v10  ;;  %8003 = vmatmul.msk.bf16.vlgmr.msra.gmra.mxu2 %vm636_vm2, %v11435_v46  ;;  %v8987_v10 = vld [vmem:[%s10445_s15 + $0x3dc] sm:$0xf] }
 0x59f   : > { %2862 = vmatpush.bf16.msrb.mxu2 %v2766_v62  ;;  %2849 = vmatpush.bf16.msrb.mxu0 %v2763_v3  ;;  %v7892_v62 = vld [vmem:[%s10445_s15 + $0x430] sm:$0xf0]  ;;  %v7899_v3 = vor.u32 %v8999_v11, %v7898_v13 }
 0x5a0   : > { %2788 = vmatpush.bf16.msra.mxu3 %v7847_v31  ;;  %8002 = vmatmul.msk.bf16.vlgmr.msra.gmra.mxu0 %vm636_vm2, %v11435_v46  ;;  %v8991_v31 = vld [vmem:[%s10445_s15 + $0x3f4] sm:$0xf0]  ;;  %v7895_v23 = vor.u32 %v8994_v43, %v7892_v62 }
 0x5a2   : > { %2774 = vmatpush.bf16.msra.mxu1 %v7875_v24  ;;  %v8998_v24 = vld [vmem:[%s10445_s15 + $0x42c] sm:$0xf0] }
 0x5a3   : > { %2863 = vmatpush.bf16.msrb.mxu2 %v7967_v48  ;;  %2850 = vmatpush.bf16.msrb.mxu0 %v7963_v58  ;;  %v7867_v48 = vor.u32 %v8991_v31, %v7866_v35  ;;  %v7890_v58 = vld [vmem:[%s10445_s15 + $0x410] sm:$0xf] }
 0x5a4   : > { %2836 = vmatpush.bf16.msrb.mxu3 %v2760_v16  ;;  %v7871_v16 = vor.u32 %v8987_v10, %v7868_v30  ;;  %v7891_v32 = vor.u32 %v8998_v24, %v7890_v58 }
 0x5a5   : > { %8001 = vmatmul.msk.bf16.vlgmr.msra.gmra.mxu3 %vm636_vm2, %v11435_v46 }
 0x5a6   : > { %2775 = vmatpush.bf16.msra.mxu1 %v7843_v29 }
 0x5a7   : > { %2864 = vmatpush.bf16.msrb.mxu2 %v7935_v34  ;;  %2851 = vmatpush.bf16.msrb.mxu0 %v7931_v15 }
 0x5a8   : > { %2837 = vmatpush.bf16.msrb.mxu3 %v7959_v45 }
 0x5a9   : > { %8000 = vmatmul.msk.bf16.vlgmr.msra.gmra.mxu1 %vm636_vm2, %v11435_v46 }
 0x5aa   : > { %2823 = vmatpush.bf16.msrb.mxu1 %v2757_v12 }
 0x5ab   : > { %2865 = vmatpush.bf16.msrb.mxu2 %v7903_v17  ;;  %2852 = vmatpush.bf16.msrb.mxu0 %v7899_v3 }
 0x5ac   : > { %2838 = vmatpush.bf16.msrb.mxu3 %v7927_v60 }
 0x5ae   : > { %2824 = vmatpush.bf16.msrb.mxu1 %v7955_v27 }
 0x5af   : > { %2866 = vmatpush.bf16.msrb.mxu2 %v7871_v16  ;;  %2853 = vmatpush.bf16.msrb.mxu0 %v7867_v48 }
 0x5b0   : > { %2839 = vmatpush.bf16.msrb.mxu3 %v7895_v23 }
 0x5b2   : > { %2825 = vmatpush.bf16.msrb.mxu1 %v7923_v63  ;;  %8007 = vmatmul.msk.bf16.vlgmr.msrb.gmra.mxu2 %vm636_vm2, %v11435_v46 }
 0x5b3   : > { %8006 = vmatmul.msk.bf16.vlgmr.msrb.gmra.mxu0 %vm636_vm2, %v11435_v46 }
 0x5b4   : > { %2840 = vmatpush.bf16.msrb.mxu3 %v7863_v21 }
 0x5b6   : > { %2826 = vmatpush.bf16.msrb.mxu1 %v7891_v32 }
 0x5b7   : > { %8005 = vmatmul.msk.bf16.vlgmr.msrb.gmra.mxu3 %vm636_vm2, %v11435_v46 }
 0x5ba   : > { %2827 = vmatpush.bf16.msrb.mxu1 %v7859_v7 }
 0x5bd   : > { %8004 = vmatmul.msk.bf16.vlgmr.msrb.gmra.mxu1 %vm636_vm2, %v11435_v46 }
 0x60a   : > { %v11481_v55 = vpop.f32.mrf.mxu0 }
 0x60f   : > { %v11483_v26 = vpop.f32.mrf.mxu2 }
 0x612   : > { %v11485_v51 = vpop.f32.mrf.mxu0  ;;  %v11487_v45 = vpop.f32.mrf.mxu3 }
 0x613   : > { %14648 = vst [vmem:[#allocation20_spill] sm:$0xff] %v11485_v51  ;;  %v11489_v34 = vpop.f32.mrf.mxu1 }
 0x617   : > { %v11491_v57 = vpop.f32.mrf.mxu2 }
 0x618   : > { %14649 = vst [vmem:[#allocation21_spill] sm:$0xff] %v11491_v57 }
 0x61b   : > { %v11493_v56 = vpop.f32.mrf.mxu3  ;;  %v11495_v29 = vpop.f32.mrf.mxu1 }
 0x61c   : > { %14650 = vst [vmem:[#allocation22_spill] sm:$0xff] %v11493_v56 }
 0x61d   : > { %v2803_v15 = vpop.f32.mrf.mxu0  ;;  %14651 = vst [vmem:[#allocation23_spill] sm:$0xff] %v11495_v29 }
 0x61e   : > { %v2804_v30 = vadd.f32 %v2803_v15, %v10587_v50 }
 0x620   : > { %v2874_v21 = vmax.f32 %v2804_v30, 0.0 }
 0x621   : > { %v2816_v41 = vpop.f32.mrf.mxu2 }
 0x622   : > { %v2817_v3 = vadd.f32 %v2816_v41, %v10587_v50 }
 0x624   : > { %v2875_v38 = vmax.f32 %v2817_v3, 0.0 }
 0x625   : > { %v2805_v25 = vpop.f32.mrf.mxu0 }
 0x626   : > { %v2777_v13 = vpop.f32.mrf.mxu1 }
 0x627   : > { %v2778_v62 = vadd.f32 %v2777_v13, %v10587_v50 }
 0x628   : > { %v2790_v12 = vpop.f32.mrf.mxu3 }
 0x629   : > { %v2818_v11 = vpop.f32.mrf.mxu2  ;;  %v2791_v17 = vadd.f32 %v2790_v12, %v10587_v50  ;;  %v2872_v16 = vmax.f32 %v2778_v62, 0.0 }
 0x62b   : > { %v2873_v23 = vmax.f32 %v2791_v17, 0.0  ;;  %v2880_v7 = vmax.f32 %v2872_v16, %v2874_v21 }
 0x62d   : > { %v2881_v32 = vmax.f32 %v2873_v23, %v2875_v38 }
 0x62e   : > { %v2779_v59 = vpop.f32.mrf.mxu1 }
 0x630   : > { %v2792_v60 = vpop.f32.mrf.mxu3  ;;  %v2855_v40 = vpop.f32.mrf.mxu0 }
 0x631   : > { %v2856_v27 = vadd.f32 %v2855_v40, %v10587_v50 }
 0x633   : > { %v2878_v58 = vmax.f32 %v2856_v27, 0.0 }
 0x635   : > { %v2868_v43 = vpop.f32.mrf.mxu2 }
 0x636   : > { %v2869_v10 = vadd.f32 %v2868_v43, %v10587_v50 }
 0x638   : > { %v2857_v31 = vpop.f32.mrf.mxu0  ;;  %v2879_v48 = vmax.f32 %v2869_v10, 0.0 }
 0x63a   : > { %v2842_v35 = vpop.f32.mrf.mxu3  ;;  %v2829_v49 = vpop.f32.mrf.mxu1 }
 0x63b   : > { %v2843_v28 = vadd.f32 %v2842_v35, %v10587_v50  ;;  %v2830_v1 = vadd.f32 %v2829_v49, %v10587_v50 }
 0x63d   : > { %v2877_v63 = vmax.f32 %v2843_v28, 0.0  ;;  %v2876_v24 = vmax.f32 %v2830_v1, 0.0  ;;  %v2870_v5 = vpop.f32.mrf.mxu2 }
 0x63f   : > { %v2883_v22 = vmax.f32 %v2877_v63, %v2879_v48  ;;  %v2882_v15 = vmax.f32 %v2876_v24, %v2878_v58 }
 0x641   : > { %v11505_v41 = vmax.f32 %v2881_v32, %v2883_v22  ;;  %v11507_v25 = vmax.f32 %v2880_v7, %v2882_v15 }
 0x642   : > { %v2844_v12 = vpop.f32.mrf.mxu3  ;;  %v2831_v13 = vpop.f32.mrf.mxu1 }
 0x643   : > { %v11511_v11 = vpack.i.bf16 %v11505_v41, %v11507_v25 }
 0x645   : > { %9615 = vrot.lane.b32.xlu0 %v11511_v11, %s14633_s23  ;;  %9610 = vrot.lane.b32.xlu2 %v11511_v11, %s14634_s28 }
 0x646   : > { %9605 = vrot.lane.b32.xlu1 %v11511_v11, %s14614_s12 }
 0x64d   : > { %9630 = vrot.lane.b32.xlu0 %v11511_v11, %s14615_s16  ;;  %9625 = vrot.lane.b32.xlu2 %v11511_v11, %s14616_s21 }
 0x64e   : > { %9620 = vrot.lane.b32.xlu1 %v11511_v11, %s14617_s25 }
 0x655   : > { %9645 = vrot.lane.b32.xlu0 %v11511_v11, %s14621_s0  ;;  %9640 = vrot.lane.b32.xlu2 %v11511_v11, %s14618_s24 }
 0x656   : > { %9635 = vrot.lane.b32.xlu1 %v11511_v11, %s14619_s14 }
 0x65d   : > { %9660 = vrot.lane.b32.xlu0 %v11511_v11, %s14622_s2  ;;  %9655 = vrot.lane.b32.xlu2 %v11511_v11, %s14620_s30 }
 0x65e   : > { %9650 = vrot.lane.b32.xlu1 %v11511_v11, %s14635_s17 }
 0x665   : > { %9670 = vrot.lane.b32.xlu0 %v11511_v11, %s14625_s26  ;;  %9675 = vrot.lane.b32.xlu2 %v11511_v11, %s14624_s13 }
 0x666   : > { %9665 = vrot.lane.b32.xlu1 %v11511_v11, %s14636_s20 }
 0x69f   : > { %v9611_v60 = vpop.permute.xlu2 %9610 }
 0x6a0   : > { %v11543_v40 = vunpack.i.h.bf16 %v9611_v60  ;;  %v9612_v59 = vunpack.i.l.bf16 %v9611_v60 }
 0x6a2   : > { %v11547_v17 = vsel %vm840_vm5, %v9612_v59, %v11543_v40 }
 0x6a3   : > { %v9684_v43 = vpack.i.bf16 %v11543_v40, %v11547_v17 }
 0x6a5   : > { %9685 = vrot.lane.b32.xlu1 %v9684_v43, %s14623_s22 }
 0x6a7   : > { %v9626_v62 = vpop.permute.xlu2 %9625 }
 0x6a8   : > { %v9628_v1 = vunpack.i.h.bf16 %v9626_v62  ;;  %v9627_v38 = vunpack.i.l.bf16 %v9626_v62 }
 0x6aa   : > { %v2997_v5 = vsel %vm912_vm7, %v9627_v38, %v9628_v1 }
 0x6ab   : > { %v9699_v43 = vpack.i.bf16 %v9628_v1, %v2997_v5 }
 0x6af   : > { %v9641_v24 = vpop.permute.xlu2 %9640 }
 0x6b0   : > { %v11585_v13 = vunpack.i.h.bf16 %v9641_v24  ;;  %v9642_v60 = vunpack.i.l.bf16 %v9641_v24 }
 0x6b7   : > { %v9616_v3 = vpop.permute.xlu0 %9615 }
 0x6b8   : > { %v11552_v10 = vunpack.i.h.bf16 %v9616_v3  ;;  %v9617_v30 = vunpack.i.l.bf16 %v9616_v3  ;;  %v9606_v27 = vpop.permute.xlu1 %9605 }
 0x6b9   : > { %v11554_v35 = vunpack.i.h.bf16 %v9606_v27  ;;  %v9607_v31 = vunpack.i.l.bf16 %v9606_v27 }
 0x6ba   : > { %v11558_v23 = vsel %vm832_vm8, %v9617_v30, %v11552_v10 }
 0x6bb   : > { %v9689_v28 = vpack.i.bf16 %v11552_v10, %v11558_v23  ;;  %v11564_v49 = vsel %vm848_vm6, %v9607_v31, %v11554_v35  ;;  %v11594_v31 = vsel %vm792_vm9, %v9642_v60, %v11585_v13 }
 0x6bc   : > { %v9679_v16 = vpack.i.bf16 %v11554_v35, %v11564_v49  ;;  %v9719_v38 = vpack.i.bf16 %v11585_v13, %v11594_v31 }
 0x6bd   : > { %9690 = vrot.lane.b32.xlu0 %v9689_v28, %s14623_s22 }
 0x6be   : > { %9680 = vrot.lane.b32.xlu2 %v9679_v16, %s14623_s22 }
 0x6bf   : > { %v9631_v48 = vpop.permute.xlu0 %9630 }
 0x6c0   : > { %v11570_v63 = vunpack.i.h.bf16 %v9631_v48  ;;  %v9632_v21 = vunpack.i.l.bf16 %v9631_v48  ;;  %v9621_v58 = vpop.permute.xlu1 %9620 }
 0x6c1   : > { %v11572_v32 = vunpack.i.h.bf16 %v9621_v58  ;;  %v9622_v22 = vunpack.i.l.bf16 %v9621_v58  ;;  %v9656_v58 = vpop.permute.xlu2 %9655 }
 0x6c2   : > { %v11577_v7 = vsel %vm808_vm10, %v9632_v21, %v11570_v63  ;;  %v9658_v5 = vunpack.i.h.bf16 %v9656_v58 }
 0x6c3   : > { %v9709_v15 = vpack.i.bf16 %v11570_v63, %v11577_v7  ;;  %v11583_v12 = vsel %vm824_vm3, %v9622_v22, %v11572_v32 }
 0x6c4   : > { %v9694_v59 = vpack.i.bf16 %v11572_v32, %v11583_v12 }
 0x6c5   : > { %9710 = vrot.lane.b32.xlu0 %v9709_v15, %s14623_s22  ;;  %v9657_v15 = vunpack.i.l.bf16 %v9656_v58 }
 0x6c6   : > { %9695 = vrot.lane.b32.xlu1 %v9694_v59, %s14623_s22  ;;  %9700 = vrot.lane.b32.xlu2 %v9699_v43, %s14623_s22 }
 0x6c7   : > { %v9646_v62 = vpop.permute.xlu0 %9645 }
 0x6c8   : > { %v9648_v3 = vunpack.i.h.bf16 %v9646_v62  ;;  %v9647_v30 = vunpack.i.l.bf16 %v9646_v62  ;;  %v9636_v27 = vpop.permute.xlu1 %9635 }
 0x6c9   : > { %v11596_v28 = vunpack.i.h.bf16 %v9636_v27  ;;  %v9637_v16 = vunpack.i.l.bf16 %v9636_v27 }
 0x6ca   : > { %3107 = vmatpush.msra.mxu0 %v9648_v3  ;;  %v2990_v1 = vsel %vm904_vm4, %v9647_v30, %v9648_v3  ;;  %v2976_v30 = vsel %vm14653_vm12, %v9657_v15, %v9658_v5  ;;  %vm14656_vm12 = vcmask 900096  }
 0x6cb   : > { %3061 = vmatpush.msra.mxu1 %v2990_v1  ;;  %v11603_v48 = vsel %vm800_vm11, %v9637_v16, %v11596_v28  ;;  %v9676_v1 = vpop.permute.xlu2 %9675 }
 0x6cc   : > { %v9714_v21 = vpack.i.bf16 %v11596_v28, %v11603_v48 }
 0x6cd   : > { %9720 = vrot.lane.b32.xlu0 %v9719_v38, %s14623_s22 }
 0x6ce   : > { %9715 = vrot.lane.b32.xlu1 %v9714_v21, %s14623_s22  ;;  %9705 = vrot.lane.b32.xlu2 %v11511_v11, %s14626_s19 }
 0x6cf   : > { %v9661_v24 = vpop.permute.xlu0 %9660 }
 0x6d0   : > { %v9651_v22 = vpop.permute.xlu1 %9650  ;;  %v9663_v43 = vunpack.i.h.bf16 %v9661_v24  ;;  %v9662_v62 = vunpack.i.l.bf16 %v9661_v24 }
 0x6d1   : > { %v9653_v60 = vunpack.i.h.bf16 %v9651_v22  ;;  %v9652_v59 = vunpack.i.l.bf16 %v9651_v22 }
 0x6d2   : > { %v2969_v16 = vsel %vm880_vm14, %v9662_v62, %v9663_v43 }
 0x6d3   : > { %3108 = vmatpush.msra.mxu0 %v9653_v60  ;;  %v2983_v3 = vsel %vm14652_vm13, %v9652_v59, %v9653_v60  ;;  %v9678_v60 = vunpack.i.h.bf16 %v9676_v1  ;;  %v9677_v59 = vunpack.i.l.bf16 %v9676_v1  ;;  %vm14655_vm13 = vcmask 818176   ;;  %v9056_v1 = vld [vmem:[%s10445_s15 + $0x604] sm:$0xf] }
 0x6d4   : > { %3062 = vmatpush.msra.mxu1 %v2983_v3 }
 0x6d5   : > { %3109 = vmatpush.msra.mxu0 %v9658_v5  ;;  %v2948_v15 = vsel %vm14656_vm12, %v9677_v59, %v9678_v60 }
 0x6d6   : > { %3063 = vmatpush.msra.mxu1 %v2976_v30  ;;  %9725 = vrot.lane.b32.xlu1 %v11511_v11, %s14623_s22 }
 0x6d7   : > { %3110 = vmatpush.msra.mxu0 %v9663_v43  ;;  %v9671_v27 = vpop.permute.xlu0 %9670 }
 0x6d8   : > { %v9666_v38 = vpop.permute.xlu1 %9665  ;;  %3064 = vmatpush.msra.mxu1 %v2969_v16  ;;  %v9673_v21 = vunpack.i.h.bf16 %v9671_v27  ;;  %v9672_v58 = vunpack.i.l.bf16 %v9671_v27  ;;  %v9057_v27 = vld [vmem:[%s10445_s15 + $0x60c] sm:$0xf] }
 0x6d9   : > { %v9668_v24 = vunpack.i.h.bf16 %v9666_v38  ;;  %v9667_v22 = vunpack.i.l.bf16 %v9666_v38  ;;  %v8192_v16 = vld [vmem:[%s10445_s15 + $0x628] sm:$0x30]  ;;  %v8184_v38 = vld [vmem:[%s10445_s15 + $0x620] sm:$0x30] }
 0x6da   : > { %v2955_v11 = vsel %vm14655_vm13, %v9672_v58, %v9673_v21  ;;  %v8195_v58 = vor.u32 %v9057_v27, %v8192_v16  ;;  %v8096_v27 = vld [vmem:[%s10445_s15 + $0x568] sm:$0xf0]  ;;  %v8088_v16 = vld [vmem:[%s10445_s15 + $0x560] sm:$0xf0] }
 0x6db   : > { %3111 = vmatpush.msra.mxu0 %v9668_v24  ;;  %v2962_v5 = vsel %vm14654_vm0, %v9667_v22, %v9668_v24  ;;  %vm14657_vm0 = vcmask 695296   ;;  %v8187_v24 = vor.u32 %v9056_v1, %v8184_v38 }
 0x6dc   : > { %3065 = vmatpush.msra.mxu1 %v2962_v5  ;;  %vm14658_vm13 = vmmov %vm14657_vm0  ;;  %v3443_v5 = vand.u32 %v8195_v58, %v10447_v2  ;;  %v9059_v58 = vld [vmem:[%s10445_s15 + $0x61c] sm:$0xf] }
 0x6dd   : > { %3112 = vmatpush.msra.mxu0 %v9673_v21  ;;  %vm14659_vm12 = vmmov %vm14657_vm0 }
 0x6de   : > { %3066 = vmatpush.msra.mxu1 %v2955_v11  ;;  %v3437_v11 = vand.u32 %v8187_v24, %v10447_v2 }
 0x6df   : > { %3113 = vmatpush.msra.mxu0 %v9678_v60 }
 0x6e0   : > { %3067 = vmatpush.msra.mxu1 %v2948_v15  ;;  %v8160_v15 = vld [vmem:[%s10445_s15 + $0x5e8] sm:$0xf0] }
 0x6e1   : > { %3114 = vmatpush.msra.mxu0 %v11554_v35 }
 0x6e2   : > { %3068 = vmatpush.msra.mxu1 %v11564_v49 }
 0x6e3   : > { %3115 = vmatpush.msra.mxu0 %v11543_v40 }
 0x6e4   : > { %3069 = vmatpush.msra.mxu1 %v11547_v17 }
 0x6e5   : > { %3116 = vmatpush.msra.mxu0 %v11552_v10 }
 0x6e6   : > { %3070 = vmatpush.msra.mxu1 %v11558_v23 }
 0x6e7   : > { %3117 = vmatpush.msra.mxu0 %v11572_v32 }
 0x6e8   : > { %3071 = vmatpush.msra.mxu1 %v11583_v12 }
 0x717   : > { %v9686_v43 = vpop.permute.xlu1 %9685 }
 0x718   : > { %v9681_v62 = vpop.permute.xlu2 %9680  ;;  %v9688_v3 = vunpack.i.h.bf16 %v9686_v43  ;;  %v9687_v35 = vunpack.i.l.bf16 %v9686_v43  ;;  %v8152_v43 = vld [vmem:[%s10445_s15 + $0x5e0] sm:$0xf0] }
 0x719   : > { %v9683_v49 = vunpack.i.h.bf16 %v9681_v62  ;;  %v9682_v40 = vunpack.i.l.bf16 %v9681_v62 }
 0x71a   : > { %v3041_v10 = vsel %vm14658_vm13, %v9687_v35, %v9688_v3  ;;  %v8120_v35 = vld [vmem:[%s10445_s15 + $0x5a0] sm:$0xf0]  ;;  %vm14660_vm13 = vmmov %vm14657_vm0 }
 0x71b   : > { %3137 = vmatpush.msra.mxu2 %v9683_v49  ;;  %v3042_v17 = vsel %vm14657_vm0, %v9682_v40, %v9683_v49 }
 0x71c   : > { %3091 = vmatpush.msra.mxu3 %v3042_v17 }
 0x71d   : > { %3138 = vmatpush.msra.mxu2 %v9688_v3  ;;  %v9040_v3 = vld [vmem:[%s10445_s15 + $0x584] sm:$0xf] }
 0x71e   : > { %3092 = vmatpush.msra.mxu3 %v3041_v10  ;;  %v8123_v40 = vor.u32 %v9040_v3, %v8120_v35 }
 0x720   : > { %v11629_v23 = vpop.permute.xlu2 %9700 }
 0x721   : > { %v9703_v17 = vunpack.i.h.bf16 %v11629_v23  ;;  %v9702_v10 = vunpack.i.l.bf16 %v11629_v23  ;;  %v8208_v23 = vld [vmem:[%s10445_s15 + $0x638] sm:$0x30] }
 0x728   : > { %v9706_v32 = vpop.permute.xlu2 %9705 }
 0x729   : > { %v9708_v12 = vunpack.i.h.bf16 %v9706_v32  ;;  %v9707_v30 = vunpack.i.l.bf16 %v9706_v32 }
 0x72b   : > { %3118 = vmatpush.msra.mxu0 %v9708_v12  ;;  %v2913_v21 = vsel %vm816_vm15, %v9707_v30, %v9708_v12  ;;  %v9033_v30 = vld [vmem:[%s10445_s15 + $0x54c] sm:$0xf] }
 0x72c   : > { %3072 = vmatpush.msra.mxu1 %v2913_v21  ;;  %v8099_v24 = vor.u32 %v9033_v30, %v8096_v27  ;;  %v9051_v27 = vld [vmem:[%s10445_s15 + $0x5dc] sm:$0xf] }
 0x72d   : > { %3119 = vmatpush.msra.mxu0 %v11570_v63  ;;  %v9049_v63 = vld [vmem:[%s10445_s15 + $0x5cc] sm:$0xf] }
 0x72e   : > { %3073 = vmatpush.msra.mxu1 %v11577_v7 }
 0x72f   : > { %3120 = vmatpush.msra.mxu0 %v11596_v28  ;;  %v9691_v22 = vpop.permute.xlu0 %9690  ;;  %v9048_v28 = vld [vmem:[%s10445_s15 + $0x5c4] sm:$0xf] }
 0x730   : > { %v9693_v60 = vunpack.i.h.bf16 %v9691_v22  ;;  %v9692_v59 = vunpack.i.l.bf16 %v9691_v22  ;;  %3074 = vmatpush.msra.mxu1 %v11603_v48  ;;  %v9041_v48 = vld [vmem:[%s10445_s15 + $0x58c] sm:$0xf]  ;;  %v8155_v62 = vor.u32 %v9048_v28, %v8152_v43  ;;  %v8211_v28 = vor.u32 %v9059_v58, %v8208_v23 }
 0x731   : > { %3121 = vmatpush.msra.mxu0 %v11585_v13  ;;  %v8163_v13 = vor.u32 %v9049_v63, %v8160_v15  ;;  %v9025_v22 = vld [vmem:[%s10445_s15 + $0x50c] sm:$0xf]  ;;  %v9024_v15 = vld [vmem:[%s10445_s15 + $0x504] sm:$0xf] }
 0x732   : > { %3075 = vmatpush.msra.mxu1 %v11594_v31  ;;  %3139 = vmatpush.msra.mxu2 %v9693_v60  ;;  %v3040_v7 = vsel %vm14659_vm12, %v9692_v59, %v9693_v60  ;;  %v8128_v31 = vld [vmem:[%s10445_s15 + $0x5a8] sm:$0xf0]  ;;  %v9058_v60 = vld [vmem:[%s10445_s15 + $0x614] sm:$0xf]  ;;  %vm14661_vm12 = vmmov %vm14657_vm0 }
 0x733   : > { %3122 = vmatpush.msra.mxu0 %v11505_v41  ;;  %3093 = vmatpush.msra.mxu3 %v3040_v7  ;;  %v8200_v59 = vld [vmem:[%s10445_s15 + $0x630] sm:$0x30]  ;;  %v8064_v63 = vld [vmem:[%s10445_s15 + $0x528] sm:$0xf0]  ;;  %v8056_v7 = vld [vmem:[%s10445_s15 + $0x520] sm:$0xf0] }
 0x734   : > { %3076 = vmatpush.msra.mxu1 %v11507_v25  ;;  %3123 = vmatmul.f32.vlgmr.msra.gmra.mxu0 %v11358_v9  ;;  %v8131_v25 = vor.u32 %v9041_v48, %v8128_v31  ;;  %v8203_v48 = vor.u32 %v9058_v60, %v8200_v59  ;;  %v8067_v31 = vor.u32 %v9025_v22, %v8064_v63  ;;  %v9043_v22 = vld [vmem:[%s10445_s15 + $0x59c] sm:$0xf]  ;;  %v8136_v63 = vld [vmem:[%s10445_s15 + $0x5b0] sm:$0xf0] }
 0x735   : > { %3499 = vmatpush.bf16.msrb.mxu0 %v3443_v5  ;;  %3077 = vmatmul.f32.vlgmr.msra.gmra.mxu1 %v11358_v9  ;;  %v9032_v9 = vld [vmem:[%s10445_s15 + $0x544] sm:$0xf]  ;;  %v3038_v5 = vsel %vm14660_vm13, %v9702_v10, %v9703_v17  ;;  %v8059_v3 = vor.u32 %v9024_v15, %v8056_v7  ;;  %v8182_v10 = vld [vmem:[%s10445_s15 + $0x600] sm:$0xf]  ;;  %vm14662_vm13 = vmmov %vm14657_vm0 }
 0x736   : > { %3473 = vmatpush.bf16.msrb.mxu1 %v3437_v11  ;;  %v8091_v11 = vor.u32 %v9032_v9, %v8088_v16  ;;  %v3449_v30 = vand.u32 %v8203_v48, %v10447_v2  ;;  %v8176_v9 = vld [vmem:[%s10445_s15 + $0x5f8] sm:$0xf0]  ;;  %v9050_v16 = vld [vmem:[%s10445_s15 + $0x5d4] sm:$0xf] }
 0x737   : > { %v9711_v41 = vpop.permute.xlu0 %9710  ;;  %v8179_v23 = vor.u32 %v9051_v27, %v8176_v9  ;;  %v8144_v60 = vld [vmem:[%s10445_s15 + $0x5b8] sm:$0xf0]  ;;  %v9044_v27 = vld [vmem:[%s10445_s15 + $0x59c] sm:$0xf0] }
 0x738   : > { %v9696_v49 = vpop.permute.xlu1 %9695  ;;  %v9713_v1 = vunpack.i.h.bf16 %v9711_v41  ;;  %v9712_v38 = vunpack.i.l.bf16 %v9711_v41  ;;  %v8147_v48 = vor.u32 %v9043_v22, %v8144_v60  ;;  %v8086_v22 = vld [vmem:[%s10445_s15 + $0x540] sm:$0xf] }
 0x739   : > { %3500 = vmatpush.bf16.msrb.mxu0 %v8163_v13  ;;  %v9698_v32 = vunpack.i.h.bf16 %v9696_v49  ;;  %v9697_v12 = vunpack.i.l.bf16 %v9696_v49 }
 0x73a   : > { %3474 = vmatpush.bf16.msrb.mxu1 %v8155_v62  ;;  %v3037_v13 = vsel %vm14661_vm12, %v9712_v38, %v9713_v1  ;;  %vm14663_vm12 = vmmov %vm14657_vm0 }
 0x73b   : > { %3140 = vmatpush.msra.mxu2 %v9698_v32  ;;  %v3039_v21 = vsel %vm14657_vm0, %v9697_v12, %v9698_v32  ;;  %v9060_v32 = vld [vmem:[%s10445_s15 + $0x61c] sm:$0x30] }
 0x73c   : > { %3094 = vmatpush.msra.mxu3 %v3039_v21  ;;  %3126 = vmatmul.f32.gmra.mxu0 %v11396_v54  ;;  %v8183_v58 = vor.u32 %v9060_v32, %v8182_v10  ;;  %v8126_v10 = vld [vmem:[%s10445_s15 + $0x588] sm:$0xf] }
 0x73d   : > { %3501 = vmatpush.bf16.msrb.mxu0 %v8131_v25  ;;  %3141 = vmatpush.msra.mxu2 %v9703_v17  ;;  %v3455_v17 = vand.u32 %v8211_v28, %v10447_v2  ;;  %v9045_v32 = vld [vmem:[%s10445_s15 + $0x5a4] sm:$0xf0] }
 0x73e   : > { %3475 = vmatpush.bf16.msrb.mxu1 %v8123_v40  ;;  %3095 = vmatpush.msra.mxu3 %v3038_v5  ;;  %v9061_v40 = vld [vmem:[%s10445_s15 + $0x624] sm:$0x30]  ;;  %v3434_v28 = vand.u32 %v8183_v58, %v10447_v2  ;;  %v8072_v58 = vld [vmem:[%s10445_s15 + $0x530] sm:$0xf0] }
 0x73f   : > { %3142 = vmatpush.msra.mxu2 %v9713_v1  ;;  %v9721_v43 = vpop.permute.xlu0 %9720  ;;  %3080 = vmatmul.f32.gmra.mxu1 %v11396_v54  ;;  %v8190_v54 = vld [vmem:[%s10445_s15 + $0x608] sm:$0xf]  ;;  %v8168_v1 = vld [vmem:[%s10445_s15 + $0x5f0] sm:$0xf0] }
 0x740   : > { %v9716_v62 = vpop.permute.xlu1 %9715  ;;  %3096 = vmatpush.msra.mxu3 %v3037_v13  ;;  %v9723_v35 = vunpack.i.h.bf16 %v9721_v43  ;;  %v9722_v41 = vunpack.i.l.bf16 %v9721_v43  ;;  %v8191_v38 = vor.u32 %v9061_v40, %v8190_v54  ;;  %v8158_v43 = vld [vmem:[%s10445_s15 + $0x5c8] sm:$0xf]  ;;  %v9034_v54 = vld [vmem:[%s10445_s15 + $0x554] sm:$0xf] }
 0x741   : > { %3502 = vmatpush.bf16.msrb.mxu0 %v8099_v24  ;;  %v9718_v49 = vunpack.i.h.bf16 %v9716_v62  ;;  %v9717_v25 = vunpack.i.l.bf16 %v9716_v62  ;;  %v8171_v24 = vor.u32 %v9050_v16, %v8168_v1  ;;  %v9053_v13 = vld [vmem:[%s10445_s15 + $0x5e4] sm:$0xf0]  ;;  %v8150_v62 = vld [vmem:[%s10445_s15 + $0x5c0] sm:$0xf]  ;;  %v8104_v40 = vld [vmem:[%s10445_s15 + $0x570] sm:$0xf0] }
 0x742   : > { %3476 = vmatpush.bf16.msrb.mxu1 %v8091_v11  ;;  %v3035_v21 = vsel %vm14662_vm13, %v9722_v41, %v9723_v35  ;;  %v3440_v5 = vand.u32 %v8191_v38, %v10447_v2  ;;  %v9042_v11 = vld [vmem:[%s10445_s15 + $0x594] sm:$0xf]  ;;  %v9035_v41 = vld [vmem:[%s10445_s15 + $0x55c] sm:$0xf]  ;;  %v8107_v9 = vor.u32 %v9034_v54, %v8104_v40  ;;  %v8127_v38 = vor.u32 %v9045_v32, %v8126_v10  ;;  %v8174_v54 = vld [vmem:[%s10445_s15 + $0x5d8] sm:$0xf] }
 0x743   : > { %3143 = vmatpush.msra.mxu2 %v9718_v49  ;;  %v3036_v12 = vsel %vm14657_vm0, %v9717_v25, %v9718_v49  ;;  %v8112_v49 = vld [vmem:[%s10445_s15 + $0x578] sm:$0xf0]  ;;  %v8159_v25 = vor.u32 %v9053_v13, %v8158_v43  ;;  %v8062_v13 = vld [vmem:[%s10445_s15 + $0x508] sm:$0xf]  ;;  %v9055_v40 = vld [vmem:[%s10445_s15 + $0x5f4] sm:$0xf0] }
 0x744   : > { %3097 = vmatpush.msra.mxu3 %v3036_v12  ;;  %v8115_v12 = vor.u32 %v9035_v41, %v8112_v49  ;;  %v9027_v16 = vld [vmem:[%s10445_s15 + $0x51c] sm:$0xf]  ;;  %v9054_v10 = vld [vmem:[%s10445_s15 + $0x5ec] sm:$0xf0]  ;;  %v8175_v32 = vor.u32 %v9055_v40, %v8174_v54  ;;  %vm14668_vm0 = vcmask 785408   ;;  %vm14669_vm13 = vcmask 793600  }
 0x745   : > { %3503 = vmatpush.bf16.msrb.mxu0 %v8067_v31  ;;  %3144 = vmatpush.msra.mxu2 %v9723_v35  ;;  %v9052_v31 = vld [vmem:[%s10445_s15 + $0x5dc] sm:$0xf0]  ;;  %v8139_v35 = vor.u32 %v9042_v11, %v8136_v63  ;;  %v8080_v1 = vld [vmem:[%s10445_s15 + $0x538] sm:$0xf0]  ;;  %v9063_v11 = vld [vmem:[%s10445_s15 + $0x634] sm:$0x30] }
 0x746   : > { %3477 = vmatpush.bf16.msrb.mxu1 %v8059_v3  ;;  %3098 = vmatpush.msra.mxu3 %v3035_v21  ;;  %v9026_v21 = vld [vmem:[%s10445_s15 + $0x514] sm:$0xf]  ;;  %v8083_v60 = vor.u32 %v9027_v16, %v8080_v1  ;;  %v9046_v16 = vld [vmem:[%s10445_s15 + $0x5ac] sm:$0xf0] }
 0x747   : > { %v8075_v63 = vor.u32 %v9026_v21, %v8072_v58  ;;  %v8110_v21 = vld [vmem:[%s10445_s15 + $0x558] sm:$0xf] }
 0x748   : > { %8215 = vmatmul.msk.bf16.vlgmr.msrb.gmra.mxu0 %vm636_vm2, %v11435_v46  ;;  %v9726_v59 = vpop.permute.xlu1 %9725  ;;  %v9039_v58 = vld [vmem:[%s10445_s15 + $0x574] sm:$0xf0] }
 0x749   : > { %3551 = vmatpush.bf16.msra.mxu0 %v3455_v17  ;;  %8213 = vmatmul.msk.bf16.vlgmr.msrb.gmra.mxu1 %vm636_vm2, %v11435_v46  ;;  %v9728_v15 = vunpack.i.h.bf16 %v9726_v59  ;;  %v9727_v7 = vunpack.i.l.bf16 %v9726_v59  ;;  %v8151_v17 = vor.u32 %v9052_v31, %v8150_v62  ;;  %v9036_v59 = vld [vmem:[%s10445_s15 + $0x55c] sm:$0xf0] }
 0x74a   : > { %3525 = vmatpush.bf16.msra.mxu1 %v3449_v30  ;;  %v8118_v30 = vld [vmem:[%s10445_s15 + $0x580] sm:$0xf]  ;;  %v8087_v43 = vor.u32 %v9036_v59, %v8086_v22  ;;  %v9031_v59 = vld [vmem:[%s10445_s15 + $0x534] sm:$0xf0] }
 0x74b   : > { %3145 = vmatpush.msra.mxu2 %v9728_v15  ;;  %v3034_v3 = vsel %vm14663_vm12, %v9727_v7, %v9728_v15  ;;  %v8198_v15 = vld [vmem:[%s10445_s15 + $0x610] sm:$0xf]  ;;  %v8054_v31 = vld [vmem:[%s10445_s15 + $0x500] sm:$0xf]  ;;  %vm14670_vm12 = vcmask 809984  }
 0x74c   : > { %3099 = vmatpush.msra.mxu3 %v3034_v3  ;;  %8010 = vmatmul.msk.f32.vlgmr.msra.gmra.mxu2 %vm988_vm1, %v11371_v52  ;;  %v9062_v7 = vld [vmem:[%s10445_s15 + $0x62c] sm:$0x30]  ;;  %v9028_v3 = vld [vmem:[%s10445_s15 + $0x51c] sm:$0xf0] }
 0x74d   : > { %3552 = vmatpush.bf16.msra.mxu0 %v8179_v23  ;;  %3486 = vmatpush.bf16.msrb.mxu2 %v3440_v5  ;;  %v8119_v23 = vor.u32 %v9044_v27, %v8118_v30  ;;  %v8206_v5 = vld [vmem:[%s10445_s15 + $0x618] sm:$0xf]  ;;  %v8055_v49 = vor.u32 %v9028_v3, %v8054_v31 }
 0x74e   : > { %3526 = vmatpush.bf16.msra.mxu1 %v8171_v24  ;;  %3460 = vmatpush.bf16.msrb.mxu3 %v3434_v28  ;;  %v9037_v24 = vld [vmem:[%s10445_s15 + $0x564] sm:$0xf0]  ;;  %v8207_v62 = vor.u32 %v9063_v11, %v8206_v5  ;;  %v8142_v30 = vld [vmem:[%s10445_s15 + $0x598] sm:$0xf]  ;;  %v8070_v5 = vld [vmem:[%s10445_s15 + $0x510] sm:$0xf] }
 0x74f   : > { %8008 = vmatmul.msk.f32.vlgmr.msra.gmra.mxu3 %vm988_vm1, %v11371_v52  ;;  %v8094_v52 = vld [vmem:[%s10445_s15 + $0x548] sm:$0xf]  ;;  %v9047_v27 = vld [vmem:[%s10445_s15 + $0x5b4] sm:$0xf0]  ;;  %v9030_v11 = vld [vmem:[%s10445_s15 + $0x52c] sm:$0xf0] }
 0x750   : > { %v8095_v28 = vor.u32 %v9037_v24, %v8094_v52  ;;  %v8143_v1 = vor.u32 %v9047_v27, %v8142_v30  ;;  %v9038_v52 = vld [vmem:[%s10445_s15 + $0x56c] sm:$0xf0]  ;;  %v8111_v24 = vor.u32 %v9039_v58, %v8110_v21 }
 0x751   : > { %3553 = vmatpush.bf16.msra.mxu0 %v8147_v48  ;;  %3487 = vmatpush.bf16.msrb.mxu2 %v8159_v25  ;;  %v9029_v48 = vld [vmem:[%s10445_s15 + $0x524] sm:$0xf0]  ;;  %v3452_v25 = vand.u32 %v8207_v62, %v10447_v2 }
 0x752   : > { %3527 = vmatpush.bf16.msra.mxu1 %v8139_v35  ;;  %3461 = vmatpush.bf16.msrb.mxu3 %v8151_v17  ;;  %v8199_v35 = vor.u32 %v9062_v7, %v8198_v15  ;;  %v8063_v41 = vor.u32 %v9029_v48, %v8062_v13  ;;  %v8166_v17 = vld [vmem:[%s10445_s15 + $0x5d0] sm:$0xf]  ;;  %v8071_v15 = vor.u32 %v9030_v11, %v8070_v5 }
 0x754   : > { %8011 = vmatmul.msk.f32.gmra.mxu2 %vm988_vm1, %v11412_v14 }
 0x755   : > { %3554 = vmatpush.bf16.msra.mxu0 %v8115_v12  ;;  %3488 = vmatpush.bf16.msrb.mxu2 %v8127_v38  ;;  %v8167_v12 = vor.u32 %v9054_v10, %v8166_v17 }
 0x756   : > { %3528 = vmatpush.bf16.msra.mxu1 %v8107_v9  ;;  %3462 = vmatpush.bf16.msrb.mxu3 %v8119_v23  ;;  %v8134_v9 = vld [vmem:[%s10445_s15 + $0x590] sm:$0xf] }
 0x757   : > { %8009 = vmatmul.msk.f32.gmra.mxu3 %vm988_vm1, %v11412_v14  ;;  %v3446_v14 = vand.u32 %v8199_v35, %v10447_v2  ;;  %v8135_v38 = vor.u32 %v9046_v16, %v8134_v9  ;;  %v8102_v23 = vld [vmem:[%s10445_s15 + $0x550] sm:$0xf] }
 0x758   : > { %v8103_v22 = vor.u32 %v9038_v52, %v8102_v23 }
 0x759   : > { %3555 = vmatpush.bf16.msra.mxu0 %v8083_v60  ;;  %3489 = vmatpush.bf16.msrb.mxu2 %v8095_v28  ;;  %v8078_v60 = vld [vmem:[%s10445_s15 + $0x518] sm:$0xf] }
 0x75a   : > { %3529 = vmatpush.bf16.msra.mxu1 %v8075_v63  ;;  %3463 = vmatpush.bf16.msrb.mxu3 %v8087_v43  ;;  %v8079_v63 = vor.u32 %v9031_v59, %v8078_v60 }
 0x75c   : > { %8219 = vmatmul.msk.bf16.vlgmr.msra.gmra.mxu0 %vm636_vm2, %v11435_v46 }
 0x75d   : > { %8217 = vmatmul.msk.bf16.vlgmr.msra.gmra.mxu1 %vm636_vm2, %v11435_v46  ;;  %3490 = vmatpush.bf16.msrb.mxu2 %v8063_v41 }
 0x75e   : > { %3464 = vmatpush.bf16.msrb.mxu3 %v8055_v49 }
 0x760   : > { %8214 = vmatmul.msk.bf16.vlgmr.msrb.gmra.mxu2 %vm636_vm2, %v11435_v46 }
 0x761   : > { %3538 = vmatpush.bf16.msra.mxu2 %v3452_v25  ;;  %8212 = vmatmul.msk.bf16.vlgmr.msrb.gmra.mxu3 %vm636_vm2, %v11435_v46 }
 0x762   : > { %3512 = vmatpush.bf16.msra.mxu3 %v3446_v14 }
 0x765   : > { %3539 = vmatpush.bf16.msra.mxu2 %v8175_v32 }
 0x766   : > { %3513 = vmatpush.bf16.msra.mxu3 %v8167_v12 }
 0x769   : > { %3540 = vmatpush.bf16.msra.mxu2 %v8143_v1 }
 0x76a   : > { %3514 = vmatpush.bf16.msra.mxu3 %v8135_v38 }
 0x76d   : > { %3541 = vmatpush.bf16.msra.mxu2 %v8111_v24 }
 0x76e   : > { %3515 = vmatpush.bf16.msra.mxu3 %v8103_v22 }
 0x771   : > { %3542 = vmatpush.bf16.msra.mxu2 %v8079_v63 }
 0x772   : > { %3516 = vmatpush.bf16.msra.mxu3 %v8071_v15 }
 0x774   : > { %8218 = vmatmul.msk.bf16.vlgmr.msra.gmra.mxu2 %vm636_vm2, %v11435_v46 }
 0x775   : > { %8216 = vmatmul.msk.bf16.vlgmr.msra.gmra.mxu3 %vm636_vm2, %v11435_v46 }
 0x7b1   : > { %v11765_v7 = vpop.f32.mrf.mxu0 }
 0x7b2   : > { %v11767_v28 = vpop.f32.mrf.mxu1 }
 0x7b9   : > { %v11769_v43 = vpop.f32.mrf.mxu0 }
 0x7ba   : > { %14664 = vst [vmem:[#allocation24_spill] sm:$0xff] %v11769_v43 }
 0x7bc   : > { %v11771_v13 = vpop.f32.mrf.mxu1 }
 0x7bd   : > { %14665 = vst [vmem:[#allocation25_spill] sm:$0xff] %v11771_v13 }
 0x7c5   : > { %v3505_v48 = vpop.f32.mrf.mxu0 }
 0x7c6   : > { %v3479_v62 = vpop.f32.mrf.mxu1  ;;  %v3506_v9 = vadd.f32 %v3505_v48, %v10587_v50 }
 0x7c7   : > { %v3480_v16 = vadd.f32 %v3479_v62, %v10587_v50 }
 0x7c8   : > { %v3564_v52 = vmax.f32 %v3506_v9, 0.0 }
 0x7c9   : > { %v3562_v60 = vmax.f32 %v3480_v16, 0.0 }
 0x7cb   : > { %v3570_v62 = vmax.f32 %v3562_v60, %v3564_v52 }
 0x7cd   : > { %v3507_v31 = vpop.f32.mrf.mxu0 }
 0x7ce   : > { %v3481_v3 = vpop.f32.mrf.mxu1 }
 0x7cf   : > { %v11773_v35 = vpop.f32.mrf.mxu2 }
 0x7d2   : > { %v11775_v41 = vpop.f32.mrf.mxu3 }
 0x7d7   : > { %v11777_v14 = vpop.f32.mrf.mxu2 }
 0x7d8   : > { %14666 = vst [vmem:[#allocation26_spill] sm:$0xff] %v11777_v14 }
 0x7d9   : > { %v3557_v49 = vpop.f32.mrf.mxu0 }
 0x7da   : > { %v3531_v25 = vpop.f32.mrf.mxu1  ;;  %v11779_v46 = vpop.f32.mrf.mxu3  ;;  %v3558_v30 = vadd.f32 %v3557_v49, %v10587_v50 }
 0x7db   : > { %14667 = vst [vmem:[#allocation27_spill] sm:$0xff] %v11779_v46  ;;  %v3532_v27 = vadd.f32 %v3531_v25, %v10587_v50 }
 0x7dc   : > { %v3568_v21 = vmax.f32 %v3558_v30, 0.0 }
 0x7dd   : > { %v3566_v58 = vmax.f32 %v3532_v27, 0.0 }
 0x7df   : > { %v3572_v15 = vmax.f32 %v3566_v58, %v3568_v21 }
 0x7e1   : > { %v3559_v54 = vpop.f32.mrf.mxu0  ;;  %v11789_v49 = vmax.f32 %v3570_v62, %v3572_v15 }
 0x7e2   : > { %v3533_v40 = vpop.f32.mrf.mxu1 }
 0x7e3   : > { %v3492_v17 = vpop.f32.mrf.mxu2 }
 0x7e4   : > { %v3466_v10 = vpop.f32.mrf.mxu3  ;;  %v3493_v1 = vadd.f32 %v3492_v17, %v10587_v50 }
 0x7e5   : > { %v3467_v38 = vadd.f32 %v3466_v10, %v10587_v50 }
 0x7e6   : > { %v3563_v59 = vmax.f32 %v3493_v1, 0.0 }
 0x7e7   : > { %v3561_v5 = vmax.f32 %v3467_v38, 0.0 }
 0x7e9   : > { %v3569_v31 = vmax.f32 %v3561_v5, %v3563_v59 }
 0x7eb   : > { %v3494_v32 = vpop.f32.mrf.mxu2 }
 0x7ec   : > { %v3468_v12 = vpop.f32.mrf.mxu3 }
 0x7f7   : > { %v3544_v23 = vpop.f32.mrf.mxu2 }
 0x7f8   : > { %v3545_v24 = vadd.f32 %v3544_v23, %v10587_v50  ;;  %v3518_v22 = vpop.f32.mrf.mxu3 }
 0x7f9   : > { %v3519_v11 = vadd.f32 %v3518_v22, %v10587_v50 }
 0x7fa   : > { %v3567_v63 = vmax.f32 %v3545_v24, 0.0 }
 0x7fb   : > { %v3565_v48 = vmax.f32 %v3519_v11, 0.0 }
 0x7fd   : > { %v3571_v3 = vmax.f32 %v3565_v48, %v3567_v63 }
 0x7ff   : > { %v11791_v25 = vmax.f32 %v3569_v31, %v3571_v3  ;;  %v3546_v54 = vpop.f32.mrf.mxu2 }
 0x800   : > { %v3520_v40 = vpop.f32.mrf.mxu3 }
 0x801   : > { %v11795_v17 = vpack.i.bf16 %v11789_v49, %v11791_v25 }
 0x803   : > { %9740 = vrot.lane.b32.xlu1 %v11795_v17, %s14633_s23  ;;  %9735 = vrot.lane.b32.xlu0 %v11795_v17, %s14634_s28 }
 0x804   : > { %9730 = vrot.lane.b32.xlu2 %v11795_v17, %s14614_s12 }
 0x80b   : > { %9755 = vrot.lane.b32.xlu1 %v11795_v17, %s14615_s16  ;;  %9750 = vrot.lane.b32.xlu0 %v11795_v17, %s14616_s21 }
 0x80c   : > { %9745 = vrot.lane.b32.xlu2 %v11795_v17, %s14617_s25 }
 0x813   : > { %9770 = vrot.lane.b32.xlu1 %v11795_v17, %s14621_s0  ;;  %9765 = vrot.lane.b32.xlu0 %v11795_v17, %s14618_s24 }
 0x814   : > { %9760 = vrot.lane.b32.xlu2 %v11795_v17, %s14619_s14 }
 0x81b   : > { %9785 = vrot.lane.b32.xlu1 %v11795_v17, %s14622_s2  ;;  %9780 = vrot.lane.b32.xlu0 %v11795_v17, %s14620_s30 }
 0x81c   : > { %9775 = vrot.lane.b32.xlu2 %v11795_v17, %s14635_s17 }
 0x823   : > { %9800 = vrot.lane.b32.xlu1 %v11795_v17, %s14624_s13  ;;  %9795 = vrot.lane.b32.xlu0 %v11795_v17, %s14625_s26 }
 0x824   : > { %9790 = vrot.lane.b32.xlu2 %v11795_v17, %s14636_s20 }
 0x82b   : > { %9805 = vrot.lane.b32.xlu0 %v11795_v17, %s14626_s19 }
 0x85e   : > { %v9731_v10 = vpop.permute.xlu2 %9730 }
 0x85f   : > { %v11829_v32 = vunpack.i.h.bf16 %v9731_v10  ;;  %v9732_v12 = vunpack.i.l.bf16 %v9731_v10 }
 0x861   : > { %v11833_v30 = vsel %vm848_vm6, %v9732_v12, %v11829_v32 }
 0x862   : > { %v9809_v27 = vpack.i.bf16 %v11829_v32, %v11833_v30 }
 0x864   : > { %9810 = vrot.lane.b32.xlu2 %v9809_v27, %s14623_s22 }
 0x866   : > { %v9746_v9 = vpop.permute.xlu2 %9745 }
 0x867   : > { %v11838_v16 = vunpack.i.h.bf16 %v9746_v9  ;;  %v9747_v1 = vunpack.i.l.bf16 %v9746_v9 }
 0x869   : > { %v11842_v38 = vsel %vm824_vm3, %v9747_v1, %v11838_v16 }
 0x86a   : > { %v9824_v21 = vpack.i.bf16 %v11838_v16, %v11842_v38 }
 0x86c   : > { %9825 = vrot.lane.b32.xlu0 %v9824_v21, %s14623_s22 }
 0x86e   : > { %v9761_v58 = vpop.permute.xlu2 %9760 }
 0x86f   : > { %v11847_v23 = vunpack.i.h.bf16 %v9761_v58  ;;  %v9762_v52 = vunpack.i.l.bf16 %v9761_v58 }
 0x871   : > { %v11851_v24 = vsel %vm800_vm11, %v9762_v52, %v11847_v23 }
 0x872   : > { %v9839_v22 = vpack.i.bf16 %v11847_v23, %v11851_v24 }
 0x874   : > { %9840 = vrot.lane.b32.xlu0 %v9839_v22, %s14623_s22 }
 0x875   : > { %v9741_v60 = vpop.permute.xlu1 %9740  ;;  %v9736_v59 = vpop.permute.xlu0 %9735 }
 0x876   : > { %v11856_v5 = vunpack.i.h.bf16 %v9741_v60  ;;  %v9742_v11 = vunpack.i.l.bf16 %v9741_v60  ;;  %v11858_v63 = vunpack.i.h.bf16 %v9736_v59  ;;  %v9737_v15 = vunpack.i.l.bf16 %v9736_v59  ;;  %v9776_v22 = vpop.permute.xlu2 %9775 }
 0x877   : > { %v9778_v60 = vunpack.i.h.bf16 %v9776_v22  ;;  %v9777_v59 = vunpack.i.l.bf16 %v9776_v22 }
 0x878   : > { %v11862_v48 = vsel %vm840_vm5, %v9737_v15, %v11858_v63  ;;  %v11866_v62 = vsel %vm832_vm8, %v9742_v11, %v11856_v5 }
 0x879   : > { %v9814_v31 = vpack.i.bf16 %v11858_v63, %v11862_v48  ;;  %v9819_v3 = vpack.i.bf16 %v11856_v5, %v11866_v62 }
 0x87b   : > { %9815 = vrot.lane.b32.xlu1 %v9814_v31, %s14623_s22  ;;  %9820 = vrot.lane.b32.xlu2 %v9819_v3, %s14623_s22 }
 0x87d   : > { %v9756_v54 = vpop.permute.xlu1 %9755  ;;  %v9751_v40 = vpop.permute.xlu0 %9750 }
 0x87e   : > { %v11874_v10 = vunpack.i.h.bf16 %v9756_v54  ;;  %v9757_v12 = vunpack.i.l.bf16 %v9756_v54  ;;  %v9753_v27 = vunpack.i.h.bf16 %v9751_v40  ;;  %v9752_v9 = vunpack.i.l.bf16 %v9751_v40 }
 0x880   : > { %v3686_v1 = vsel %vm912_vm7, %v9752_v9, %v9753_v27  ;;  %v11879_v21 = vsel %vm808_vm10, %v9757_v12, %v11874_v10 }
 0x881   : > { %v9829_v58 = vpack.i.bf16 %v9753_v27, %v3686_v1  ;;  %v9834_v52 = vpack.i.bf16 %v11874_v10, %v11879_v21  ;;  %v3672_v1 = vsel %vm14668_vm0, %v9777_v59, %v9778_v60  ;;  %vm14671_vm0 = vcmask 818176  }
 0x883   : > { %9830 = vrot.lane.b32.xlu1 %v9829_v58, %s14623_s22  ;;  %9835 = vrot.lane.b32.xlu2 %v9834_v52, %s14623_s22  ;;  %v9791_v58 = vpop.permute.xlu2 %9790 }
 0x885   : > { %v9771_v11 = vpop.permute.xlu1 %9770  ;;  %v9766_v15 = vpop.permute.xlu0 %9765 }
 0x886   : > { %v9773_v31 = vunpack.i.h.bf16 %v9771_v11  ;;  %v9772_v3 = vunpack.i.l.bf16 %v9771_v11  ;;  %v11885_v54 = vunpack.i.h.bf16 %v9766_v15  ;;  %v9767_v40 = vunpack.i.l.bf16 %v9766_v15 }
 0x888   : > { %3796 = vmatpush.msrb.mxu2 %v9773_v31  ;;  %v3679_v12 = vsel %vm904_vm4, %v9772_v3, %v9773_v31  ;;  %v11890_v27 = vsel %vm792_vm9, %v9767_v40, %v11885_v54  ;;  %v9793_v40 = vunpack.i.h.bf16 %v9791_v58 }
 0x889   : > { %3750 = vmatpush.msrb.mxu3 %v3679_v12  ;;  %v9844_v9 = vpack.i.bf16 %v11885_v54, %v11890_v27  ;;  %v9792_v12 = vunpack.i.l.bf16 %v9791_v58 }
 0x88a   : > { %3797 = vmatpush.msrb.mxu2 %v9778_v60 }
 0x88b   : > { %9845 = vrot.lane.b32.xlu1 %v9844_v9, %s14623_s22  ;;  %3751 = vmatpush.msrb.mxu3 %v3672_v1  ;;  %v3651_v59 = vsel %vm14670_vm12, %v9792_v12, %v9793_v40  ;;  %v8332_v12 = vld [vmem:[%s10445_s15 + $0x6e0] sm:$0xf0]  ;;  %vm14673_vm12 = vcmask 695296  }
 0x88c   : > { %9850 = vrot.lane.b32.xlu2 %v11795_v17, %s14623_s22 }
 0x88d   : > { %v9786_v52 = vpop.permute.xlu1 %9785  ;;  %v9781_v22 = vpop.permute.xlu0 %9780 }
 0x88e   : > { %v9788_v11 = vunpack.i.h.bf16 %v9786_v52  ;;  %v9787_v15 = vunpack.i.l.bf16 %v9786_v52  ;;  %v9783_v31 = vunpack.i.h.bf16 %v9781_v22  ;;  %v9782_v3 = vunpack.i.l.bf16 %v9781_v22 }
 0x890   : > { %3798 = vmatpush.msrb.mxu2 %v9783_v31  ;;  %v3665_v46 = vsel %vm14669_vm13, %v9782_v3, %v9783_v31  ;;  %v3658_v60 = vsel %vm880_vm14, %v9787_v15, %v9788_v11  ;;  %vm14672_vm13 = vcmask 900096   ;;  %v8404_v3 = vld [vmem:[%s10445_s15 + $0x768] sm:$0x30] }
 0x891   : > { %3752 = vmatpush.msrb.mxu3 %v3665_v46 }
 0x892   : > { %3799 = vmatpush.msrb.mxu2 %v9788_v11 }
 0x893   : > { %3753 = vmatpush.msrb.mxu3 %v3658_v60 }
 0x894   : > { %3800 = vmatpush.msrb.mxu2 %v9793_v40  ;;  %v8372_v40 = vld [vmem:[%s10445_s15 + $0x728] sm:$0xf0] }
 0x895   : > { %v9801_v17 = vpop.permute.xlu1 %9800  ;;  %v9796_v9 = vpop.permute.xlu0 %9795  ;;  %3754 = vmatpush.msrb.mxu3 %v3651_v59 }
 0x896   : > { %v9803_v1 = vunpack.i.h.bf16 %v9801_v17  ;;  %v9802_v52 = vunpack.i.l.bf16 %v9801_v17  ;;  %v9798_v13 = vunpack.i.h.bf16 %v9796_v9  ;;  %v9797_v22 = vunpack.i.l.bf16 %v9796_v9  ;;  %v9073_v17 = vld [vmem:[%s10445_s15 + $0x68c] sm:$0xf] }
 0x897   : > { %v8308_v9 = vld [vmem:[%s10445_s15 + $0x6a8] sm:$0xf0] }
 0x898   : > { %3801 = vmatpush.msrb.mxu2 %v9798_v13  ;;  %v3644_v58 = vsel %vm14671_vm0, %v9797_v22, %v9798_v13  ;;  %v3637_v46 = vsel %vm14672_vm13, %v9802_v52, %v9803_v1  ;;  %v9097_v13 = vld [vmem:[%s10445_s15 + $0x74c] sm:$0xf]  ;;  %v8300_v52 = vld [vmem:[%s10445_s15 + $0x6a0] sm:$0xf0]  ;;  %v9099_v22 = vld [vmem:[%s10445_s15 + $0x75c] sm:$0xf] }
 0x899   : > { %3755 = vmatpush.msrb.mxu3 %v3644_v58  ;;  %v8420_v58 = vld [vmem:[%s10445_s15 + $0x778] sm:$0x30]  ;;  %vm14674_vm0 = vmmov %vm14673_vm12 }
 0x89a   : > { %3802 = vmatpush.msrb.mxu2 %v9803_v1  ;;  %v9072_v1 = vld [vmem:[%s10445_s15 + $0x684] sm:$0xf]  ;;  %vm14675_vm13 = vmmov %vm14674_vm0 }
 0x89b   : > { %3756 = vmatpush.msrb.mxu3 %v3637_v46  ;;  %v9098_v46 = vld [vmem:[%s10445_s15 + $0x754] sm:$0xf] }
 0x89c   : > { %3803 = vmatpush.msrb.mxu2 %v11829_v32  ;;  %v9096_v32 = vld [vmem:[%s10445_s15 + $0x744] sm:$0xf] }
 0x89d   : > { %v9806_v11 = vpop.permute.xlu0 %9805  ;;  %3757 = vmatpush.msrb.mxu3 %v11833_v30  ;;  %v8396_v30 = vld [vmem:[%s10445_s15 + $0x760] sm:$0x30] }
 0x89e   : > { %3804 = vmatpush.msrb.mxu2 %v11858_v63  ;;  %v9808_v15 = vunpack.i.h.bf16 %v9806_v11  ;;  %v9807_v31 = vunpack.i.l.bf16 %v9806_v11  ;;  %v8412_v11 = vld [vmem:[%s10445_s15 + $0x770] sm:$0x30] }
 0x89f   : > { %3758 = vmatpush.msrb.mxu3 %v11862_v48  ;;  %v8407_v48 = vor.u32 %v9097_v13, %v8404_v3  ;;  %v8303_v13 = vor.u32 %v9072_v1, %v8300_v52  ;;  %v9065_v3 = vld [vmem:[%s10445_s15 + $0x64c] sm:$0xf]  ;;  %v9082_v1 = vld [vmem:[%s10445_s15 + $0x6d4] sm:$0xf] }
 0x8a0   : > { %3805 = vmatpush.msrb.mxu2 %v11856_v5  ;;  %v3602_v63 = vsel %vm816_vm15, %v9807_v31, %v9808_v15  ;;  %v8399_v5 = vor.u32 %v9096_v32, %v8396_v30  ;;  %v10240_v31 = vld [vmem:[%s14530_s3 + $0x10] sm:$0xff]  ;;  %v8276_v32 = vld [vmem:[%s10445_s15 + $0x668] sm:$0xf0]  ;;  %v8423_v30 = vor.u32 %v9099_v22, %v8420_v58 }
 0x8a1   : > { %3759 = vmatpush.msrb.mxu3 %v11866_v62  ;;  %v9089_v62 = vld [vmem:[%s10445_s15 + $0x70c] sm:$0xf]  ;;  %v8348_v52 = vld [vmem:[%s10445_s15 + $0x6f0] sm:$0xf0] }
 0x8a2   : > { %3806 = vmatpush.msrb.mxu2 %v11838_v16  ;;  %v4132_v16 = vand.u32 %v8407_v48, %v10447_v2  ;;  %v8268_v48 = vld [vmem:[%s10445_s15 + $0x660] sm:$0xf0] }
 0x8a3   : > { %3760 = vmatpush.msrb.mxu3 %v11842_v38  ;;  %v4126_v38 = vand.u32 %v8399_v5, %v10447_v2  ;;  %v8415_v5 = vor.u32 %v9098_v46, %v8412_v11  ;;  %v8351_v46 = vor.u32 %v9082_v1, %v8348_v52  ;;  %v9075_v11 = vld [vmem:[%s10445_s15 + $0x69c] sm:$0xf] }
 0x8a4   : > { %3807 = vmatpush.msrb.mxu2 %v9808_v15  ;;  %v8311_v15 = vor.u32 %v9073_v17, %v8308_v9  ;;  %v8356_v17 = vld [vmem:[%s10445_s15 + $0x6f8] sm:$0xf0]  ;;  %v11967_v9 = vld [vmem:[%s14528_s1] sm:$0xf] }
 0x8a5   : > { %3761 = vmatpush.msrb.mxu3 %v3602_v63  ;;  %v9064_v63 = vld [vmem:[%s10445_s15 + $0x644] sm:$0xf] }
 0x8a6   : > { %3808 = vmatpush.msrb.mxu2 %v11874_v10  ;;  %v9088_v10 = vld [vmem:[%s10445_s15 + $0x704] sm:$0xf] }
 0x8a7   : > { %3762 = vmatpush.msrb.mxu3 %v11879_v21  ;;  %v8364_v21 = vld [vmem:[%s10445_s15 + $0x720] sm:$0xf0] }
 0x8a8   : > { %3809 = vmatpush.msrb.mxu2 %v11847_v23  ;;  %v8375_v23 = vor.u32 %v9089_v62, %v8372_v40  ;;  %v4144_v62 = vand.u32 %v8423_v30, %v10447_v2  ;;  %v4138_v40 = vand.u32 %v8415_v5, %v10447_v2  ;;  %v9067_v30 = vld [vmem:[%s10445_s15 + $0x65c] sm:$0xf]  ;;  %v8284_v5 = vld [vmem:[%s10445_s15 + $0x670] sm:$0xf0] }
 0x8a9   : > { %3763 = vmatpush.msrb.mxu3 %v11851_v24  ;;  %v11933_v24 = vld [vmem:[%s14530_s3] sm:$0xff] }
 0x8aa   : > { %3810 = vmatpush.msrb.mxu2 %v11885_v54  ;;  %v8367_v54 = vor.u32 %v9088_v10, %v8364_v21  ;;  %v9091_v10 = vld [vmem:[%s10445_s15 + $0x71c] sm:$0xf] }
 0x8ab   : > { %3764 = vmatpush.msrb.mxu3 %v11890_v27  ;;  %v9080_v27 = vld [vmem:[%s10445_s15 + $0x6c4] sm:$0xf]  ;;  %v8388_v21 = vld [vmem:[%s10445_s15 + $0x738] sm:$0xf0] }
 0x8ac   : > { %3811 = vmatpush.msrb.mxu2 %v11789_v49  ;;  %v9081_v49 = vld [vmem:[%s10445_s15 + $0x6cc] sm:$0xf]  ;;  %v8335_v59 = vor.u32 %v9080_v27, %v8332_v12 }
 0x8ad   : > { %3765 = vmatpush.msrb.mxu3 %v11791_v25  ;;  %3812 = vmatmul.f32.vlgmr.msrb.gmra.mxu2 %v11933_v24  ;;  %v8340_v25 = vld [vmem:[%s10445_s15 + $0x6e8] sm:$0xf0] }
 0x8ae   : > { %4188 = vmatpush.bf16.msra.mxu2 %v4132_v16  ;;  %3766 = vmatmul.f32.vlgmr.msrb.gmra.mxu3 %v11933_v24  ;;  %v8343_v60 = vor.u32 %v9081_v49, %v8340_v25  ;;  %v8279_v16 = vor.u32 %v9065_v3, %v8276_v32  ;;  %v8391_v25 = vor.u32 %v9091_v10, %v8388_v21 }
 0x8af   : > { %4162 = vmatpush.bf16.msra.mxu3 %v4126_v38  ;;  %v8271_v38 = vor.u32 %v9064_v63, %v8268_v48  ;;  %v8292_v63 = vld [vmem:[%s10445_s15 + $0x678] sm:$0xf0]  ;;  %v9066_v48 = vld [vmem:[%s10445_s15 + $0x654] sm:$0xf] }
 0x8b2   : > { %4189 = vmatpush.bf16.msra.mxu2 %v8375_v23  ;;  %v9090_v23 = vld [vmem:[%s10445_s15 + $0x714] sm:$0xf] }
 0x8b3   : > { %4163 = vmatpush.bf16.msra.mxu3 %v8367_v54  ;;  %v8380_v54 = vld [vmem:[%s10445_s15 + $0x730] sm:$0xf0] }
 0x8b5   : > { %3815 = vmatmul.f32.gmra.mxu2 %v10240_v31 }
 0x8b6   : > { %4190 = vmatpush.bf16.msra.mxu2 %v8343_v60  ;;  %3769 = vmatmul.f32.gmra.mxu3 %v10240_v31  ;;  %v8383_v60 = vor.u32 %v9090_v23, %v8380_v54  ;;  %v9074_v31 = vld [vmem:[%s10445_s15 + $0x694] sm:$0xf] }
 0x8b7   : > { %4164 = vmatpush.bf16.msra.mxu3 %v8335_v59  ;;  %v9083_v59 = vld [vmem:[%s10445_s15 + $0x6dc] sm:$0xf] }
 0x8b8   : > { %v8359_v58 = vor.u32 %v9083_v59, %v8356_v17 }
 0x8ba   : > { %4191 = vmatpush.bf16.msra.mxu2 %v8311_v15  ;;  %v8324_v15 = vld [vmem:[%s10445_s15 + $0x6b8] sm:$0xf0] }
 0x8bb   : > { %4165 = vmatpush.bf16.msra.mxu3 %v8303_v13  ;;  %v8316_v13 = vld [vmem:[%s10445_s15 + $0x6b0] sm:$0xf0]  ;;  %v8327_v3 = vor.u32 %v9075_v11, %v8324_v15 }
 0x8bc   : > { %v8319_v32 = vor.u32 %v9074_v31, %v8316_v13 }
 0x8be   : > { %4192 = vmatpush.bf16.msra.mxu2 %v8279_v16  ;;  %v9811_v49 = vpop.permute.xlu2 %9810  ;;  %v8295_v16 = vor.u32 %v9067_v30, %v8292_v63  ;;  %v8394_v30 = vld [vmem:[%s10445_s15 + $0x740] sm:$0xf] }
 0x8bf   : > { %4166 = vmatpush.bf16.msra.mxu3 %v8271_v38  ;;  %v9813_v27 = vunpack.i.h.bf16 %v9811_v49  ;;  %v9812_v12 = vunpack.i.l.bf16 %v9811_v49  ;;  %v8287_v38 = vor.u32 %v9066_v48, %v8284_v5  ;;  %v9100_v63 = vld [vmem:[%s10445_s15 + $0x75c] sm:$0x30] }
 0x8c1   : > { %8427 = vmatmul.msk.bf16.vlgmr.msra.gmra.mxu2 %vm636_vm2, %v11967_v9  ;;  %3826 = vmatpush.msrb.mxu0 %v9813_v27  ;;  %v3731_v22 = vsel %vm14673_vm12, %v9812_v12, %v9813_v27  ;;  %vm14676_vm12 = vmmov %vm14674_vm0 }
 0x8c2   : > { %4240 = vmatpush.bf16.msrb.mxu2 %v4144_v62  ;;  %8425 = vmatmul.msk.bf16.vlgmr.msra.gmra.mxu3 %vm636_vm2, %v11967_v9 }
 0x8c3   : > { %4214 = vmatpush.bf16.msrb.mxu3 %v4138_v40  ;;  %3780 = vmatpush.msrb.mxu1 %v3731_v22 }
 0x8c6   : > { %4241 = vmatpush.bf16.msrb.mxu2 %v8391_v25 }
 0x8c7   : > { %4215 = vmatpush.bf16.msrb.mxu3 %v8383_v60 }
 0x8ca   : > { %4242 = vmatpush.bf16.msrb.mxu2 %v8359_v58 }
 0x8cb   : > { %4216 = vmatpush.bf16.msrb.mxu3 %v8351_v46 }
 0x8ce   : > { %4243 = vmatpush.bf16.msrb.mxu2 %v8327_v3  ;;  %v8402_v3 = vld [vmem:[%s10445_s15 + $0x748] sm:$0xf] }
 0x8cf   : > { %4217 = vmatpush.bf16.msrb.mxu3 %v8319_v32  ;;  %v9101_v32 = vld [vmem:[%s10445_s15 + $0x764] sm:$0x30] }
 0x8d2   : > { %4244 = vmatpush.bf16.msrb.mxu2 %v8295_v16  ;;  %v8403_v16 = vor.u32 %v9101_v32, %v8402_v3  ;;  %v8306_v32 = vld [vmem:[%s10445_s15 + $0x688] sm:$0xf] }
 0x8d3   : > { %4218 = vmatpush.bf16.msrb.mxu3 %v8287_v38 }
 0x8d5   : > { %8431 = vmatmul.msk.bf16.vlgmr.msrb.gmra.mxu2 %vm636_vm2, %v11967_v9  ;;  %v9821_v62 = vpop.permute.xlu2 %9820 }
 0x8d6   : > { %8429 = vmatmul.msk.bf16.vlgmr.msrb.gmra.mxu3 %vm636_vm2, %v11967_v9  ;;  %v9823_v21 = vunpack.i.h.bf16 %v9821_v62  ;;  %v9822_v23 = vunpack.i.l.bf16 %v9821_v62  ;;  %v8395_v62 = vor.u32 %v9100_v63, %v8394_v30  ;;  %v9077_v30 = vld [vmem:[%s10445_s15 + $0x6a4] sm:$0xf0]  ;;  %v8298_v63 = vld [vmem:[%s10445_s15 + $0x680] sm:$0xf] }
 0x8d8   : > { %v3729_v59 = vsel %vm14675_vm13, %v9822_v23, %v9823_v21  ;;  %vm14677_vm13 = vmmov %vm14674_vm0 }
 0x8dd   : > { %v9836_v60 = vpop.permute.xlu2 %9835 }
 0x8de   : > { %v9826_v40 = vpop.permute.xlu0 %9825  ;;  %v9838_v22 = vunpack.i.h.bf16 %v9836_v60  ;;  %v9837_v58 = vunpack.i.l.bf16 %v9836_v60  ;;  %v9093_v60 = vld [vmem:[%s10445_s15 + $0x724] sm:$0xf0] }
 0x8df   : > { %v9828_v25 = vunpack.i.h.bf16 %v9826_v40  ;;  %v9827_v27 = vunpack.i.l.bf16 %v9826_v40 }
 0x8e0   : > { %v3726_v48 = vsel %vm14677_vm13, %v9837_v58, %v9838_v22  ;;  %vm14679_vm13 = vmmov %vm14674_vm0 }
 0x8e1   : > { %v3728_v17 = vsel %vm14676_vm12, %v9827_v27, %v9828_v25  ;;  %vm14678_vm12 = vmmov %vm14674_vm0  ;;  %v4123_v27 = vand.u32 %v8395_v62, %v10447_v2  ;;  %v9102_v62 = vld [vmem:[%s10445_s15 + $0x76c] sm:$0x30] }
 0x8e6   : > { %v9841_v1 = vpop.permute.xlu0 %9840  ;;  %v9851_v5 = vpop.permute.xlu2 %9850 }
 0x8e7   : > { %v9843_v15 = vunpack.i.h.bf16 %v9841_v1  ;;  %v9842_v31 = vunpack.i.l.bf16 %v9841_v1 }
 0x8e9   : > { %v3725_v38 = vsel %vm14678_vm12, %v9842_v31, %v9843_v15  ;;  %v9084_v31 = vld [vmem:[%s10445_s15 + $0x6dc] sm:$0xf0]  ;;  %vm14684_vm12 = vcmask 785408  }
 0x8ed   : > { %v9816_v10 = vpop.permute.xlu1 %9815 }
 0x8ee   : > { %v9818_v54 = vunpack.i.h.bf16 %v9816_v10  ;;  %v9817_v49 = vunpack.i.l.bf16 %v9816_v10  ;;  %v9853_v10 = vunpack.i.h.bf16 %v9851_v5 }
 0x8f0   : > { %3827 = vmatpush.msrb.mxu0 %v9818_v54  ;;  %v3730_v12 = vsel %vm14674_vm0, %v9817_v49, %v9818_v54  ;;  %v4129_v49 = vand.u32 %v8403_v16, %v10447_v2  ;;  %v9103_v16 = vld [vmem:[%s10445_s15 + $0x774] sm:$0x30] }
 0x8f1   : > { %3781 = vmatpush.msrb.mxu1 %v3730_v12  ;;  %v8370_v12 = vld [vmem:[%s10445_s15 + $0x708] sm:$0xf] }
 0x8f2   : > { %3828 = vmatpush.msrb.mxu0 %v9823_v21  ;;  %v9852_v21 = vunpack.i.l.bf16 %v9851_v5  ;;  %v8418_v5 = vld [vmem:[%s10445_s15 + $0x758] sm:$0xf] }
 0x8f3   : > { %3782 = vmatpush.msrb.mxu1 %v3729_v59  ;;  %v8362_v59 = vld [vmem:[%s10445_s15 + $0x700] sm:$0xf] }
 0x8f4   : > { %3829 = vmatpush.msrb.mxu0 %v9828_v25  ;;  %v3723_v1 = vsel %vm14679_vm13, %v9852_v21, %v9853_v10  ;;  %vm14686_vm13 = vcmask 809984  }
 0x8f5   : > { %v9831_v52 = vpop.permute.xlu1 %9830  ;;  %3783 = vmatpush.msrb.mxu1 %v3728_v17  ;;  %v9092_v17 = vld [vmem:[%s10445_s15 + $0x71c] sm:$0xf0] }
 0x8f6   : > { %v9833_v46 = vunpack.i.h.bf16 %v9831_v52  ;;  %v9832_v11 = vunpack.i.l.bf16 %v9831_v52  ;;  %v8371_v52 = vor.u32 %v9093_v60, %v8370_v12  ;;  %v8363_v58 = vor.u32 %v9092_v17, %v8362_v59 }
 0x8f8   : > { %3830 = vmatpush.msrb.mxu0 %v9833_v46  ;;  %v3727_v13 = vsel %vm14674_vm0, %v9832_v11, %v9833_v46  ;;  %v8338_v46 = vld [vmem:[%s10445_s15 + $0x6c8] sm:$0xf] }
 0x8f9   : > { %3784 = vmatpush.msrb.mxu1 %v3727_v13  ;;  %v9085_v11 = vld [vmem:[%s10445_s15 + $0x6e4] sm:$0xf0] }
 0x8fa   : > { %3831 = vmatpush.msrb.mxu0 %v9838_v22  ;;  %v12009_v22 = vld [vmem:[%s14530_s3 + $0x8] sm:$0xff]  ;;  %v8339_v13 = vor.u32 %v9085_v11, %v8338_v46  ;;  %v8378_v46 = vld [vmem:[%s10445_s15 + $0x710] sm:$0xf] }
 0x8fb   : > { %3785 = vmatpush.msrb.mxu1 %v3726_v48  ;;  %v9076_v48 = vld [vmem:[%s10445_s15 + $0x69c] sm:$0xf0]  ;;  %v9094_v11 = vld [vmem:[%s10445_s15 + $0x72c] sm:$0xf0] }
 0x8fc   : > { %3832 = vmatpush.msrb.mxu0 %v9843_v15  ;;  %v8330_v15 = vld [vmem:[%s10445_s15 + $0x6c0] sm:$0xf]  ;;  %v8299_v21 = vor.u32 %v9076_v48, %v8298_v63 }
 0x8fd   : > { %v9846_v40 = vpop.permute.xlu1 %9845  ;;  %3786 = vmatpush.msrb.mxu1 %v3725_v38  ;;  %v8331_v3 = vor.u32 %v9084_v31, %v8330_v15  ;;  %v8410_v38 = vld [vmem:[%s10445_s15 + $0x750] sm:$0xf]  ;;  %v8379_v31 = vor.u32 %v9094_v11, %v8378_v46 }
 0x8fe   : > { %v9848_v23 = vunpack.i.h.bf16 %v9846_v40  ;;  %v9847_v54 = vunpack.i.l.bf16 %v9846_v40  ;;  %v8307_v40 = vor.u32 %v9077_v30, %v8306_v32  ;;  %v8411_v12 = vor.u32 %v9102_v62, %v8410_v38  ;;  %v8346_v32 = vld [vmem:[%s10445_s15 + $0x6d0] sm:$0xf] }
 0x8ff   : > { %v9086_v30 = vld [vmem:[%s10445_s15 + $0x6ec] sm:$0xf0] }
 0x900   : > { %3833 = vmatpush.msrb.mxu0 %v9848_v23  ;;  %v3724_v25 = vsel %vm14674_vm0, %v9847_v54, %v9848_v23  ;;  %v8274_v23 = vld [vmem:[%s10445_s15 + $0x648] sm:$0xf]  ;;  %v8347_v48 = vor.u32 %v9086_v30, %v8346_v32  ;;  %v8314_v38 = vld [vmem:[%s10445_s15 + $0x690] sm:$0xf]  ;;  %vm14685_vm0 = vcmask 793600  }
 0x901   : > { %3787 = vmatpush.msrb.mxu1 %v3724_v25  ;;  %v9069_v54 = vld [vmem:[%s10445_s15 + $0x664] sm:$0xf0]  ;;  %v8266_v25 = vld [vmem:[%s10445_s15 + $0x640] sm:$0xf]  ;;  %v9078_v62 = vld [vmem:[%s10445_s15 + $0x6ac] sm:$0xf0] }
 0x902   : > { %3834 = vmatpush.msrb.mxu0 %v9853_v10  ;;  %v12030_v10 = vld [vmem:[%s14530_s3 + $0x18] sm:$0xff]  ;;  %v8275_v60 = vor.u32 %v9069_v54, %v8274_v23 }
 0x903   : > { %3788 = vmatpush.msrb.mxu1 %v3723_v1  ;;  %8222 = vmatmul.msk.f32.vlgmr.msrb.gmra.mxu0 %vm988_vm1, %v12009_v22  ;;  %v4135_v1 = vand.u32 %v8411_v12, %v10447_v2  ;;  %v8290_v23 = vld [vmem:[%s10445_s15 + $0x658] sm:$0xf] }
 0x904   : > { %4175 = vmatpush.bf16.msra.mxu0 %v4129_v49  ;;  %8220 = vmatmul.msk.f32.vlgmr.msrb.gmra.mxu1 %vm988_vm1, %v12009_v22  ;;  %v8419_v49 = vor.u32 %v9103_v16, %v8418_v5  ;;  %v8322_v5 = vld [vmem:[%s10445_s15 + $0x698] sm:$0xf] }
 0x905   : > { %4149 = vmatpush.bf16.msra.mxu1 %v4123_v27  ;;  %v9068_v27 = vld [vmem:[%s10445_s15 + $0x65c] sm:$0xf0]  ;;  %v9079_v16 = vld [vmem:[%s10445_s15 + $0x6b4] sm:$0xf0] }
 0x906   : > { %v8267_v59 = vor.u32 %v9068_v27, %v8266_v25  ;;  %v4141_v17 = vand.u32 %v8419_v49, %v10447_v2  ;;  %v9071_v54 = vld [vmem:[%s10445_s15 + $0x674] sm:$0xf0]  ;;  %v8282_v49 = vld [vmem:[%s10445_s15 + $0x650] sm:$0xf] }
 0x907   : > { %v9070_v25 = vld [vmem:[%s10445_s15 + $0x66c] sm:$0xf0]  ;;  %v8291_v27 = vor.u32 %v9071_v54, %v8290_v23 }
 0x908   : > { %4176 = vmatpush.bf16.msra.mxu0 %v8371_v52  ;;  %v8386_v52 = vld [vmem:[%s10445_s15 + $0x718] sm:$0xf]  ;;  %v8283_v12 = vor.u32 %v9070_v25, %v8282_v49 }
 0x909   : > { %4150 = vmatpush.bf16.msra.mxu1 %v8363_v58  ;;  %v9095_v58 = vld [vmem:[%s10445_s15 + $0x734] sm:$0xf0] }
 0x90a   : > { %v8387_v15 = vor.u32 %v9095_v58, %v8386_v52 }
 0x90b   : > { %8223 = vmatmul.msk.f32.gmra.mxu0 %vm988_vm1, %v12030_v10 }
 0x90c   : > { %4177 = vmatpush.bf16.msra.mxu0 %v8339_v13  ;;  %8221 = vmatmul.msk.f32.gmra.mxu1 %vm988_vm1, %v12030_v10  ;;  %v8354_v13 = vld [vmem:[%s10445_s15 + $0x6d8] sm:$0xf] }
 0x90d   : > { %4151 = vmatpush.bf16.msra.mxu1 %v8331_v3  ;;  %v9087_v3 = vld [vmem:[%s10445_s15 + $0x6f4] sm:$0xf0] }
 0x90e   : > { %v8355_v63 = vor.u32 %v9087_v3, %v8354_v13 }
 0x910   : > { %4178 = vmatpush.bf16.msra.mxu0 %v8307_v40  ;;  %v8323_v40 = vor.u32 %v9079_v16, %v8322_v5 }
 0x911   : > { %4152 = vmatpush.bf16.msra.mxu1 %v8299_v21  ;;  %v8315_v21 = vor.u32 %v9078_v62, %v8314_v38 }
 0x914   : > { %4179 = vmatpush.bf16.msra.mxu0 %v8275_v60 }
 0x915   : > { %4153 = vmatpush.bf16.msra.mxu1 %v8267_v59 }
 0x917   : > { %8426 = vmatmul.msk.bf16.vlgmr.msra.gmra.mxu0 %vm636_vm2, %v11967_v9 }
 0x918   : > { %4227 = vmatpush.bf16.msrb.mxu0 %v4141_v17  ;;  %8424 = vmatmul.msk.bf16.vlgmr.msra.gmra.mxu1 %vm636_vm2, %v11967_v9 }
 0x919   : > { %4201 = vmatpush.bf16.msrb.mxu1 %v4135_v1 }
 0x91c   : > { %4228 = vmatpush.bf16.msrb.mxu0 %v8387_v15 }
 0x91d   : > { %4202 = vmatpush.bf16.msrb.mxu1 %v8379_v31 }
 0x920   : > { %4229 = vmatpush.bf16.msrb.mxu0 %v8355_v63 }
 0x921   : > { %4203 = vmatpush.bf16.msrb.mxu1 %v8347_v48 }
 0x924   : > { %4230 = vmatpush.bf16.msrb.mxu0 %v8323_v40 }
 0x925   : > { %4204 = vmatpush.bf16.msrb.mxu1 %v8315_v21 }
 0x928   : > { %4231 = vmatpush.bf16.msrb.mxu0 %v8291_v27 }
 0x929   : > { %4205 = vmatpush.bf16.msrb.mxu1 %v8283_v12 }
 0x92b   : > { %8430 = vmatmul.msk.bf16.vlgmr.msrb.gmra.mxu0 %vm636_vm2, %v11967_v9 }
 0x92c   : > { %8428 = vmatmul.msk.bf16.vlgmr.msrb.gmra.mxu1 %vm636_vm2, %v11967_v9 }
 0x930   : > { %v12066_v60 = vpop.f32.mrf.mxu2 }
 0x931   : > { %v12068_v59 = vpop.f32.mrf.mxu3 }
 0x938   : > { %v12070_v17 = vpop.f32.mrf.mxu2 }
 0x939   : > { %14680 = vst [vmem:[#allocation28_spill] sm:$0xff] %v12070_v17  ;;  %v12072_v1 = vpop.f32.mrf.mxu3 }
 0x93a   : > { %14681 = vst [vmem:[#allocation29_spill] sm:$0xff] %v12072_v1 }
 0x944   : > { %v4194_v52 = vpop.f32.mrf.mxu2 }
 0x945   : > { %v4195_v58 = vadd.f32 %v4194_v52, %v10587_v50  ;;  %v4168_v46 = vpop.f32.mrf.mxu3 }
 0x946   : > { %v4169_v11 = vadd.f32 %v4168_v46, %v10587_v50 }
 0x947   : > { %v4253_v15 = vmax.f32 %v4195_v58, 0.0 }
 0x948   : > { %v4251_v31 = vmax.f32 %v4169_v11, 0.0 }
 0x94a   : > { %v4259_v13 = vmax.f32 %v4251_v31, %v4253_v15 }
 0x94c   : > { %v4196_v3 = vpop.f32.mrf.mxu2 }
 0x94d   : > { %v4170_v32 = vpop.f32.mrf.mxu3 }
 0x958   : > { %v4246_v9 = vpop.f32.mrf.mxu2 }
 0x959   : > { %v4247_v30 = vadd.f32 %v4246_v9, %v10587_v50  ;;  %v4220_v63 = vpop.f32.mrf.mxu3 }
 0x95a   : > { %v4221_v48 = vadd.f32 %v4220_v63, %v10587_v50 }
 0x95b   : > { %v4257_v5 = vmax.f32 %v4247_v30, 0.0 }
 0x95c   : > { %v4255_v16 = vmax.f32 %v4221_v48, 0.0 }
 0x95e   : > { %v4261_v38 = vmax.f32 %v4255_v16, %v4257_v5 }
 0x960   : > { %v12078_v62 = vmax.f32 %v4259_v13, %v4261_v38  ;;  %v4248_v40 = vpop.f32.mrf.mxu2 }
 0x961   : > { %v4222_v21 = vpop.f32.mrf.mxu3 }
 0x980   : > { %v12080_v23 = vpop.f32.mrf.mxu0 }
 0x981   : > { %v12082_v54 = vpop.f32.mrf.mxu1 }
 0x988   : > { %v12084_v49 = vpop.f32.mrf.mxu0 }
 0x989   : > { %14682 = vst [vmem:[#allocation30_spill] sm:$0xff] %v12084_v49  ;;  %v12086_v25 = vpop.f32.mrf.mxu1 }
 0x98a   : > { %14683 = vst [vmem:[#allocation31_spill] sm:$0xff] %v12086_v25 }
 0x994   : > { %v4181_v27 = vpop.f32.mrf.mxu0 }
 0x995   : > { %v4155_v12 = vpop.f32.mrf.mxu1  ;;  %v4182_v46 = vadd.f32 %v4181_v27, %v10587_v50 }
 0x996   : > { %v4156_v11 = vadd.f32 %v4155_v12, %v10587_v50 }
 0x997   : > { %v4252_v3 = vmax.f32 %v4182_v46, 0.0 }
 0x998   : > { %v4250_v32 = vmax.f32 %v4156_v11, 0.0 }
 0x99a   : > { %v4258_v48 = vmax.f32 %v4250_v32, %v4252_v3 }
 0x99c   : > { %v4183_v52 = vpop.f32.mrf.mxu0 }
 0x99d   : > { %v4157_v58 = vpop.f32.mrf.mxu1 }
 0x9a8   : > { %v4233_v15 = vpop.f32.mrf.mxu0 }
 0x9a9   : > { %v4234_v31 = vadd.f32 %v4233_v15, %v10587_v50  ;;  %v4207_v13 = vpop.f32.mrf.mxu1 }
 0x9aa   : > { %v4208_v9 = vadd.f32 %v4207_v13, %v10587_v50 }
 0x9ab   : > { %v4256_v30 = vmax.f32 %v4234_v31, 0.0 }
 0x9ac   : > { %v4254_v63 = vmax.f32 %v4208_v9, 0.0 }
 0x9ae   : > { %v4260_v5 = vmax.f32 %v4254_v63, %v4256_v30 }
 0x9b0   : > { %v12092_v16 = vmax.f32 %v4258_v48, %v4260_v5  ;;  %v4235_v38 = vpop.f32.mrf.mxu0 }
 0x9b1   : > { %v4209_v40 = vpop.f32.mrf.mxu1 }
 0x9b2   : > { %v12096_v21 = vpack.i.bf16 %v12078_v62, %v12092_v16 }
 0x9b4   : > { %9865 = vrot.lane.b32.xlu2 %v12096_v21, %s14633_s23  ;;  %9860 = vrot.lane.b32.xlu1 %v12096_v21, %s14634_s28 }
 0x9b5   : > { %9855 = vrot.lane.b32.xlu0 %v12096_v21, %s14614_s12 }
 0x9bc   : > { %9880 = vrot.lane.b32.xlu2 %v12096_v21, %s14615_s16  ;;  %9875 = vrot.lane.b32.xlu1 %v12096_v21, %s14616_s21 }
 0x9bd   : > { %9870 = vrot.lane.b32.xlu0 %v12096_v21, %s14617_s25 }
 0x9c4   : > { %9895 = vrot.lane.b32.xlu2 %v12096_v21, %s14621_s0  ;;  %9890 = vrot.lane.b32.xlu1 %v12096_v21, %s14618_s24 }
 0x9c5   : > { %9885 = vrot.lane.b32.xlu0 %v12096_v21, %s14619_s14 }
 0x9cc   : > { %9910 = vrot.lane.b32.xlu2 %v12096_v21, %s14622_s2  ;;  %9905 = vrot.lane.b32.xlu1 %v12096_v21, %s14620_s30 }
 0x9cd   : > { %9900 = vrot.lane.b32.xlu0 %v12096_v21, %s14635_s17 }
 0x9d4   : > { %9920 = vrot.lane.b32.xlu2 %v12096_v21, %s14625_s26  ;;  %9925 = vrot.lane.b32.xlu1 %v12096_v21, %s14624_s13 }
 0x9d5   : > { %9915 = vrot.lane.b32.xlu0 %v12096_v21, %s14636_s20 }
 0xa0e   : > { %v9866_v27 = vpop.permute.xlu2 %9865 }
 0xa0f   : > { %v12128_v12 = vunpack.i.h.bf16 %v9866_v27  ;;  %v9867_v52 = vunpack.i.l.bf16 %v9866_v27 }
 0xa11   : > { %v12132_v58 = vsel %vm832_vm8, %v9867_v52, %v12128_v12 }
 0xa12   : > { %v9939_v46 = vpack.i.bf16 %v12128_v12, %v12132_v58 }
 0xa14   : > { %9940 = vrot.lane.b32.xlu2 %v9939_v46, %s14623_s22 }
 0xa16   : > { %v9881_v11 = vpop.permute.xlu2 %9880 }
 0xa17   : > { %v12137_v15 = vunpack.i.h.bf16 %v9881_v11  ;;  %v9882_v31 = vunpack.i.l.bf16 %v9881_v11 }
 0xa19   : > { %v12141_v13 = vsel %vm808_vm10, %v9882_v31, %v12137_v15 }
 0xa1a   : > { %v9959_v3 = vpack.i.bf16 %v12137_v15, %v12141_v13 }
 0xa1c   : > { %9960 = vrot.lane.b32.xlu2 %v9959_v3, %s14623_s22 }
 0xa1e   : > { %v9896_v32 = vpop.permute.xlu2 %9895 }
 0xa1f   : > { %v9898_v9 = vunpack.i.h.bf16 %v9896_v32  ;;  %v9897_v30 = vunpack.i.l.bf16 %v9896_v32 }
 0xa21   : > { %4485 = vmatpush.msra.mxu0 %v9898_v9  ;;  %v4368_v63 = vsel %vm904_vm4, %v9897_v30, %v9898_v9 }
 0xa22   : > { %4439 = vmatpush.msra.mxu1 %v4368_v63 }
 0xa26   : > { %v9861_v48 = vpop.permute.xlu1 %9860 }
 0xa27   : > { %v12147_v5 = vunpack.i.h.bf16 %v9861_v48  ;;  %v9862_v38 = vunpack.i.l.bf16 %v9861_v48  ;;  %v9856_v40 = vpop.permute.xlu0 %9855 }
 0xa28   : > { %v12149_v27 = vunpack.i.h.bf16 %v9856_v40  ;;  %v9857_v52 = vunpack.i.l.bf16 %v9856_v40 }
 0xa29   : > { %v12153_v46 = vsel %vm840_vm5, %v9862_v38, %v12147_v5 }
 0xa2a   : > { %v9934_v11 = vpack.i.bf16 %v12147_v5, %v12153_v46  ;;  %v12159_v31 = vsel %vm848_vm6, %v9857_v52, %v12149_v27 }
 0xa2b   : > { %v9929_v3 = vpack.i.bf16 %v12149_v27, %v12159_v31 }
 0xa2c   : > { %9935 = vrot.lane.b32.xlu0 %v9934_v11, %s14623_s22 }
 0xa2d   : > { %9930 = vrot.lane.b32.xlu1 %v9929_v3, %s14623_s22 }
 0xa2e   : > { %v9876_v32 = vpop.permute.xlu1 %9875 }
 0xa2f   : > { %v9878_v9 = vunpack.i.h.bf16 %v9876_v32  ;;  %v9877_v30 = vunpack.i.l.bf16 %v9876_v32  ;;  %v9871_v63 = vpop.permute.xlu0 %9870 }
 0xa30   : > { %v12165_v48 = vunpack.i.h.bf16 %v9871_v63  ;;  %v9872_v38 = vunpack.i.l.bf16 %v9871_v63 }
 0xa31   : > { %v4375_v40 = vsel %vm912_vm7, %v9877_v30, %v9878_v9 }
 0xa32   : > { %v9949_v49 = vpack.i.bf16 %v9878_v9, %v4375_v40  ;;  %v4298_v52 = vsel %vm824_vm3, %v9872_v38, %v12165_v48 }
 0xa33   : > { %v9944_v17 = vpack.i.bf16 %v12165_v48, %v4298_v52 }
 0xa35   : > { %9945 = vrot.lane.b32.xlu0 %v9944_v17, %s14623_s22  ;;  %9950 = vrot.lane.b32.xlu1 %v9949_v49, %s14623_s22  ;;  %v9911_v49 = vpop.permute.xlu2 %9910 }
 0xa36   : > { %v9891_v11 = vpop.permute.xlu1 %9890  ;;  %v9913_v56 = vunpack.i.h.bf16 %v9911_v49 }
 0xa37   : > { %v12173_v3 = vunpack.i.h.bf16 %v9891_v11  ;;  %v9892_v32 = vunpack.i.l.bf16 %v9891_v11  ;;  %v9886_v25 = vpop.permute.xlu0 %9885 }
 0xa38   : > { %v12175_v1 = vunpack.i.h.bf16 %v9886_v25  ;;  %v9887_v63 = vunpack.i.l.bf16 %v9886_v25 }
 0xa39   : > { %v12179_v9 = vsel %vm792_vm9, %v9892_v32, %v12173_v3 }
 0xa3a   : > { %v9969_v30 = vpack.i.bf16 %v12173_v3, %v12179_v9  ;;  %v12185_v17 = vsel %vm800_vm11, %v9887_v63, %v12175_v1  ;;  %v9912_v63 = vunpack.i.l.bf16 %v9911_v49 }
 0xa3b   : > { %v9964_v38 = vpack.i.bf16 %v12175_v1, %v12185_v17 }
 0xa3c   : > { %9970 = vrot.lane.b32.xlu2 %v9969_v30, %s14623_s22 }
 0xa3d   : > { %9965 = vrot.lane.b32.xlu0 %v9964_v38, %s14623_s22  ;;  %9955 = vrot.lane.b32.xlu1 %v12096_v21, %s14626_s19  ;;  %v9921_v61 = vpop.permute.xlu2 %9920  ;;  %v4347_v38 = vsel %vm880_vm14, %v9912_v63, %v9913_v56 }
 0xa3e   : > { %v9906_v25 = vpop.permute.xlu1 %9905  ;;  %v9922_v49 = vunpack.i.l.bf16 %v9921_v61 }
 0xa3f   : > { %v9901_v40 = vpop.permute.xlu0 %9900  ;;  %v9908_v11 = vunpack.i.h.bf16 %v9906_v25  ;;  %v9907_v32 = vunpack.i.l.bf16 %v9906_v25 }
 0xa40   : > { %v9903_v14 = vunpack.i.h.bf16 %v9901_v40  ;;  %v9902_v36 = vunpack.i.l.bf16 %v9901_v40  ;;  %v9923_v40 = vunpack.i.h.bf16 %v9921_v61 }
 0xa41   : > { %v4354_v30 = vsel %vm14685_vm0, %v9907_v32, %v9908_v11  ;;  %vm14688_vm0 = vcmask 900096  }
 0xa42   : > { %4486 = vmatpush.msra.mxu0 %v9903_v14  ;;  %v4361_v43 = vsel %vm14684_vm12, %v9902_v36, %v9903_v14  ;;  %vm14687_vm12 = vcmask 818176  }
 0xa43   : > { %4440 = vmatpush.msra.mxu1 %v4361_v43 }
 0xa44   : > { %4487 = vmatpush.msra.mxu0 %v9908_v11  ;;  %v4333_v11 = vsel %vm14687_vm12, %v9922_v49, %v9923_v40 }
 0xa45   : > { %4441 = vmatpush.msra.mxu1 %v4354_v30  ;;  %9975 = vrot.lane.b32.xlu0 %v12096_v21, %s14623_s22 }
 0xa46   : > { %4488 = vmatpush.msra.mxu0 %v9913_v56  ;;  %v9926_v25 = vpop.permute.xlu1 %9925 }
 0xa47   : > { %v9916_v57 = vpop.permute.xlu0 %9915  ;;  %4442 = vmatpush.msra.mxu1 %v4347_v38  ;;  %v9928_v36 = vunpack.i.h.bf16 %v9926_v25  ;;  %v9927_v43 = vunpack.i.l.bf16 %v9926_v25 }
 0xa48   : > { %v9918_v42 = vunpack.i.h.bf16 %v9916_v57  ;;  %v9917_v6 = vunpack.i.l.bf16 %v9916_v57 }
 0xa49   : > { %v4326_v56 = vsel %vm14688_vm0, %v9927_v43, %v9928_v36 }
 0xa4a   : > { %4489 = vmatpush.msra.mxu0 %v9918_v42  ;;  %v4340_v14 = vsel %vm14686_vm13, %v9917_v6, %v9918_v42  ;;  %vm14689_vm13 = vcmask 695296  }
 0xa4b   : > { %4443 = vmatpush.msra.mxu1 %v4340_v14  ;;  %vm14690_vm12 = vmmov %vm14689_vm13 }
 0xa4c   : > { %4490 = vmatpush.msra.mxu0 %v9923_v40  ;;  %vm14691_vm0 = vmmov %vm14690_vm12 }
 0xa4d   : > { %4444 = vmatpush.msra.mxu1 %v4333_v11 }
 0xa4e   : > { %4491 = vmatpush.msra.mxu0 %v9928_v36 }
 0xa4f   : > { %4445 = vmatpush.msra.mxu1 %v4326_v56 }
 0xa50   : > { %4492 = vmatpush.msra.mxu0 %v12149_v27 }
 0xa51   : > { %4446 = vmatpush.msra.mxu1 %v12159_v31 }
 0xa52   : > { %4493 = vmatpush.msra.mxu0 %v12147_v5 }
 0xa53   : > { %4447 = vmatpush.msra.mxu1 %v12153_v46 }
 0xa54   : > { %4494 = vmatpush.msra.mxu0 %v12128_v12 }
 0xa55   : > { %4448 = vmatpush.msra.mxu1 %v12132_v58 }
 0xa56   : > { %4495 = vmatpush.msra.mxu0 %v12165_v48 }
 0xa57   : > { %4449 = vmatpush.msra.mxu1 %v4298_v52 }
 0xa6e   : > { %v9941_v42 = vpop.permute.xlu2 %9940 }
 0xa6f   : > { %v9943_v63 = vunpack.i.h.bf16 %v9941_v42  ;;  %v9942_v31 = vunpack.i.l.bf16 %v9941_v42 }
 0xa71   : > { %v4418_v58 = vsel %vm14691_vm0, %v9942_v31, %v9943_v63  ;;  %v8614_v31 = vld [vmem:[%s10445_s15 + $0x888] sm:$0xf] }
 0xa76   : > { %v9961_v46 = vpop.permute.xlu2 %9960 }
 0xa77   : > { %v9963_v49 = vunpack.i.h.bf16 %v9961_v46  ;;  %v9962_v36 = vunpack.i.l.bf16 %v9961_v46  ;;  %v9137_v46 = vld [vmem:[%s10445_s15 + $0x88c] sm:$0xf] }
 0xa79   : > { %v4415_v56 = vsel %vm14691_vm0, %v9962_v36, %v9963_v49 }
 0xa96   : > { %v9971_v14 = vpop.permute.xlu2 %9970 }
 0xa97   : > { %v9973_v42 = vunpack.i.h.bf16 %v9971_v14 }
 0xa9e   : > { %v9936_v61 = vpop.permute.xlu0 %9935 }
 0xa9f   : > { %v9931_v6 = vpop.permute.xlu1 %9930  ;;  %v9938_v57 = vunpack.i.h.bf16 %v9936_v61  ;;  %v9937_v21 = vunpack.i.l.bf16 %v9936_v61  ;;  %v9972_v61 = vunpack.i.l.bf16 %v9971_v14 }
 0xaa0   : > { %v9933_v32 = vunpack.i.h.bf16 %v9931_v6  ;;  %v9932_v27 = vunpack.i.l.bf16 %v9931_v6 }
 0xaa1   : > { %v4419_v12 = vsel %vm14690_vm12, %v9937_v21, %v9938_v57  ;;  %vm14693_vm12 = vmmov %vm14691_vm0 }
 0xaa2   : > { %4515 = vmatpush.msra.mxu2 %v9933_v32  ;;  %v4420_v5 = vsel %vm14689_vm13, %v9932_v27, %v9933_v32  ;;  %vm14692_vm13 = vmmov %vm14691_vm0 }
 0xaa3   : > { %4469 = vmatpush.msra.mxu3 %v4420_v5  ;;  %v9141_v5 = vld [vmem:[%s10445_s15 + $0x8a4] sm:$0x30] }
 0xaa4   : > { %4516 = vmatpush.msra.mxu2 %v9938_v57 }
 0xaa5   : > { %4470 = vmatpush.msra.mxu3 %v4419_v12  ;;  %v8616_v12 = vld [vmem:[%s10445_s15 + $0x8a8] sm:$0x30] }
 0xaa6   : > { %4517 = vmatpush.msra.mxu2 %v9943_v63  ;;  %v8619_v36 = vor.u32 %v9137_v46, %v8616_v12  ;;  %v9125_v46 = vld [vmem:[%s10445_s15 + $0x824] sm:$0xf0] }
 0xaa7   : > { %v9946_v48 = vpop.permute.xlu0 %9945  ;;  %v9951_v52 = vpop.permute.xlu1 %9950  ;;  %4471 = vmatpush.msra.mxu3 %v4418_v58  ;;  %v8606_v58 = vld [vmem:[%s10445_s15 + $0x880] sm:$0xf] }
 0xaa8   : > { %v9948_v30 = vunpack.i.h.bf16 %v9946_v48  ;;  %v9947_v38 = vunpack.i.l.bf16 %v9946_v48  ;;  %v9953_v25 = vunpack.i.h.bf16 %v9951_v52  ;;  %v9952_v40 = vunpack.i.l.bf16 %v9951_v52 }
 0xaaa   : > { %4518 = vmatpush.msra.mxu2 %v9948_v30  ;;  %v4417_v43 = vsel %vm14692_vm13, %v9947_v38, %v9948_v30  ;;  %v4416_v11 = vsel %vm14693_vm12, %v9952_v40, %v9953_v25  ;;  %vm14694_vm13 = vmmov %vm14691_vm0  ;;  %v9140_v30 = vld [vmem:[%s10445_s15 + $0x89c] sm:$0x30]  ;;  %v9136_v38 = vld [vmem:[%s10445_s15 + $0x884] sm:$0xf] }
 0xaab   : > { %4472 = vmatpush.msra.mxu3 %v4417_v43  ;;  %vm14695_vm12 = vmmov %vm14691_vm0  ;;  %v8607_v43 = vor.u32 %v9140_v30, %v8606_v58  ;;  %v9124_v30 = vld [vmem:[%s10445_s15 + $0x81c] sm:$0xf0] }
 0xaac   : > { %4519 = vmatpush.msra.mxu2 %v9953_v25  ;;  %v8608_v25 = vld [vmem:[%s10445_s15 + $0x8a0] sm:$0x30]  ;;  %v4413_v40 = vsel %vm14695_vm12, %v9972_v61, %v9973_v42  ;;  %v8582_v61 = vld [vmem:[%s10445_s15 + $0x848] sm:$0xf]  ;;  %vm14701_vm12 = vcmask 793600  }
 0xaad   : > { %4473 = vmatpush.msra.mxu3 %v4416_v11  ;;  %v8611_v14 = vor.u32 %v9136_v38, %v8608_v25  ;;  %v9120_v38 = vld [vmem:[%s10445_s15 + $0x804] sm:$0xf] }
 0xaae   : > { %4520 = vmatpush.msra.mxu2 %v9963_v49  ;;  %v8615_v49 = vor.u32 %v9141_v5, %v8614_v31  ;;  %v8544_v25 = vld [vmem:[%s10445_s15 + $0x820] sm:$0xf0] }
 0xaaf   : > { %v9966_v6 = vpop.permute.xlu0 %9965  ;;  %v9956_v57 = vpop.permute.xlu1 %9955  ;;  %4474 = vmatpush.msra.mxu3 %v4415_v56 }
 0xab0   : > { %v9968_v21 = vunpack.i.h.bf16 %v9966_v6  ;;  %v9967_v32 = vunpack.i.l.bf16 %v9966_v6  ;;  %v9958_v27 = vunpack.i.h.bf16 %v9956_v57  ;;  %v9957_v63 = vunpack.i.l.bf16 %v9956_v57  ;;  %v9133_v6 = vld [vmem:[%s10445_s15 + $0x864] sm:$0xf0] }
 0xab1   : > { %v4815_v57 = vand.u32 %v8611_v14, %v10447_v2  ;;  %v8583_v31 = vor.u32 %v9133_v6, %v8582_v61  ;;  %v9113_v14 = vld [vmem:[%s10445_s15 + $0x7cc] sm:$0xf]  ;;  %v8630_v61 = vld [vmem:[%s10445_s15 + $0x898] sm:$0xf] }
 0xab2   : > { %4496 = vmatpush.msra.mxu0 %v9958_v27  ;;  %4521 = vmatpush.msra.mxu2 %v9968_v21  ;;  %v4291_v48 = vsel %vm816_vm15, %v9957_v63, %v9958_v27  ;;  %v4414_v52 = vsel %vm14694_vm13, %v9967_v32, %v9968_v21  ;;  %v8584_v21 = vld [vmem:[%s10445_s15 + $0x868] sm:$0xf0]  ;;  %v8574_v32 = vld [vmem:[%s10445_s15 + $0x840] sm:$0xf]  ;;  %v9128_v63 = vld [vmem:[%s10445_s15 + $0x844] sm:$0xf] }
 0xab3   : > { %4450 = vmatpush.msra.mxu1 %v4291_v48  ;;  %4475 = vmatpush.msra.mxu3 %v4414_v52  ;;  %v9132_v27 = vld [vmem:[%s10445_s15 + $0x85c] sm:$0xf0]  ;;  %v9121_v48 = vld [vmem:[%s10445_s15 + $0x80c] sm:$0xf]  ;;  %v9143_v6 = vld [vmem:[%s10445_s15 + $0x8b4] sm:$0x30] }
 0xab4   : > { %4497 = vmatpush.msra.mxu0 %v12137_v15  ;;  %4522 = vmatpush.msra.mxu2 %v9973_v42  ;;  %v4821_v42 = vand.u32 %v8619_v36, %v10447_v2  ;;  %v8575_v12 = vor.u32 %v9132_v27, %v8574_v32  ;;  %v8552_v52 = vld [vmem:[%s10445_s15 + $0x828] sm:$0xf0]  ;;  %v8622_v32 = vld [vmem:[%s10445_s15 + $0x890] sm:$0xf]  ;;  %vm14700_vm13 = vcmask 785408  }
 0xab5   : > { %4451 = vmatpush.msra.mxu1 %v12141_v13  ;;  %4476 = vmatpush.msra.mxu3 %v4413_v40  ;;  %v4818_v13 = vand.u32 %v8615_v49, %v10447_v2  ;;  %v8518_v40 = vld [vmem:[%s10445_s15 + $0x7c8] sm:$0xf]  ;;  %v8555_v36 = vor.u32 %v9121_v48, %v8552_v52  ;;  %v12284_v48 = vld [vmem:[%s14530_s3 + $0x10] sm:$0xff]  ;;  %v9108_v52 = vld [vmem:[%s10445_s15 + $0x79c] sm:$0xf0] }
 0xab6   : > { %4498 = vmatpush.msra.mxu0 %v12175_v1  ;;  %v4812_v1 = vand.u32 %v8607_v43, %v10447_v2  ;;  %v9117_v43 = vld [vmem:[%s10445_s15 + $0x7e4] sm:$0xf0] }
 0xab7   : > { %v9976_v11 = vpop.permute.xlu0 %9975  ;;  %4452 = vmatpush.msra.mxu1 %v12185_v17  ;;  %v9129_v17 = vld [vmem:[%s10445_s15 + $0x84c] sm:$0xf] }
 0xab8   : > { %v9978_v15 = vunpack.i.h.bf16 %v9976_v11  ;;  %v9977_v56 = vunpack.i.l.bf16 %v9976_v11  ;;  %4499 = vmatpush.msra.mxu0 %v12173_v3  ;;  %v8587_v5 = vor.u32 %v9129_v17, %v8584_v21  ;;  %v9139_v17 = vld [vmem:[%s10445_s15 + $0x89c] sm:$0xf] }
 0xab9   : > { %4453 = vmatpush.msra.mxu1 %v12179_v9  ;;  %v8576_v9 = vld [vmem:[%s10445_s15 + $0x860] sm:$0xf0]  ;;  %v8632_v21 = vld [vmem:[%s10445_s15 + $0x8b8] sm:$0x30] }
 0xaba   : > { %4500 = vmatpush.msra.mxu0 %v12078_v62  ;;  %4523 = vmatpush.msra.mxu2 %v9978_v15  ;;  %v4412_v3 = vsel %vm14691_vm0, %v9977_v56, %v9978_v15  ;;  %v8550_v62 = vld [vmem:[%s10445_s15 + $0x808] sm:$0xf]  ;;  %v8579_v58 = vor.u32 %v9128_v63, %v8576_v9  ;;  %v8510_v15 = vld [vmem:[%s10445_s15 + $0x7c0] sm:$0xf]  ;;  %v9142_v63 = vld [vmem:[%s10445_s15 + $0x8ac] sm:$0x30] }
 0xabb   : > { %4454 = vmatpush.msra.mxu1 %v12092_v16  ;;  %4477 = vmatpush.msra.mxu3 %v4412_v3  ;;  %v8542_v16 = vld [vmem:[%s10445_s15 + $0x800] sm:$0xf]  ;;  %v8551_v49 = vor.u32 %v9125_v46, %v8550_v62  ;;  %v8519_v3 = vor.u32 %v9117_v43, %v8518_v40  ;;  %v9138_v9 = vld [vmem:[%s10445_s15 + $0x894] sm:$0xf]  ;;  %v9105_v46 = vld [vmem:[%s10445_s15 + $0x78c] sm:$0xf]  ;;  %v8623_v40 = vor.u32 %v9142_v63, %v8622_v32 }
 0xabc   : > { %4864 = vmatpush.bf16.msrb.mxu2 %v4818_v13  ;;  %4877 = vmatpush.bf16.msrb.mxu0 %v4821_v42  ;;  %v8543_v11 = vor.u32 %v9124_v30, %v8542_v16  ;;  %v9116_v56 = vld [vmem:[%s10445_s15 + $0x7dc] sm:$0xf0]  ;;  %v9112_v13 = vld [vmem:[%s10445_s15 + $0x7c4] sm:$0xf]  ;;  %vm14702_vm0 = vcmask 809984  }
 0xabd   : > { %4838 = vmatpush.bf16.msrb.mxu3 %v4812_v1  ;;  %4851 = vmatpush.bf16.msrb.mxu1 %v4815_v57  ;;  %v8512_v42 = vld [vmem:[%s10445_s15 + $0x7e0] sm:$0xf0]  ;;  %v8486_v1 = vld [vmem:[%s10445_s15 + $0x788] sm:$0xf] }
 0xabe   : > { %4501 = vmatmul.f32.vlgmr.msra.gmra.mxu0 %v11933_v24  ;;  %8434 = vmatmul.msk.f32.vlgmr.msra.gmra.mxu2 %vm988_vm1, %v12009_v22  ;;  %v9109_v57 = vld [vmem:[%s10445_s15 + $0x7a4] sm:$0xf0]  ;;  %v8515_v62 = vor.u32 %v9112_v13, %v8512_v42  ;;  %v9104_v16 = vld [vmem:[%s10445_s15 + $0x784] sm:$0xf]  ;;  %v9131_v42 = vld [vmem:[%s10445_s15 + $0x85c] sm:$0xf] }
 0xabf   : > { %4455 = vmatmul.f32.vlgmr.msra.gmra.mxu1 %v11933_v24  ;;  %8432 = vmatmul.msk.f32.vlgmr.msra.gmra.mxu3 %vm988_vm1, %v12009_v22  ;;  %v8520_v24 = vld [vmem:[%s10445_s15 + $0x7e8] sm:$0xf0]  ;;  %v8547_v22 = vor.u32 %v9120_v38, %v8544_v25  ;;  %v8480_v30 = vld [vmem:[%s10445_s15 + $0x7a0] sm:$0xf0]  ;;  %v8631_v38 = vor.u32 %v9143_v6, %v8630_v61  ;;  %v8635_v25 = vor.u32 %v9139_v17, %v8632_v21  ;;  %v8600_v61 = vld [vmem:[%s10445_s15 + $0x878] sm:$0xf0] }
 0xac0   : > { %4865 = vmatpush.bf16.msrb.mxu2 %v8583_v31  ;;  %4878 = vmatpush.bf16.msrb.mxu0 %v8587_v5  ;;  %v8523_v27 = vor.u32 %v9113_v14, %v8520_v24  ;;  %v8624_v31 = vld [vmem:[%s10445_s15 + $0x8b0] sm:$0x30]  ;;  %v8511_v5 = vor.u32 %v9116_v56, %v8510_v15  ;;  %v8483_v24 = vor.u32 %v9104_v16, %v8480_v30  ;;  %v9135_v15 = vld [vmem:[%s10445_s15 + $0x874] sm:$0xf0]  ;;  %v8590_v6 = vld [vmem:[%s10445_s15 + $0x850] sm:$0xf] }
 0xac1   : > { %4839 = vmatpush.bf16.msrb.mxu3 %v8575_v12  ;;  %4852 = vmatpush.bf16.msrb.mxu1 %v8579_v58  ;;  %v8488_v12 = vld [vmem:[%s10445_s15 + $0x7a8] sm:$0xf0]  ;;  %v8478_v58 = vld [vmem:[%s10445_s15 + $0x780] sm:$0xf]  ;;  %v4824_v56 = vand.u32 %v8623_v40, %v10447_v2  ;;  %v8592_v17 = vld [vmem:[%s10445_s15 + $0x870] sm:$0xf0]  ;;  %v8603_v32 = vor.u32 %v9131_v42, %v8600_v61 }
 0xac2   : > { %v8491_v43 = vor.u32 %v9105_v46, %v8488_v12  ;;  %v8479_v14 = vor.u32 %v9108_v52, %v8478_v58  ;;  %v12315_v46 = vld [vmem:[%s14528_s1] sm:$0xf]  ;;  %v9126_v12 = vld [vmem:[%s10445_s15 + $0x82c] sm:$0xf0]  ;;  %v9122_v58 = vld [vmem:[%s10445_s15 + $0x814] sm:$0xf] }
 0xac3   : > { %v8560_v52 = vld [vmem:[%s10445_s15 + $0x830] sm:$0xf0] }
 0xac4   : > { %4866 = vmatpush.bf16.msrb.mxu2 %v8551_v49  ;;  %4879 = vmatpush.bf16.msrb.mxu0 %v8555_v36  ;;  %v8627_v49 = vor.u32 %v9138_v9, %v8624_v31  ;;  %v8487_v36 = vor.u32 %v9109_v57, %v8486_v1  ;;  %v9134_v1 = vld [vmem:[%s10445_s15 + $0x86c] sm:$0xf0]  ;;  %v9130_v57 = vld [vmem:[%s10445_s15 + $0x854] sm:$0xf]  ;;  %v9123_v31 = vld [vmem:[%s10445_s15 + $0x81c] sm:$0xf] }
 0xac5   : > { %4840 = vmatpush.bf16.msrb.mxu3 %v8543_v11  ;;  %4853 = vmatpush.bf16.msrb.mxu1 %v8547_v22  ;;  %v4830_v11 = vand.u32 %v8631_v38, %v10447_v2  ;;  %v8598_v22 = vld [vmem:[%s10445_s15 + $0x858] sm:$0xf]  ;;  %v8591_v63 = vor.u32 %v9134_v1, %v8590_v6  ;;  %v8595_v9 = vor.u32 %v9130_v57, %v8592_v17  ;;  %v9107_v6 = vld [vmem:[%s10445_s15 + $0x79c] sm:$0xf]  ;;  %v8494_v57 = vld [vmem:[%s10445_s15 + $0x790] sm:$0xf] }
 0xac6   : > { %4504 = vmatmul.f32.gmra.mxu0 %v12284_v48  ;;  %8435 = vmatmul.msk.f32.gmra.mxu2 %vm988_vm1, %v12030_v10  ;;  %v4827_v13 = vand.u32 %v8627_v49, %v10447_v2  ;;  %v8599_v21 = vor.u32 %v9135_v15, %v8598_v22  ;;  %v8534_v38 = vld [vmem:[%s10445_s15 + $0x7d8] sm:$0xf]  ;;  %v8563_v49 = vor.u32 %v9122_v58, %v8560_v52  ;;  %v8504_v1 = vld [vmem:[%s10445_s15 + $0x7b8] sm:$0xf0]  ;;  %v9110_v17 = vld [vmem:[%s10445_s15 + $0x7ac] sm:$0xf0] }
 0xac7   : > { %4458 = vmatmul.f32.gmra.mxu1 %v12284_v48  ;;  %8433 = vmatmul.msk.f32.gmra.mxu3 %vm988_vm1, %v12030_v10  ;;  %v4833_v10 = vand.u32 %v8635_v25, %v10447_v2  ;;  %v9119_v25 = vld [vmem:[%s10445_s15 + $0x7f4] sm:$0xf0] }
 0xac8   : > { %4867 = vmatpush.bf16.msrb.mxu2 %v8519_v3  ;;  %4880 = vmatpush.bf16.msrb.mxu0 %v8523_v27  ;;  %v8566_v3 = vld [vmem:[%s10445_s15 + $0x818] sm:$0xf]  ;;  %v8535_v22 = vor.u32 %v9119_v25, %v8534_v38 }
 0xac9   : > { %4841 = vmatpush.bf16.msrb.mxu3 %v8511_v5  ;;  %4854 = vmatpush.bf16.msrb.mxu1 %v8515_v62  ;;  %v9127_v27 = vld [vmem:[%s10445_s15 + $0x834] sm:$0xf0]  ;;  %v8568_v5 = vld [vmem:[%s10445_s15 + $0x838] sm:$0xf0]  ;;  %v8558_v62 = vld [vmem:[%s10445_s15 + $0x810] sm:$0xf] }
 0xaca   : > { %v8567_v16 = vor.u32 %v9127_v27, %v8566_v3  ;;  %v8571_v30 = vor.u32 %v9123_v31, %v8568_v5  ;;  %v8559_v40 = vor.u32 %v9126_v12, %v8558_v62  ;;  %v8507_v27 = vor.u32 %v9107_v6, %v8504_v1 }
 0xacc   : > { %4868 = vmatpush.bf16.msrb.mxu2 %v8487_v36  ;;  %4881 = vmatpush.bf16.msrb.mxu0 %v8491_v43  ;;  %v9115_v36 = vld [vmem:[%s10445_s15 + $0x7dc] sm:$0xf] }
 0xacd   : > { %4842 = vmatpush.bf16.msrb.mxu3 %v8479_v14  ;;  %4855 = vmatpush.bf16.msrb.mxu1 %v8483_v24  ;;  %v8536_v43 = vld [vmem:[%s10445_s15 + $0x7f8] sm:$0xf0]  ;;  %v8526_v14 = vld [vmem:[%s10445_s15 + $0x7d0] sm:$0xf] }
 0xace   : > { %v9118_v24 = vld [vmem:[%s10445_s15 + $0x7ec] sm:$0xf0]  ;;  %v8539_v15 = vor.u32 %v9115_v36, %v8536_v43 }
 0xacf   : > { %8638 = vmatmul.msk.bf16.vlgmr.msrb.gmra.mxu2 %vm636_vm2, %v12315_v46  ;;  %8639 = vmatmul.msk.bf16.vlgmr.msrb.gmra.mxu0 %vm636_vm2, %v12315_v46  ;;  %v8527_v42 = vor.u32 %v9118_v24, %v8526_v14 }
 0xad0   : > { %4916 = vmatpush.bf16.msra.mxu2 %v4830_v11  ;;  %4929 = vmatpush.bf16.msra.mxu0 %v4833_v10  ;;  %v9114_v11 = vld [vmem:[%s10445_s15 + $0x7d4] sm:$0xf] }
 0xad1   : > { %4890 = vmatpush.bf16.msra.mxu3 %v4824_v56  ;;  %4903 = vmatpush.bf16.msra.mxu1 %v4827_v13  ;;  %v8528_v10 = vld [vmem:[%s10445_s15 + $0x7f0] sm:$0xf0]  ;;  %v8502_v56 = vld [vmem:[%s10445_s15 + $0x798] sm:$0xf] }
 0xad2   : > { %8636 = vmatmul.msk.bf16.vlgmr.msrb.gmra.mxu3 %vm636_vm2, %v12315_v46  ;;  %8637 = vmatmul.msk.bf16.vlgmr.msrb.gmra.mxu1 %vm636_vm2, %v12315_v46  ;;  %v9111_v13 = vld [vmem:[%s10445_s15 + $0x7b4] sm:$0xf0]  ;;  %v8531_v61 = vor.u32 %v9114_v11, %v8528_v10 }
 0xad3   : > { %v8503_v3 = vor.u32 %v9111_v13, %v8502_v56 }
 0xad4   : > { %4917 = vmatpush.bf16.msra.mxu2 %v8599_v21  ;;  %4930 = vmatpush.bf16.msra.mxu0 %v8603_v32  ;;  %v9106_v21 = vld [vmem:[%s10445_s15 + $0x794] sm:$0xf] }
 0xad5   : > { %4891 = vmatpush.bf16.msra.mxu3 %v8591_v63  ;;  %4904 = vmatpush.bf16.msra.mxu1 %v8595_v9  ;;  %v8496_v32 = vld [vmem:[%s10445_s15 + $0x7b0] sm:$0xf0]  ;;  %v8495_v63 = vor.u32 %v9110_v17, %v8494_v57 }
 0xad6   : > { %v8499_v9 = vor.u32 %v9106_v21, %v8496_v32 }
 0xad8   : > { %4918 = vmatpush.bf16.msra.mxu2 %v8567_v16  ;;  %4931 = vmatpush.bf16.msra.mxu0 %v8571_v30 }
 0xad9   : > { %4892 = vmatpush.bf16.msra.mxu3 %v8559_v40  ;;  %4905 = vmatpush.bf16.msra.mxu1 %v8563_v49 }
 0xadc   : > { %4919 = vmatpush.bf16.msra.mxu2 %v8535_v22  ;;  %4932 = vmatpush.bf16.msra.mxu0 %v8539_v15 }
 0xadd   : > { %4893 = vmatpush.bf16.msra.mxu3 %v8527_v42  ;;  %4906 = vmatpush.bf16.msra.mxu1 %v8531_v61 }
 0xae0   : > { %4920 = vmatpush.bf16.msra.mxu2 %v8503_v3  ;;  %4933 = vmatpush.bf16.msra.mxu0 %v8507_v27 }
 0xae1   : > { %4894 = vmatpush.bf16.msra.mxu3 %v8495_v63  ;;  %4907 = vmatpush.bf16.msra.mxu1 %v8499_v9 }
 0xae3   : > { %8642 = vmatmul.msk.bf16.vlgmr.msra.gmra.mxu2 %vm636_vm2, %v12315_v46  ;;  %8643 = vmatmul.msk.bf16.vlgmr.msra.gmra.mxu0 %vm636_vm2, %v12315_v46 }
 0xae4   : > { %8640 = vmatmul.msk.bf16.vlgmr.msra.gmra.mxu3 %vm636_vm2, %v12315_v46  ;;  %8641 = vmatmul.msk.bf16.vlgmr.msra.gmra.mxu1 %vm636_vm2, %v12315_v46 }
 0xb3b   : > { %v12352_v31 = vpop.f32.mrf.mxu0 }
 0xb3c   : > { %v12354_v5 = vpop.f32.mrf.mxu1 }
 0xb41   : > { %v12356_v62 = vpop.f32.mrf.mxu2 }
 0xb42   : > { %v12358_v12 = vpop.f32.mrf.mxu3 }
 0xb43   : > { %v12360_v58 = vpop.f32.mrf.mxu0 }
 0xb44   : > { %14696 = vst [vmem:[#allocation32_spill] sm:$0xff] %v12360_v58  ;;  %v12362_v52 = vpop.f32.mrf.mxu1 }
 0xb45   : > { %14697 = vst [vmem:[#allocation33_spill] sm:$0xff] %v12362_v52 }
 0xb49   : > { %v12364_v16 = vpop.f32.mrf.mxu2 }
 0xb4a   : > { %14698 = vst [vmem:[#allocation34_spill] sm:$0xff] %v12364_v16  ;;  %v12366_v30 = vpop.f32.mrf.mxu3 }
 0xb4b   : > { %14699 = vst [vmem:[#allocation35_spill] sm:$0xff] %v12366_v30 }
 0xb4c   : > { %v4883_v38 = vpop.f32.mrf.mxu0 }
 0xb4d   : > { %v4884_v56 = vadd.f32 %v4883_v38, %v10587_v50 }
 0xb4f   : > { %v4857_v25 = vpop.f32.mrf.mxu1  ;;  %v4942_v17 = vmax.f32 %v4884_v56, 0.0 }
 0xb50   : > { %v4858_v13 = vadd.f32 %v4857_v25, %v10587_v50 }
 0xb52   : > { %v4870_v40 = vpop.f32.mrf.mxu2  ;;  %v4940_v3 = vmax.f32 %v4858_v13, 0.0 }
 0xb53   : > { %v4871_v42 = vadd.f32 %v4870_v40, %v10587_v50 }
 0xb54   : > { %v4885_v36 = vpop.f32.mrf.mxu0  ;;  %v4948_v40 = vmax.f32 %v4940_v3, %v4942_v17 }
 0xb55   : > { %v4844_v49 = vpop.f32.mrf.mxu3  ;;  %v4941_v27 = vmax.f32 %v4871_v42, 0.0 }
 0xb56   : > { %v4845_v61 = vadd.f32 %v4844_v49, %v10587_v50 }
 0xb57   : > { %v4859_v43 = vpop.f32.mrf.mxu1 }
 0xb58   : > { %v4939_v63 = vmax.f32 %v4845_v61, 0.0 }
 0xb5a   : > { %v4872_v14 = vpop.f32.mrf.mxu2 }
 0xb5d   : > { %v4846_v24 = vpop.f32.mrf.mxu3 }
 0xb5e   : > { %v4947_v24 = vmax.f32 %v4939_v63, %v4941_v27 }
 0xb60   : > { %v4935_v11 = vpop.f32.mrf.mxu0 }
 0xb61   : > { %v4909_v10 = vpop.f32.mrf.mxu1  ;;  %v4936_v22 = vadd.f32 %v4935_v11, %v10587_v50 }
 0xb62   : > { %v4910_v15 = vadd.f32 %v4909_v10, %v10587_v50 }
 0xb63   : > { %v4946_v6 = vmax.f32 %v4936_v22, 0.0 }
 0xb64   : > { %v4944_v1 = vmax.f32 %v4910_v15, 0.0 }
 0xb66   : > { %v4922_v57 = vpop.f32.mrf.mxu2  ;;  %v4950_v25 = vmax.f32 %v4944_v1, %v4946_v6 }
 0xb67   : > { %v4923_v21 = vadd.f32 %v4922_v57, %v10587_v50  ;;  %v4896_v32 = vpop.f32.mrf.mxu3 }
 0xb68   : > { %v4897_v9 = vadd.f32 %v4896_v32, %v10587_v50  ;;  %v4937_v36 = vpop.f32.mrf.mxu0  ;;  %v12376_v11 = vmax.f32 %v4948_v40, %v4950_v25 }
 0xb69   : > { %v4945_v38 = vmax.f32 %v4923_v21, 0.0  ;;  %v4911_v43 = vpop.f32.mrf.mxu1 }
 0xb6a   : > { %v4943_v14 = vmax.f32 %v4897_v9, 0.0 }
 0xb6c   : > { %v4949_v49 = vmax.f32 %v4943_v14, %v4945_v38 }
 0xb6e   : > { %v12378_v10 = vmax.f32 %v4947_v24, %v4949_v49  ;;  %v4924_v22 = vpop.f32.mrf.mxu2 }
 0xb6f   : > { %v4898_v15 = vpop.f32.mrf.mxu3 }
 0xb70   : > { %v12382_v56 = vpack.i.bf16 %v12376_v11, %v12378_v10 }
 0xb72   : > { %9990 = vrot.lane.b32.xlu0 %v12382_v56, %s14633_s23  ;;  %9985 = vrot.lane.b32.xlu2 %v12382_v56, %s14634_s28 }
 0xb73   : > { %9980 = vrot.lane.b32.xlu1 %v12382_v56, %s14614_s12 }
 0xb7a   : > { %10005 = vrot.lane.b32.xlu0 %v12382_v56, %s14615_s16  ;;  %10000 = vrot.lane.b32.xlu2 %v12382_v56, %s14616_s21 }
 0xb7b   : > { %9995 = vrot.lane.b32.xlu1 %v12382_v56, %s14617_s25 }
 0xb82   : > { %10020 = vrot.lane.b32.xlu0 %v12382_v56, %s14621_s0  ;;  %10015 = vrot.lane.b32.xlu2 %v12382_v56, %s14618_s24 }
 0xb83   : > { %10010 = vrot.lane.b32.xlu1 %v12382_v56, %s14619_s14 }
 0xb8a   : > { %10035 = vrot.lane.b32.xlu0 %v12382_v56, %s14622_s2  ;;  %10030 = vrot.lane.b32.xlu2 %v12382_v56, %s14620_s30 }
 0xb8b   : > { %10025 = vrot.lane.b32.xlu1 %v12382_v56, %s14635_s17 }
 0xb92   : > { %10050 = vrot.lane.b32.xlu0 %v12382_v56, %s14624_s13  ;;  %10045 = vrot.lane.b32.xlu2 %v12382_v56, %s14625_s26 }
 0xb93   : > { %10040 = vrot.lane.b32.xlu1 %v12382_v56, %s14636_s20 }
 0xb9a   : > { %10055 = vrot.lane.b32.xlu2 %v12382_v56, %s14626_s19 }
 0xbcc   : > { %v9986_v13 = vpop.permute.xlu2 %9985 }
 0xbcd   : > { %v12416_v42 = vunpack.i.h.bf16 %v9986_v13  ;;  %v9987_v61 = vunpack.i.l.bf16 %v9986_v13 }
 0xbcf   : > { %v12420_v6 = vsel %vm840_vm5, %v9987_v61, %v12416_v42 }
 0xbd0   : > { %v10064_v1 = vpack.i.bf16 %v12416_v42, %v12420_v6 }
 0xbd2   : > { %10065 = vrot.lane.b32.xlu0 %v10064_v1, %s14623_s22 }
 0xbd4   : > { %v10001_v57 = vpop.permute.xlu2 %10000 }
 0xbd5   : > { %v10003_v17 = vunpack.i.h.bf16 %v10001_v57  ;;  %v10002_v21 = vunpack.i.l.bf16 %v10001_v57 }
 0xbd7   : > { %v5064_v32 = vsel %vm912_vm7, %v10002_v21, %v10003_v17 }
 0xbd8   : > { %v10079_v3 = vpack.i.bf16 %v10003_v17, %v5064_v32 }
 0xbda   : > { %10080 = vrot.lane.b32.xlu0 %v10079_v3, %s14623_s22 }
 0xbdc   : > { %v10016_v27 = vpop.permute.xlu2 %10015 }
 0xbdd   : > { %v12427_v63 = vunpack.i.h.bf16 %v10016_v27  ;;  %v10017_v9 = vunpack.i.l.bf16 %v10016_v27 }
 0xbdf   : > { %v12431_v36 = vsel %vm792_vm9, %v10017_v9, %v12427_v63 }
 0xbe0   : > { %v10094_v38 = vpack.i.bf16 %v12427_v63, %v12431_v36 }
 0xbe2   : > { %10095 = vrot.lane.b32.xlu0 %v10094_v38, %s14623_s22 }
 0xbe4   : > { %v9991_v43 = vpop.permute.xlu0 %9990 }
 0xbe5   : > { %v9981_v25 = vpop.permute.xlu1 %9980  ;;  %v12444_v22 = vunpack.i.h.bf16 %v9991_v43  ;;  %v9992_v15 = vunpack.i.l.bf16 %v9991_v43 }
 0xbe6   : > { %v12436_v14 = vunpack.i.h.bf16 %v9981_v25  ;;  %v9982_v40 = vunpack.i.l.bf16 %v9981_v25 }
 0xbe7   : > { %v12449_v1 = vsel %vm832_vm8, %v9992_v15, %v12444_v22 }
 0xbe8   : > { %v12440_v24 = vsel %vm848_vm6, %v9982_v40, %v12436_v14  ;;  %v10069_v32 = vpack.i.bf16 %v12444_v22, %v12449_v1 }
 0xbe9   : > { %v10059_v49 = vpack.i.bf16 %v12436_v14, %v12440_v24 }
 0xbeb   : > { %10060 = vrot.lane.b32.xlu1 %v10059_v49, %s14623_s22 }
 0xbec   : > { %v10006_v13 = vpop.permute.xlu0 %10005 }
 0xbed   : > { %v9996_v61 = vpop.permute.xlu1 %9995  ;;  %v12461_v27 = vunpack.i.h.bf16 %v10006_v13  ;;  %v10007_v9 = vunpack.i.l.bf16 %v10006_v13 }
 0xbee   : > { %v12451_v57 = vunpack.i.h.bf16 %v9996_v61  ;;  %v9997_v17 = vunpack.i.l.bf16 %v9996_v61 }
 0xbef   : > { %v12467_v49 = vsel %vm808_vm10, %v10007_v9, %v12461_v27 }
 0xbf0   : > { %v12455_v21 = vsel %vm824_vm3, %v9997_v17, %v12451_v57 }
 0xbf1   : > { %v10074_v3 = vpack.i.bf16 %v12451_v57, %v12455_v21 }
 0xbf3   : > { %10075 = vrot.lane.b32.xlu2 %v10074_v3, %s14623_s22  ;;  %10070 = vrot.lane.b32.xlu1 %v10069_v32, %s14623_s22  ;;  %v10031_v32 = vpop.permute.xlu2 %10030  ;;  %v10084_v3 = vpack.i.bf16 %v12461_v27, %v12467_v49 }
 0xbf4   : > { %v10021_v38 = vpop.permute.xlu0 %10020  ;;  %v10033_v16 = vunpack.i.h.bf16 %v10031_v32 }
 0xbf5   : > { %v10023_v43 = vunpack.i.h.bf16 %v10021_v38  ;;  %v10022_v25 = vunpack.i.l.bf16 %v10021_v38  ;;  %v10011_v40 = vpop.permute.xlu1 %10010 }
 0xbf6   : > { %v12469_v15 = vunpack.i.h.bf16 %v10011_v40  ;;  %v10012_v61 = vunpack.i.l.bf16 %v10011_v40 }
 0xbf7   : > { %5174 = vmatpush.msrb.mxu2 %v10023_v43  ;;  %v5057_v17 = vsel %vm904_vm4, %v10022_v25, %v10023_v43  ;;  %v10032_v43 = vunpack.i.l.bf16 %v10031_v32 }
 0xbf8   : > { %v12474_v13 = vsel %vm800_vm11, %v10012_v61, %v12469_v15  ;;  %5128 = vmatpush.msrb.mxu3 %v5057_v17 }
 0xbf9   : > { %v10089_v38 = vpack.i.bf16 %v12469_v15, %v12474_v13  ;;  %v5043_v52 = vsel %vm14701_vm12, %v10032_v43, %v10033_v16  ;;  %vm14704_vm12 = vcmask 900096   ;;  %v8828_v43 = vld [vmem:[%s10445_s15 + $0x9e8] sm:$0x30] }
 0xbfb   : > { %10090 = vrot.lane.b32.xlu2 %v10089_v38, %s14623_s22  ;;  %10085 = vrot.lane.b32.xlu1 %v10084_v3, %s14623_s22  ;;  %v10046_v29 = vpop.permute.xlu2 %10045 }
 0xbfc   : > { %v10036_v9 = vpop.permute.xlu0 %10035 }
 0xbfd   : > { %v10026_v40 = vpop.permute.xlu1 %10025  ;;  %v10038_v61 = vunpack.i.h.bf16 %v10036_v9  ;;  %v10037_v30 = vunpack.i.l.bf16 %v10036_v9  ;;  %v10047_v9 = vunpack.i.l.bf16 %v10046_v29 }
 0xbfe   : > { %v10028_v25 = vunpack.i.h.bf16 %v10026_v40  ;;  %v10027_v58 = vunpack.i.l.bf16 %v10026_v40  ;;  %v10048_v40 = vunpack.i.h.bf16 %v10046_v29 }
 0xbff   : > { %v5036_v3 = vsel %vm880_vm14, %v10037_v30, %v10038_v61 }
 0xc00   : > { %5175 = vmatpush.msrb.mxu2 %v10028_v25  ;;  %v5050_v17 = vsel %vm14700_vm13, %v10027_v58, %v10028_v25  ;;  %vm14703_vm13 = vcmask 818176  }
 0xc01   : > { %5129 = vmatpush.msrb.mxu3 %v5050_v17  ;;  %v8756_v17 = vld [vmem:[%s10445_s15 + $0x960] sm:$0xf0] }
 0xc02   : > { %5176 = vmatpush.msrb.mxu2 %v10033_v16 }
 0xc03   : > { %5130 = vmatpush.msrb.mxu3 %v5043_v52  ;;  %10100 = vrot.lane.b32.xlu1 %v12382_v56, %s14623_s22  ;;  %v5022_v52 = vsel %vm14703_vm13, %v10047_v9, %v10048_v40  ;;  %v10056_v29 = vpop.permute.xlu2 %10055  ;;  %v9177_v56 = vld [vmem:[%s10445_s15 + $0x9cc] sm:$0xf]  ;;  %v9152_v9 = vld [vmem:[%s10445_s15 + $0x904] sm:$0xf] }
 0xc04   : > { %5177 = vmatpush.msrb.mxu2 %v10038_v61  ;;  %v10051_v32 = vpop.permute.xlu0 %10050  ;;  %v8796_v61 = vld [vmem:[%s10445_s15 + $0x9a8] sm:$0xf0] }
 0xc05   : > { %v10041_v38 = vpop.permute.xlu1 %10040  ;;  %5131 = vmatpush.msrb.mxu3 %v5036_v3  ;;  %v10053_v58 = vunpack.i.h.bf16 %v10051_v32  ;;  %v10052_v25 = vunpack.i.l.bf16 %v10051_v32 }
 0xc06   : > { %v10043_v44 = vunpack.i.h.bf16 %v10041_v38  ;;  %v10042_v4 = vunpack.i.l.bf16 %v10041_v38  ;;  %v9153_v38 = vld [vmem:[%s10445_s15 + $0x90c] sm:$0xf] }
 0xc07   : > { %v5015_v30 = vsel %vm14704_vm12, %v10052_v25, %v10053_v58  ;;  %v9179_v25 = vld [vmem:[%s10445_s15 + $0x9dc] sm:$0xf] }
 0xc08   : > { %5178 = vmatpush.msrb.mxu2 %v10043_v44  ;;  %v5029_v16 = vsel %vm14702_vm0, %v10042_v4, %v10043_v44  ;;  %v10058_v44 = vunpack.i.h.bf16 %v10056_v29  ;;  %v10057_v4 = vunpack.i.l.bf16 %v10056_v29  ;;  %vm14705_vm0 = vcmask 695296  }
 0xc09   : > { %5132 = vmatpush.msrb.mxu3 %v5029_v16  ;;  %v8844_v16 = vld [vmem:[%s10445_s15 + $0x9f8] sm:$0x30]  ;;  %vm14706_vm13 = vmmov %vm14705_vm0 }
 0xc0a   : > { %5179 = vmatpush.msrb.mxu2 %v10048_v40  ;;  %v8732_v40 = vld [vmem:[%s10445_s15 + $0x928] sm:$0xf0]  ;;  %vm14707_vm12 = vmmov %vm14705_vm0 }
 0xc0b   : > { %5133 = vmatpush.msrb.mxu3 %v5022_v52  ;;  %v9178_v52 = vld [vmem:[%s10445_s15 + $0x9d4] sm:$0xf]  ;;  %v8735_v29 = vor.u32 %v9153_v38, %v8732_v40  ;;  %v8748_v38 = vld [vmem:[%s10445_s15 + $0x938] sm:$0xf0] }
 0xc0c   : > { %5180 = vmatpush.msrb.mxu2 %v10053_v58  ;;  %v8724_v58 = vld [vmem:[%s10445_s15 + $0x920] sm:$0xf0]  ;;  %v9154_v40 = vld [vmem:[%s10445_s15 + $0x914] sm:$0xf] }
 0xc0d   : > { %5134 = vmatpush.msrb.mxu3 %v5015_v30  ;;  %v8836_v30 = vld [vmem:[%s10445_s15 + $0x9f0] sm:$0x30] }
 0xc0e   : > { %5181 = vmatpush.msrb.mxu2 %v12436_v14  ;;  %v9176_v14 = vld [vmem:[%s10445_s15 + $0x9c4] sm:$0xf] }
 0xc0f   : > { %5135 = vmatpush.msrb.mxu3 %v12440_v24  ;;  %v8820_v24 = vld [vmem:[%s10445_s15 + $0x9e0] sm:$0x30] }
 0xc10   : > { %5182 = vmatpush.msrb.mxu2 %v12416_v42  ;;  %v4980_v42 = vsel %vm816_vm15, %v10057_v4, %v10058_v44  ;;  %v9145_v4 = vld [vmem:[%s10445_s15 + $0x8cc] sm:$0xf] }
 0xc11   : > { %5136 = vmatpush.msrb.mxu3 %v12420_v6  ;;  %v8831_v6 = vor.u32 %v9177_v56, %v8828_v43  ;;  %v8700_v56 = vld [vmem:[%s10445_s15 + $0x8e8] sm:$0xf0]  ;;  %v8847_v43 = vor.u32 %v9179_v25, %v8844_v16  ;;  %v9147_v16 = vld [vmem:[%s10445_s15 + $0x8dc] sm:$0xf] }
 0xc12   : > { %5183 = vmatpush.msrb.mxu2 %v12444_v22  ;;  %v8823_v22 = vor.u32 %v9176_v14, %v8820_v24  ;;  %v9144_v14 = vld [vmem:[%s10445_s15 + $0x8c4] sm:$0xf] }
 0xc13   : > { %5137 = vmatpush.msrb.mxu3 %v12449_v1  ;;  %v5510_v1 = vand.u32 %v8831_v6, %v10447_v2  ;;  %v8692_v24 = vld [vmem:[%s10445_s15 + $0x8e0] sm:$0xf0]  ;;  %v8703_v6 = vor.u32 %v9145_v4, %v8700_v56 }
 0xc14   : > { %5184 = vmatpush.msrb.mxu2 %v12451_v57  ;;  %v5504_v57 = vand.u32 %v8823_v22, %v10447_v2  ;;  %v8695_v22 = vor.u32 %v9144_v14, %v8692_v24 }
 0xc15   : > { %5138 = vmatpush.msrb.mxu3 %v12455_v21  ;;  %v9169_v21 = vld [vmem:[%s10445_s15 + $0x98c] sm:$0xf] }
 0xc16   : > { %5185 = vmatpush.msrb.mxu2 %v10058_v44  ;;  %v8727_v44 = vor.u32 %v9152_v9, %v8724_v58  ;;  %v8740_v9 = vld [vmem:[%s10445_s15 + $0x930] sm:$0xf0] }
 0xc17   : > { %5139 = vmatpush.msrb.mxu3 %v4980_v42  ;;  %v8839_v42 = vor.u32 %v9178_v52, %v8836_v30  ;;  %v8743_v25 = vor.u32 %v9154_v40, %v8740_v9  ;;  %v8716_v52 = vld [vmem:[%s10445_s15 + $0x8f8] sm:$0xf0]  ;;  %v9146_v30 = vld [vmem:[%s10445_s15 + $0x8d4] sm:$0xf] }
 0xc18   : > { %5186 = vmatpush.msrb.mxu2 %v12461_v27  ;;  %v9168_v27 = vld [vmem:[%s10445_s15 + $0x984] sm:$0xf] }
 0xc19   : > { %5140 = vmatpush.msrb.mxu3 %v12467_v49  ;;  %v8788_v49 = vld [vmem:[%s10445_s15 + $0x9a0] sm:$0xf0] }
 0xc1a   : > { %5187 = vmatpush.msrb.mxu2 %v12469_v15  ;;  %v8799_v15 = vor.u32 %v9169_v21, %v8796_v61  ;;  %v9171_v21 = vld [vmem:[%s10445_s15 + $0x99c] sm:$0xf] }
 0xc1b   : > { %5141 = vmatpush.msrb.mxu3 %v12474_v13  ;;  %v9160_v13 = vld [vmem:[%s10445_s15 + $0x944] sm:$0xf]  ;;  %v8812_v61 = vld [vmem:[%s10445_s15 + $0x9b8] sm:$0xf0] }
 0xc1c   : > { %5188 = vmatpush.msrb.mxu2 %v12427_v63  ;;  %v12520_v63 = vld [vmem:[%s14530_s3] sm:$0xff]  ;;  %v8759_v32 = vor.u32 %v9160_v13, %v8756_v17  ;;  %v8772_v13 = vld [vmem:[%s10445_s15 + $0x970] sm:$0xf0] }
 0xc1d   : > { %5142 = vmatpush.msrb.mxu3 %v12431_v36  ;;  %v8791_v36 = vor.u32 %v9168_v27, %v8788_v49  ;;  %v9170_v27 = vld [vmem:[%s10445_s15 + $0x994] sm:$0xf] }
 0xc1e   : > { %5189 = vmatpush.msrb.mxu2 %v12376_v11  ;;  %v9161_v11 = vld [vmem:[%s10445_s15 + $0x94c] sm:$0xf]  ;;  %v8804_v49 = vld [vmem:[%s10445_s15 + $0x9b0] sm:$0xf0] }
 0xc1f   : > { %5143 = vmatpush.msrb.mxu3 %v12378_v10  ;;  %5190 = vmatmul.f32.vlgmr.msrb.gmra.mxu2 %v12520_v63  ;;  %v8764_v10 = vld [vmem:[%s10445_s15 + $0x968] sm:$0xf0] }
 0xc20   : > { %5566 = vmatpush.bf16.msra.mxu2 %v5510_v1  ;;  %5144 = vmatmul.f32.vlgmr.msrb.gmra.mxu3 %v12520_v63  ;;  %v8767_v3 = vor.u32 %v9161_v11, %v8764_v10  ;;  %v5522_v1 = vand.u32 %v8847_v43, %v10447_v2  ;;  %v8780_v11 = vld [vmem:[%s10445_s15 + $0x978] sm:$0xf0]  ;;  %v9162_v10 = vld [vmem:[%s10445_s15 + $0x954] sm:$0xf] }
 0xc21   : > { %5540 = vmatpush.bf16.msra.mxu3 %v5504_v57  ;;  %v5516_v57 = vand.u32 %v8839_v42, %v10447_v2 }
 0xc24   : > { %5567 = vmatpush.bf16.msra.mxu2 %v8799_v15  ;;  %v8807_v15 = vor.u32 %v9170_v27, %v8804_v49 }
 0xc25   : > { %5541 = vmatpush.bf16.msra.mxu3 %v8791_v36  ;;  %v9163_v36 = vld [vmem:[%s10445_s15 + $0x95c] sm:$0xf] }
 0xc26   : > { %v8783_v17 = vor.u32 %v9163_v36, %v8780_v11 }
 0xc27   : > { %5193 = vmatmul.f32.gmra.mxu2 %v12284_v48 }
 0xc28   : > { %5568 = vmatpush.bf16.msra.mxu2 %v8767_v3  ;;  %5147 = vmatmul.f32.gmra.mxu3 %v12284_v48  ;;  %v8815_v48 = vor.u32 %v9171_v21, %v8812_v61  ;;  %v8775_v3 = vor.u32 %v9162_v10, %v8772_v13 }
 0xc29   : > { %5542 = vmatpush.bf16.msra.mxu3 %v8759_v32  ;;  %v9155_v32 = vld [vmem:[%s10445_s15 + $0x91c] sm:$0xf] }
 0xc2a   : > { %v8751_v58 = vor.u32 %v9155_v32, %v8748_v38 }
 0xc2c   : > { %5569 = vmatpush.bf16.msra.mxu2 %v8735_v29  ;;  %v8708_v29 = vld [vmem:[%s10445_s15 + $0x8f0] sm:$0xf0] }
 0xc2d   : > { %5543 = vmatpush.bf16.msra.mxu3 %v8727_v44  ;;  %v8719_v44 = vor.u32 %v9147_v16, %v8716_v52  ;;  %v8711_v4 = vor.u32 %v9146_v30, %v8708_v29  ;;  %v8826_v16 = vld [vmem:[%s10445_s15 + $0x9c8] sm:$0xf]  ;;  %v8818_v30 = vld [vmem:[%s10445_s15 + $0x9c0] sm:$0xf] }
 0xc2e   : > { %v9181_v52 = vld [vmem:[%s10445_s15 + $0x9e4] sm:$0x30]  ;;  %v9180_v29 = vld [vmem:[%s10445_s15 + $0x9dc] sm:$0x30] }
 0xc30   : > { %5570 = vmatpush.bf16.msra.mxu2 %v8703_v6 }
 0xc31   : > { %5544 = vmatpush.bf16.msra.mxu3 %v8695_v22 }
 0xc33   : > { %8851 = vmatmul.msk.bf16.vlgmr.msra.gmra.mxu2 %vm636_vm2, %v12315_v46 }
 0xc34   : > { %5618 = vmatpush.bf16.msrb.mxu2 %v5522_v1  ;;  %8849 = vmatmul.msk.bf16.vlgmr.msra.gmra.mxu3 %vm636_vm2, %v12315_v46 }
 0xc35   : > { %5592 = vmatpush.bf16.msrb.mxu3 %v5516_v57 }
 0xc38   : > { %5619 = vmatpush.bf16.msrb.mxu2 %v8815_v48 }
 0xc39   : > { %5593 = vmatpush.bf16.msrb.mxu3 %v8807_v15 }
 0xc3c   : > { %5620 = vmatpush.bf16.msrb.mxu2 %v8783_v17 }
 0xc3d   : > { %5594 = vmatpush.bf16.msrb.mxu3 %v8775_v3 }
 0xc40   : > { %5621 = vmatpush.bf16.msrb.mxu2 %v8751_v58 }
 0xc41   : > { %5595 = vmatpush.bf16.msrb.mxu3 %v8743_v25 }
 0xc44   : > { %5622 = vmatpush.bf16.msrb.mxu2 %v8719_v44  ;;  %v10066_v56 = vpop.permute.xlu0 %10065 }
 0xc45   : > { %5596 = vmatpush.bf16.msrb.mxu3 %v8711_v4  ;;  %v10068_v14 = vunpack.i.h.bf16 %v10066_v56  ;;  %v10067_v24 = vunpack.i.l.bf16 %v10066_v56 }
 0xc47   : > { %8855 = vmatmul.msk.bf16.vlgmr.msrb.gmra.mxu2 %vm636_vm2, %v12315_v46  ;;  %v5108_v57 = vsel %vm14706_vm13, %v10067_v24, %v10068_v14  ;;  %vm14708_vm13 = vmmov %vm14705_vm0  ;;  %v8819_v24 = vor.u32 %v9180_v29, %v8818_v30  ;;  %v9183_v30 = vld [vmem:[%s10445_s15 + $0x9f4] sm:$0x30]  ;;  %v8834_v29 = vld [vmem:[%s10445_s15 + $0x9d0] sm:$0xf] }
 0xc48   : > { %8853 = vmatmul.msk.bf16.vlgmr.msrb.gmra.mxu3 %vm636_vm2, %v12315_v46 }
 0xc4c   : > { %v10081_v21 = vpop.permute.xlu0 %10080 }
 0xc4d   : > { %v10076_v1 = vpop.permute.xlu2 %10075  ;;  %v10083_v36 = vunpack.i.h.bf16 %v10081_v21  ;;  %v10082_v11 = vunpack.i.l.bf16 %v10081_v21  ;;  %v5501_v21 = vand.u32 %v8819_v24, %v10447_v2  ;;  %v9149_v24 = vld [vmem:[%s10445_s15 + $0x8e4] sm:$0xf0] }
 0xc4e   : > { %v10078_v27 = vunpack.i.h.bf16 %v10076_v1  ;;  %v10077_v49 = vunpack.i.l.bf16 %v10076_v1 }
 0xc4f   : > { %v5105_v3 = vsel %vm14708_vm13, %v10082_v11, %v10083_v36  ;;  %vm14710_vm13 = vmmov %vm14705_vm0  ;;  %v12590_v11 = vld [vmem:[%s14530_s3 + $0x8] sm:$0xff] }
 0xc50   : > { %v5106_v13 = vsel %vm14705_vm0, %v10077_v49, %v10078_v27  ;;  %v8786_v49 = vld [vmem:[%s10445_s15 + $0x980] sm:$0xf] }
 0xc54   : > { %v10096_v32 = vpop.permute.xlu0 %10095 }
 0xc55   : > { %v10091_v17 = vpop.permute.xlu2 %10090  ;;  %v10098_v44 = vunpack.i.h.bf16 %v10096_v32  ;;  %v10097_v4 = vunpack.i.l.bf16 %v10096_v32  ;;  %v9164_v32 = vld [vmem:[%s10445_s15 + $0x95c] sm:$0xf0] }
 0xc56   : > { %v10093_v40 = vunpack.i.h.bf16 %v10091_v17  ;;  %v10092_v9 = vunpack.i.l.bf16 %v10091_v17  ;;  %v9165_v17 = vld [vmem:[%s10445_s15 + $0x964] sm:$0xf0] }
 0xc5d   : > { %v10061_v43 = vpop.permute.xlu1 %10060 }
 0xc5e   : > { %v10063_v42 = vunpack.i.h.bf16 %v10061_v43  ;;  %v10062_v6 = vunpack.i.l.bf16 %v10061_v43  ;;  %v8827_v43 = vor.u32 %v9181_v52, %v8826_v16  ;;  %v9156_v16 = vld [vmem:[%s10445_s15 + $0x91c] sm:$0xf0]  ;;  %v8842_v52 = vld [vmem:[%s10445_s15 + $0x9d8] sm:$0xf] }
 0xc60   : > { %5204 = vmatpush.msrb.mxu0 %v10063_v42  ;;  %v5109_v22 = vsel %vm14705_vm0, %v10062_v6, %v10063_v42  ;;  %v5102_v42 = vsel %vm14710_vm13, %v10097_v4, %v10098_v44  ;;  %vm14726_vm13 = vmmov %vm14705_vm0 }
 0xc61   : > { %5158 = vmatpush.msrb.mxu1 %v5109_v22  ;;  %v5507_v22 = vand.u32 %v8827_v43, %v10447_v2 }
 0xc62   : > { %5205 = vmatpush.msrb.mxu0 %v10068_v14  ;;  %v5103_v14 = vsel %vm14705_vm0, %v10092_v9, %v10093_v40  ;;  %v8730_v9 = vld [vmem:[%s10445_s15 + $0x908] sm:$0xf] }
 0xc63   : > { %5159 = vmatpush.msrb.mxu1 %v5108_v57 }
 0xc65   : > { %v10071_v61 = vpop.permute.xlu1 %10070 }
 0xc66   : > { %v10073_v48 = vunpack.i.h.bf16 %v10071_v61  ;;  %v10072_v15 = vunpack.i.l.bf16 %v10071_v61  ;;  %v8794_v61 = vld [vmem:[%s10445_s15 + $0x988] sm:$0xf] }
 0xc68   : > { %5206 = vmatpush.msrb.mxu0 %v10073_v48  ;;  %v5107_v10 = vsel %vm14707_vm12, %v10072_v15, %v10073_v48  ;;  %vm14709_vm12 = vmmov %vm14705_vm0  ;;  %v9172_v48 = vld [vmem:[%s10445_s15 + $0x99c] sm:$0xf0] }
 0xc69   : > { %5160 = vmatpush.msrb.mxu1 %v5107_v10  ;;  %v8787_v10 = vor.u32 %v9172_v48, %v8786_v49  ;;  %v8810_v49 = vld [vmem:[%s10445_s15 + $0x998] sm:$0xf] }
 0xc6a   : > { %5207 = vmatpush.msrb.mxu0 %v10078_v27  ;;  %v9173_v27 = vld [vmem:[%s10445_s15 + $0x9a4] sm:$0xf0]  ;;  %v9175_v48 = vld [vmem:[%s10445_s15 + $0x9b4] sm:$0xf0] }
 0xc6b   : > { %5161 = vmatpush.msrb.mxu1 %v5106_v13  ;;  %v8762_v13 = vld [vmem:[%s10445_s15 + $0x948] sm:$0xf] }
 0xc6c   : > { %5208 = vmatpush.msrb.mxu0 %v10083_v36  ;;  %v8795_v36 = vor.u32 %v9173_v27, %v8794_v61 }
 0xc6d   : > { %v10086_v38 = vpop.permute.xlu1 %10085  ;;  %5162 = vmatpush.msrb.mxu1 %v5105_v3  ;;  %v8754_v3 = vld [vmem:[%s10445_s15 + $0x940] sm:$0xf] }
 0xc6e   : > { %v10088_v58 = vunpack.i.h.bf16 %v10086_v38  ;;  %v10087_v25 = vunpack.i.l.bf16 %v10086_v38  ;;  %v8763_v38 = vor.u32 %v9165_v17, %v8762_v13  ;;  %v8778_v17 = vld [vmem:[%s10445_s15 + $0x958] sm:$0xf] }
 0xc70   : > { %5209 = vmatpush.msrb.mxu0 %v10088_v58  ;;  %v5104_v56 = vsel %vm14709_vm12, %v10087_v25, %v10088_v58  ;;  %vm14711_vm12 = vmmov %vm14705_vm0  ;;  %v9157_v58 = vld [vmem:[%s10445_s15 + $0x924] sm:$0xf0]  ;;  %v8722_v25 = vld [vmem:[%s10445_s15 + $0x900] sm:$0xf] }
 0xc71   : > { %5163 = vmatpush.msrb.mxu1 %v5104_v56  ;;  %v8731_v4 = vor.u32 %v9157_v58, %v8730_v9  ;;  %v12611_v56 = vld [vmem:[%s14530_s3 + $0x18] sm:$0xff]  ;;  %v8723_v43 = vor.u32 %v9156_v16, %v8722_v25  ;;  %v8738_v25 = vld [vmem:[%s10445_s15 + $0x910] sm:$0xf] }
 0xc72   : > { %5210 = vmatpush.msrb.mxu0 %v10093_v40  ;;  %v8755_v40 = vor.u32 %v9164_v32, %v8754_v3  ;;  %v9167_v3 = vld [vmem:[%s10445_s15 + $0x974] sm:$0xf0]  ;;  %v9166_v32 = vld [vmem:[%s10445_s15 + $0x96c] sm:$0xf0] }
 0xc73   : > { %5164 = vmatpush.msrb.mxu1 %v5103_v14  ;;  %v8698_v14 = vld [vmem:[%s10445_s15 + $0x8c8] sm:$0xf]  ;;  %v8746_v9 = vld [vmem:[%s10445_s15 + $0x918] sm:$0xf]  ;;  %v9158_v16 = vld [vmem:[%s10445_s15 + $0x92c] sm:$0xf0] }
 0xc74   : > { %5211 = vmatpush.msrb.mxu0 %v10098_v44  ;;  %v9182_v44 = vld [vmem:[%s10445_s15 + $0x9ec] sm:$0x30]  ;;  %v9159_v58 = vld [vmem:[%s10445_s15 + $0x934] sm:$0xf0] }
 0xc75   : > { %v10101_v6 = vpop.permute.xlu1 %10100  ;;  %5165 = vmatpush.msrb.mxu1 %v5102_v42  ;;  %v8843_v42 = vor.u32 %v9183_v30, %v8842_v52  ;;  %v8747_v52 = vor.u32 %v9159_v58, %v8746_v9  ;;  %v8739_v30 = vor.u32 %v9158_v16, %v8738_v25 }
 0xc76   : > { %v10103_v1 = vunpack.i.h.bf16 %v10101_v6  ;;  %v10102_v57 = vunpack.i.l.bf16 %v10101_v6  ;;  %v8690_v6 = vld [vmem:[%s10445_s15 + $0x8c0] sm:$0xf] }
 0xc77   : > { %v5519_v61 = vand.u32 %v8843_v42, %v10447_v2 }
 0xc78   : > { %5212 = vmatpush.msrb.mxu0 %v10103_v1  ;;  %v5101_v15 = vsel %vm14711_vm12, %v10102_v57, %v10103_v1  ;;  %v8835_v1 = vor.u32 %v9182_v44, %v8834_v29  ;;  %v8699_v57 = vor.u32 %v9149_v24, %v8698_v14  ;;  %v8714_v29 = vld [vmem:[%s10445_s15 + $0x8d8] sm:$0xf]  ;;  %vm14727_vm12 = vmmov %vm14705_vm0 }
 0xc79   : > { %5166 = vmatpush.msrb.mxu1 %v5101_v15  ;;  %8646 = vmatmul.msk.f32.vlgmr.msrb.gmra.mxu0 %vm988_vm1, %v12590_v11  ;;  %v8802_v15 = vld [vmem:[%s10445_s15 + $0x990] sm:$0xf]  ;;  %v9151_v44 = vld [vmem:[%s10445_s15 + $0x8f4] sm:$0xf0] }
 0xc7a   : > { %5553 = vmatpush.bf16.msra.mxu0 %v5507_v22  ;;  %8644 = vmatmul.msk.f32.vlgmr.msrb.gmra.mxu1 %vm988_vm1, %v12590_v11  ;;  %v9148_v22 = vld [vmem:[%s10445_s15 + $0x8dc] sm:$0xf0]  ;;  %v5513_v27 = vand.u32 %v8835_v1, %v10447_v2  ;;  %v8770_v2 = vld [vmem:[%s10445_s15 + $0x950] sm:$0xf]  ;;  %v8715_v14 = vor.u32 %v9151_v44, %v8714_v29 }
 0xc7b   : > { %5527 = vmatpush.bf16.msra.mxu1 %v5501_v21  ;;  %v8691_v21 = vor.u32 %v9148_v22, %v8690_v6 }
 0xc7e   : > { %5554 = vmatpush.bf16.msra.mxu0 %v8795_v36  ;;  %v9174_v36 = vld [vmem:[%s10445_s15 + $0x9ac] sm:$0xf0] }
 0xc7f   : > { %5528 = vmatpush.bf16.msra.mxu1 %v8787_v10  ;;  %v8811_v10 = vor.u32 %v9175_v48, %v8810_v49  ;;  %v8803_v13 = vor.u32 %v9174_v36, %v8802_v15 }
 0xc81   : > { %8647 = vmatmul.msk.f32.gmra.mxu0 %vm988_vm1, %v12611_v56 }
 0xc82   : > { %5555 = vmatpush.bf16.msra.mxu0 %v8763_v38  ;;  %8645 = vmatmul.msk.f32.gmra.mxu1 %vm988_vm1, %v12611_v56  ;;  %v8779_v38 = vor.u32 %v9167_v3, %v8778_v17 }
 0xc83   : > { %5529 = vmatpush.bf16.msra.mxu1 %v8755_v40  ;;  %v8771_v40 = vor.u32 %v9166_v32, %v8770_v2 }
 0xc86   : > { %5556 = vmatpush.bf16.msra.mxu0 %v8731_v4  ;;  %v8706_v4 = vld [vmem:[%s10445_s15 + $0x8d0] sm:$0xf] }
 0xc87   : > { %5530 = vmatpush.bf16.msra.mxu1 %v8723_v43  ;;  %v9150_v43 = vld [vmem:[%s10445_s15 + $0x8ec] sm:$0xf0] }
 0xc88   : > { %v8707_v24 = vor.u32 %v9150_v43, %v8706_v4 }
 0xc8a   : > { %5557 = vmatpush.bf16.msra.mxu0 %v8699_v57 }
 0xc8b   : > { %5531 = vmatpush.bf16.msra.mxu1 %v8691_v21 }
 0xc8d   : > { %8850 = vmatmul.msk.bf16.vlgmr.msra.gmra.mxu0 %vm636_vm2, %v12315_v46 }
 0xc8e   : > { %5605 = vmatpush.bf16.msrb.mxu0 %v5519_v61  ;;  %8848 = vmatmul.msk.bf16.vlgmr.msra.gmra.mxu1 %vm636_vm2, %v12315_v46 }
 0xc8f   : > { %5579 = vmatpush.bf16.msrb.mxu1 %v5513_v27 }
 0xc92   : > { %5606 = vmatpush.bf16.msrb.mxu0 %v8811_v10 }
 0xc93   : > { %5580 = vmatpush.bf16.msrb.mxu1 %v8803_v13 }
 0xc96   : > { %5607 = vmatpush.bf16.msrb.mxu0 %v8779_v38 }
 0xc97   : > { %5581 = vmatpush.bf16.msrb.mxu1 %v8771_v40 }
 0xc9a   : > { %5608 = vmatpush.bf16.msrb.mxu0 %v8747_v52 }
 0xc9b   : > { %5582 = vmatpush.bf16.msrb.mxu1 %v8739_v30 }
 0xc9e   : > { %5609 = vmatpush.bf16.msrb.mxu0 %v8715_v14 }
 0xc9f   : > { %5583 = vmatpush.bf16.msrb.mxu1 %v8707_v24 }
 0xca1   : > { %8854 = vmatmul.msk.bf16.vlgmr.msrb.gmra.mxu0 %vm636_vm2, %v12315_v46 }
 0xca2   : > { %8852 = vmatmul.msk.bf16.vlgmr.msrb.gmra.mxu1 %vm636_vm2, %v12315_v46  ;;  %v12647_v42 = vpop.f32.mrf.mxu2  ;;  %vm14716_vm2 = vcmask 785408  }
 0xca3   : > { %v12649_v6 = vpop.f32.mrf.mxu3 }
 0xcaa   : > { %v12651_v22 = vpop.f32.mrf.mxu2 }
 0xcab   : > { %14712 = vst [vmem:[#allocation36_spill] sm:$0xff] %v12651_v22  ;;  %v12653_v1 = vpop.f32.mrf.mxu3 }
 0xcac   : > { %14713 = vst [vmem:[#allocation37_spill] sm:$0xff] %v12653_v1 }
 0xcb6   : > { %v5572_v57 = vpop.f32.mrf.mxu2 }
 0xcb7   : > { %v5573_v21 = vadd.f32 %v5572_v57, %v10587_v50  ;;  %v5546_v61 = vpop.f32.mrf.mxu3 }
 0xcb8   : > { %v5547_v27 = vadd.f32 %v5546_v61, %v10587_v50 }
 0xcb9   : > { %v5631_v49 = vmax.f32 %v5573_v21, 0.0 }
 0xcba   : > { %v5629_v48 = vmax.f32 %v5547_v27, 0.0 }
 0xcbc   : > { %v5637_v15 = vmax.f32 %v5629_v48, %v5631_v49 }
 0xcbe   : > { %v5574_v36 = vpop.f32.mrf.mxu2 }
 0xcbf   : > { %v5548_v10 = vpop.f32.mrf.mxu3 }
 0xcca   : > { %v5624_v46 = vpop.f32.mrf.mxu2 }
 0xccb   : > { %v5625_v13 = vadd.f32 %v5624_v46, %v10587_v50  ;;  %v5598_v17 = vpop.f32.mrf.mxu3 }
 0xccc   : > { %v5599_v3 = vadd.f32 %v5598_v17, %v10587_v50 }
 0xccd   : > { %v5635_v2 = vmax.f32 %v5625_v13, 0.0 }
 0xcce   : > { %v5633_v32 = vmax.f32 %v5599_v3, 0.0 }
 0xcd0   : > { %v5639_v38 = vmax.f32 %v5633_v32, %v5635_v2 }
 0xcd2   : > { %v12659_v40 = vmax.f32 %v5637_v15, %v5639_v38  ;;  %v5626_v9 = vpop.f32.mrf.mxu2 }
 0xcd3   : > { %v5600_v58 = vpop.f32.mrf.mxu3 }
 0xcf6   : > { %v12661_v25 = vpop.f32.mrf.mxu0 }
 0xcf7   : > { %v12663_v16 = vpop.f32.mrf.mxu1 }
 0xcfe   : > { %v12665_v52 = vpop.f32.mrf.mxu0 }
 0xcff   : > { %14714 = vst [vmem:[#allocation38_spill] sm:$0xff] %v12665_v52  ;;  %v12667_v30 = vpop.f32.mrf.mxu1 }
 0xd00   : > { %14715 = vst [vmem:[#allocation39_spill] sm:$0xff] %v12667_v30 }
 0xd0a   : > { %v5559_v29 = vpop.f32.mrf.mxu0 }
 0xd0b   : > { %v5533_v44 = vpop.f32.mrf.mxu1  ;;  %v5560_v14 = vadd.f32 %v5559_v29, %v10587_v50 }
 0xd0c   : > { %v5534_v24 = vadd.f32 %v5533_v44, %v10587_v50 }
 0xd0d   : > { %v5630_v27 = vmax.f32 %v5560_v14, 0.0 }
 0xd0e   : > { %v5628_v49 = vmax.f32 %v5534_v24, 0.0 }
 0xd10   : > { %v5636_v10 = vmax.f32 %v5628_v49, %v5630_v27 }
 0xd12   : > { %v5561_v4 = vpop.f32.mrf.mxu0 }
 0xd13   : > { %v5535_v43 = vpop.f32.mrf.mxu1 }
 0xd1e   : > { %v5611_v57 = vpop.f32.mrf.mxu0 }
 0xd1f   : > { %v5612_v21 = vadd.f32 %v5611_v57, %v10587_v50  ;;  %v5585_v61 = vpop.f32.mrf.mxu1 }
 0xd20   : > { %v5586_v48 = vadd.f32 %v5585_v61, %v10587_v50 }
 0xd21   : > { %v5634_v15 = vmax.f32 %v5612_v21, 0.0 }
 0xd22   : > { %v5632_v36 = vmax.f32 %v5586_v48, 0.0 }
 0xd24   : > { %v5638_v46 = vmax.f32 %v5632_v36, %v5634_v15 }
 0xd26   : > { %v12673_v13 = vmax.f32 %v5636_v10, %v5638_v46  ;;  %v5613_v17 = vpop.f32.mrf.mxu0 }
 0xd27   : > { %v5587_v3 = vpop.f32.mrf.mxu1 }
 0xd28   : > { %v10114_v2 = vpack.i.bf16 %v12659_v40, %v12673_v13 }
 0xd2a   : > { %10115 = vrot.lane.b32.xlu1 %v10114_v2, %s14633_s23  ;;  %10110 = vrot.lane.b32.xlu0 %v10114_v2, %s14634_s28  ;;  %s10270_s23 = scalar_lea.hbm %s14538_s11, 16 }
 0xd2b   : > { %10105 = vrot.lane.b32.xlu2 %v10114_v2, %s14614_s12 }
 0xd32   : > { %10130 = vrot.lane.b32.xlu1 %v10114_v2, %s14615_s16  ;;  %10125 = vrot.lane.b32.xlu0 %v10114_v2, %s14616_s21  ;;  %s14766_s16 = sld [smem:[#allocation42_spill]] }
 0xd33   : > { %10120 = vrot.lane.b32.xlu2 %v10114_v2, %s14617_s25 }
 0xd3a   : > { %10145 = vrot.lane.b32.xlu1 %v10114_v2, %s14621_s0  ;;  %10140 = vrot.lane.b32.xlu0 %v10114_v2, %s14618_s24 }
 0xd3b   : > { %10135 = vrot.lane.b32.xlu2 %v10114_v2, %s14619_s14 }
 0xd42   : > { %10160 = vrot.lane.b32.xlu1 %v10114_v2, %s14622_s2  ;;  %10155 = vrot.lane.b32.xlu0 %v10114_v2, %s14620_s30  ;;  %s380_s30 = sand.u32 1, %s10304_s18  }
 0xd43   : > { %10150 = vrot.lane.b32.xlu2 %v10114_v2, %s14635_s17  ;;  %s7123_s2 = scalar_lea.sflag [#allocation4], %s380_s30 }
 0xd4a   : > { %10170 = vrot.lane.b32.xlu0 %v10114_v2, %s14625_s26 }
 0xd4b   : > { %10165 = vrot.lane.b32.xlu2 %v10114_v2, %s14636_s20 }
 0xd53   : > { %10175 = vrot.lane.b32.xlu2 %v10114_v2, %s14624_s13  ;;  %s7201_s13 = sshll.u32 %s380_s30, 3 }
 0xd54   : > { %s382_s10 = scalar_lea.vmem [#allocation3], %s7201_s13 }
 0xd55   : > { %s7135_s27 = sshll.u32 %s382_s10, 4  ;;  %s7136_s27 = int_to_ptr.vmem [resolvable:$true] %s7135_s27 }
 0xd85   : > { %v10106_v50 = vpop.permute.xlu2 %10105 }
 0xd86   : > { %v12692_v32 = vunpack.i.h.bf16 %v10106_v50  ;;  %v10107_v38 = vunpack.i.l.bf16 %v10106_v50 }
 0xd88   : > { %v12696_v9 = vsel %vm848_vm6, %v10107_v38, %v12692_v32  ;;  %vm14719_vm6 = vcmask 818176  }
 0xd89   : > { %v10179_v58 = vpack.i.bf16 %v12692_v32, %v12696_v9 }
 0xd8b   : > { %10180 = vrot.lane.b32.xlu1 %v10179_v58, %s14623_s22 }
 0xd8d   : > { %v10121_v29 = vpop.permute.xlu2 %10120 }
 0xd8e   : > { %v12701_v44 = vunpack.i.h.bf16 %v10121_v29  ;;  %v10122_v4 = vunpack.i.l.bf16 %v10121_v29 }
 0xd90   : > { %v12705_v43 = vsel %vm824_vm3, %v10122_v4, %v12701_v44 }
 0xd91   : > { %v10194_v14 = vpack.i.bf16 %v12701_v44, %v12705_v43 }
 0xd93   : > { %10195 = vrot.lane.b32.xlu2 %v10194_v14, %s14623_s22 }
 0xd95   : > { %v10136_v24 = vpop.permute.xlu2 %10135 }
 0xd9b   : > { %10200 = vrot.lane.b32.xlu2 %v10114_v2, %s14626_s19 }
 0xd9c   : > { %v10116_v57 = vpop.permute.xlu1 %10115  ;;  %v10111_v21 = vpop.permute.xlu0 %10110 }
 0xd9d   : > { %v12711_v61 = vunpack.i.h.bf16 %v10116_v57  ;;  %v10117_v27 = vunpack.i.l.bf16 %v10116_v57  ;;  %v12713_v49 = vunpack.i.h.bf16 %v10111_v21  ;;  %v10112_v48 = vunpack.i.l.bf16 %v10111_v21  ;;  %v10151_v4 = vpop.permute.xlu2 %10150 }
 0xd9e   : > { %v12737_v21 = vunpack.i.h.bf16 %v10136_v24 }
 0xd9f   : > { %v12717_v15 = vsel %vm832_vm8, %v10117_v27, %v12711_v61  ;;  %v12721_v36 = vsel %vm840_vm5, %v10112_v48, %v12713_v49  ;;  %v10137_v27 = vunpack.i.l.bf16 %v10136_v24  ;;  %vm14718_vm5 = vcmask 809984   ;;  %vm14721_vm8 = vmmov %vm14705_vm0 }
 0xda0   : > { %v10189_v10 = vpack.i.bf16 %v12711_v61, %v12717_v15  ;;  %v10184_v46 = vpack.i.bf16 %v12713_v49, %v12721_v36 }
 0xda2   : > { %10185 = vrot.lane.b32.xlu0 %v10184_v46, %s14623_s22  ;;  %10190 = vrot.lane.b32.xlu1 %v10189_v10, %s14623_s22  ;;  %v12745_v10 = vsel %vm800_vm11, %v10137_v27, %v12737_v21  ;;  %v10153_v46 = vunpack.i.h.bf16 %v10151_v4  ;;  %vm14723_vm11 = vmmov %vm14705_vm0 }
 0xda3   : > { %10225 = vrot.lane.b32.xlu2 %v10114_v2, %s14623_s22  ;;  %v10214_v27 = vpack.i.bf16 %v12737_v21, %v12745_v10 }
 0xda4   : > { %v10131_v17 = vpop.permute.xlu1 %10130  ;;  %v10126_v3 = vpop.permute.xlu0 %10125 }
 0xda5   : > { %v12730_v50 = vunpack.i.h.bf16 %v10131_v17  ;;  %v10132_v38 = vunpack.i.l.bf16 %v10131_v17  ;;  %v10128_v58 = vunpack.i.h.bf16 %v10126_v3  ;;  %v10127_v29 = vunpack.i.l.bf16 %v10126_v3 }
 0xda6   : > { %v10152_v17 = vunpack.i.l.bf16 %v10151_v4 }
 0xda7   : > { %v12734_v14 = vsel %vm808_vm10, %v10132_v38, %v12730_v50  ;;  %v5753_v57 = vsel %vm912_vm7, %v10127_v29, %v10128_v58  ;;  %vm14720_vm7 = vcmask 900096   ;;  %vm14722_vm10 = vmmov %vm14705_vm0 }
 0xda8   : > { %v10209_v2 = vpack.i.bf16 %v12730_v50, %v12734_v14  ;;  %v10204_v48 = vpack.i.bf16 %v10128_v58, %v5753_v57 }
 0xdaa   : > { %10205 = vrot.lane.b32.xlu0 %v10204_v48, %s14623_s22  ;;  %10210 = vrot.lane.b32.xlu1 %v10209_v2, %s14623_s22  ;;  %v10166_v2 = vpop.permute.xlu2 %10165  ;;  %v5739_v48 = vsel %vm14716_vm2, %v10152_v17, %v10153_v46  ;;  %v398_v17 = vld [vmem:[%s14531_s4 + $0x8] sm:$0xff]  ;;  %vm14728_vm2 = vmmov %vm14705_vm0 }
 0xdab   : > { %v10168_v22 = vunpack.i.h.bf16 %v10166_v2  ;;  %v10167_v51 = vunpack.i.l.bf16 %v10166_v2 }
 0xdac   : > { %v10146_v3 = vpop.permute.xlu1 %10145  ;;  %v10141_v38 = vpop.permute.xlu0 %10140 }
 0xdad   : > { %v10148_v29 = vunpack.i.h.bf16 %v10146_v3  ;;  %v10147_v30 = vunpack.i.l.bf16 %v10146_v3  ;;  %v12747_v1 = vunpack.i.h.bf16 %v10141_v38  ;;  %v10142_v24 = vunpack.i.l.bf16 %v10141_v38 }
 0xdae   : > { %v5718_v2 = vsel %vm14718_vm5, %v10167_v51, %v10168_v22  ;;  %vm6102_vm5 = vcmask 1044484  }
 0xdaf   : > { %v12751_v58 = vsel %vm792_vm9, %v10142_v24, %v12747_v1  ;;  %5863 = vmatpush.msra.mxu0 %v10148_v29  ;;  %v5746_v57 = vsel %vm904_vm4, %v10147_v30, %v10148_v29  ;;  %vm14717_vm4 = vcmask 793600  }
 0xdb0   : > { %v10219_v4 = vpack.i.bf16 %v12747_v1, %v12751_v58  ;;  %5817 = vmatpush.msra.mxu1 %v5746_v57 }
 0xdb1   : > { %5864 = vmatpush.msra.mxu0 %v10153_v46  ;;  %v397_v46 = vld [vmem:[%s14531_s4] sm:$0xff] }
 0xdb2   : > { %5818 = vmatpush.msra.mxu1 %v5739_v48  ;;  %10215 = vrot.lane.b32.xlu0 %v10214_v27, %s14623_s22  ;;  %v10176_v27 = vpop.permute.xlu2 %10175 }
 0xdb3   : > { %10220 = vrot.lane.b32.xlu1 %v10219_v4, %s14623_s22  ;;  %v10178_v4 = vunpack.i.h.bf16 %v10176_v27  ;;  %v10177_v48 = vunpack.i.l.bf16 %v10176_v27  ;;  %s7133_s22 = scalar_lea.hbm %s14538_s11, %s10438_s29 }
 0xdb4   : > { %v10161_v3 = vpop.permute.xlu1 %10160  ;;  %v10156_v38 = vpop.permute.xlu0 %10155  ;;  %s7137_s0 = sshll.u32 %s7133_s22, 4  ;;  %s7138_s0 = int_to_ptr.hbm [resolvable:$true] %s7137_s0 }
 0xdb5   : > { %v10163_v24 = vunpack.i.h.bf16 %v10161_v3  ;;  %v10162_v30 = vunpack.i.l.bf16 %v10161_v3  ;;  %v10158_v29 = vunpack.i.h.bf16 %v10156_v38  ;;  %v10157_v52 = vunpack.i.l.bf16 %v10156_v38  ;;  %s10264_s17 = sshra.s32 %s7138_s0, 4  ;;  %s10265_s17 = int_to_ptr.hbm [resolvable:$true] %s10264_s17 }
 0xdb6   : > { %s10266_s19 = scalar_lea.hbm %s10265_s17, 8  ;;  %p10271_p0 = scmp.lt.s32.totalorder %s10265_s17, %s14538_s11 }
 0xdb7   : > { %5865 = vmatpush.msra.mxu0 %v10158_v29  ;;  %v5732_v53 = vsel %vm14717_vm4, %v10157_v52, %v10158_v29  ;;  %v5725_v57 = vsel %vm880_vm14, %v10162_v30, %v10163_v24  ;;  %vm14724_vm14 = vmmov %vm14705_vm0  ;;  %vm6099_vm4 = vcmask 1043459   ;;  %p10267_p11 = scmp.ne.s32.totalorder %s10265_s17, %s10266_s19  ;;  %p10272_p1 = scmp.lt.s32.totalorder %s10270_s23, %s10266_s19 }
 0xdb8   : > { %5819 = vmatpush.msra.mxu1 %v5732_v53 }
 0xdb9   : > { %5866 = vmatpush.msra.mxu0 %v10163_v24  ;;  %v5704_v24 = vsel %vm14720_vm7, %v10177_v48, %v10178_v4  ;;  %vm6108_vm7 = vcmask 1046534   ;;  %p10268_p12 = pnand %p10267_p11, %p10428_p5  ;;  %p10273_p2 = por %p10272_p1, %p10271_p0 }
 0xdba   : > { %5820 = vmatpush.msra.mxu1 %v5725_v57  ;;  %980 = vperm.xlu0 %9243, %v397_v46  }
 0xdbb   : > { %985 = vperm.xlu1 %10229, %v398_v17   ;;  %5867 = vmatpush.msra.mxu0 %v10168_v22  ;;  %p10269_p13 = pneg %p10268_p12 }
 0xdbc   : > { %v10171_v52 = vpop.permute.xlu0 %10170  ;;  %5821 = vmatpush.msra.mxu1 %v5718_v2 }
 0xdbd   : > { %v10173_v3 = vunpack.i.h.bf16 %v10171_v52  ;;  %v10172_v53 = vunpack.i.l.bf16 %v10171_v52  ;;  %p10274_p3 = pnand %p10273_p2, %p10269_p13 }
 0xdbf   : > { %5868 = vmatpush.msra.mxu0 %v10173_v3  ;;  %v5711_v38 = vsel %vm14719_vm6, %v10172_v53, %v10173_v3  ;;  %vm6105_vm6 = vcmask 1045509  }
 0xdc0   : > { %5822 = vmatpush.msra.mxu1 %v5711_v38 }
 0xdc1   : > { %5869 = vmatpush.msra.mxu0 %v10178_v4 }
 0xdc2   : > { %5823 = vmatpush.msra.mxu1 %v5704_v24 }
 0xdc3   : > { %5870 = vmatpush.msra.mxu0 %v12692_v32 }
 0xdc4   : > { %5824 = vmatpush.msra.mxu1 %v12696_v9 }
 0xdc5   : > { %5871 = vmatpush.msra.mxu0 %v12713_v49  ;;  %v10249_v49 = vld [vmem:[%s14530_s3 + $0x10] sm:$0xff] }
 0xdc6   : > { %5825 = vmatpush.msra.mxu1 %v12721_v36 }
 0xdc7   : > { %5872 = vmatpush.msra.mxu0 %v12711_v61 }
 0xdc8   : > { %5826 = vmatpush.msra.mxu1 %v12717_v15 }
 0xdc9   : > { %5873 = vmatpush.msra.mxu0 %v12701_v44 }
 0xdca   : > { %5827 = vmatpush.msra.mxu1 %v12705_v43 }
 0xded   : > { %v10196_v51 = vpop.permute.xlu2 %10195 }
 0xdf5   : > { %v10201_v22 = vpop.permute.xlu2 %10200 }
 0xdf6   : > { %v10203_v30 = vunpack.i.h.bf16 %v10201_v22  ;;  %v10202_v29 = vunpack.i.l.bf16 %v10201_v22 }
 0xdf8   : > { %5874 = vmatpush.msra.mxu0 %v10203_v30  ;;  %v5669_v32 = vsel %vm816_vm15, %v10202_v29, %v10203_v30  ;;  %vm14725_vm15 = vmmov %vm14705_vm0 }
 0xdf9   : > { %5828 = vmatpush.msra.mxu1 %v5669_v32 }
 0xdfa   : > { %5875 = vmatpush.msra.mxu0 %v12730_v50 }
 0xdfb   : > { %5829 = vmatpush.msra.mxu1 %v12734_v14 }
 0xdfc   : > { %5876 = vmatpush.msra.mxu0 %v12737_v21  ;;  %v10198_v21 = vunpack.i.h.bf16 %v10196_v51 }
 0xdfd   : > { %v10181_v9 = vpop.permute.xlu1 %10180  ;;  %5830 = vmatpush.msra.mxu1 %v12745_v10  ;;  %v10197_v10 = vunpack.i.l.bf16 %v10196_v51  ;;  %v10226_v3 = vpop.permute.xlu2 %10225 }
 0xdfe   : > { %v10183_v44 = vunpack.i.h.bf16 %v10181_v9  ;;  %v10182_v61 = vunpack.i.l.bf16 %v10181_v9  ;;  %5877 = vmatpush.msra.mxu0 %v12747_v1  ;;  %v10228_v29 = vunpack.i.h.bf16 %v10226_v3  ;;  %v10227_v32 = vunpack.i.l.bf16 %v10226_v3 }
 0xdff   : > { %5831 = vmatpush.msra.mxu1 %v12751_v58  ;;  %v5795_v58 = vsel %vm14724_vm14, %v10197_v10, %v10198_v21 }
 0xe00   : > { %5878 = vmatpush.msra.mxu0 %v12659_v40  ;;  %5893 = vmatpush.msra.mxu2 %v10183_v44  ;;  %v5798_v43 = vsel %vm14721_vm8, %v10182_v61, %v10183_v44  ;;  %v5790_v61 = vsel %vm14728_vm2, %v10227_v32, %v10228_v29  ;;  %vm6111_vm8 = vcmask 1047559  }
 0xe01   : > { %5832 = vmatpush.msra.mxu1 %v12673_v13  ;;  %5847 = vmatpush.msra.mxu3 %v5798_v43 }
 0xe02   : > { %5879 = vmatmul.f32.vlgmr.msra.gmra.mxu0 %v12520_v63  ;;  %5833 = vmatmul.f32.vlgmr.msra.gmra.mxu1 %v12520_v63 }
 0xe0a   : > { %5882 = vmatmul.f32.gmra.mxu0 %v10249_v49  ;;  %5836 = vmatmul.f32.gmra.mxu1 %v10249_v49 }
 0xe14   : > { %v10186_v1 = vpop.permute.xlu0 %10185  ;;  %v10191_v15 = vpop.permute.xlu1 %10190 }
 0xe15   : > { %v10188_v36 = vunpack.i.h.bf16 %v10186_v1  ;;  %v10187_v40 = vunpack.i.l.bf16 %v10186_v1  ;;  %v10193_v50 = vunpack.i.h.bf16 %v10191_v15  ;;  %v10192_v14 = vunpack.i.l.bf16 %v10191_v15 }
 0xe17   : > { %5894 = vmatpush.msra.mxu2 %v10188_v36  ;;  %v5797_v13 = vsel %vm14722_vm10, %v10187_v40, %v10188_v36  ;;  %v5796_v63 = vsel %vm14723_vm11, %v10192_v14, %v10193_v50 }
 0xe18   : > { %5848 = vmatpush.msra.mxu3 %v5797_v13 }
 0xe19   : > { %5895 = vmatpush.msra.mxu2 %v10193_v50 }
 0xe1a   : > { %5849 = vmatpush.msra.mxu3 %v5796_v63 }
 0xe1b   : > { %5896 = vmatpush.msra.mxu2 %v10198_v21 }
 0xe1c   : > { %v10206_v46 = vpop.permute.xlu0 %10205  ;;  %v10211_v17 = vpop.permute.xlu1 %10210  ;;  %5850 = vmatpush.msra.mxu3 %v5795_v58 }
 0xe1d   : > { %v10208_v57 = vunpack.i.h.bf16 %v10206_v46  ;;  %v10207_v27 = vunpack.i.l.bf16 %v10206_v46  ;;  %v10213_v2 = vunpack.i.h.bf16 %v10211_v17  ;;  %v10212_v52 = vunpack.i.l.bf16 %v10211_v17 }
 0xe1f   : > { %5897 = vmatpush.msra.mxu2 %v10208_v57  ;;  %v5794_v4 = vsel %vm14725_vm15, %v10207_v27, %v10208_v57  ;;  %v5793_v48 = vsel %vm14705_vm0, %v10212_v52, %v10213_v2  ;;  %v14730_v52 = vld [vmem:[#allocation20_spill] sm:$0xff] }
 0xe20   : > { %5851 = vmatpush.msra.mxu3 %v5794_v4 }
 0xe21   : > { %5898 = vmatpush.msra.mxu2 %v10213_v2 }
 0xe22   : > { %5852 = vmatpush.msra.mxu3 %v5793_v48  ;;  %v14731_v48 = vld [vmem:[#allocation19_spill] sm:$0xff] }
 0xe24   : > { %v10216_v53 = vpop.permute.xlu0 %10215 }
 0xe25   : > { %v10218_v38 = vunpack.i.h.bf16 %v10216_v53  ;;  %v10217_v24 = vunpack.i.l.bf16 %v10216_v53  ;;  %v10221_v51 = vpop.permute.xlu1 %10220 }
 0xe26   : > { %v10223_v22 = vunpack.i.h.bf16 %v10221_v51  ;;  %v10222_v30 = vunpack.i.l.bf16 %v10221_v51  ;;  %v14734_v51 = vld [vmem:[#allocation18_spill] sm:$0xff] }
 0xe27   : > { %5899 = vmatpush.msra.mxu2 %v10218_v38  ;;  %v5792_v9 = vsel %vm14726_vm13, %v10217_v24, %v10218_v38 }
 0xe28   : > { %5853 = vmatpush.msra.mxu3 %v5792_v9  ;;  %v5791_v44 = vsel %vm14727_vm12, %v10222_v30, %v10223_v22  ;;  %v14735_v30 = vld [vmem:[#allocation14_spill] sm:$0xff] }
 0xe29   : > { %5900 = vmatpush.msra.mxu2 %v10223_v22 }
 0xe2a   : > { %5854 = vmatpush.msra.mxu3 %v5791_v44  ;;  %v14736_v44 = vld [vmem:[#allocation21_spill] sm:$0xff] }
 0xe2b   : > { %5901 = vmatpush.msra.mxu2 %v10228_v29 }
 0xe2c   : > { %v12803_v43 = vpop.permute.xlu0 %980  ;;  %5855 = vmatpush.msra.mxu3 %v5790_v61  ;;  %8858 = vmatmul.msk.f32.vlgmr.msra.gmra.mxu2 %vm988_vm1, %v12590_v11 }
 0xe2d   : > { %8856 = vmatmul.msk.f32.vlgmr.msra.gmra.mxu3 %vm988_vm1, %v12590_v11  ;;  %v1747_v49 = vadd.f32 %v11197_v18, %v12803_v43  ;;  %v1701_v1 = vadd.f32 %v11199_v8, %v12803_v43  ;;  %v2390_v15 = vadd.f32 %v11481_v55, %v12803_v43  ;;  %v1013_v11 = vadd.f32 %v10913_v39, %v12803_v43 }
 0xe2e   : > { %v2436_v55 = vadd.f32 %v11483_v26, %v12803_v43  ;;  %v3125_v21 = vadd.f32 %v11765_v7, %v12803_v43  ;;  %v3079_v10 = vadd.f32 %v11767_v28, %v12803_v43  ;;  %v4457_v13 = vadd.f32 %v12354_v5, %v12803_v43 }
 0xe2f   : > { %v12816_v36 = vadd.f32 %v11189_v0, %v1747_v49  ;;  %v12819_v40 = vadd.f32 %v11191_v19, %v1701_v1  ;;  %v12822_v50 = vadd.f32 %v11489_v34, %v2390_v15  ;;  %v1059_v0 = vadd.f32 %v10919_v47, %v12803_v43  ;;  %v14737_v49 = vld [vmem:[#allocation16_spill] sm:$0xff] }
 0xe30   : > { %v12847_v39 = vadd.f32 %v10911_v37, %v1013_v11  ;;  %v12850_v47 = vadd.f32 %v11487_v45, %v2436_v55  ;;  %v3768_v37 = vadd.f32 %v12068_v59, %v12803_v43  ;;  %v12877_v45 = vadd.f32 %v11775_v41, %v3079_v10  ;;  %v14738_v11 = vld [vmem:[#allocation24_spill] sm:$0xff]  ;;  %v14740_v10 = vld [vmem:[#allocation13_spill] sm:$0xff] }
 0xe31   : > { %v1776_v18 = vmax.f32 %v12816_v36, 0.0  ;;  %v1775_v14 = vmax.f32 %v12819_v40, 0.0  ;;  %v2464_v8 = vmax.f32 %v12822_v50, 0.0  ;;  %v12853_v19 = vadd.f32 %v10907_v33, %v1059_v0  ;;  %v14739_v0 = vld [vmem:[#allocation22_spill] sm:$0xff] }
 0xe32   : > { %v1087_v26 = vmax.f32 %v12847_v39, 0.0  ;;  %v2465_v34 = vmax.f32 %v12850_v47, 0.0  ;;  %v12874_v33 = vadd.f32 %v11773_v35, %v3125_v21  ;;  %v12880_v7 = vadd.f32 %v12082_v54, %v3768_v37 }
 0xe33   : > { %1785 = vrot.lane.b32.xlu0 %v1776_v18, %s14618_s24  ;;  %1783 = vrot.lane.b32.xlu2 %v1775_v14, %s14618_s24  ;;  %v3153_v59 = vmax.f32 %v12877_v45, 0.0  ;;  %v3814_v63 = vadd.f32 %v12066_v60, %v12803_v43  ;;  %v4503_v35 = vadd.f32 %v12352_v31, %v12803_v43  ;;  %v12901_v41 = vadd.f32 %v12358_v12, %v4457_v13  ;;  %v12909_v31 = vpop.permute.xlu1 %985  ;;  %v14741_v13 = vld [vmem:[#allocation26_spill] sm:$0xff] }
 0xe34   : > { %2472 = vrot.lane.b32.xlu1 %v2464_v8, %s14618_s24  ;;  %8859 = vmatmul.msk.f32.gmra.mxu2 %vm988_vm1, %v12611_v56  ;;  %v3154_v28 = vmax.f32 %v12874_v33, 0.0  ;;  %v3842_v58 = vmax.f32 %v12880_v7, 0.0  ;;  %v5192_v17 = vadd.f32 %v12647_v42, %v12803_v43  ;;  %v5146_v57 = vadd.f32 %v12649_v6, %v12803_v43  ;;  %v14729_v6 = vld [vmem:[#allocation17_spill] sm:$0xff] }
 0xe35   : > { %8857 = vmatmul.msk.f32.gmra.mxu3 %vm988_vm1, %v12611_v56  ;;  %v1088_v56 = vmax.f32 %v12853_v19, 0.0  ;;  %v12904_v60 = vadd.f32 %v12080_v23, %v3814_v63  ;;  %v12907_v54 = vadd.f32 %v12356_v62, %v4503_v35  ;;  %v4531_v5 = vmax.f32 %v12901_v41, 0.0 }
 0xe36   : > { %v1750_v23 = vadd.f32 %v11201_v20, %v12909_v31  ;;  %v12930_v62 = vadd.f32 %v12661_v25, %v5192_v17  ;;  %v12933_v42 = vadd.f32 %v12663_v16, %v5146_v57  ;;  %v2393_v4 = vadd.f32 %v14730_v52, %v12909_v31  ;;  %v14732_v25 = vld [vmem:[#allocation15_spill] sm:$0xff]  ;;  %v14742_v57 = vld [vmem:[#allocation25_spill] sm:$0xff] }
 0xe37   : > { %v3843_v46 = vmax.f32 %v12904_v60, 0.0  ;;  %v4532_v12 = vmax.f32 %v12907_v54, 0.0  ;;  %v1704_v3 = vadd.f32 %v14731_v48, %v12909_v31  ;;  %v1016_v38 = vadd.f32 %v14732_v25, %v12909_v31  ;;  %v14733_v16 = vld [vmem:[#allocation23_spill] sm:$0xff]  ;;  %v14744_v48 = vld [vmem:[#allocation33_spill] sm:$0xff] }
 0xe38   : > { %v12936_v20 = vadd.f32 %v14729_v6, %v1750_v23  ;;  %v5221_v27 = vmax.f32 %v12930_v62, 0.0  ;;  %v5220_v2 = vmax.f32 %v12933_v42, 0.0  ;;  %v12957_v24 = vadd.f32 %v14733_v16, %v2393_v4  ;;  %v14743_v6 = vld [vmem:[#allocation29_spill] sm:$0xff]  ;;  %v14745_v25 = vld [vmem:[#allocation27_spill] sm:$0xff] }
 0xe39   : > { %v12960_v22 = vadd.f32 %v14734_v51, %v1704_v3  ;;  %v12963_v29 = vadd.f32 %v14735_v30, %v1016_v38  ;;  %v2439_v61 = vadd.f32 %v14736_v44, %v12909_v31  ;;  %v1062_v1 = vadd.f32 %v14737_v49, %v12909_v31  ;;  %v14746_v16 = vld [vmem:[#allocation31_spill] sm:$0xff] }
 0xe3a   : > { %v1778_v53 = vmax.f32 %v12936_v20, 0.0  ;;  %v2466_v32 = vmax.f32 %v12957_v24, 0.0  ;;  %v3128_v55 = vadd.f32 %v14738_v11, %v12909_v31  ;;  %v3082_v23 = vadd.f32 %v14742_v57, %v12909_v31  ;;  %v14747_v30 = vld [vmem:[#allocation35_spill] sm:$0xff] }
 0xe3b   : > { %1095 = vrot.lane.b32.xlu0 %v1087_v26, %s14618_s24  ;;  %2474 = vrot.lane.b32.xlu2 %v2465_v34, %s14618_s24  ;;  %v1777_v9 = vmax.f32 %v12960_v22, 0.0  ;;  %v14589_v15 = vmax.f32 %v12963_v29, 0.0  ;;  %v12984_v21 = vadd.f32 %v14739_v0, %v2439_v61  ;;  %v12987_v37 = vadd.f32 %v14740_v10, %v1062_v1  ;;  %v14748_v1 = vld [vmem:[#allocation28_spill] sm:$0xff] }
 0xe3c   : > { %1097 = vrot.lane.b32.xlu1 %v1088_v56, %s14618_s24  ;;  %v12990_v63 = vadd.f32 %v14741_v13, %v3128_v55  ;;  %v3771_v52 = vadd.f32 %v14743_v6, %v12909_v31  ;;  %v4460_v3 = vadd.f32 %v14744_v48, %v12909_v31  ;;  %v13011_v38 = vadd.f32 %v14745_v25, %v3082_v23  ;;  %v14749_v55 = vld [vmem:[#allocation32_spill] sm:$0xff]  ;;  %v14751_v23 = vld [vmem:[#allocation30_spill] sm:$0xff] }
 0xe3d   : > { %v2467_v35 = vmax.f32 %v12984_v21, 0.0  ;;  %v14593_v17 = vmax.f32 %v12987_v37, 0.0  ;;  %v3817_v11 = vadd.f32 %v14748_v1, %v12909_v31  ;;  %v4506_v0 = vadd.f32 %v14749_v55, %v12909_v31  ;;  %v14750_v13 = vld [vmem:[#allocation36_spill] sm:$0xff]  ;;  %v14754_v1 = vld [vmem:[#allocation37_spill] sm:$0xff] }
 0xe3e   : > { %v14588_v4 = vmax.f32 %v12990_v63, 0.0  ;;  %v13014_v51 = vadd.f32 %v14746_v16, %v3771_v52  ;;  %v13017_v44 = vadd.f32 %v14747_v30, %v4460_v3  ;;  %v3155_v61 = vmax.f32 %v13011_v38, 0.0  ;;  %v14752_v52 = vld [vmem:[#allocation34_spill] sm:$0xff] }
 0xe3f   : > { %v5195_v57 = vadd.f32 %v14750_v13, %v12909_v31  ;;  %v13038_v6 = vadd.f32 %v14751_v23, %v3817_v11  ;;  %v13041_v48 = vadd.f32 %v14752_v52, %v4506_v0  ;;  %v14753_v3 = vld [vmem:[#allocation38_spill] sm:$0xff]  ;;  %v5149_v55 = vadd.f32 %v14754_v1, %v12909_v31  ;;  %v14755_v11 = vld [vmem:[#allocation39_spill] sm:$0xff] }
 0xe40   : > { %v14592_v49 = vmax.f32 %v13014_v51, 0.0  ;;  %v14587_v10 = vmax.f32 %v13017_v44, 0.0  ;;  %vm6096_vm1 = vcmask 1042434  }
 0xe41   : > { %v13044_v25 = vadd.f32 %v14753_v3, %v5195_v57  ;;  %v3845_v16 = vmax.f32 %v13038_v6, 0.0  ;;  %v14591_v30 = vmax.f32 %v13041_v48, 0.0  ;;  %v13061_v0 = vadd.f32 %v14755_v11, %v5149_v55 }
 0xe43   : > { %3163 = vrot.lane.b32.xlu0 %v3154_v28, %s14618_s24  ;;  %3161 = vrot.lane.b32.xlu2 %v3153_v59, %s14618_s24  ;;  %v14590_v13 = vmax.f32 %v13044_v25, 0.0  ;;  %v14595_v57 = vmax.f32 %v13061_v0, 0.0 }
 0xe44   : > { %3850 = vrot.lane.b32.xlu1 %v3842_v58, %s14618_s24 }
 0xe4b   : > { %4539 = vrot.lane.b32.xlu0 %v4531_v5, %s14618_s24  ;;  %3852 = vrot.lane.b32.xlu2 %v3843_v46, %s14618_s24 }
 0xe4c   : > { %4541 = vrot.lane.b32.xlu1 %v4532_v12, %s14618_s24 }
 0xe53   : > { %5230 = vrot.lane.b32.xlu0 %v5221_v27, %s14618_s24  ;;  %5228 = vrot.lane.b32.xlu2 %v5220_v2, %s14618_s24 }
 0xe54   : > { %1789 = vrot.lane.b32.xlu1 %v1778_v53, %s14618_s24 }
 0xe5b   : > { %2476 = vrot.lane.b32.xlu2 %v2466_v32, %s14618_s24  ;;  %1787 = vrot.lane.b32.xlu0 %v1777_v9, %s14618_s24 }
 0xe5c   : > { %1099 = vrot.lane.b32.xlu1 %v14589_v15, %s14618_s24 }
 0xe63   : > { %2478 = vrot.lane.b32.xlu0 %v2467_v35, %s14618_s24  ;;  %1101 = vrot.lane.b32.xlu2 %v14593_v17, %s14618_s24 }
 0xe64   : > { %3167 = vrot.lane.b32.xlu1 %v14588_v4, %s14618_s24 }
 0xe6b   : > { %3165 = vrot.lane.b32.xlu0 %v3155_v61, %s14618_s24  ;;  %3854 = vrot.lane.b32.xlu2 %v14592_v49, %s14618_s24 }
 0xe6c   : > { %4543 = vrot.lane.b32.xlu1 %v14587_v10, %s14618_s24 }
 0xe73   : > { %3856 = vrot.lane.b32.xlu0 %v3845_v16, %s14618_s24  ;;  %4545 = vrot.lane.b32.xlu2 %v14591_v30, %s14618_s24 }
 0xe74   : > { %5234 = vrot.lane.b32.xlu1 %v14590_v13, %s14618_s24 }
 0xe7b   : > { %5232 = vrot.lane.b32.xlu0 %v14595_v57, %s14618_s24 }
 0xe7f   : > { %v5880_v30 = vpop.f32.mrf.mxu0  ;;  %v5834_v36 = vpop.f32.mrf.mxu1 }
 0xe8d   : > { %v1784_v23 = vpop.permute.xlu2 %1783 }
 0xe95   : > { %v2475_v52 = vpop.permute.xlu2 %2474 }
 0xe96   : > { %v2488_v57 = vmax.f32 %v2465_v34, %v2475_v52 }
 0xe9d   : > { %v3162_v3 = vpop.permute.xlu2 %3161 }
 0xea5   : > { %v1786_v1 = vpop.permute.xlu0 %1785 }
 0xea6   : > { %v1791_v10 = vsel %vm792_vm9, %v1784_v23, %v1786_v1  ;;  %v1799_v4 = vmax.f32 %v1776_v18, %v1786_v1  ;;  %v2473_v15 = vpop.permute.xlu1 %2472  ;;  %v3853_v18 = vpop.permute.xlu2 %3852 }
 0xea7   : > { %v13072_v55 = vmax.f32 %v1775_v14, %v1791_v10  ;;  %v2480_v11 = vsel %vm792_vm9, %v2473_v15, %v2475_v52  ;;  %v5881_v14 = vadd.f32 %v5880_v30, %v12803_v43  ;;  %v5835_v15 = vadd.f32 %v5834_v36, %v12803_v43 }
 0xea8   : > { %v13077_v13 = vmax.f32 %v2464_v8, %v2480_v11  ;;  %1807 = vrot.lane.b32.xlu2 %v1799_v4, %s14617_s25  ;;  %v5883_v11 = vpop.f32.mrf.mxu0 }
 0xea9   : > { %1805 = vrot.lane.b32.xlu1 %v13072_v55, %s14617_s25  ;;  %v5884_v43 = vadd.f32 %v5883_v11, %v12909_v31 }
 0xeaa   : > { %2494 = vrot.lane.b32.xlu0 %v13077_v13, %s14617_s25 }
 0xead   : > { %v1096_v40 = vpop.permute.xlu0 %1095 }
 0xeae   : > { %v1098_v10 = vpop.permute.xlu1 %1097  ;;  %v5229_v30 = vpop.permute.xlu2 %5228 }
 0xeaf   : > { %v5903_v50 = vpop.f32.mrf.mxu2 }
 0xeb0   : > { %v13086_v8 = vadd.f32 %v5903_v50, %v5881_v14  ;;  %v5857_v23 = vpop.f32.mrf.mxu3  ;;  %v1103_v14 = vsel %vm792_vm9, %v1096_v40, %v1098_v10 }
 0xeb1   : > { %v13088_v4 = vadd.f32 %v5857_v23, %v5835_v15  ;;  %v13104_v23 = vmax.f32 %v1087_v26, %v1103_v14 }
 0xeb2   : > { %v14594_v1 = vmax.f32 %v13086_v8, 0.0  ;;  %v14757_v6 = vmax.f32 %v13086_v8, 0.0 }
 0xeb3   : > { %v5909_v49 = vmax.f32 %v13088_v4, 0.0 }
 0xeb4   : > { %5919 = vrot.lane.b32.xlu2 %v14594_v1, %s14618_s24 }
 0xeb5   : > { %v3164_v17 = vpop.permute.xlu0 %3163  ;;  %5917 = vrot.lane.b32.xlu1 %v5909_v49, %s14618_s24 }
 0xeb6   : > { %v3851_v36 = vpop.permute.xlu1 %3850  ;;  %v3169_v39 = vsel %vm792_vm9, %v3162_v3, %v3164_v17  ;;  %v2477_v26 = vpop.permute.xlu2 %2476  ;;  %v3177_v47 = vmax.f32 %v3154_v28, %v3164_v17  ;;  %v3866_v28 = vmax.f32 %v3843_v46, %v3853_v18 }
 0xeb7   : > { %v5906_v15 = vpop.f32.mrf.mxu2  ;;  %v13122_v34 = vmax.f32 %v3153_v59, %v3169_v39  ;;  %v3858_v3 = vsel %vm792_vm9, %v3851_v36, %v3853_v18 }
 0xeb8   : > { %v13100_v50 = vadd.f32 %v5906_v15, %v5884_v43  ;;  %v1111_v43 = vmax.f32 %v1088_v56, %v1098_v10  ;;  %v13132_v56 = vmax.f32 %v3842_v58, %v3858_v3  ;;  %v5860_v17 = vpop.f32.mrf.mxu3 }
 0xeba   : > { %v5912_v1 = vmax.f32 %v13100_v50, 0.0 }
 0xebc   : > { %5923 = vrot.lane.b32.xlu0 %v5912_v1, %s14618_s24  ;;  %1117 = vrot.lane.b32.xlu2 %v13104_v23, %s14617_s25 }
 0xebd   : > { %v4540_v40 = vpop.permute.xlu0 %4539  ;;  %2496 = vrot.lane.b32.xlu1 %v2488_v57, %s14617_s25 }
 0xebe   : > { %v4542_v11 = vpop.permute.xlu1 %4541  ;;  %v1102_v33 = vpop.permute.xlu2 %1101 }
 0xebf   : > { %v4547_v19 = vsel %vm792_vm9, %v4540_v40, %v4542_v11  ;;  %v4555_v60 = vmax.f32 %v4532_v12, %v4542_v11 }
 0xec0   : > { %v13136_v45 = vmax.f32 %v4531_v5, %v4547_v19  ;;  %v5837_v5 = vpop.f32.mrf.mxu1 }
 0xec1   : > { %v5838_v10 = vadd.f32 %v5837_v5, %v12909_v31 }
 0xec3   : > { %v13162_v54 = vadd.f32 %v5860_v17, %v5838_v10 }
 0xec4   : > { %1119 = vrot.lane.b32.xlu0 %v1111_v43, %s14617_s25  ;;  %3185 = vrot.lane.b32.xlu2 %v3177_v47, %s14617_s25 }
 0xec5   : > { %v5231_v52 = vpop.permute.xlu0 %5230  ;;  %3183 = vrot.lane.b32.xlu1 %v13122_v34, %s14617_s25  ;;  %v5911_v42 = vmax.f32 %v13162_v54, 0.0  ;;  %v6474_v54 = vld [vmem:[%s14532_s5 + $0x78] sm:$0xff] }
 0xec6   : > { %v1790_v57 = vpop.permute.xlu1 %1789  ;;  %v5236_v41 = vsel %vm792_vm9, %v5229_v30, %v5231_v52  ;;  %v5244_v46 = vmax.f32 %v5221_v27, %v5231_v52  ;;  %v3855_v36 = vpop.permute.xlu2 %3854  ;;  %v14758_v52 = vmax.f32 %v12987_v37, 0.0  ;;  %6719 = vmatpush.msrb.mxu3 %v6474_v54 }
 0xec7   : > { %v13155_v18 = vmax.f32 %v5220_v2, %v5236_v41  ;;  %v1800_v31 = vmax.f32 %v1778_v53, %v1790_v57  ;;  %v14760_v41 = vmax.f32 %v13041_v48, 0.0 }
 0xecc   : > { %3872 = vrot.lane.b32.xlu0 %v13132_v56, %s14617_s25  ;;  %4561 = vrot.lane.b32.xlu2 %v13136_v45, %s14617_s25 }
 0xecd   : > { %v1788_v59 = vpop.permute.xlu0 %1787  ;;  %3874 = vrot.lane.b32.xlu1 %v3866_v28, %s14617_s25 }
 0xece   : > { %v1100_v7 = vpop.permute.xlu1 %1099  ;;  %v4546_v2 = vpop.permute.xlu2 %4545  ;;  %v1792_v15 = vsel %vm792_vm9, %v1788_v59, %v1790_v57  ;;  %v1112_v57 = vmax.f32 %v14758_v52, %v1102_v33  ;;  %v6519_v52 = vld [vmem:[%s14532_s5 + $0x1e0] sm:$0xff] }
 0xecf   : > { %v13146_v58 = vsel %vm792_vm9, %v1100_v7, %v1102_v33  ;;  %v13186_v53 = vmax.f32 %v1777_v9, %v1792_v15  ;;  %v14759_v7 = vmax.f32 %v13014_v51, 0.0  ;;  %v4556_v5 = vmax.f32 %v14760_v41, %v4546_v2 }
 0xed4   : > { %4563 = vrot.lane.b32.xlu0 %v4555_v60, %s14617_s25  ;;  %5252 = vrot.lane.b32.xlu2 %v5244_v46, %s14617_s25 }
 0xed5   : > { %v2479_v30 = vpop.permute.xlu0 %2478  ;;  %5250 = vrot.lane.b32.xlu1 %v13155_v18, %s14617_s25 }
 0xed6   : > { %v13164_v12 = vpop.permute.xlu1 %3167  ;;  %v2481_v62 = vsel %vm792_vm9, %v2477_v26, %v2479_v30  ;;  %v14756_v26 = vmax.f32 %v13061_v0, 0.0 }
 0xed7   : > { %v13172_v27 = vmax.f32 %v2466_v32, %v2481_v62  ;;  %v2489_v32 = vmax.f32 %v2467_v35, %v2479_v30  ;;  %v14761_v30 = vmax.f32 %v12963_v29, 0.0 }
 0xed9   : > { %v13249_v4 = vmax.f32 %v14761_v30, %v13146_v58  ;;  %v14762_v58 = vmax.f32 %v12990_v63, 0.0  ;;  %v6506_v63 = vld [vmem:[%s14532_s5 + $0x178] sm:$0xff]  ;;  %v6483_v30 = vld [vmem:[%s14532_s5 + $0xc0] sm:$0xff] }
 0xeda   : > { %6759 = vmatpush.msrb.mxu2 %v6506_v63  ;;  %v6497_v63 = vld [vmem:[%s14532_s5 + $0x130] sm:$0xff] }
 0xedb   : > { %v3178_v15 = vmax.f32 %v14762_v58, %v13164_v12 }
 0xedc   : > { %1811 = vrot.lane.b32.xlu0 %v1800_v31, %s14617_s25  ;;  %5921 = vrot.lane.b32.xlu2 %v5911_v42, %s14618_s24 }
 0xedd   : > { %2498 = vrot.lane.b32.xlu1 %v13172_v27, %s14617_s25  ;;  %v3166_v24 = vpop.permute.xlu0 %3165 }
 0xede   : > { %v4544_v14 = vpop.permute.xlu1 %4543  ;;  %v3170_v40 = vsel %vm792_vm9, %v3166_v24, %v13164_v12  ;;  %v6522_v12 = vld [vmem:[%s14532_s5 + $0x1f8] sm:$0xff] }
 0xedf   : > { %v13182_v20 = vsel %vm792_vm9, %v4544_v14, %v4546_v2  ;;  %v13197_v11 = vmax.f32 %v3155_v61, %v3170_v40  ;;  %v6489_v40 = vld [vmem:[%s14532_s5 + $0xf0] sm:$0xff]  ;;  %6779 = vmatpush.msrb.mxu0 %v6522_v12 }
 0xee4   : > { %1809 = vrot.lane.b32.xlu2 %v13186_v53, %s14617_s25 }
 0xee5   : > { %v3857_v39 = vpop.permute.xlu0 %3856 }
 0xee6   : > { %v3867_v22 = vmax.f32 %v3845_v16, %v3857_v39  ;;  %v13204_v21 = vpop.permute.xlu1 %5234  ;;  %v3859_v0 = vsel %vm792_vm9, %v3855_v36, %v3857_v39 }
 0xee7   : > { %v13225_v8 = vmax.f32 %v14759_v7, %v3859_v0  ;;  %v6486_v0 = vld [vmem:[%s14532_s5 + $0xd8] sm:$0xff]  ;;  %v6469_v7 = vld [vmem:[%s14532_s5 + $0x50] sm:$0xff] }
 0xeec   : > { %2500 = vrot.lane.b32.xlu2 %v2489_v32, %s14617_s25  ;;  %v6473_v32 = vld [vmem:[%s14532_s5 + $0x70] sm:$0xff] }
 0xeed   : > { %v5233_v9 = vpop.permute.xlu0 %5232  ;;  %6720 = vmatpush.msrb.mxu3 %v6473_v32  ;;  %v6480_v32 = vld [vmem:[%s14532_s5 + $0xa8] sm:$0xff] }
 0xeee   : > { %v5237_v35 = vsel %vm792_vm9, %v5233_v9, %v13204_v21  ;;  %v6521_v9 = vld [vmem:[%s14532_s5 + $0x1f0] sm:$0xff] }
 0xeef   : > { %v13210_v38 = vmax.f32 %v14756_v26, %v5237_v35  ;;  %v6472_v35 = vld [vmem:[%s14532_s5 + $0x68] sm:$0xff]  ;;  %v14763_v26 = vmax.f32 %v13017_v44, 0.0  ;;  %6780 = vmatpush.msrb.mxu0 %v6521_v9  ;;  %v6495_v9 = vld [vmem:[%s14532_s5 + $0x120] sm:$0xff] }
 0xef0   : > { %v6520_v44 = vld [vmem:[%s14532_s5 + $0x1e8] sm:$0xff]  ;;  %6721 = vmatpush.msrb.mxu3 %v6472_v35  ;;  %v6511_v35 = vld [vmem:[%s14532_s5 + $0x1a0] sm:$0xff] }
 0xef1   : > { %6781 = vmatpush.msrb.mxu0 %v6520_v44  ;;  %v6461_v44 = vld [vmem:[%s14532_s5 + $0x10] sm:$0xff] }
 0xef3   : > { %6782 = vmatpush.msrb.mxu0 %v6519_v52  ;;  %v6460_v52 = vld [vmem:[%s14532_s5 + $0x8] sm:$0xff] }
 0xef4   : > { %3187 = vrot.lane.b32.xlu2 %v13197_v11, %s14617_s25 }
 0xefc   : > { %3878 = vrot.lane.b32.xlu2 %v3867_v22, %s14617_s25  ;;  %v6505_v22 = vld [vmem:[%s14532_s5 + $0x170] sm:$0xff] }
 0xefd   : > { %6760 = vmatpush.msrb.mxu2 %v6505_v22  ;;  %v6479_v22 = vld [vmem:[%s14532_s5 + $0xa0] sm:$0xff] }
 0xf02   : > { %v1808_v61 = vpop.permute.xlu2 %1807 }
 0xf04   : > { %5254 = vrot.lane.b32.xlu2 %v13210_v38, %s14617_s25 }
 0xf0e   : > { %v5920_v43 = vpop.permute.xlu2 %5919 }
 0xf0f   : > { %v5933_v16 = vmax.f32 %v14757_v6, %v5920_v43  ;;  %v6488_v6 = vld [vmem:[%s14532_s5 + $0xe8] sm:$0xff] }
 0xf11   : > { %5941 = vrot.lane.b32.xlu1 %v5933_v16, %s14617_s25  ;;  %v6504_v16 = vld [vmem:[%s14532_s5 + $0x168] sm:$0xff] }
 0xf12   : > { %6761 = vmatpush.msrb.mxu2 %v6504_v16  ;;  %v6510_v16 = vld [vmem:[%s14532_s5 + $0x198] sm:$0xff] }
 0xf16   : > { %v1118_v47 = vpop.permute.xlu2 %1117 }
 0xf19   : > { %1123 = vrot.lane.b32.xlu1 %v1112_v57, %s14617_s25  ;;  %v6470_v57 = vld [vmem:[%s14532_s5 + $0x58] sm:$0xff] }
 0xf1b   : > { %v1806_v3 = vpop.permute.xlu1 %1805 }
 0xf1c   : > { %v1813_v19 = vsel %vm824_vm3, %v1806_v3, %v1808_v61  ;;  %v2495_v37 = vpop.permute.xlu0 %2494  ;;  %v13301_v61 = vmax.f32 %v14763_v26, %v13182_v20  ;;  %v6487_v20 = vld [vmem:[%s14532_s5 + $0xe0] sm:$0xff]  ;;  %v6462_v26 = vld [vmem:[%s14532_s5 + $0x18] sm:$0xff] }
 0xf1d   : > { %v1817_v28 = vmax.f32 %v13072_v55, %v1813_v19  ;;  %v6502_v19 = vld [vmem:[%s14532_s5 + $0x158] sm:$0xff] }
 0xf1e   : > { %v3186_v59 = vpop.permute.xlu2 %3185 }
 0xf1f   : > { %1820 = vst [vmem:[#allocation2 + $0x10] sm:$0xff] %v1817_v28 }
 0xf21   : > { %3876 = vrot.lane.b32.xlu1 %v13225_v8, %s14617_s25 }
 0xf26   : > { %v13229_v33 = vpop.permute.xlu2 %4561 }
 0xf27   : > { %v5918_v60 = vpop.permute.xlu1 %5917 }
 0xf28   : > { %v5925_v46 = vsel %vm792_vm9, %v5918_v60, %v5920_v43  ;;  %v6501_v60 = vld [vmem:[%s14532_s5 + $0x150] sm:$0xff] }
 0xf29   : > { %v13236_v55 = vmax.f32 %v5909_v49, %v5925_v46  ;;  %4567 = vrot.lane.b32.xlu1 %v4556_v5, %s14617_s25  ;;  %v6485_v5 = vld [vmem:[%s14532_s5 + $0xd0] sm:$0xff] }
 0xf2b   : > { %5939 = vrot.lane.b32.xlu0 %v13236_v55, %s14617_s25 }
 0xf2e   : > { %v5924_v51 = vpop.permute.xlu0 %5923  ;;  %v13241_v17 = vpop.permute.xlu2 %5252 }
 0xf2f   : > { %v5934_v10 = vmax.f32 %v5912_v1, %v5924_v51  ;;  %v2497_v48 = vpop.permute.xlu1 %2496 }
 0xf30   : > { %v2502_v36 = vsel %vm824_vm3, %v2495_v37, %v2497_v48 }
 0xf31   : > { %v2506_v49 = vmax.f32 %v13077_v13, %v2502_v36  ;;  %5945 = vrot.lane.b32.xlu2 %v5934_v10, %s14617_s25  ;;  %v14764_v10 = vmax.f32 %v13044_v25, 0.0  ;;  %v6500_v25 = vld [vmem:[%s14532_s5 + $0x148] sm:$0xff] }
 0xf33   : > { %2509 = vst [vmem:[#allocation2 + $0x20] sm:$0xff] %v2506_v49  ;;  %1121 = vrot.lane.b32.xlu0 %v13249_v4, %s14617_s25  ;;  %v5245_v48 = vmax.f32 %v14764_v10, %v13204_v21  ;;  %v6467_v21 = vld [vmem:[%s14532_s5 + $0x40] sm:$0xff]  ;;  %v6585_v10 = vld [vmem:[%s14532_s5 + $0x3f0] sm:$0xff] }
 0xf34   : > { %v6499_v49 = vld [vmem:[%s14532_s5 + $0x140] sm:$0xff] }
 0xf36   : > { %v1120_v62 = vpop.permute.xlu0 %1119  ;;  %v5922_v31 = vpop.permute.xlu2 %5921 }
 0xf37   : > { %v1125_v1 = vsel %vm824_vm3, %v1118_v47, %v1120_v62  ;;  %v5926_v50 = vsel %vm792_vm9, %v5922_v31, %v5924_v51  ;;  %v3184_v2 = vpop.permute.xlu1 %3183  ;;  %v6503_v47 = vld [vmem:[%s14532_s5 + $0x160] sm:$0xff]  ;;  %v6466_v31 = vld [vmem:[%s14532_s5 + $0x38] sm:$0xff]  ;;  %vm6093_vm9 = vcmask 1041409  }
 0xf38   : > { %v1129_v14 = vmax.f32 %v13104_v23, %v1125_v1  ;;  %v13260_v29 = vmax.f32 %v5911_v42, %v5926_v50  ;;  %v3191_v13 = vsel %vm824_vm3, %v3184_v2, %v3186_v59  ;;  %v6490_v42 = vld [vmem:[%s14532_s5 + $0xf8] sm:$0xff]  ;;  %6762 = vmatpush.msrb.mxu2 %v6503_v47  ;;  %v6515_v62 = vld [vmem:[%s14532_s5 + $0x1c0] sm:$0xff]  ;;  %v6509_v47 = vld [vmem:[%s14532_s5 + $0x190] sm:$0xff] }
 0xf39   : > { %v3195_v24 = vmax.f32 %v13122_v34, %v3191_v13  ;;  %6739 = vmatpush.msrb.mxu1 %v6490_v42  ;;  %v6518_v59 = vld [vmem:[%s14532_s5 + $0x1d8] sm:$0xff] }
 0xf3a   : > { %1131 = vst [vmem:[#allocation2] sm:$0xff] %v1129_v14  ;;  %5943 = vrot.lane.b32.xlu1 %v13260_v29, %s14617_s25  ;;  %6763 = vmatpush.msrb.mxu2 %v6502_v19  ;;  %v6482_v1 = vld [vmem:[%s14532_s5 + $0xb8] sm:$0xff]  ;;  %v6459_v19 = vld [vmem:[%s14532_s5] sm:$0xff] }
 0xf3b   : > { %3198 = vst [vmem:[#allocation2 + $0x30] sm:$0xff] %v3195_v24  ;;  %3189 = vrot.lane.b32.xlu0 %v3178_v15, %s14617_s25  ;;  %6740 = vmatpush.msrb.mxu1 %v6489_v40  ;;  %v6498_v2 = vld [vmem:[%s14532_s5 + $0x138] sm:$0xff]  ;;  %v6465_v24 = vld [vmem:[%s14532_s5 + $0x30] sm:$0xff]  ;;  %v6496_v40 = vld [vmem:[%s14532_s5 + $0x128] sm:$0xff] }
 0xf3c   : > { %6783 = vmatpush.msrb.mxu0 %v6518_v59  ;;  %6764 = vmatpush.msrb.mxu2 %v6501_v60  ;;  %v6514_v14 = vld [vmem:[%s14532_s5 + $0x1b8] sm:$0xff]  ;;  %v6491_v59 = vld [vmem:[%s14532_s5 + $0x100] sm:$0xff] }
 0xf3d   : > { %6741 = vmatpush.msrb.mxu1 %v6488_v6  ;;  %v6494_v6 = vld [vmem:[%s14532_s5 + $0x118] sm:$0xff] }
 0xf3e   : > { %v3873_v23 = vpop.permute.xlu0 %3872  ;;  %v1810_v3 = vpop.permute.xlu2 %1809  ;;  %6765 = vmatpush.msrb.mxu2 %v6500_v25  ;;  %v6586_v60 = vld [vmem:[%s14532_s5 + $0x3f8] sm:$0xff]  ;;  %v6535_v25 = vld [vmem:[%s14532_s5 + $0x260] sm:$0xff] }
 0xf3f   : > { %v3875_v34 = vpop.permute.xlu1 %3874  ;;  %6742 = vmatpush.msrb.mxu1 %v6487_v20  ;;  %v6493_v20 = vld [vmem:[%s14532_s5 + $0x110] sm:$0xff] }
 0xf40   : > { %v3880_v39 = vsel %vm824_vm3, %v3873_v23, %v3875_v34  ;;  %6766 = vmatpush.msrb.mxu2 %v6499_v49  ;;  %v6481_v23 = vld [vmem:[%s14532_s5 + $0xb0] sm:$0xff]  ;;  %v6534_v49 = vld [vmem:[%s14532_s5 + $0x258] sm:$0xff] }
 0xf41   : > { %v3884_v43 = vmax.f32 %v13132_v56, %v3880_v39  ;;  %v6471_v56 = vld [vmem:[%s14532_s5 + $0x60] sm:$0xff]  ;;  %6743 = vmatpush.msrb.mxu1 %v6486_v0  ;;  %v6513_v34 = vld [vmem:[%s14532_s5 + $0x1b0] sm:$0xff]  ;;  %v6508_v0 = vld [vmem:[%s14532_s5 + $0x188] sm:$0xff] }
 0xf42   : > { %6722 = vmatpush.msrb.mxu3 %v6471_v56  ;;  %6767 = vmatpush.msrb.mxu2 %v6498_v2  ;;  %v6463_v39 = vld [vmem:[%s14532_s5 + $0x20] sm:$0xff]  ;;  %v6477_v56 = vld [vmem:[%s14532_s5 + $0x90] sm:$0xff] }
 0xf43   : > { %3887 = vst [vmem:[#allocation2 + $0x40] sm:$0xff] %v3884_v43  ;;  %4565 = vrot.lane.b32.xlu0 %v13301_v61, %s14617_s25  ;;  %6744 = vmatpush.msrb.mxu1 %v6485_v5  ;;  %v6478_v43 = vld [vmem:[%s14532_s5 + $0x98] sm:$0xff]  ;;  %v6549_v2 = vld [vmem:[%s14532_s5 + $0x2d0] sm:$0xff] }
 0xf44   : > { %6723 = vmatpush.msrb.mxu3 %v6470_v57  ;;  %6768 = vmatpush.msrb.mxu2 %v6497_v63  ;;  %v6476_v57 = vld [vmem:[%s14532_s5 + $0x88] sm:$0xff]  ;;  %v6570_v5 = vld [vmem:[%s14532_s5 + $0x378] sm:$0xff]  ;;  %v6563_v63 = vld [vmem:[%s14532_s5 + $0x340] sm:$0xff] }
 0xf46   : > { %v4564_v28 = vpop.permute.xlu0 %4563  ;;  %6724 = vmatpush.msrb.mxu3 %v6469_v7  ;;  %v2501_v13 = vpop.permute.xlu2 %2500  ;;  %6769 = vmatpush.msrb.mxu2 %v6496_v40  ;;  %v6507_v7 = vld [vmem:[%s14532_s5 + $0x180] sm:$0xff]  ;;  %v6578_v40 = vld [vmem:[%s14532_s5 + $0x3b8] sm:$0xff] }
 0xf47   : > { %v4569_v37 = vsel %vm824_vm3, %v13229_v33, %v4564_v28  ;;  %v5251_v41 = vpop.permute.xlu1 %5250  ;;  %v6517_v33 = vld [vmem:[%s14532_s5 + $0x1d0] sm:$0xff]  ;;  %v6475_v28 = vld [vmem:[%s14532_s5 + $0x80] sm:$0xff] }
 0xf48   : > { %v4573_v46 = vmax.f32 %v13136_v45, %v4569_v37  ;;  %v5258_v51 = vsel %vm824_vm3, %v5251_v41, %v13241_v17  ;;  %v6468_v45 = vld [vmem:[%s14532_s5 + $0x48] sm:$0xff]  ;;  %6784 = vmatpush.msrb.mxu0 %v6517_v33  ;;  %6770 = vmatpush.msrb.mxu2 %v6495_v9  ;;  %v6538_v37 = vld [vmem:[%s14532_s5 + $0x278] sm:$0xff]  ;;  %v6569_v33 = vld [vmem:[%s14532_s5 + $0x370] sm:$0xff] }
 0xf49   : > { %v5262_v36 = vmax.f32 %v13155_v18, %v5258_v51  ;;  %v6484_v17 = vld [vmem:[%s14532_s5 + $0xc8] sm:$0xff]  ;;  %6725 = vmatpush.msrb.mxu3 %v6468_v45  ;;  %v6554_v41 = vld [vmem:[%s14532_s5 + $0x2f8] sm:$0xff]  ;;  %v6553_v51 = vld [vmem:[%s14532_s5 + $0x2f0] sm:$0xff] }
 0xf4a   : > { %4576 = vst [vmem:[#allocation2 + $0x50] sm:$0xff] %v4573_v46  ;;  %v6516_v18 = vld [vmem:[%s14532_s5 + $0x1c8] sm:$0xff]  ;;  %6745 = vmatpush.msrb.mxu1 %v6484_v17  ;;  %6771 = vmatpush.msrb.mxu2 %v6494_v6  ;;  %v6537_v46 = vld [vmem:[%s14532_s5 + $0x270] sm:$0xff] }
 0xf4b   : > { %5265 = vst [vmem:[#allocation2 + $0x60] sm:$0xff] %v5262_v36  ;;  %5256 = vrot.lane.b32.xlu0 %v5245_v48, %s14617_s25  ;;  %6785 = vmatpush.msrb.mxu0 %v6516_v18  ;;  %v6536_v48 = vld [vmem:[%s14532_s5 + $0x268] sm:$0xff]  ;;  %v6551_v18 = vld [vmem:[%s14532_s5 + $0x2e0] sm:$0xff]  ;;  %v6577_v9 = vld [vmem:[%s14532_s5 + $0x3b0] sm:$0xff] }
 0xf4c   : > { %6726 = vmatpush.msrb.mxu3 %v6467_v21  ;;  %6746 = vmatpush.msrb.mxu1 %v6483_v30  ;;  %v6552_v36 = vld [vmem:[%s14532_s5 + $0x2e8] sm:$0xff]  ;;  %v6567_v21 = vld [vmem:[%s14532_s5 + $0x360] sm:$0xff] }
 0xf4d   : > { %6786 = vmatpush.msrb.mxu0 %v6515_v62  ;;  %6772 = vmatpush.msrb.mxu2 %v6493_v20  ;;  %v6568_v45 = vld [vmem:[%s14532_s5 + $0x368] sm:$0xff]  ;;  %v6583_v30 = vld [vmem:[%s14532_s5 + $0x3e0] sm:$0xff]  ;;  %v6550_v62 = vld [vmem:[%s14532_s5 + $0x2d8] sm:$0xff] }
 0xf4e   : > { %v1812_v50 = vpop.permute.xlu0 %1811  ;;  %6727 = vmatpush.msrb.mxu3 %v6466_v31  ;;  %6747 = vmatpush.msrb.mxu1 %v6482_v1  ;;  %v6584_v17 = vld [vmem:[%s14532_s5 + $0x3e8] sm:$0xff]  ;;  %v6566_v31 = vld [vmem:[%s14532_s5 + $0x358] sm:$0xff]  ;;  %v6559_v20 = vld [vmem:[%s14532_s5 + $0x320] sm:$0xff] }
 0xf4f   : > { %v1814_v58 = vsel %vm824_vm3, %v1810_v3, %v1812_v50  ;;  %v2499_v15 = vpop.permute.xlu1 %2498  ;;  %6787 = vmatpush.msrb.mxu0 %v6514_v14  ;;  %v6492_v3 = vld [vmem:[%s14532_s5 + $0x108] sm:$0xff]  ;;  %v6582_v1 = vld [vmem:[%s14532_s5 + $0x3d8] sm:$0xff]  ;;  %v6533_v50 = vld [vmem:[%s14532_s5 + $0x250] sm:$0xff] }
 0xf50   : > { %v1818_v54 = vmax.f32 %v13186_v53, %v1814_v58  ;;  %v2503_v42 = vsel %vm824_vm3, %v2499_v15, %v2501_v13  ;;  %v6464_v53 = vld [vmem:[%s14532_s5 + $0x28] sm:$0xff]  ;;  %6728 = vmatpush.msrb.mxu3 %v6465_v24  ;;  %6748 = vmatpush.msrb.mxu1 %v6481_v23  ;;  %v6565_v14 = vld [vmem:[%s14532_s5 + $0x350] sm:$0xff] }
 0xf51   : > { %v2507_v12 = vmax.f32 %v13172_v27, %v2503_v42  ;;  %v6512_v27 = vld [vmem:[%s14532_s5 + $0x1a8] sm:$0xff]  ;;  %6788 = vmatpush.msrb.mxu0 %v6513_v34  ;;  %6773 = vmatpush.msrb.mxu2 %v6492_v3  ;;  %v6581_v13 = vld [vmem:[%s14532_s5 + $0x3d0] sm:$0xff]  ;;  %v6547_v42 = vld [vmem:[%s14532_s5 + $0x2c0] sm:$0xff] }
 0xf52   : > { %1821 = vst [vmem:[#allocation2 + $0x18] sm:$0xff] %v1818_v54  ;;  %6729 = vmatpush.msrb.mxu3 %v6464_v53  ;;  %6749 = vmatpush.msrb.mxu1 %v6480_v32  ;;  %v6532_v58 = vld [vmem:[%s14532_s5 + $0x248] sm:$0xff]  ;;  %v6531_v54 = vld [vmem:[%s14532_s5 + $0x240] sm:$0xff]  ;;  %v6546_v53 = vld [vmem:[%s14532_s5 + $0x2b8] sm:$0xff] }
 0xf53   : > { %2510 = vst [vmem:[#allocation2 + $0x28] sm:$0xff] %v2507_v12  ;;  %6789 = vmatpush.msrb.mxu0 %v6512_v27  ;;  %6774 = vmatpush.msrb.mxu2 %v6491_v59  ;;  %v6548_v15 = vld [vmem:[%s14532_s5 + $0x2c8] sm:$0xff]  ;;  %v6579_v34 = vld [vmem:[%s14532_s5 + $0x3c0] sm:$0xff]  ;;  %v6530_v12 = vld [vmem:[%s14532_s5 + $0x238] sm:$0xff] }
 0xf54   : > { %6730 = vmatpush.msrb.mxu3 %v6463_v39  ;;  %6750 = vmatpush.msrb.mxu1 %v6479_v22  ;;  %v6564_v24 = vld [vmem:[%s14532_s5 + $0x348] sm:$0xff]  ;;  %v6562_v32 = vld [vmem:[%s14532_s5 + $0x338] sm:$0xff]  ;;  %v6529_v27 = vld [vmem:[%s14532_s5 + $0x230] sm:$0xff] }
 0xf55   : > { %6790 = vmatpush.msrb.mxu0 %v6511_v35  ;;  %6839 = vmatpush.msra.mxu2 %v6570_v5  ;;  %v6580_v23 = vld [vmem:[%s14532_s5 + $0x3c8] sm:$0xff]  ;;  %v6545_v39 = vld [vmem:[%s14532_s5 + $0x2b0] sm:$0xff]  ;;  %v6558_v3 = vld [vmem:[%s14532_s5 + $0x318] sm:$0xff] }
 0xf56   : > { %6731 = vmatpush.msrb.mxu3 %v6462_v26  ;;  %6751 = vmatpush.msrb.mxu1 %v6478_v43  ;;  %v6561_v22 = vld [vmem:[%s14532_s5 + $0x330] sm:$0xff]  ;;  %v6528_v35 = vld [vmem:[%s14532_s5 + $0x228] sm:$0xff] }
 0xf57   : > { %6791 = vmatpush.msrb.mxu0 %v6510_v16  ;;  %6840 = vmatpush.msra.mxu2 %v6569_v33  ;;  %v6544_v26 = vld [vmem:[%s14532_s5 + $0x2a8] sm:$0xff]  ;;  %v6541_v59 = vld [vmem:[%s14532_s5 + $0x290] sm:$0xff] }
 0xf58   : > { %6732 = vmatpush.msrb.mxu3 %v6461_v44  ;;  %6752 = vmatpush.msrb.mxu1 %v6477_v56  ;;  %v6560_v6 = vld [vmem:[%s14532_s5 + $0x328] sm:$0xff]  ;;  %v6527_v44 = vld [vmem:[%s14532_s5 + $0x220] sm:$0xff] }
 0xf59   : > { %6792 = vmatpush.msrb.mxu0 %v6509_v47  ;;  %6841 = vmatpush.msra.mxu2 %v6568_v45  ;;  %v6576_v16 = vld [vmem:[%s14532_s5 + $0x3a8] sm:$0xff]  ;;  %v6543_v56 = vld [vmem:[%s14532_s5 + $0x2a0] sm:$0xff] }
 0xf5a   : > { %6733 = vmatpush.msrb.mxu3 %v6460_v52  ;;  %6753 = vmatpush.msrb.mxu1 %v6476_v57  ;;  %v6575_v47 = vld [vmem:[%s14532_s5 + $0x3a0] sm:$0xff]  ;;  %v6526_v52 = vld [vmem:[%s14532_s5 + $0x218] sm:$0xff]  ;;  %v6540_v5 = vld [vmem:[%s14532_s5 + $0x288] sm:$0xff] }
 0xf5b   : > { %6793 = vmatpush.msrb.mxu0 %v6508_v0  ;;  %6842 = vmatpush.msra.mxu2 %v6567_v21  ;;  %v6542_v57 = vld [vmem:[%s14532_s5 + $0x298] sm:$0xff]  ;;  %v6556_v33 = vld [vmem:[%s14532_s5 + $0x308] sm:$0xff]  ;;  %v6539_v45 = vld [vmem:[%s14532_s5 + $0x280] sm:$0xff] }
 0xf5c   : > { %6734 = vmatpush.msrb.mxu3 %v6459_v19  ;;  %6754 = vmatpush.msrb.mxu1 %v6475_v28  ;;  %v6574_v0 = vld [vmem:[%s14532_s5 + $0x398] sm:$0xff]  ;;  %v13643_v19 = vpop.permute.xlu2 %3187  ;;  %v6525_v28 = vld [vmem:[%s14532_s5 + $0x210] sm:$0xff] }
 0xf5d   : > { %6794 = vmatpush.msrb.mxu0 %v6507_v7  ;;  %6843 = vmatpush.msra.mxu2 %v6566_v31  ;;  %v6557_v7 = vld [vmem:[%s14532_s5 + $0x310] sm:$0xff]  ;;  %v5958_v31 = vld [vmem:[#allocation2 + $0x20] sm:$0x1] }
 0xf5e   : > { %6799 = vmatpush.msra.mxu3 %v6538_v37  ;;  %6819 = vmatpush.msra.mxu1 %v6554_v41  ;;  %v6573_v37 = vld [vmem:[%s14532_s5 + $0x390] sm:$0xff]  ;;  %v6524_v41 = vld [vmem:[%s14532_s5 + $0x208] sm:$0xff] }
 0xf5f   : > { %6859 = vmatpush.msra.mxu0 %v6586_v60  ;;  %6844 = vmatpush.msra.mxu2 %v6565_v14  ;;  %v5957_v60 = vld [vmem:[#allocation2 + $0x10] sm:$0x1]  ;;  %v13689_v21 = vld [vmem:[#allocation2 + $0x14] sm:$0x1] }
 0xf60   : > { %6800 = vmatpush.msra.mxu3 %v6537_v46  ;;  %6820 = vmatpush.msra.mxu1 %v6553_v51  ;;  %v13663_v46 = vld [vmem:[#allocation2 + $0x11] sm:$0x1] }
 0xf61   : > { %6860 = vmatpush.msra.mxu0 %v6585_v10  ;;  %6845 = vmatpush.msra.mxu2 %v6564_v24  ;;  %v6572_v10 = vld [vmem:[%s14532_s5 + $0x388] sm:$0xff] }
 0xf62   : > { %6801 = vmatpush.msra.mxu3 %v6536_v48  ;;  %6821 = vmatpush.msra.mxu1 %v6552_v36  ;;  %v6523_v48 = vld [vmem:[%s14532_s5 + $0x200] sm:$0xff]  ;;  %v13676_v36 = vld [vmem:[#allocation2 + $0x12] sm:$0x1] }
 0xf63   : > { %6861 = vmatpush.msra.mxu0 %v6584_v17  ;;  %6846 = vmatpush.msra.mxu2 %v6563_v63  ;;  %v6555_v17 = vld [vmem:[%s14532_s5 + $0x300] sm:$0xff] }
 0xf64   : > { %6802 = vmatpush.msra.mxu3 %v6535_v25  ;;  %6822 = vmatpush.msra.mxu1 %v6551_v18  ;;  %v6571_v25 = vld [vmem:[%s14532_s5 + $0x380] sm:$0xff]  ;;  %v13687_v18 = vld [vmem:[#allocation2 + $0x13] sm:$0x1] }
 0xf65   : > { %6862 = vmatpush.msra.mxu0 %v6583_v30  ;;  %6847 = vmatpush.msra.mxu2 %v6562_v32  ;;  %v13691_v30 = vld [vmem:[#allocation2 + $0x15] sm:$0x1]  ;;  %v6168_v14 = vrot.slane %v13687_v18, 7  ;;  %v5974_v63 = vld [vmem:[#allocation2 + $0x22] sm:$0x1] }
 0xf66   : > { %6803 = vmatpush.msra.mxu3 %v6534_v49  ;;  %6823 = vmatpush.msra.mxu1 %v6550_v62  ;;  %v13693_v49 = vld [vmem:[#allocation2 + $0x16] sm:$0x1]  ;;  %v13695_v62 = vld [vmem:[#allocation2 + $0x17] sm:$0x1]  ;;  %v13706_v32 = vld [vmem:[#allocation2 + $0x24] sm:$0x1] }
 0xf67   : > { %6863 = vmatpush.msra.mxu0 %v6582_v1  ;;  %6848 = vmatpush.msra.mxu2 %v6561_v22  ;;  %v6092_v1 = vrot.slane %v5957_v60, 7  ;;  %v6237_v24 = vrot.slane %v13693_v49, 7  ;;  %v5960_v22 = vld [vmem:[#allocation2 + $0x40] sm:$0x1] }
 0xf68   : > { %6804 = vmatpush.msra.mxu3 %v6533_v50  ;;  %6824 = vmatpush.msra.mxu1 %v6549_v2  ;;  %v6122_v50 = vrot.slane %v13663_v46, 7  ;;  %v6145_v2 = vrot.slane %v13676_v36, 7  ;;  %v5962_v46 = vld [vmem:[#allocation2 + $0x60] sm:$0x1] }
 0xf69   : > { %6864 = vmatpush.msra.mxu0 %v6581_v13  ;;  %6849 = vmatpush.msra.mxu2 %v6560_v6  ;;  %v6191_v13 = vrot.slane %v13689_v21, 7 }
 0xf6a   : > { %6805 = vmatpush.msra.mxu3 %v6532_v58  ;;  %6825 = vmatpush.msra.mxu1 %v6548_v15  ;;  %v6214_v58 = vrot.slane %v13691_v30, 7  ;;  %v5966_v15 = vld [vmem:[#allocation2 + $0x21] sm:$0x1] }
 0xf6b   : > { %6865 = vmatpush.msra.mxu0 %v6580_v23  ;;  %6850 = vmatpush.msra.mxu2 %v6559_v20  ;;  %v6260_v23 = vrot.slane %v13695_v62, 7  ;;  %v6124_v6 = vrot.slane %v5966_v15, 6  ;;  %v6193_v20 = vrot.slane %v13706_v32, 6  ;;  %v5977_v15 = vld [vmem:[#allocation2 + $0x52] sm:$0x1] }
 0xf6c   : > { %6806 = vmatpush.msra.mxu3 %v6531_v54  ;;  %6826 = vmatpush.msra.mxu1 %v6547_v42  ;;  %v5956_v54 = vld [vmem:[#allocation2] sm:$0x1]  ;;  %v6095_v42 = vrot.slane %v5958_v31, 6 }
 0xf6d   : > { %6866 = vmatpush.msra.mxu0 %v6579_v34  ;;  %6851 = vmatpush.msra.mxu2 %v6558_v3  ;;  %v3879_v34 = vpop.permute.xlu2 %3878  ;;  %v6101_v3 = vrot.slane %v5960_v22, 4 }
 0xf6e   : > { %6807 = vmatpush.msra.mxu3 %v6530_v12  ;;  %6827 = vmatpush.msra.mxu1 %v6546_v53  ;;  %v13704_v53 = vld [vmem:[#allocation2 + $0x23] sm:$0x1] }
 0xf6f   : > { %6867 = vmatpush.msra.mxu0 %v6578_v40  ;;  %6852 = vmatpush.msra.mxu2 %v6557_v7  ;;  %v13708_v40 = vld [vmem:[#allocation2 + $0x25] sm:$0x1]  ;;  %v5972_v7 = vld [vmem:[#allocation2 + $0x2] sm:$0x1] }
 0xf70   : > { %6808 = vmatpush.msra.mxu3 %v6529_v27  ;;  %6828 = vmatpush.msra.mxu1 %v6545_v39  ;;  %v5959_v39 = vld [vmem:[#allocation2 + $0x30] sm:$0x1]  ;;  %v6146_v31 = vsel %vm6093_vm9, %v6145_v2, %v5972_v7 }
 0xf71   : > { %6868 = vmatpush.msra.mxu0 %v6577_v9  ;;  %6853 = vmatpush.msra.mxu2 %v6556_v33  ;;  %v5964_v9 = vld [vmem:[#allocation2 + $0x1] sm:$0x1] }
 0xf72   : > { %6809 = vmatpush.msra.mxu3 %v6528_v35  ;;  %6829 = vmatpush.msra.mxu1 %v6544_v26  ;;  %v6094_v26 = vsel %vm6093_vm9, %v6092_v1, %v5956_v54  ;;  %v5983_v54 = vld [vmem:[#allocation2 + $0x33] sm:$0x1] }
 0xf73   : > { %6869 = vmatpush.msra.mxu0 %v6576_v16  ;;  %6854 = vmatpush.msra.mxu2 %v6555_v17  ;;  %v6147_v16 = vrot.slane %v5974_v63, 6 }
 0xf74   : > { %6810 = vmatpush.msra.mxu3 %v6527_v44  ;;  %6830 = vmatpush.msra.mxu1 %v6543_v56  ;;  %v5967_v44 = vld [vmem:[#allocation2 + $0x31] sm:$0x1]  ;;  %v6170_v56 = vrot.slane %v13704_v53, 6 }
 0xf75   : > { %6870 = vmatpush.msra.mxu0 %v6575_v47  ;;  %v13715_v47 = vld [vmem:[#allocation2 + $0x26] sm:$0x1] }
 0xf76   : > { %6811 = vmatpush.msra.mxu3 %v6526_v52  ;;  %6831 = vmatpush.msra.mxu1 %v6542_v57  ;;  %v5961_v52 = vld [vmem:[#allocation2 + $0x50] sm:$0x1]  ;;  %v6098_v57 = vrot.slane %v5959_v39, 5  ;;  %v6239_v60 = vrot.slane %v13715_v47, 6  ;;  %v5985_v39 = vld [vmem:[#allocation2 + $0x53] sm:$0x1] }
 0xf77   : > { %6871 = vmatpush.msra.mxu0 %v6574_v0  ;;  %v6123_v0 = vsel %vm6093_vm9, %v6122_v50, %v5964_v9  ;;  %v6104_v33 = vrot.slane %v5961_v52, 3  ;;  %v5978_v52 = vld [vmem:[#allocation2 + $0x62] sm:$0x1]  ;;  %v6176_v7 = vrot.slane %v5985_v39, 3  ;;  %v6649_v47 = vld [vmem:[%s14532_s5 + $0x5f0] sm:$0xff] }
 0xf78   : > { %6812 = vmatpush.msra.mxu3 %v6525_v28  ;;  %6832 = vmatpush.msra.mxu1 %v6541_v59  ;;  %v6216_v28 = vrot.slane %v13708_v40, 6  ;;  %v5968_v59 = vld [vmem:[#allocation2 + $0x41] sm:$0x1] }
 0xf79   : > { %6872 = vmatpush.msra.mxu0 %v6573_v37  ;;  %v5975_v37 = vld [vmem:[#allocation2 + $0x32] sm:$0x1]  ;;  %v6128_v17 = vrot.slane %v5968_v59, 4 }
 0xf7a   : > { %6813 = vmatpush.msra.mxu3 %v6524_v41  ;;  %6833 = vmatpush.msra.mxu1 %v6540_v5  ;;  %v6126_v41 = vrot.slane %v5967_v44, 5  ;;  %v5980_v5 = vld [vmem:[#allocation2 + $0x3] sm:$0x1]  ;;  %v6149_v1 = vrot.slane %v5975_v37, 5  ;;  %v5993_v37 = vld [vmem:[#allocation2 + $0x54] sm:$0x1] }
 0xf7b   : > { %6873 = vmatpush.msra.mxu0 %v6572_v10  ;;  %v5969_v10 = vld [vmem:[#allocation2 + $0x51] sm:$0x1]  ;;  %v6169_v22 = vsel %vm6093_vm9, %v6168_v14, %v5980_v5  ;;  %v6153_v14 = vrot.slane %v5977_v15, 3 }
 0xf7c   : > { %6814 = vmatpush.msra.mxu3 %v6523_v48  ;;  %6834 = vmatpush.msra.mxu1 %v6539_v45  ;;  %v6125_v48 = vsel %vm6096_vm1, %v6124_v6, %v6123_v0  ;;  %v13723_v45 = vld [vmem:[#allocation2 + $0x61] sm:$0x1]  ;;  %v6130_v53 = vrot.slane %v5969_v10, 3  ;;  %v5991_v6 = vld [vmem:[#allocation2 + $0x34] sm:$0x1] }
 0xf7d   : > { %6874 = vmatpush.msra.mxu0 %v6571_v25  ;;  %v5976_v25 = vld [vmem:[#allocation2 + $0x42] sm:$0x1]  ;;  %v5992_v0 = vld [vmem:[#allocation2 + $0x44] sm:$0x1] }
 0xf83   : > { %v13611_v43 = vpop.permute.xlu1 %5941 }
 0xf8b   : > { %v13665_v51 = vpop.permute.xlu1 %1123 }
 0xf93   : > { %v3877_v12 = vpop.permute.xlu1 %3876 }
 0xf94   : > { %v3881_v27 = vsel %vm824_vm3, %v3877_v12, %v3879_v34  ;;  %v6107_v34 = vrot.slane %v5962_v46, 2  ;;  %v6127_v12 = vsel %vm6099_vm4, %v6126_v41, %v6125_v48  ;;  %v6195_v41 = vrot.slane %v5991_v6, 5 }
 0xf95   : > { %v3885_v35 = vmax.f32 %v13225_v8, %v3881_v27  ;;  %v6097_v8 = vsel %vm6096_vm1, %v6095_v42, %v6094_v26  ;;  %v5988_v42 = vld [vmem:[#allocation2 + $0x4] sm:$0x1]  ;;  %v5984_v27 = vld [vmem:[#allocation2 + $0x43] sm:$0x1]  ;;  %v6148_v26 = vsel %vm6096_vm1, %v6147_v16, %v6146_v31  ;;  %v6129_v16 = vsel %vm6102_vm5, %v6128_v17, %v6127_v12  ;;  %v13752_v17 = vld [vmem:[#allocation2 + $0x45] sm:$0x1] }
 0xf96   : > { %v6100_v36 = vsel %vm6099_vm4, %v6098_v57, %v6097_v8  ;;  %v6151_v57 = vrot.slane %v5976_v25, 4  ;;  %v6192_v18 = vsel %vm6093_vm9, %v6191_v13, %v5988_v42  ;;  %v5986_v8 = vld [vmem:[#allocation2 + $0x63] sm:$0x1]  ;;  %v6174_v59 = vrot.slane %v5984_v27, 4  ;;  %v13754_v25 = vpop.permute.xlu2 %5254 }
 0xf97   : > { %3888 = vst [vmem:[#allocation2 + $0x48] sm:$0xff] %v3885_v35  ;;  %v6103_v50 = vsel %vm6102_vm5, %v6101_v3, %v6100_v36  ;;  %v6132_v35 = vrot.slane %v13723_v45, 2  ;;  %v6172_v3 = vrot.slane %v5983_v54, 5  ;;  %v6150_v46 = vsel %vm6099_vm4, %v6149_v1, %v6148_v26  ;;  %v5999_v45 = vld [vmem:[#allocation2 + $0x35] sm:$0x1] }
 0xf98   : > { %v6106_v9 = vsel %vm6105_vm6, %v6104_v33, %v6103_v50  ;;  %v13744_v33 = vld [vmem:[#allocation2 + $0x64] sm:$0x1]  ;;  %v6194_v21 = vsel %vm6096_vm1, %v6193_v20, %v6192_v18  ;;  %v6197_v13 = vrot.slane %v5992_v0, 4  ;;  %v6152_v10 = vsel %vm6102_vm5, %v6151_v57, %v6150_v46  ;;  %v13759_v20 = vld [vmem:[#allocation2 + $0x55] sm:$0x1] }
 0xf99   : > { %v6109_v5 = vsel %vm6108_vm7, %v6107_v34, %v6106_v9  ;;  %v6155_v48 = vrot.slane %v5978_v52, 2  ;;  %v6178_v32 = vrot.slane %v5986_v8, 2  ;;  %v6199_v50 = vrot.slane %v5993_v37, 3  ;;  %v13781_v52 = vld [vmem:[#allocation2 + $0x37] sm:$0x1] }
 0xf9a   : > { %v6154_v42 = vsel %vm6105_vm6, %v6153_v14, %v6152_v10  ;;  %v6196_v34 = vsel %vm6099_vm4, %v6195_v41, %v6194_v21  ;;  %v6201_v12 = vrot.slane %v13744_v33, 2  ;;  %v6220_v30 = vrot.slane %v13752_v17, 4  ;;  %v13794_v37 = vld [vmem:[#allocation2 + $0x65] sm:$0x1]  ;;  %v13798_v46 = vld [vmem:[#allocation2 + $0x47] sm:$0x1] }
 0xf9b   : > { %v13756_v31 = vpop.permute.xlu1 %4567  ;;  %v6198_v39 = vsel %vm6102_vm5, %v6197_v13, %v6196_v34  ;;  %v6222_v6 = vrot.slane %v13759_v20, 3  ;;  %v6156_v14 = vsel %vm6108_vm7, %v6155_v48, %v6154_v42  ;;  %v13800_v21 = vld [vmem:[#allocation2 + $0x57] sm:$0x1]  ;;  %v6602_v10 = vld [vmem:[%s14532_s5 + $0x478] sm:$0xff] }
 0xf9c   : > { %v13787_v40 = vsel %vm6105_vm6, %v6199_v50, %v6198_v39  ;;  %v6618_v48 = vld [vmem:[%s14532_s5 + $0x4f8] sm:$0xff]  ;;  %v6633_v39 = vld [vmem:[%s14532_s5 + $0x570] sm:$0xff] }
 0xf9d   : > { %v5940_v63 = vpop.permute.xlu0 %5939  ;;  %v6614_v33 = vld [vmem:[%s14532_s5 + $0x4d8] sm:$0xff] }
 0xf9e   : > { %v5947_v2 = vsel %vm824_vm3, %v5940_v63, %v13611_v43  ;;  %v6171_v43 = vsel %vm6096_vm1, %v6170_v56, %v6169_v22  ;;  %v6131_v56 = vsel %vm6105_vm6, %v6130_v53, %v6129_v16  ;;  %v6004_v53 = vld [vmem:[#allocation2 + $0x6] sm:$0x1]  ;;  %v6218_v22 = vrot.slane %v5999_v45, 5  ;;  %v13816_v45 = vld [vmem:[#allocation2 + $0x67] sm:$0x1] }
 0xf9f   : > { %v5951_v44 = vmax.f32 %v13236_v55, %v5947_v2  ;;  %v5996_v55 = vld [vmem:[#allocation2 + $0x5] sm:$0x1]  ;;  %v6173_v36 = vsel %vm6099_vm4, %v6172_v3, %v6171_v43  ;;  %v13772_v2 = vld [vmem:[#allocation2 + $0x36] sm:$0x1]  ;;  %v6133_v0 = vsel %vm6108_vm7, %v6132_v35, %v6131_v56  ;;  %v6238_v16 = vsel %vm6093_vm9, %v6237_v24, %v6004_v53 }
 0xfa0   : > { %v6175_v1 = vsel %vm6102_vm5, %v6174_v59, %v6173_v36  ;;  %v6215_v15 = vsel %vm6093_vm9, %v6214_v58, %v5996_v55  ;;  %v6012_v58 = vld [vmem:[#allocation2 + $0x7] sm:$0x1]  ;;  %v6241_v55 = vrot.slane %v13772_v2, 5  ;;  %v13814_v36 = vld [vmem:[#allocation2 + $0x66] sm:$0x1]  ;;  %v6266_v2 = vrot.slane %v13798_v46, 4 }
 0xfa1   : > { %5954 = vst [vmem:[#allocation2 + $0x70] sm:$0xff] %v5951_v44  ;;  %v6177_v63 = vsel %vm6105_vm6, %v6176_v7, %v6175_v1  ;;  %v6217_v26 = vsel %vm6096_vm1, %v6216_v28, %v6215_v15  ;;  %v13779_v44 = vld [vmem:[#allocation2 + $0x46] sm:$0x1]  ;;  %v13789_v28 = vld [vmem:[#allocation2 + $0x56] sm:$0x1]  ;;  %v6261_v13 = vsel %vm6093_vm9, %v6260_v23, %v6012_v58  ;;  %v5946_v23 = vpop.permute.xlu2 %5945  ;;  %v6634_v1 = vld [vmem:[%s14532_s5 + $0x578] sm:$0xff] }
 0xfa2   : > { %v6219_v41 = vsel %vm6099_vm4, %v6218_v22, %v6217_v26  ;;  %v6601_v15 = vld [vmem:[%s14532_s5 + $0x470] sm:$0xff]  ;;  %v6243_v42 = vrot.slane %v13779_v44, 4  ;;  %v6600_v26 = vld [vmem:[%s14532_s5 + $0x468] sm:$0xff] }
 0xfa5   : > { %v1122_v54 = vpop.permute.xlu0 %1121 }
 0xfa6   : > { %v1126_v27 = vsel %vm824_vm3, %v1122_v54, %v13665_v51  ;;  %v6014_v51 = vld [vmem:[#allocation2 + $0x27] sm:$0x1]  ;;  %v6240_v54 = vsel %vm6096_vm1, %v6239_v60, %v6238_v16  ;;  %v6245_v60 = vrot.slane %v13789_v28, 3  ;;  %v6270_v28 = vrot.slane %v13816_v45, 2 }
 0xfa7   : > { %v1130_v9 = vmax.f32 %v13249_v4, %v1126_v27  ;;  %v6179_v4 = vsel %vm6108_vm7, %v6178_v32, %v6177_v63  ;;  %v6262_v62 = vrot.slane %v6014_v51, 6  ;;  %v6650_v32 = vld [vmem:[%s14532_s5 + $0x5f8] sm:$0xff]  ;;  %v6264_v63 = vrot.slane %v13781_v52, 5  ;;  %v6617_v27 = vld [vmem:[%s14532_s5 + $0x4f0] sm:$0xff] }
 0xfa8   : > { %v5963_v57 = vld [vmem:[#allocation2 + $0x70] sm:$0x1]  ;;  %v5971_v3 = vld [vmem:[#allocation2 + $0x71] sm:$0x1]  ;;  %v5979_v18 = vld [vmem:[#allocation2 + $0x72] sm:$0x1]  ;;  %v6221_v52 = vsel %vm6102_vm5, %v6220_v30, %v6219_v41  ;;  %v6242_v17 = vsel %vm6099_vm4, %v6241_v55, %v6240_v54 }
 0xfa9   : > { %1132 = vst [vmem:[#allocation2 + $0x8] sm:$0xff] %v1130_v9  ;;  %v6110_v8 = vrot.slane %v5963_v57, 1  ;;  %v6134_v43 = vrot.slane %v5971_v3, 1  ;;  %v6157_v59 = vrot.slane %v5979_v18, 1  ;;  %v5987_v7 = vld [vmem:[#allocation2 + $0x73] sm:$0x1]  ;;  %v6263_v22 = vsel %vm6096_vm1, %v6262_v62, %v6261_v13 }
 0xfaa   : > { %v6180_v35 = vrot.slane %v5987_v7, 1  ;;  %v5995_v44 = vld [vmem:[#allocation2 + $0x74] sm:$0x1]  ;;  %v6003_v51 = vld [vmem:[#allocation2 + $0x75] sm:$0x1]  ;;  %v6268_v57 = vrot.slane %v13800_v21, 3  ;;  %v6244_v20 = vsel %vm6102_vm5, %v6243_v42, %v6242_v17  ;;  %v6202_v13 = vsel %vm6108_vm7, %v6201_v12, %v13787_v40 }
 0xfab   : > { %v6112_v56 = vsel %vm6111_vm8, %v6110_v8, %v6109_v5  ;;  %v6135_v49 = vsel %vm6111_vm8, %v6134_v43, %v6133_v0  ;;  %v6158_v24 = vsel %vm6111_vm8, %v6157_v59, %v6156_v14  ;;  %v6224_v0 = vrot.slane %v13794_v37, 2  ;;  %v6011_v18 = vld [vmem:[#allocation2 + $0x76] sm:$0x1]  ;;  %v6019_v30 = vld [vmem:[#allocation2 + $0x77] sm:$0x1]  ;;  %v6648_v14 = vld [vmem:[%s14532_s5 + $0x5e8] sm:$0xff] }
 0xfac   : > { %6735 = vmatmul.f32.vlgmr.msrb.gmra.mxu3 %v6112_v56  ;;  %6755 = vmatmul.f32.vlgmr.msrb.gmra.mxu1 %v6135_v49  ;;  %v6181_v5 = vsel %vm6111_vm8, %v6180_v35, %v6179_v4  ;;  %v5944_v50 = vpop.permute.xlu1 %5943  ;;  %v6265_v4 = vsel %vm6099_vm4, %v6264_v63, %v6263_v22  ;;  %v6599_v8 = vld [vmem:[%s14532_s5 + $0x460] sm:$0xff]  ;;  %v6203_v59 = vrot.slane %v5995_v44, 1  ;;  %v6226_v7 = vrot.slane %v6003_v51, 1  ;;  %v6630_v62 = vld [vmem:[%s14532_s5 + $0x558] sm:$0xff]  ;;  %v6613_v54 = vld [vmem:[%s14532_s5 + $0x4d0] sm:$0xff] }
 0xfad   : > { %6775 = vmatmul.f32.vlgmr.msrb.gmra.mxu2 %v6158_v24  ;;  %6795 = vmatmul.f32.vlgmr.msrb.gmra.mxu0 %v6181_v5  ;;  %v5948_v34 = vsel %vm824_vm3, %v5944_v50, %v5946_v23  ;;  %v3190_v53 = vpop.permute.xlu0 %3189  ;;  %v6615_v43 = vld [vmem:[%s14532_s5 + $0x4e0] sm:$0xff]  ;;  %v6246_v16 = vsel %vm6105_vm6, %v6245_v60, %v6244_v20  ;;  %v6267_v35 = vsel %vm6102_vm5, %v6266_v2, %v6265_v4  ;;  %v6249_v55 = vrot.slane %v6011_v18, 1  ;;  %v6646_v23 = vld [vmem:[%s14532_s5 + $0x5d8] sm:$0xff]  ;;  %v13928_v63 = vld [vmem:[#allocation2 + $0x29] sm:$0x1] }
 0xfae   : > { %6879 = vmatpush.msrb.mxu3 %v6602_v10  ;;  %6899 = vmatpush.msrb.mxu1 %v6618_v48  ;;  %v5952_v58 = vmax.f32 %v13260_v29, %v5948_v34  ;;  %v3192_v9 = vsel %vm824_vm3, %v13643_v19, %v3190_v53  ;;  %v6616_v29 = vld [vmem:[%s14532_s5 + $0x4e8] sm:$0xff]  ;;  %v6223_v19 = vsel %vm6105_vm6, %v6222_v6, %v6221_v52  ;;  %v6247_v6 = vrot.slane %v13814_v36, 2  ;;  %v6631_v37 = vld [vmem:[%s14532_s5 + $0x560] sm:$0xff]  ;;  %v6598_v36 = vld [vmem:[%s14532_s5 + $0x458] sm:$0xff] }
 0xfaf   : > { %6919 = vmatpush.msrb.mxu2 %v6634_v1  ;;  %6939 = vmatpush.msrb.mxu0 %v6650_v32  ;;  %v3196_v3 = vmax.f32 %v13197_v11, %v3192_v9  ;;  %v6632_v11 = vld [vmem:[%s14532_s5 + $0x568] sm:$0xff]  ;;  %v6647_v41 = vld [vmem:[%s14532_s5 + $0x5e0] sm:$0xff]  ;;  %v6269_v46 = vsel %vm6105_vm6, %v6268_v57, %v6267_v35  ;;  %v6272_v21 = vrot.slane %v6019_v30, 1  ;;  %v6225_v56 = vsel %vm6108_vm7, %v6224_v0, %v6223_v19  ;;  %v13915_v1 = vld [vmem:[#allocation2 + $0x18] sm:$0x1] }
 0xfb0   : > { %5955 = vst [vmem:[#allocation2 + $0x78] sm:$0xff] %v5952_v58  ;;  %6880 = vmatpush.msrb.mxu3 %v6601_v15  ;;  %6900 = vmatpush.msrb.mxu1 %v6617_v27  ;;  %v6248_v49 = vsel %vm6108_vm7, %v6247_v6, %v6246_v16  ;;  %v6204_v24 = vsel %vm6111_vm8, %v6203_v59, %v6202_v13  ;;  %v13917_v32 = vld [vmem:[#allocation2 + $0x28] sm:$0x1]  ;;  %v6597_v15 = vld [vmem:[%s14532_s5 + $0x450] sm:$0xff]  ;;  %v13926_v42 = vld [vmem:[#allocation2 + $0x19] sm:$0x1] }
 0xfb1   : > { %3199 = vst [vmem:[#allocation2 + $0x38] sm:$0xff] %v3196_v3  ;;  %6920 = vmatpush.msrb.mxu2 %v6633_v39  ;;  %6940 = vmatpush.msrb.mxu0 %v6649_v47  ;;  %v6227_v10 = vsel %vm6111_vm8, %v6226_v7, %v6225_v56  ;;  %v6271_v48 = vsel %vm6108_vm7, %v6270_v28, %v6269_v46  ;;  %v6645_v34 = vld [vmem:[%s14532_s5 + $0x5d0] sm:$0xff]  ;;  %v13938_v53 = vld [vmem:[#allocation2 + $0x2a] sm:$0x1]  ;;  %v6595_v22 = vld [vmem:[%s14532_s5 + $0x440] sm:$0xff]  ;;  %v6283_v44 = vrot.slane %v13915_v1, 7 }
 0xfb2   : > { %6881 = vmatpush.msrb.mxu3 %v6600_v26  ;;  %6901 = vmatpush.msrb.mxu1 %v6616_v29  ;;  %v6250_v40 = vsel %vm6111_vm8, %v6249_v55, %v6248_v49  ;;  %v6273_v45 = vsel %vm6111_vm8, %v6272_v21, %v6271_v48  ;;  %v6596_v27 = vld [vmem:[%s14532_s5 + $0x448] sm:$0xff]  ;;  %v6611_v2 = vld [vmem:[%s14532_s5 + $0x4c0] sm:$0xff]  ;;  %v6594_v26 = vld [vmem:[%s14532_s5 + $0x438] sm:$0xff]  ;;  %v6285_v51 = vrot.slane %v13917_v32, 6  ;;  %v6306_v0 = vrot.slane %v13926_v42, 7 }
 0xfb3   : > { %6921 = vmatpush.msrb.mxu2 %v6632_v11  ;;  %6941 = vmatpush.msrb.mxu0 %v6648_v14  ;;  %v6612_v39 = vld [vmem:[%s14532_s5 + $0x4c8] sm:$0xff]  ;;  %v6627_v58 = vld [vmem:[%s14532_s5 + $0x540] sm:$0xff]  ;;  %v6045_v52 = vld [vmem:[#allocation2 + $0x1b] sm:$0x1]  ;;  %v6308_v18 = vrot.slane %v13928_v63, 6  ;;  %v6331_v4 = vrot.slane %v13938_v53, 6 }
 0xfb4   : > { %6882 = vmatpush.msrb.mxu3 %v6599_v8  ;;  %6902 = vmatpush.msrb.mxu1 %v6615_v43  ;;  %v6628_v47 = vld [vmem:[%s14532_s5 + $0x548] sm:$0xff]  ;;  %v6643_v9 = vld [vmem:[%s14532_s5 + $0x5c0] sm:$0xff]  ;;  %v6610_v3 = vld [vmem:[%s14532_s5 + $0x4b8] sm:$0xff] }
 0xfb5   : > { %6922 = vmatpush.msrb.mxu2 %v6631_v37  ;;  %6942 = vmatpush.msrb.mxu0 %v6647_v41  ;;  %v4566_v12 = vpop.permute.xlu0 %4565  ;;  %v6644_v60 = vld [vmem:[%s14532_s5 + $0x5c8] sm:$0xff]  ;;  %v6626_v29 = vld [vmem:[%s14532_s5 + $0x538] sm:$0xff]  ;;  %v6593_v11 = vld [vmem:[%s14532_s5 + $0x430] sm:$0xff] }
 0xfb6   : > { %6815 = vmatmul.f32.vlgmr.msra.gmra.mxu3 %v6204_v24  ;;  %6835 = vmatmul.f32.vlgmr.msra.gmra.mxu1 %v6227_v10  ;;  %v4570_v5 = vsel %vm824_vm3, %v4566_v12, %v13756_v31  ;;  %v13930_v31 = vld [vmem:[#allocation2 + $0x1a] sm:$0x1]  ;;  %v13969_v57 = vld [vmem:[#allocation2 + $0x2b] sm:$0x1]  ;;  %v6609_v14 = vld [vmem:[%s14532_s5 + $0x4b0] sm:$0xff]  ;;  %v6352_v24 = vrot.slane %v6045_v52, 7 }
 0xfb7   : > { %6855 = vmatmul.f32.vlgmr.msra.gmra.mxu2 %v6250_v40  ;;  %6875 = vmatmul.f32.vlgmr.msra.gmra.mxu0 %v6273_v45  ;;  %v4574_v50 = vmax.f32 %v13301_v61, %v4570_v5  ;;  %v6629_v61 = vld [vmem:[%s14532_s5 + $0x550] sm:$0xff]  ;;  %v6642_v19 = vld [vmem:[%s14532_s5 + $0x5b8] sm:$0xff]  ;;  %v6329_v17 = vrot.slane %v13930_v31, 7  ;;  %v6020_v20 = vld [vmem:[#allocation2 + $0x8] sm:$0x1]  ;;  %v6354_v10 = vrot.slane %v13969_v57, 6 }
 0xfb8   : > { %6883 = vmatpush.msrb.mxu3 %v6598_v36  ;;  %6903 = vmatpush.msrb.mxu1 %v6614_v33  ;;  %v6028_v6 = vld [vmem:[#allocation2 + $0x9] sm:$0x1]  ;;  %v6625_v8 = vld [vmem:[%s14532_s5 + $0x530] sm:$0xff]  ;;  %v6023_v59 = vld [vmem:[#allocation2 + $0x38] sm:$0x1]  ;;  %v6284_v56 = vsel %vm6093_vm9, %v6283_v44, %v6020_v20 }
 0xfb9   : > { %6923 = vmatpush.msrb.mxu2 %v6630_v62  ;;  %6943 = vmatpush.msrb.mxu0 %v6646_v23  ;;  %4577 = vst [vmem:[#allocation2 + $0x58] sm:$0xff] %v4574_v50  ;;  %v6641_v43 = vld [vmem:[%s14532_s5 + $0x5b0] sm:$0xff]  ;;  %v13998_v7 = vld [vmem:[#allocation2 + $0x48] sm:$0x1]  ;;  %v6036_v16 = vld [vmem:[#allocation2 + $0xa] sm:$0x1]  ;;  %v6307_v12 = vsel %vm6093_vm9, %v6306_v0, %v6028_v6 }
 0xfba   : > { %6884 = vmatpush.msrb.mxu3 %v6597_v15  ;;  %6904 = vmatpush.msrb.mxu1 %v6613_v54  ;;  %v6044_v35 = vld [vmem:[#allocation2 + $0xb] sm:$0x1]  ;;  %v6031_v55 = vld [vmem:[#allocation2 + $0x39] sm:$0x1]  ;;  %v6039_v46 = vld [vmem:[#allocation2 + $0x3a] sm:$0x1]  ;;  %v6330_v45 = vsel %vm6093_vm9, %v6329_v17, %v6036_v16 }
 0xfbb   : > { %6924 = vmatpush.msrb.mxu2 %v6629_v61  ;;  %6944 = vmatpush.msrb.mxu0 %v6645_v34  ;;  %v6608_v41 = vld [vmem:[%s14532_s5 + $0x4a8] sm:$0xff]  ;;  %v6047_v21 = vld [vmem:[#allocation2 + $0x3b] sm:$0x1]  ;;  %v6591_v48 = vld [vmem:[%s14532_s5 + $0x420] sm:$0xff]  ;;  %v6287_v33 = vrot.slane %v6023_v59, 5  ;;  %v6310_v5 = vrot.slane %v6031_v55, 5  ;;  %v6353_v15 = vsel %vm6093_vm9, %v6352_v24, %v6044_v35 }
 0xfbc   : > { %6885 = vmatpush.msrb.mxu3 %v6596_v27  ;;  %6905 = vmatpush.msrb.mxu1 %v6612_v39  ;;  %v6624_v13 = vld [vmem:[%s14532_s5 + $0x528] sm:$0xff]  ;;  %v6607_v36 = vld [vmem:[%s14532_s5 + $0x4a0] sm:$0xff]  ;;  %v6333_v1 = vrot.slane %v6039_v46, 5  ;;  %v6356_v54 = vrot.slane %v6047_v21, 5  ;;  %v6590_v42 = vld [vmem:[%s14532_s5 + $0x418] sm:$0xff]  ;;  %v6289_v34 = vrot.slane %v13998_v7, 4  ;;  %v6286_v39 = vsel %vm6096_vm1, %v6285_v51, %v6284_v56 }
 0xfbd   : > { %6925 = vmatpush.msrb.mxu2 %v6628_v47  ;;  %6945 = vmatpush.msrb.mxu0 %v6644_v60  ;;  %v5257_v30 = vpop.permute.xlu0 %5256  ;;  %v14014_v49 = vld [vmem:[#allocation2 + $0x49] sm:$0x1]  ;;  %v14024_v40 = vld [vmem:[#allocation2 + $0x4a] sm:$0x1]  ;;  %v6623_v62 = vld [vmem:[%s14532_s5 + $0x520] sm:$0xff]  ;;  %v6309_v60 = vsel %vm6096_vm1, %v6308_v18, %v6307_v12  ;;  %v6288_v63 = vsel %vm6099_vm4, %v6287_v33, %v6286_v39  ;;  %v6355_v51 = vsel %vm6096_vm1, %v6354_v10, %v6353_v15 }
 0xfbe   : > { %6886 = vmatpush.msrb.mxu3 %v6595_v22  ;;  %6906 = vmatpush.msrb.mxu1 %v6611_v2  ;;  %v5259_v28 = vsel %vm824_vm3, %v13754_v25, %v5257_v30  ;;  %v6592_v25 = vld [vmem:[%s14532_s5 + $0x428] sm:$0xff]  ;;  %v6639_v23 = vld [vmem:[%s14532_s5 + $0x5a0] sm:$0xff]  ;;  %v6606_v31 = vld [vmem:[%s14532_s5 + $0x498] sm:$0xff]  ;;  %v6312_v27 = vrot.slane %v14014_v49, 4  ;;  %v6335_v44 = vrot.slane %v14024_v40, 4  ;;  %v6290_v59 = vsel %vm6102_vm5, %v6289_v34, %v6288_v63 }
 0xfbf   : > { %6926 = vmatpush.msrb.mxu2 %v6627_v58  ;;  %6946 = vmatpush.msrb.mxu0 %v6643_v9  ;;  %v5263_v37 = vmax.f32 %v13210_v38, %v5259_v28  ;;  %v6640_v38 = vld [vmem:[%s14532_s5 + $0x5a8] sm:$0xff]  ;;  %v6622_v58 = vld [vmem:[%s14532_s5 + $0x518] sm:$0xff]  ;;  %v6589_v9 = vld [vmem:[%s14532_s5 + $0x410] sm:$0xff] }
 0xfc0   : > { %6887 = vmatpush.msrb.mxu3 %v6594_v26  ;;  %6907 = vmatpush.msrb.mxu1 %v6610_v3  ;;  %v14033_v50 = vld [vmem:[#allocation2 + $0x4b] sm:$0x1]  ;;  %v14042_v61 = vld [vmem:[#allocation2 + $0x58] sm:$0x1]  ;;  %v6033_v47 = vld [vmem:[#allocation2 + $0x59] sm:$0x1]  ;;  %v6332_v26 = vsel %vm6096_vm1, %v6331_v4, %v6330_v45  ;;  %v6311_v3 = vsel %vm6099_vm4, %v6310_v5, %v6309_v60 }
 0xfc1   : > { %6927 = vmatpush.msrb.mxu2 %v6626_v29  ;;  %6947 = vmatpush.msrb.mxu0 %v6642_v19  ;;  %5266 = vst [vmem:[#allocation2 + $0x68] sm:$0xff] %v5263_v37  ;;  %v6041_v22 = vld [vmem:[#allocation2 + $0x5a] sm:$0x1]  ;;  %v14052_v2 = vld [vmem:[#allocation2 + $0x5b] sm:$0x1]  ;;  %v6605_v52 = vld [vmem:[%s14532_s5 + $0x490] sm:$0xff]  ;;  %v6334_v29 = vsel %vm6099_vm4, %v6333_v1, %v6332_v26  ;;  %v6357_v19 = vsel %vm6099_vm4, %v6356_v54, %v6355_v51 }
 0xfc2   : > { %6888 = vmatpush.msrb.mxu3 %v6593_v11  ;;  %6908 = vmatpush.msrb.mxu1 %v6609_v14  ;;  %v6638_v32 = vld [vmem:[%s14532_s5 + $0x598] sm:$0xff]  ;;  %v6621_v57 = vld [vmem:[%s14532_s5 + $0x510] sm:$0xff]  ;;  %v6358_v0 = vrot.slane %v14033_v50, 4  ;;  %v6588_v18 = vld [vmem:[%s14532_s5 + $0x408] sm:$0xff]  ;;  %v6291_v30 = vrot.slane %v14042_v61, 3  ;;  %v6314_v11 = vrot.slane %v6033_v47, 3  ;;  %v6313_v46 = vsel %vm6102_vm5, %v6312_v27, %v6311_v3 }
 0xfc3   : > { %6928 = vmatpush.msrb.mxu2 %v6625_v8  ;;  %6948 = vmatpush.msrb.mxu0 %v6641_v43  ;;  %v6637_v53 = vld [vmem:[%s14532_s5 + $0x590] sm:$0xff]  ;;  %v6604_v17 = vld [vmem:[%s14532_s5 + $0x488] sm:$0xff]  ;;  %v6337_v14 = vrot.slane %v6041_v22, 3  ;;  %v6360_v20 = vrot.slane %v14052_v2, 3  ;;  %v6035_v55 = vld [vmem:[#allocation2 + $0x79] sm:$0x1]  ;;  %v6336_v21 = vsel %vm6102_vm5, %v6335_v44, %v6334_v29 }
 0xfc4   : > { %6889 = vmatpush.msrb.mxu3 %v6592_v25  ;;  %6909 = vmatpush.msrb.mxu1 %v6608_v41  ;;  %v6620_v6 = vld [vmem:[%s14532_s5 + $0x508] sm:$0xff]  ;;  %v6587_v25 = vld [vmem:[%s14532_s5 + $0x400] sm:$0xff]  ;;  %v6027_v41 = vld [vmem:[#allocation2 + $0x78] sm:$0x1]  ;;  %v6292_v49 = vsel %vm6105_vm6, %v6291_v30, %v6290_v59  ;;  %v6315_v24 = vsel %vm6105_vm6, %v6314_v11, %v6313_v46  ;;  %v6318_v50 = vrot.slane %v6035_v55, 1 }
 0xfc5   : > { %6929 = vmatpush.msrb.mxu2 %v6624_v13  ;;  %6949 = vmatpush.msrb.mxu0 %v6640_v38  ;;  %v6636_v43 = vld [vmem:[%s14532_s5 + $0x588] sm:$0xff]  ;;  %v6359_v13 = vsel %vm6102_vm5, %v6358_v0, %v6357_v19  ;;  %v6603_v56 = vld [vmem:[%s14532_s5 + $0x480] sm:$0xff]  ;;  %v6043_v10 = vld [vmem:[#allocation2 + $0x7a] sm:$0x1]  ;;  %v6295_v1 = vrot.slane %v6027_v41, 1 }
 0xfc6   : > { %6890 = vmatpush.msrb.mxu3 %v6591_v48  ;;  %6910 = vmatpush.msrb.mxu1 %v6607_v36  ;;  %v6338_v48 = vsel %vm6105_vm6, %v6337_v14, %v6336_v21  ;;  %v6051_v36 = vld [vmem:[#allocation2 + $0x7b] sm:$0x1]  ;;  %v6619_v33 = vld [vmem:[%s14532_s5 + $0x500] sm:$0xff]  ;;  %v6341_v61 = vrot.slane %v6043_v10, 1  ;;  %v6665_v22 = vld [vmem:[%s14532_s5 + $0x670] sm:$0xff] }
 0xfc7   : > { %6930 = vmatpush.msrb.mxu2 %v6623_v62  ;;  %6950 = vmatpush.msrb.mxu0 %v6639_v23  ;;  %v6635_v12 = vld [vmem:[%s14532_s5 + $0x580] sm:$0xff]  ;;  %v6361_v62 = vsel %vm6105_vm6, %v6360_v20, %v6359_v13  ;;  %v6666_v23 = vld [vmem:[%s14532_s5 + $0x678] sm:$0xff]  ;;  %v6364_v34 = vrot.slane %v6051_v36, 1  ;;  %v6681_v2 = vld [vmem:[%s14532_s5 + $0x6f0] sm:$0xff] }
 0xfc8   : > { %6891 = vmatpush.msrb.mxu3 %v6590_v42  ;;  %6911 = vmatpush.msrb.mxu1 %v6606_v31  ;;  %v6026_v4 = vld [vmem:[#allocation2 + $0x68] sm:$0x1]  ;;  %v6034_v28 = vld [vmem:[#allocation2 + $0x69] sm:$0x1]  ;;  %v6042_v8 = vld [vmem:[#allocation2 + $0x6a] sm:$0x1] }
 0xfc9   : > { %6931 = vmatpush.msrb.mxu2 %v6622_v58  ;;  %6951 = vmatpush.msrb.mxu0 %v6638_v32  ;;  %v6293_v7 = vrot.slane %v6026_v4, 2  ;;  %v6316_v16 = vrot.slane %v6034_v28, 2  ;;  %v6339_v35 = vrot.slane %v6042_v8, 2  ;;  %v6050_v37 = vld [vmem:[#allocation2 + $0x6b] sm:$0x1]  ;;  %v6682_v5 = vld [vmem:[%s14532_s5 + $0x6f8] sm:$0xff] }
 0xfca   : > { %6892 = vmatpush.msrb.mxu3 %v6589_v9  ;;  %6912 = vmatpush.msrb.mxu1 %v6605_v52  ;;  %v6362_v38 = vrot.slane %v6050_v37, 2  ;;  %v6698_v42 = vld [vmem:[%s14532_s5 + $0x778] sm:$0xff]  ;;  %v6697_v58 = vld [vmem:[%s14532_s5 + $0x770] sm:$0xff]  ;;  %v6664_v9 = vld [vmem:[%s14532_s5 + $0x668] sm:$0xff] }
 0xfcb   : > { %6932 = vmatpush.msrb.mxu2 %v6621_v57  ;;  %6952 = vmatpush.msrb.mxu0 %v6637_v53  ;;  %v6294_v40 = vsel %vm6108_vm7, %v6293_v7, %v6292_v49  ;;  %v6317_v45 = vsel %vm6108_vm7, %v6316_v16, %v6315_v24  ;;  %v6340_v15 = vsel %vm6108_vm7, %v6339_v35, %v6338_v48  ;;  %v6714_v31 = vld [vmem:[%s14532_s5 + $0x7f8] sm:$0xff]  ;;  %v6713_v32 = vld [vmem:[%s14532_s5 + $0x7f0] sm:$0xff]  ;;  %v6680_v63 = vld [vmem:[%s14532_s5 + $0x6e8] sm:$0xff] }
 0xfcc   : > { %6893 = vmatpush.msrb.mxu3 %v6588_v18  ;;  %6913 = vmatpush.msrb.mxu1 %v6604_v17  ;;  %v6363_v54 = vsel %vm6108_vm7, %v6362_v38, %v6361_v62  ;;  %v6296_v27 = vsel %vm6111_vm8, %v6295_v1, %v6294_v40  ;;  %v6319_v39 = vsel %vm6111_vm8, %v6318_v50, %v6317_v45  ;;  %v6696_v26 = vld [vmem:[%s14532_s5 + $0x768] sm:$0xff]  ;;  %v6663_v51 = vld [vmem:[%s14532_s5 + $0x660] sm:$0xff]  ;;  %v6662_v3 = vld [vmem:[%s14532_s5 + $0x658] sm:$0xff] }
 0xfcd   : > { %6933 = vmatpush.msrb.mxu2 %v6620_v6  ;;  %6953 = vmatpush.msrb.mxu0 %v6636_v43  ;;  %v6342_v47 = vsel %vm6111_vm8, %v6341_v61, %v6340_v15  ;;  %v6365_v60 = vsel %vm6111_vm8, %v6364_v34, %v6363_v54  ;;  %v6712_v44 = vld [vmem:[%s14532_s5 + $0x7e8] sm:$0xff]  ;;  %v6679_v52 = vld [vmem:[%s14532_s5 + $0x6e0] sm:$0xff]  ;;  %v6678_v29 = vld [vmem:[%s14532_s5 + $0x6d8] sm:$0xff] }
 0xfce   : > { %6894 = vmatpush.msrb.mxu3 %v6587_v25  ;;  %6914 = vmatpush.msrb.mxu1 %v6603_v56  ;;  %v6695_v57 = vld [vmem:[%s14532_s5 + $0x760] sm:$0xff]  ;;  %v6694_v19 = vld [vmem:[%s14532_s5 + $0x758] sm:$0xff]  ;;  %v6661_v18 = vld [vmem:[%s14532_s5 + $0x650] sm:$0xff] }
 0xfcf   : > { %6934 = vmatpush.msrb.mxu2 %v6619_v33  ;;  %6954 = vmatpush.msrb.mxu0 %v6635_v12  ;;  %v6711_v53 = vld [vmem:[%s14532_s5 + $0x7e0] sm:$0xff]  ;;  %v6710_v0 = vld [vmem:[%s14532_s5 + $0x7d8] sm:$0xff]  ;;  %v6677_v17 = vld [vmem:[%s14532_s5 + $0x6d0] sm:$0xff] }
 0xfd0   : > { %6959 = vmatpush.msra.mxu3 %v6666_v23  ;;  %6979 = vmatpush.msra.mxu1 %v6682_v5  ;;  %v6693_v30 = vld [vmem:[%s14532_s5 + $0x750] sm:$0xff]  ;;  %v6053_v14 = vld [vmem:[#allocation2 + $0x1c] sm:$0x1]  ;;  %v14196_v20 = vld [vmem:[#allocation2 + $0x2c] sm:$0x1] }
 0xfd1   : > { %6999 = vmatpush.msra.mxu2 %v6698_v42  ;;  %7019 = vmatpush.msra.mxu0 %v6714_v31  ;;  %v6709_v11 = vld [vmem:[%s14532_s5 + $0x7d0] sm:$0xff]  ;;  %v14198_v6 = vld [vmem:[#allocation2 + $0x1d] sm:$0x1]  ;;  %v6660_v4 = vld [vmem:[%s14532_s5 + $0x648] sm:$0xff]  ;;  %v6375_v48 = vrot.slane %v6053_v14, 7  ;;  %v6377_v36 = vrot.slane %v14196_v20, 6 }
 0xfd2   : > { %6895 = vmatmul.f32.vlgmr.msrb.gmra.mxu3 %v6296_v27  ;;  %6915 = vmatmul.f32.vlgmr.msrb.gmra.mxu1 %v6319_v39  ;;  %v6676_v28 = vld [vmem:[%s14532_s5 + $0x6c8] sm:$0xff]  ;;  %v14208_v43 = vld [vmem:[#allocation2 + $0x1e] sm:$0x1]  ;;  %v14218_v37 = vld [vmem:[#allocation2 + $0x1f] sm:$0x1]  ;;  %v6398_v12 = vrot.slane %v14198_v6, 7 }
 0xfd3   : > { %6935 = vmatmul.f32.vlgmr.msrb.gmra.mxu2 %v6342_v47  ;;  %6955 = vmatmul.f32.vlgmr.msrb.gmra.mxu0 %v6365_v60  ;;  %v14206_v8 = vld [vmem:[#allocation2 + $0x2d] sm:$0x1]  ;;  %v14210_v59 = vld [vmem:[#allocation2 + $0x2e] sm:$0x1]  ;;  %v6052_v35 = vld [vmem:[#allocation2 + $0xc] sm:$0x1] }
 0xfd4   : > { %6960 = vmatpush.msra.mxu3 %v6665_v22  ;;  %6980 = vmatpush.msra.mxu1 %v6681_v2  ;;  %v6692_v7 = vld [vmem:[%s14532_s5 + $0x748] sm:$0xff]  ;;  %v6659_v41 = vld [vmem:[%s14532_s5 + $0x640] sm:$0xff]  ;;  %v6658_v38 = vld [vmem:[%s14532_s5 + $0x638] sm:$0xff]  ;;  %v6400_v1 = vrot.slane %v14206_v8, 6  ;;  %v6421_v50 = vrot.slane %v14208_v43, 7  ;;  %v6423_v15 = vrot.slane %v14210_v59, 6  ;;  %v6376_v61 = vsel %vm6093_vm9, %v6375_v48, %v6052_v35 }
 0xfd5   : > { %7000 = vmatpush.msra.mxu2 %v6697_v58  ;;  %7020 = vmatpush.msra.mxu0 %v6713_v32  ;;  %v6708_v16 = vld [vmem:[%s14532_s5 + $0x7c8] sm:$0xff]  ;;  %v6675_v55 = vld [vmem:[%s14532_s5 + $0x6c0] sm:$0xff]  ;;  %v6055_v56 = vld [vmem:[#allocation2 + $0x3c] sm:$0x1]  ;;  %v6444_v27 = vrot.slane %v14218_v37, 7 }
 0xfd6   : > { %6961 = vmatpush.msra.mxu3 %v6664_v9  ;;  %6981 = vmatpush.msra.mxu1 %v6680_v63  ;;  %v14220_v25 = vld [vmem:[#allocation2 + $0x2f] sm:$0x1]  ;;  %v6691_v46 = vld [vmem:[%s14532_s5 + $0x740] sm:$0xff]  ;;  %v14231_v21 = vld [vmem:[#allocation2 + $0x4c] sm:$0x1]  ;;  %v6379_v34 = vrot.slane %v6055_v56, 5 }
 0xfd7   : > { %7001 = vmatpush.msra.mxu2 %v6696_v26  ;;  %7021 = vmatpush.msra.mxu0 %v6712_v44  ;;  %v6707_v13 = vld [vmem:[%s14532_s5 + $0x7c0] sm:$0xff]  ;;  %v6674_v49 = vld [vmem:[%s14532_s5 + $0x6b8] sm:$0xff]  ;;  %v14249_v33 = vld [vmem:[#allocation2 + $0x4d] sm:$0x1]  ;;  %v6446_v39 = vrot.slane %v14220_v25, 6  ;;  %v6381_v22 = vrot.slane %v14231_v21, 4 }
 0xfd8   : > { %6962 = vmatpush.msra.mxu3 %v6663_v51  ;;  %6982 = vmatpush.msra.mxu1 %v6679_v52  ;;  %v6690_v24 = vld [vmem:[%s14532_s5 + $0x738] sm:$0xff]  ;;  %v14252_v40 = vld [vmem:[#allocation2 + $0x4e] sm:$0x1]  ;;  %v6657_v45 = vld [vmem:[%s14532_s5 + $0x630] sm:$0xff] }
 0xfd9   : > { %7002 = vmatpush.msra.mxu2 %v6695_v57  ;;  %7022 = vmatpush.msra.mxu0 %v6711_v53  ;;  %v6706_v10 = vld [vmem:[%s14532_s5 + $0x7b8] sm:$0xff]  ;;  %v6673_v62 = vld [vmem:[%s14532_s5 + $0x6b0] sm:$0xff]  ;;  %v6060_v5 = vld [vmem:[#allocation2 + $0xd] sm:$0x1]  ;;  %v6378_v53 = vsel %vm6096_vm1, %v6377_v36, %v6376_v61 }
 0xfda   : > { %6963 = vmatpush.msra.mxu3 %v6662_v3  ;;  %6983 = vmatpush.msra.mxu1 %v6678_v29  ;;  %v6689_v23 = vld [vmem:[%s14532_s5 + $0x730] sm:$0xff]  ;;  %v6656_v42 = vld [vmem:[%s14532_s5 + $0x628] sm:$0xff]  ;;  %v6063_v2 = vld [vmem:[#allocation2 + $0x3d] sm:$0x1]  ;;  %v6404_v3 = vrot.slane %v14249_v33, 4  ;;  %v6427_v29 = vrot.slane %v14252_v40, 4 }
 0xfdb   : > { %7003 = vmatpush.msra.mxu2 %v6694_v19  ;;  %7023 = vmatpush.msra.mxu0 %v6710_v0  ;;  %v6705_v54 = vld [vmem:[%s14532_s5 + $0x7b0] sm:$0xff]  ;;  %v6672_v31 = vld [vmem:[%s14532_s5 + $0x6a8] sm:$0xff]  ;;  %v6655_v32 = vld [vmem:[%s14532_s5 + $0x620] sm:$0xff] }
 0xfdc   : > { %6964 = vmatpush.msra.mxu3 %v6661_v18  ;;  %6984 = vmatpush.msra.mxu1 %v6677_v17  ;;  %v6688_v47 = vld [vmem:[%s14532_s5 + $0x728] sm:$0xff]  ;;  %v6671_v9 = vld [vmem:[%s14532_s5 + $0x6a0] sm:$0xff]  ;;  %v6071_v63 = vld [vmem:[#allocation2 + $0x3e] sm:$0x1]  ;;  %v6380_v18 = vsel %vm6099_vm4, %v6379_v34, %v6378_v53 }
 0xfdd   : > { %7004 = vmatpush.msra.mxu2 %v6693_v30  ;;  %7024 = vmatpush.msra.mxu0 %v6709_v11  ;;  %v6704_v60 = vld [vmem:[%s14532_s5 + $0x7a8] sm:$0xff]  ;;  %v6079_v44 = vld [vmem:[#allocation2 + $0x3f] sm:$0x1]  ;;  %v6687_v51 = vld [vmem:[%s14532_s5 + $0x720] sm:$0xff]  ;;  %v6399_v30 = vsel %vm6093_vm9, %v6398_v12, %v6060_v5  ;;  %v6402_v11 = vrot.slane %v6063_v2, 5 }
 0xfde   : > { %6965 = vmatpush.msra.mxu3 %v6660_v4  ;;  %6985 = vmatpush.msra.mxu1 %v6676_v28  ;;  %v6068_v58 = vld [vmem:[#allocation2 + $0xe] sm:$0x1]  ;;  %v6076_v26 = vld [vmem:[#allocation2 + $0xf] sm:$0x1]  ;;  %v6703_v52 = vld [vmem:[%s14532_s5 + $0x7a0] sm:$0xff]  ;;  %v6425_v28 = vrot.slane %v6071_v63, 5 }
 0xfdf   : > { %7005 = vmatpush.msra.mxu2 %v6692_v7  ;;  %7025 = vmatpush.msra.mxu0 %v6708_v16  ;;  %v6057_v57 = vld [vmem:[#allocation2 + $0x5c] sm:$0x1]  ;;  %v6058_v0 = vld [vmem:[#allocation2 + $0x6c] sm:$0x1]  ;;  %v14304_v17 = vld [vmem:[#allocation2 + $0x5d] sm:$0x1]  ;;  %v6422_v4 = vsel %vm6093_vm9, %v6421_v50, %v6068_v58  ;;  %v6445_v7 = vsel %vm6093_vm9, %v6444_v27, %v6076_v26 }
 0xfe0   : > { %6966 = vmatpush.msra.mxu3 %v6659_v41  ;;  %6986 = vmatpush.msra.mxu1 %v6675_v55  ;;  %v6654_v19 = vld [vmem:[%s14532_s5 + $0x618] sm:$0xff]  ;;  %v14313_v6 = vld [vmem:[#allocation2 + $0x6d] sm:$0x1]  ;;  %v6080_v43 = vld [vmem:[#allocation2 + $0x4f] sm:$0x1]  ;;  %v6448_v16 = vrot.slane %v6079_v44, 5  ;;  %v6424_v36 = vsel %vm6096_vm1, %v6423_v15, %v6422_v4  ;;  %v6447_v12 = vsel %vm6096_vm1, %v6446_v39, %v6445_v7 }
 0xfe1   : > { %7006 = vmatpush.msra.mxu2 %v6691_v46  ;;  %7026 = vmatpush.msra.mxu0 %v6707_v13  ;;  %v6670_v14 = vld [vmem:[%s14532_s5 + $0x698] sm:$0xff]  ;;  %v6383_v37 = vrot.slane %v6057_v57, 3  ;;  %v6382_v46 = vsel %vm6102_vm5, %v6381_v22, %v6380_v18  ;;  %v6385_v21 = vrot.slane %v6058_v0, 2  ;;  %v6401_v13 = vsel %vm6096_vm1, %v6400_v1, %v6399_v30  ;;  %v6074_v56 = vld [vmem:[#allocation2 + $0x6e] sm:$0x1]  ;;  %v6651_v27 = vld [vmem:[%s14532_s5 + $0x600] sm:$0xff] }
 0xfe2   : > { %6967 = vmatpush.msra.mxu3 %v6658_v38  ;;  %6987 = vmatpush.msra.mxu1 %v6674_v49  ;;  %v6686_v20 = vld [vmem:[%s14532_s5 + $0x718] sm:$0xff]  ;;  %v6406_v38 = vrot.slane %v14304_v17, 3  ;;  %v6082_v49 = vld [vmem:[#allocation2 + $0x6f] sm:$0x1]  ;;  %v6403_v48 = vsel %vm6099_vm4, %v6402_v11, %v6401_v13  ;;  %v6408_v8 = vrot.slane %v14313_v6, 2  ;;  %v6449_v25 = vsel %vm6099_vm4, %v6448_v16, %v6447_v12  ;;  %v6667_v2 = vld [vmem:[%s14532_s5 + $0x680] sm:$0xff] }
 0xfe3   : > { %7007 = vmatpush.msra.mxu2 %v6690_v24  ;;  %7027 = vmatpush.msra.mxu0 %v6706_v10  ;;  %v6702_v35 = vld [vmem:[%s14532_s5 + $0x798] sm:$0xff]  ;;  %v6653_v24 = vld [vmem:[%s14532_s5 + $0x610] sm:$0xff]  ;;  %v6652_v59 = vld [vmem:[%s14532_s5 + $0x608] sm:$0xff]  ;;  %v6450_v61 = vrot.slane %v6080_v43, 4  ;;  %v6454_v34 = vrot.slane %v6082_v49, 2  ;;  %v6405_v22 = vsel %vm6102_vm5, %v6404_v3, %v6403_v48 }
 0xfe4   : > { %6968 = vmatpush.msra.mxu3 %v6657_v45  ;;  %6988 = vmatpush.msra.mxu1 %v6673_v62  ;;  %v6073_v41 = vld [vmem:[#allocation2 + $0x5e] sm:$0x1]  ;;  %v6081_v55 = vld [vmem:[#allocation2 + $0x5f] sm:$0x1]  ;;  %v6669_v10 = vld [vmem:[%s14532_s5 + $0x690] sm:$0xff]  ;;  %v6407_v58 = vsel %vm6105_vm6, %v6406_v38, %v6405_v22 }
 0xfe5   : > { %7008 = vmatpush.msra.mxu2 %v6689_v23  ;;  %7028 = vmatpush.msra.mxu0 %v6705_v54  ;;  %v6685_v45 = vld [vmem:[%s14532_s5 + $0x710] sm:$0xff]  ;;  %v6426_v23 = vsel %vm6099_vm4, %v6425_v28, %v6424_v36  ;;  %v6429_v5 = vrot.slane %v6073_v41, 3  ;;  %v6452_v1 = vrot.slane %v6081_v55, 3  ;;  %v6668_v50 = vld [vmem:[%s14532_s5 + $0x688] sm:$0xff]  ;;  %v6059_v39 = vld [vmem:[#allocation2 + $0x7c] sm:$0x1]  ;;  %v6451_v26 = vsel %vm6102_vm5, %v6450_v61, %v6449_v25 }
 0xfe6   : > { %6969 = vmatpush.msra.mxu3 %v6656_v42  ;;  %6989 = vmatpush.msra.mxu1 %v6672_v31  ;;  %v6701_v62 = vld [vmem:[%s14532_s5 + $0x790] sm:$0xff]  ;;  %v6684_v15 = vld [vmem:[%s14532_s5 + $0x708] sm:$0xff]  ;;  %v6384_v42 = vsel %vm6105_vm6, %v6383_v37, %v6382_v46  ;;  %v6431_v31 = vrot.slane %v6074_v56, 2  ;;  %v6083_v63 = vld [vmem:[#allocation2 + $0x7f] sm:$0x1]  ;;  %v6387_v57 = vrot.slane %v6059_v39, 1 }
 0xfe7   : > { %7009 = vmatpush.msra.mxu2 %v6688_v47  ;;  %7029 = vmatpush.msra.mxu0 %v6704_v60  ;;  %v6700_v54 = vld [vmem:[%s14532_s5 + $0x788] sm:$0xff]  ;;  %v6386_v47 = vsel %vm6108_vm7, %v6385_v21, %v6384_v42  ;;  %v6067_v60 = vld [vmem:[#allocation2 + $0x7d] sm:$0x1]  ;;  %v6683_v33 = vld [vmem:[%s14532_s5 + $0x700] sm:$0xff]  ;;  %v6453_v40 = vsel %vm6105_vm6, %v6452_v1, %v6451_v26  ;;  %v6456_v0 = vrot.slane %v6083_v63, 1 }
 0xfe8   : > { %6970 = vmatpush.msra.mxu3 %v6655_v32  ;;  %6990 = vmatpush.msra.mxu1 %v6671_v9  ;;  %v6075_v32 = vld [vmem:[#allocation2 + $0x7e] sm:$0x1]  ;;  %v6428_v9 = vsel %vm6102_vm5, %v6427_v29, %v6426_v23  ;;  %v6699_v44 = vld [vmem:[%s14532_s5 + $0x780] sm:$0xff]  ;;  %v6410_v53 = vrot.slane %v6067_v60, 1  ;;  %v6455_v29 = vsel %vm6108_vm7, %v6454_v34, %v6453_v40  ;;  %v6388_v18 = vsel %vm6111_vm8, %v6387_v57, %v6386_v47  ;;  %v7053_v6 = vld [vmem:[%s14534_s7 + $0x68] sm:$0xff] }
 0xfe9   : > { %7010 = vmatpush.msra.mxu2 %v6687_v51  ;;  %7030 = vmatpush.msra.mxu0 %v6703_v52  ;;  %v6409_v51 = vsel %vm6108_vm7, %v6408_v8, %v6407_v58  ;;  %v6430_v52 = vsel %vm6105_vm6, %v6429_v5, %v6428_v9  ;;  %v6457_v11 = vsel %vm6111_vm8, %v6456_v0, %v6455_v29  ;;  %v7052_v4 = vld [vmem:[%s14534_s7 + $0x60] sm:$0xff]  ;;  %v7051_v28 = vld [vmem:[%s14534_s7 + $0x58] sm:$0xff]  ;;  %v7050_v43 = vld [vmem:[%s14534_s7 + $0x50] sm:$0xff] }
 0xfea   : > { %6971 = vmatpush.msra.mxu3 %v6654_v19  ;;  %6991 = vmatpush.msra.mxu1 %v6670_v14  ;;  %v6432_v3 = vsel %vm6108_vm7, %v6431_v31, %v6430_v52  ;;  %v6433_v19 = vrot.slane %v6075_v32, 1  ;;  %v6411_v17 = vsel %vm6111_vm8, %v6410_v53, %v6409_v51  ;;  %v7055_v14 = vld [vmem:[%s14534_s7 + $0x78] sm:$0xff]  ;;  %v7049_v7 = vld [vmem:[%s14534_s7 + $0x48] sm:$0xff]  ;;  %v10230_v16 = vld [vmem:[%s14533_s6] ss:$0 sm:$0xff] }
 0xfeb   : > { %7011 = vmatpush.msra.mxu2 %v6686_v20  ;;  %7031 = vmatpush.msra.mxu0 %v6702_v35  ;;  %v7054_v20 = vld [vmem:[%s14534_s7 + $0x70] sm:$0xff]  ;;  %v7048_v46 = vld [vmem:[%s14534_s7 + $0x40] sm:$0xff]  ;;  %v7047_v21 = vld [vmem:[%s14534_s7 + $0x38] sm:$0xff] }
 0xfec   : > { %6972 = vmatpush.msra.mxu3 %v6653_v24  ;;  %6992 = vmatpush.msra.mxu1 %v6669_v10  ;;  %v6434_v30 = vsel %vm6111_vm8, %v6433_v19, %v6432_v3  ;;  %v7046_v56 = vld [vmem:[%s14534_s7 + $0x30] sm:$0xff]  ;;  %v7045_v12 = vld [vmem:[%s14534_s7 + $0x28] sm:$0xff]  ;;  %v7040_v34 = vld [vmem:[%s14534_s7] sm:$0xff] }
 0xfed   : > { %7012 = vmatpush.msra.mxu2 %v6685_v45  ;;  %7032 = vmatpush.msra.mxu0 %v6701_v62  ;;  %v7044_v45 = vld [vmem:[%s14534_s7 + $0x20] sm:$0xff]  ;;  %v7043_v62 = vld [vmem:[%s14534_s7 + $0x18] sm:$0xff]  ;;  %v7095_v23 = vld [vmem:[%s14536_s9 + $0x70] sm:$0xff] }
 0xfee   : > { %6973 = vmatpush.msra.mxu3 %v6652_v59  ;;  %6993 = vmatpush.msra.mxu1 %v6668_v50  ;;  %v7096_v59 = vld [vmem:[%s14536_s9 + $0x78] sm:$0xff]  ;;  %v7042_v1 = vld [vmem:[%s14534_s7 + $0x10] sm:$0xff]  ;;  %v7094_v50 = vld [vmem:[%s14536_s9 + $0x68] sm:$0xff] }
 0xfef   : > { %7013 = vmatpush.msra.mxu2 %v6684_v15  ;;  %7033 = vmatpush.msra.mxu0 %v6700_v54  ;;  %v7041_v15 = vld [vmem:[%s14534_s7 + $0x8] sm:$0xff]  ;;  %v7093_v54 = vld [vmem:[%s14536_s9 + $0x60] sm:$0xff]  ;;  %v7091_v47 = vld [vmem:[%s14536_s9 + $0x50] sm:$0xff] }
 0xff0   : > { %6974 = vmatpush.msra.mxu3 %v6651_v27  ;;  %6994 = vmatpush.msra.mxu1 %v6667_v2  ;;  %v7092_v27 = vld [vmem:[%s14536_s9 + $0x58] sm:$0xff]  ;;  %v7090_v60 = vld [vmem:[%s14536_s9 + $0x48] sm:$0xff]  ;;  %v7089_v58 = vld [vmem:[%s14536_s9 + $0x40] sm:$0xff] }
 0xff1   : > { %7014 = vmatpush.msra.mxu2 %v6683_v33  ;;  %7034 = vmatpush.msra.mxu0 %v6699_v44  ;;  %v7088_v32 = vld [vmem:[%s14536_s9 + $0x38] sm:$0xff]  ;;  %v7087_v26 = vld [vmem:[%s14536_s9 + $0x30] sm:$0xff]  ;;  %v7086_v33 = vld [vmem:[%s14536_s9 + $0x28] sm:$0xff] }
 0xff2   : > { %6975 = vmatmul.f32.vlgmr.msra.gmra.mxu3 %v6388_v18  ;;  %6995 = vmatmul.f32.vlgmr.msra.gmra.mxu1 %v6411_v17  ;;  %v7085_v52 = vld [vmem:[%s14536_s9 + $0x20] sm:$0xff]  ;;  %v7084_v53 = vld [vmem:[%s14536_s9 + $0x18] sm:$0xff] }
 0xff3   : > { %7015 = vmatmul.f32.vlgmr.msra.gmra.mxu2 %v6434_v30  ;;  %7035 = vmatmul.f32.vlgmr.msra.gmra.mxu0 %v6457_v11  ;;  %v7083_v11 = vld [vmem:[%s14536_s9 + $0x10] sm:$0xff] }
 0xff4   : > { %7060 = vmatpush.msrb.mxu3 %v7055_v14  ;;  %7101 = vmatpush.msrb.mxu1 %v7096_v59  ;;  %v7082_v14 = vld [vmem:[%s14536_s9 + $0x8] sm:$0xff] }
 0xff6   : > { %7061 = vmatpush.msrb.mxu3 %v7054_v20  ;;  %7102 = vmatpush.msrb.mxu1 %v7095_v23  ;;  %v7081_v20 = vld [vmem:[%s14536_s9] sm:$0xff] }
 0xff8   : > { %7062 = vmatpush.msrb.mxu3 %v7053_v6  ;;  %7103 = vmatpush.msrb.mxu1 %v7094_v50  ;;  %v10231_v6 = vld [vmem:[%s14535_s8] ss:$0 sm:$0xff] }
 0xffa   : > { %7063 = vmatpush.msrb.mxu3 %v7052_v4  ;;  %7104 = vmatpush.msrb.mxu1 %v7093_v54 }
 0xffc   : > { %7064 = vmatpush.msrb.mxu3 %v7051_v28  ;;  %7105 = vmatpush.msrb.mxu1 %v7092_v27 }
 0xffe   : > { %7065 = vmatpush.msrb.mxu3 %v7050_v43  ;;  %7106 = vmatpush.msrb.mxu1 %v7091_v47 }
0x1000   : > { %7066 = vmatpush.msrb.mxu3 %v7049_v7  ;;  %7107 = vmatpush.msrb.mxu1 %v7090_v60  ;;  %v10232_v7 = vld [vmem:[%s14766_s16] ss:$0 sm:$0xff] }
0x1002   : > { %7067 = vmatpush.msrb.mxu3 %v7048_v46  ;;  %7108 = vmatpush.msrb.mxu1 %v7089_v58 }
0x1004   : > { %7068 = vmatpush.msrb.mxu3 %v7047_v21  ;;  %7109 = vmatpush.msrb.mxu1 %v7088_v32 }
0x1006   : > { %7069 = vmatpush.msrb.mxu3 %v7046_v56  ;;  %7110 = vmatpush.msrb.mxu1 %v7087_v26 }
0x1008   : > { %7070 = vmatpush.msrb.mxu3 %v7045_v12  ;;  %7111 = vmatpush.msrb.mxu1 %v7086_v33 }
0x100a   : > { %7071 = vmatpush.msrb.mxu3 %v7044_v45  ;;  %7112 = vmatpush.msrb.mxu1 %v7085_v52 }
0x100c   : > { %7072 = vmatpush.msrb.mxu3 %v7043_v62  ;;  %7113 = vmatpush.msrb.mxu1 %v7084_v53 }
0x100e   : > { %7073 = vmatpush.msrb.mxu3 %v7042_v1  ;;  %7114 = vmatpush.msrb.mxu1 %v7083_v11 }
0x1010   : > { %7074 = vmatpush.msrb.mxu3 %v7041_v15  ;;  %7115 = vmatpush.msrb.mxu1 %v7082_v14 }
0x1012   : > { %7075 = vmatpush.msrb.mxu3 %v7040_v34  ;;  %7116 = vmatpush.msrb.mxu1 %v7081_v20 }
0x1029   : > { %v6756_v41 = vpop.f32.mrf.mxu1 }
0x102a   : > { %v6796_v49 = vpop.f32.mrf.mxu0 }
0x102f   : > { %v6736_v35 = vpop.f32.mrf.mxu3 }
0x1030   : > { %v6737_v37 = vadd.f32 %v10230_v16, %v6736_v35  ;;  %v6776_v13 = vpop.f32.mrf.mxu2 }
0x1032   : > { %v6757_v55 = vadd.f32 %v6756_v41, %v6737_v37 }
0x1033   : > { %v6836_v8 = vpop.f32.mrf.mxu1 }
0x1034   : > { %v6777_v38 = vadd.f32 %v6776_v13, %v6757_v55  ;;  %v6876_v42 = vpop.f32.mrf.mxu0 }
0x1036   : > { %v6797_v24 = vadd.f32 %v6796_v49, %v6777_v38 }
0x1039   : > { %v6816_v10 = vpop.f32.mrf.mxu3 }
0x103a   : > { %v6817_v48 = vadd.f32 %v6816_v10, %v6797_v24  ;;  %v6856_v5 = vpop.f32.mrf.mxu2 }
0x103c   : > { %v6837_v36 = vadd.f32 %v6836_v8, %v6817_v48 }
0x103e   : > { %v6857_v25 = vadd.f32 %v6856_v5, %v6837_v36 }
0x1040   : > { %v6877_v61 = vadd.f32 %v6876_v42, %v6857_v25 }
0x104f   : > { %v6916_v22 = vpop.f32.mrf.mxu1 }
0x1050   : > { %v6956_v44 = vpop.f32.mrf.mxu0 }
0x1055   : > { %v6896_v31 = vpop.f32.mrf.mxu3 }
0x1056   : > { %v6897_v39 = vadd.f32 %v6896_v31, %v6877_v61  ;;  %v6936_v9 = vpop.f32.mrf.mxu2 }
0x1058   : > { %v6917_v2 = vadd.f32 %v6916_v22, %v6897_v39 }
0x105a   : > { %v6937_v63 = vadd.f32 %v6936_v9, %v6917_v2 }
0x105c   : > { %v6957_v51 = vadd.f32 %v6956_v44, %v6937_v63 }
0x106f   : > { %v6996_v3 = vpop.f32.mrf.mxu1 }
0x1070   : > { %v7036_v18 = vpop.f32.mrf.mxu0 }
0x1075   : > { %v6976_v40 = vpop.f32.mrf.mxu3 }
0x1076   : > { %v6977_v57 = vadd.f32 %v6976_v40, %v6957_v51  ;;  %v7016_v19 = vpop.f32.mrf.mxu2 }
0x1078   : > { %v6997_v29 = vadd.f32 %v6996_v3, %v6977_v57 }
0x107a   : > { %v7017_v0 = vadd.f32 %v7016_v19, %v6997_v29 }
0x107c   : > { %v7037_v17 = vadd.f32 %v7036_v18, %v7017_v0 }
0x107e   : > { %v7039_v30 = vmax.f32 %v7037_v17, 0.0 }
0x1080   : > { %7076 = vmatmul.f32.vlgmr.msrb.gmra.mxu3 %v7039_v30 }
0x1103   : > { %v7077_v4 = vpop.f32.mrf.mxu3 }
0x1104   : > { %v7078_v28 = vadd.f32 %v10231_v6, %v7077_v4 }
0x1106   : > { %v7080_v43 = vmax.f32 %v7078_v28, 0.0 }
0x1108   : > { %7117 = vmatmul.f32.vlgmr.msrb.gmra.mxu1 %v7080_v43 }
0x1185   : > { %v7118_v16 = vpop.f32.mrf.mxu1 }
0x1186   : > { %v7119_v35 = vadd.f32 %v10232_v7, %v7118_v16 }
0x1188   : > { %7121 = vst [vmem:[%s382_s10] sm:$0xff] %v7119_v35 }
0x1189   : > { %10277 = shalt.err (!%p10274_p3)
}
0x118a   : > { %9185 = dma.vmem_to_hbm [thread:$0]  (%p10428_p5), %s7136_s27, 128, %s7138_s0, %s7123_s2  }
0x118b PF: > { %s14767_s15 = sld [smem:[#allocation8_spill]] }
0x118c   : > { %s14768_s30 = sld [smem:[#allocation6_spill]] }
0x1191   : > { %p9191_p4 = scmp.ge.s32.totalorder %s14767_s15, 2 }
0x1192   : > { %s7149_s14 = sand.u32 1, %s14768_s30  }
0x1193   : > { %p9188_p7 = pnand %p9191_p4, %p10432_p6  ;;  %s7150_s21 = scalar_lea.sflag [#allocation4], %s7149_s14 }
0x1195   : > { %p9189_p8 = pneg %p9188_p7 }
0x1197   : > { %10295 = dma.done.wait (%p9189_p8), %s7150_s21, 128  }
0x1198   : > { %10297 = vsyncadd (%p9189_p8), %s7150_s21, 4294967168  ;;  %s14770_s20 = sld [smem:[#allocation9_spill]]  ;;  %s14773_s17 = smov %s10304_s18 }
0x1199   : > { %s14771_s22 = sld [smem:[#allocation7_spill]] }
0x119a   : > { %s14772_s19 = sld [smem:[#allocation10_spill]] }
0x119e   : > { %p21_p9 = scmp.ge.s32.totalorder %s14770_s20, 4  }
0x119f   : > { %s14774_s18 = smov %s14771_s22 }
0x11a0   :  { %23 = sbr.rel (!%p21_p9) target bundleno = 7 (0x7), region = 113 }
0x11a5   :  { %7156 = vsyncpa [#allocation4], 1 }
0x11a6   :  { %7158 = vsyncpa [#allocation4 + $0x1], 1 }

</bundles_post_ra>
